<compile_context>
chip_gen: v7x
topology: tpu7x:2x2x1
jax: 0.10.0
libtpu: 0.0.40
codegen_flags: <defaults>
</compile_context>

<pallas_src>
import numpy as np

import jax
import jax.numpy as jnp
from jax.experimental import pallas as pl
from jax.experimental.pallas import tpu as pltpu


# Set to jnp.bfloat16 on v6e/v7x for large d_model (accumulation stays f32).
MXU_DTYPE = jnp.float32


# ----------------------------- in-kernel helpers -----------------------------

def _mm(a, w):
    """2D matmul on the MXU with f32 accumulation."""
    return jnp.dot(a.astype(MXU_DTYPE), w.astype(MXU_DTYPE),
                   preferred_element_type=jnp.float32)


def _layernorm(x, gamma, beta, eps=1e-5):
    mean = jnp.mean(x, axis=-1, keepdims=True)
    var = jnp.mean((x - mean) ** 2, axis=-1, keepdims=True)
    return (x - mean) * jax.lax.rsqrt(var + eps) * gamma + beta


def _gelu(x):
    # TODO(synk): nn.GELU() default is the exact erf form; tanh approximation is used
    # for robust Mosaic lowering (max abs diff ~1e-3).
    c = 0.7978845608028654  # sqrt(2/pi)
    return 0.5 * x * (1.0 + jnp.tanh(c * (x + 0.044715 * x * x * x)))


def _softmax_lastdim(x):
    m = jnp.max(x, axis=-1, keepdims=True)
    e = jnp.exp(x - m)
    return e * pl.reciprocal(jnp.sum(e, axis=-1, keepdims=True), approx=True)


def _mha_core(q, k, v, n_heads):
    """Multi-head attention on already-projected q/k/v.

    q: (B, Lq, D), k/v: (B, Lk, D). Heads are lane-slices of D; score contraction is
    expressed directly on the last axes (no materialized K transpose).
    """
    D = q.shape[-1]
    dk = D // n_heads
    scale = 1.0 / float(dk) ** 0.5
    outs = []
    for h in range(n_heads):
        lo, hi = h * dk, (h + 1) * dk
        qh, kh, vh = q[:, :, lo:hi], k[:, :, lo:hi], v[:, :, lo:hi]
        s = jnp.einsum('bqd,bkd->bqk', qh.astype(MXU_DTYPE), kh.astype(MXU_DTYPE),
                       preferred_element_type=jnp.float32) * scale
        p = _softmax_lastdim(s)
        outs.append(jnp.einsum('bqk,bkd->bqd', p.astype(MXU_DTYPE), vh.astype(MXU_DTYPE),
                               preferred_element_type=jnp.float32))
    return jnp.concatenate(outs, axis=-1)  # (B, Lq, D)


# --------------------------------- kernel ------------------------------------

def _make_kernel(*, ts_d, seg_m, d_model, win_size, n_heads, d_ff, depth, factor):
    R = ts_d * seg_m
    D = d_model

    def kernel(x_ref, perm_ref, permt_ref, *rest):
        out_ref = rest[-1]
        params = iter(rest[:-1])
        ld = lambda: next(params)[...]

        # (ts_d, seg_m, win*D or D) for this batch element
        x = x_ref[0].astype(jnp.float32)
        xf = x.reshape(R, x.shape[-1])          # merge leading dims only (lane dim untouched)

        # ---------------- SegMerging: LayerNorm(win*d) + Linear(win*d -> d) ----------------
        if win_size > 1:
            g_m, b_m, w_m, bias_m = ld(), ld(), ld(), ld()
            xf = _layernorm(xf, g_m, b_m)
            xf = _mm(xf, w_m) + bias_m          # (R, D)

        perm = perm_ref[...]                    # (R, R) time-order -> dim-order row permutation
        perm_t = permt_ref[...]                 # (R, R) inverse permutation

        # ---------------- TwoStageAttentionLayer x depth ----------------
        for _ in range(depth):
            w_qkv, b_qkv, w_to, b_to = ld(), ld(), ld(), ld()
            w_sq, b_sq = ld(), ld()             # dim_sender Q (projects the router)
            w_dkvq, b_dkvq = ld(), ld()         # fused: sender K/V + receiver Q (projects ds_flat)
            w_so, b_so = ld(), ld()             # dim_sender out proj
            w_rkv, b_rkv = ld(), ld()           # dim_receiver fused K/V (projects buffer)
            w_ro, b_ro = ld(), ld()             # dim_receiver out proj
            router = ld()                       # (seg_m, factor, D)
            ln = ld()                           # (8, D): g1,b1,g2,b2,g3,b3,g4,b4
            w1a, b1a, w2a, b2a = ld(), ld(), ld(), ld()
            w1b, b1b, w2b, b2b = ld(), ld(), ld(), ld()

            g1, be1 = ln[0:1, :], ln[1:2, :]
            g2, be2 = ln[2:3, :], ln[3:4, :]
            g3, be3 = ln[4:5, :], ln[5:6, :]
            g4, be4 = ln[6:7, :], ln[7:8, :]

            # ----- cross-time stage: attention over segments, batched over ts_d -----
            qkv = _mm(xf, w_qkv) + b_qkv                        # (R, 3D) fused projection
            q = qkv[:, :D].reshape(ts_d, seg_m, D)
            k = qkv[:, D:2 * D].reshape(ts_d, seg_m, D)
            v = qkv[:, 2 * D:].reshape(ts_d, seg_m, D)
            att = _mha_core(q, k, v, n_heads).reshape(R, D)
            att = _mm(att, w_to) + b_to
            dim_in = _layernorm(xf + att, g1, be1)              # dropout = identity (eval)
            y = _mm(dim_in, w1a) + b1a
            y = _mm(_gelu(y), w2a) + b2a
            dim_in = _layernorm(dim_in + y, g2, be2)            # (R, D), t-major rows

            # ----- cross-dimension stage: router attention over ts_d, batched over segments -----
            # Row re-ordering (b ts_d) seg <-> (b seg) ts_d done with a 0/1 permutation matmul.
            ds_flat = jnp.dot(perm, dim_in, preferred_element_type=jnp.float32)  # (R, D) s-major

            # single fused projection of the s-major activations: sender K, sender V, receiver Q
            kvq = _mm(ds_flat, w_dkvq) + b_dkvq                 # (R, 3D)
            k_s = kvq[:, :D].reshape(seg_m, ts_d, D)
            v_s = kvq[:, D:2 * D].reshape(seg_m, ts_d, D)
            q_d = kvq[:, 2 * D:].reshape(seg_m, ts_d, D)

            q_r = (_mm(router.reshape(seg_m * factor, D), w_sq) + b_sq
                   ).reshape(seg_m, factor, D)
            buf = _mha_core(q_r, k_s, v_s, n_heads)             # (seg_m, factor, D)
            buf = _mm(buf.reshape(seg_m * factor, D), w_so) + b_so

            kv_b = _mm(buf, w_rkv) + b_rkv                      # (seg_m*factor, 2D) fused K/V
            k_b = kv_b[:, :D].reshape(seg_m, factor, D)
            v_b = kv_b[:, D:].reshape(seg_m, factor, D)
            rec = _mha_core(q_d, k_b, v_b, n_heads).reshape(R, D)
            rec = _mm(rec, w_ro) + b_ro

            dim_enc = _layernorm(ds_flat + rec, g3, be3)
            y = _mm(dim_enc, w1b) + b1b
            y = _mm(_gelu(y), w2b) + b2b
            dim_enc = _layernorm(dim_enc + y, g4, be4)          # (R, D), s-major rows

            # back to t-major row order for the next layer / output
            xf = jnp.dot(perm_t, dim_enc, preferred_element_type=jnp.float32)

        out_ref[0] = xf.reshape(ts_d, seg_m, D).astype(out_ref.dtype)

    return kernel


# -------------------------------- parameters ----------------------------------

def init_params(key, *, d_model, win_size, n_heads, d_ff, depth, seg_m, factor):
    """Deterministic synthetic parameters (no checkpoint load)."""
    del n_heads  # head split is a view of d_model; no extra params
    keys = iter(jax.random.split(key, 32 * max(depth, 1) + 8))
    nk = lambda: next(keys)

    def dense(din, dout):
        return [0.02 * jax.random.normal(nk(), (din, dout), jnp.float32),
                jnp.zeros((1, dout), jnp.float32)]

    ones = lambda d: jnp.ones((1, d), jnp.float32)
    zeros = lambda d: jnp.zeros((1, d), jnp.float32)

    params = []
    if win_size > 1:
        params += [ones(win_size * d_model), zeros(win_size * d_model)]   # SegMerging norm
        params += dense(win_size * d_model, d_model)                      # linear_trans
    for _ in range(depth):
        params += dense(d_model, 3 * d_model)          # time attention fused QKV
        params += dense(d_model, d_model)              # time attention out proj
        params += dense(d_model, d_model)              # dim_sender Q (router projection)
        params += dense(d_model, 3 * d_model)          # fused: sender KV (2D) + receiver Q (D)
        params += dense(d_model, d_model)              # dim_sender out proj
        params += dense(d_model, 2 * d_model)          # dim_receiver fused KV
        params += dense(d_model, d_model)              # dim_receiver out proj
        params += [0.02 * jax.random.normal(nk(), (seg_m, factor, d_model), jnp.float32)]
        # norm1..4 packed as one (8, D) tile: g1,b1,g2,b2,g3,b3,g4,b4
        ln = jnp.stack([jnp.ones((d_model,), jnp.float32) if i % 2 == 0
                        else jnp.zeros((d_model,), jnp.float32) for i in range(8)], axis=0)
        params += [ln]
        params += dense(d_model, d_ff) + dense(d_ff, d_model)   # MLP1
        params += dense(d_model, d_ff) + dense(d_ff, d_model)   # MLP2
    return params


def _cost_estimate(b, ts_d, seg_m, d_model, din, d_ff, factor, depth, win_size, param_floats):
    R, D = ts_d * seg_m, d_model
    fl = 2 * R * din * D if win_size > 1 else 0
    per = 0
    per += 2 * R * D * 3 * D + 2 * R * D * D                    # time fused QKV + out proj
    per += 2 * ts_d * seg_m * seg_m * D * 2                     # time scores + AV
    per += 4 * R * D * d_ff                                     # MLP1 (two matmuls)
    per += 2 * R * D * 3 * D                                    # fused sender-KV + receiver-Q
    per += 2 * seg_m * factor * D * (D + D + 2 * D)             # sender Q / out, receiver KV
    per += 2 * R * D * D                                        # receiver out proj
    per += 2 * seg_m * factor * ts_d * D * 2                    # sender attention
    per += 2 * seg_m * ts_d * factor * D * 2                    # receiver attention
    per += 4 * R * D * d_ff                                     # MLP2
    per += 2 * 2 * R * R * D                                    # permutation matmuls
    fl += depth * per
    fl *= b
    tr = b * depth * (ts_d * seg_m * seg_m + 2 * seg_m * factor * ts_d + 2 * R * d_ff) + b * R * 10
    by = 4 * (b * R * din + b * R * D + param_floats)
    return int(fl), int(tr), int(by)


# -------------------------------- wrapper -------------------------------------

def scale_block_forward(x, params, *, win_size, d_model, n_heads, d_ff, depth, factor):
    b, ts_d, seg_num, d = x.shape
    assert d == d_model

    # SegMerging interleave (pure index plumbing -> wrapper side; norm + linear run in-kernel).
    if win_size > 1:
        pad_num = (-seg_num) % win_size
        if pad_num:
            x = jnp.concatenate([x, x[:, :, -pad_num:, :]], axis=2)
        seg_m = (seg_num + pad_num) // win_size
        xk = x.reshape(b, ts_d, seg_m, win_size * d_model)   # == torch interleave + concat(-1)
        din = win_size * d_model
    else:
        seg_m, xk, din = seg_num, x, d_model

    R = ts_d * seg_m
    # 0/1 permutation matrices: time-order rows (t-major) <-> dim-order rows (s-major).
    perm_np = np.zeros((R, R), np.float32)
    for s in range(seg_m):
        for t in range(ts_d):
            perm_np[s * ts_d + t, t * seg_m + s] = 1.0
    perm = jnp.asarray(perm_np)
    perm_t = jnp.asarray(np.ascontiguousarray(perm_np.T))

    kernel = _make_kernel(ts_d=ts_d, seg_m=seg_m, d_model=d_model, win_size=win_size,
                          n_heads=n_heads, d_ff=d_ff, depth=depth, factor=factor)

    def bcast_spec(p):
        nd = p.ndim
        return pl.BlockSpec(p.shape, lambda i, _nd=nd: (0,) * _nd)

    in_specs = ([pl.BlockSpec((1, ts_d, seg_m, din), lambda i: (i, 0, 0, 0)),
                 bcast_spec(perm), bcast_spec(perm_t)]
                + [bcast_spec(p) for p in params])
    out_specs = pl.BlockSpec((1, ts_d, seg_m, d_model), lambda i: (i, 0, 0, 0))
    out_shape = jax.ShapeDtypeStruct((b, ts_d, seg_m, d_model), x.dtype)

    param_floats = sum(int(np.prod(p.shape)) for p in params)
    fl, tr, by = _cost_estimate(b, ts_d, seg_m, d_model, din, d_ff, factor, depth,
                                win_size, param_floats)

    out = pl.pallas_call(
        kernel,
        grid=(b,),
        in_specs=in_specs,
        out_specs=out_specs,
        out_shape=out_shape,
        compiler_params=pltpu.CompilerParams(dimension_semantics=("parallel",)),
        cost_estimate=pl.CostEstimate(flops=fl, transcendentals=tr, bytes_accessed=by),
    )(xk, perm, perm_t, *params)

    return out, None


# ---------------------------------- demo --------------------------------------

if __name__ == "__main__":
    key = jax.random.PRNGKey(0)
    kx, kp = jax.random.split(key)

    # small shapes consistent with the module
    b, ts_d = 2, 4
    seg_num = 8
    d_model, n_heads, d_ff = 128, 4, 256   # d_model = 128 keeps every tile lane-dense
    win_size, depth, factor = 2, 1, 10

    seg_m = (seg_num + (-seg_num) % win_size) // win_size

    x = jax.random.normal(kx, (b, ts_d, seg_num, d_model), jnp.float32)
    params = init_params(kp, d_model=d_model, win_size=win_size, n_heads=n_heads,
                         d_ff=d_ff, depth=depth, seg_m=seg_m, factor=factor)

    out, attn = scale_block_forward(x, params, win_size=win_size, d_model=d_model,
                                    n_heads=n_heads, d_ff=d_ff, depth=depth, factor=factor)
    jax.block_until_ready(out)

    assert out.shape == (b, ts_d, seg_m, d_model)
    assert attn is None
    print("KERNEL_OK")
</pallas_src>

<mosaic_0001>
module attributes {stable_mosaic.version = 11 : i64} {
  func.func @kernel(%arg0: i32, %arg1: memref<1x4x4x256xf32, #tpu.memory_space<vmem>>, %arg2: memref<16x16xf32, #tpu.memory_space<vmem>>, %arg3: memref<16x16xf32, #tpu.memory_space<vmem>>, %arg4: memref<1x256xf32, #tpu.memory_space<vmem>>, %arg5: memref<1x256xf32, #tpu.memory_space<vmem>>, %arg6: memref<256x128xf32, #tpu.memory_space<vmem>>, %arg7: memref<1x128xf32, #tpu.memory_space<vmem>>, %arg8: memref<128x384xf32, #tpu.memory_space<vmem>>, %arg9: memref<1x384xf32, #tpu.memory_space<vmem>>, %arg10: memref<128x128xf32, #tpu.memory_space<vmem>>, %arg11: memref<1x128xf32, #tpu.memory_space<vmem>>, %arg12: memref<128x128xf32, #tpu.memory_space<vmem>>, %arg13: memref<1x128xf32, #tpu.memory_space<vmem>>, %arg14: memref<128x384xf32, #tpu.memory_space<vmem>>, %arg15: memref<1x384xf32, #tpu.memory_space<vmem>>, %arg16: memref<128x128xf32, #tpu.memory_space<vmem>>, %arg17: memref<1x128xf32, #tpu.memory_space<vmem>>, %arg18: memref<128x256xf32, #tpu.memory_space<vmem>>, %arg19: memref<1x256xf32, #tpu.memory_space<vmem>>, %arg20: memref<128x128xf32, #tpu.memory_space<vmem>>, %arg21: memref<1x128xf32, #tpu.memory_space<vmem>>, %arg22: memref<4x10x128xf32, #tpu.memory_space<vmem>>, %arg23: memref<8x128xf32, #tpu.memory_space<vmem>>, %arg24: memref<128x256xf32, #tpu.memory_space<vmem>>, %arg25: memref<1x256xf32, #tpu.memory_space<vmem>>, %arg26: memref<256x128xf32, #tpu.memory_space<vmem>>, %arg27: memref<1x128xf32, #tpu.memory_space<vmem>>, %arg28: memref<128x256xf32, #tpu.memory_space<vmem>>, %arg29: memref<1x256xf32, #tpu.memory_space<vmem>>, %arg30: memref<256x128xf32, #tpu.memory_space<vmem>>, %arg31: memref<1x128xf32, #tpu.memory_space<vmem>>, %arg32: memref<1x4x4x128xf32, #tpu.memory_space<vmem>>) attributes {dimension_semantics = [#tpu.dimension_semantics<parallel>], iteration_bounds = array<i64: 2>, scalar_prefetch = 0 : i64, scratch_operands = 0 : i64, tpu.core_type = #tpu.core_type<tc>, window_params = [{transform_indices = @transform_0, window_bounds = array<i64: 1, 4, 4, 256>}, {pipeline_mode = #tpu.pipeline_mode<synchronous>, transform_indices = @transform_1, window_bounds = array<i64: 16, 16>}, {pipeline_mode = #tpu.pipeline_mode<synchronous>, transform_indices = @transform_2, window_bounds = array<i64: 16, 16>}, {pipeline_mode = #tpu.pipeline_mode<synchronous>, transform_indices = @transform_3, window_bounds = array<i64: 1, 256>}, {pipeline_mode = #tpu.pipeline_mode<synchronous>, transform_indices = @transform_4, window_bounds = array<i64: 1, 256>}, {pipeline_mode = #tpu.pipeline_mode<synchronous>, transform_indices = @transform_5, window_bounds = array<i64: 256, 128>}, {pipeline_mode = #tpu.pipeline_mode<synchronous>, transform_indices = @transform_6, window_bounds = array<i64: 1, 128>}, {pipeline_mode = #tpu.pipeline_mode<synchronous>, transform_indices = @transform_7, window_bounds = array<i64: 128, 384>}, {pipeline_mode = #tpu.pipeline_mode<synchronous>, transform_indices = @transform_8, window_bounds = array<i64: 1, 384>}, {pipeline_mode = #tpu.pipeline_mode<synchronous>, transform_indices = @transform_9, window_bounds = array<i64: 128, 128>}, {pipeline_mode = #tpu.pipeline_mode<synchronous>, transform_indices = @transform_10, window_bounds = array<i64: 1, 128>}, {pipeline_mode = #tpu.pipeline_mode<synchronous>, transform_indices = @transform_11, window_bounds = array<i64: 128, 128>}, {pipeline_mode = #tpu.pipeline_mode<synchronous>, transform_indices = @transform_12, window_bounds = array<i64: 1, 128>}, {pipeline_mode = #tpu.pipeline_mode<synchronous>, transform_indices = @transform_13, window_bounds = array<i64: 128, 384>}, {pipeline_mode = #tpu.pipeline_mode<synchronous>, transform_indices = @transform_14, window_bounds = array<i64: 1, 384>}, {pipeline_mode = #tpu.pipeline_mode<synchronous>, transform_indices = @transform_15, window_bounds = array<i64: 128, 128>}, {pipeline_mode = #tpu.pipeline_mode<synchronous>, transform_indices = @transform_16, window_bounds = array<i64: 1, 128>}, {pipeline_mode = #tpu.pipeline_mode<synchronous>, transform_indices = @transform_17, window_bounds = array<i64: 128, 256>}, {pipeline_mode = #tpu.pipeline_mode<synchronous>, transform_indices = @transform_18, window_bounds = array<i64: 1, 256>}, {pipeline_mode = #tpu.pipeline_mode<synchronous>, transform_indices = @transform_19, window_bounds = array<i64: 128, 128>}, {pipeline_mode = #tpu.pipeline_mode<synchronous>, transform_indices = @transform_20, window_bounds = array<i64: 1, 128>}, {pipeline_mode = #tpu.pipeline_mode<synchronous>, transform_indices = @transform_21, window_bounds = array<i64: 4, 10, 128>}, {pipeline_mode = #tpu.pipeline_mode<synchronous>, transform_indices = @transform_22, window_bounds = array<i64: 8, 128>}, {pipeline_mode = #tpu.pipeline_mode<synchronous>, transform_indices = @transform_23, window_bounds = array<i64: 128, 256>}, {pipeline_mode = #tpu.pipeline_mode<synchronous>, transform_indices = @transform_24, window_bounds = array<i64: 1, 256>}, {pipeline_mode = #tpu.pipeline_mode<synchronous>, transform_indices = @transform_25, window_bounds = array<i64: 256, 128>}, {pipeline_mode = #tpu.pipeline_mode<synchronous>, transform_indices = @transform_26, window_bounds = array<i64: 1, 128>}, {pipeline_mode = #tpu.pipeline_mode<synchronous>, transform_indices = @transform_27, window_bounds = array<i64: 128, 256>}, {pipeline_mode = #tpu.pipeline_mode<synchronous>, transform_indices = @transform_28, window_bounds = array<i64: 1, 256>}, {pipeline_mode = #tpu.pipeline_mode<synchronous>, transform_indices = @transform_29, window_bounds = array<i64: 256, 128>}, {pipeline_mode = #tpu.pipeline_mode<synchronous>, transform_indices = @transform_30, window_bounds = array<i64: 1, 128>}, {transform_indices = @transform_31, window_bounds = array<i64: 1, 4, 4, 128>}]} {
    %c0 = arith.constant 0 : index
    %c0_0 = arith.constant 0 : index
    %c0_1 = arith.constant 0 : index
    %c0_2 = arith.constant 0 : index
    %0 = vector.load %arg1[%c0, %c0_0, %c0_1, %c0_2] : memref<1x4x4x256xf32, #tpu.memory_space<vmem>>, vector<1x4x4x256xf32>
    %1 = vector.shape_cast %0 : vector<1x4x4x256xf32> to vector<4x4x256xf32>
    %2 = vector.shape_cast %1 : vector<4x4x256xf32> to vector<16x256xf32>
    %c0_3 = arith.constant 0 : index
    %c0_4 = arith.constant 0 : index
    %3 = vector.load %arg4[%c0_3, %c0_4] : memref<1x256xf32, #tpu.memory_space<vmem>>, vector<1x256xf32>
    %c0_5 = arith.constant 0 : index
    %c0_6 = arith.constant 0 : index
    %4 = vector.load %arg5[%c0_5, %c0_6] : memref<1x256xf32, #tpu.memory_space<vmem>>, vector<1x256xf32>
    %c0_7 = arith.constant 0 : index
    %c0_8 = arith.constant 0 : index
    %5 = vector.load %arg6[%c0_7, %c0_8] : memref<256x128xf32, #tpu.memory_space<vmem>>, vector<256x128xf32>
    %c0_9 = arith.constant 0 : index
    %c0_10 = arith.constant 0 : index
    %6 = vector.load %arg7[%c0_9, %c0_10] : memref<1x128xf32, #tpu.memory_space<vmem>>, vector<1x128xf32>
    %cst = arith.constant dense<0.000000e+00> : vector<16xf32>
    %7 = vector.multi_reduction <add>, %2, %cst [1] : vector<16x256xf32> to vector<16xf32>
    %8 = vector.shape_cast %7 : vector<16xf32> to vector<16x1xf32>
    %cst_11 = arith.constant 2.560000e+02 : f32
    %9 = vector.broadcast %cst_11 : f32 to vector<16x1xf32>
    %10 = arith.divf %8, %9 : vector<16x1xf32>
    %11 = vector.broadcast %10 : vector<16x1xf32> to vector<16x256xf32>
    %12 = arith.subf %2, %11 : vector<16x256xf32>
    %13 = arith.mulf %12, %12 : vector<16x256xf32>
    %cst_12 = arith.constant dense<0.000000e+00> : vector<16xf32>
    %14 = vector.multi_reduction <add>, %13, %cst_12 [1] : vector<16x256xf32> to vector<16xf32>
    %15 = vector.shape_cast %14 : vector<16xf32> to vector<16x1xf32>
    %cst_13 = arith.constant 2.560000e+02 : f32
    %16 = vector.broadcast %cst_13 : f32 to vector<16x1xf32>
    %17 = arith.divf %15, %16 : vector<16x1xf32>
    %18 = vector.broadcast %10 : vector<16x1xf32> to vector<16x256xf32>
    %19 = arith.subf %2, %18 : vector<16x256xf32>
    %cst_14 = arith.constant 9.99999974E-6 : f32
    %20 = vector.broadcast %cst_14 : f32 to vector<16x1xf32>
    %21 = arith.addf %17, %20 : vector<16x1xf32>
    %22 = math.rsqrt %21 : vector<16x1xf32>
    %23 = vector.broadcast %22 : vector<16x1xf32> to vector<16x256xf32>
    %24 = arith.mulf %19, %23 : vector<16x256xf32>
    %25 = vector.broadcast %3 : vector<1x256xf32> to vector<16x256xf32>
    %26 = arith.mulf %24, %25 : vector<16x256xf32>
    %27 = vector.broadcast %4 : vector<1x256xf32> to vector<16x256xf32>
    %28 = arith.addf %26, %27 : vector<16x256xf32>
    %cst_15 = arith.constant dense<0.000000e+00> : vector<16x128xf32>
    %29 = tpu.matmul %28, %5, %cst_15 {dimension_numbers = #tpu.dot_dimension_numbers<[1], [0], [0], [1], [0, 0, 1, 1], [], []>} : vector<16x256xf32>, vector<256x128xf32>, vector<16x128xf32> -> vector<16x128xf32>
    %30 = vector.broadcast %6 : vector<1x128xf32> to vector<16x128xf32>
    %31 = arith.addf %29, %30 : vector<16x128xf32>
    %c0_16 = arith.constant 0 : index
    %c0_17 = arith.constant 0 : index
    %32 = vector.load %arg2[%c0_16, %c0_17] : memref<16x16xf32, #tpu.memory_space<vmem>>, vector<16x16xf32>
    %c0_18 = arith.constant 0 : index
    %c0_19 = arith.constant 0 : index
    %33 = vector.load %arg3[%c0_18, %c0_19] : memref<16x16xf32, #tpu.memory_space<vmem>>, vector<16x16xf32>
    %c0_20 = arith.constant 0 : index
    %c0_21 = arith.constant 0 : index
    %34 = vector.load %arg8[%c0_20, %c0_21] : memref<128x384xf32, #tpu.memory_space<vmem>>, vector<128x384xf32>
    %c0_22 = arith.constant 0 : index
    %c0_23 = arith.constant 0 : index
    %35 = vector.load %arg9[%c0_22, %c0_23] : memref<1x384xf32, #tpu.memory_space<vmem>>, vector<1x384xf32>
    %c0_24 = arith.constant 0 : index
    %c0_25 = arith.constant 0 : index
    %36 = vector.load %arg10[%c0_24, %c0_25] : memref<128x128xf32, #tpu.memory_space<vmem>>, vector<128x128xf32>
    %c0_26 = arith.constant 0 : index
    %c0_27 = arith.constant 0 : index
    %37 = vector.load %arg11[%c0_26, %c0_27] : memref<1x128xf32, #tpu.memory_space<vmem>>, vector<1x128xf32>
    %c0_28 = arith.constant 0 : index
    %c0_29 = arith.constant 0 : index
    %38 = vector.load %arg12[%c0_28, %c0_29] : memref<128x128xf32, #tpu.memory_space<vmem>>, vector<128x128xf32>
    %c0_30 = arith.constant 0 : index
    %c0_31 = arith.constant 0 : index
    %39 = vector.load %arg13[%c0_30, %c0_31] : memref<1x128xf32, #tpu.memory_space<vmem>>, vector<1x128xf32>
    %c0_32 = arith.constant 0 : index
    %c0_33 = arith.constant 0 : index
    %40 = vector.load %arg14[%c0_32, %c0_33] : memref<128x384xf32, #tpu.memory_space<vmem>>, vector<128x384xf32>
    %c0_34 = arith.constant 0 : index
    %c0_35 = arith.constant 0 : index
    %41 = vector.load %arg15[%c0_34, %c0_35] : memref<1x384xf32, #tpu.memory_space<vmem>>, vector<1x384xf32>
    %c0_36 = arith.constant 0 : index
    %c0_37 = arith.constant 0 : index
    %42 = vector.load %arg16[%c0_36, %c0_37] : memref<128x128xf32, #tpu.memory_space<vmem>>, vector<128x128xf32>
    %c0_38 = arith.constant 0 : index
    %c0_39 = arith.constant 0 : index
    %43 = vector.load %arg17[%c0_38, %c0_39] : memref<1x128xf32, #tpu.memory_space<vmem>>, vector<1x128xf32>
    %c0_40 = arith.constant 0 : index
    %c0_41 = arith.constant 0 : index
    %44 = vector.load %arg18[%c0_40, %c0_41] : memref<128x256xf32, #tpu.memory_space<vmem>>, vector<128x256xf32>
    %c0_42 = arith.constant 0 : index
    %c0_43 = arith.constant 0 : index
    %45 = vector.load %arg19[%c0_42, %c0_43] : memref<1x256xf32, #tpu.memory_space<vmem>>, vector<1x256xf32>
    %c0_44 = arith.constant 0 : index
    %c0_45 = arith.constant 0 : index
    %46 = vector.load %arg20[%c0_44, %c0_45] : memref<128x128xf32, #tpu.memory_space<vmem>>, vector<128x128xf32>
    %c0_46 = arith.constant 0 : index
    %c0_47 = arith.constant 0 : index
    %47 = vector.load %arg21[%c0_46, %c0_47] : memref<1x128xf32, #tpu.memory_space<vmem>>, vector<1x128xf32>
    %c0_48 = arith.constant 0 : index
    %c0_49 = arith.constant 0 : index
    %c0_50 = arith.constant 0 : index
    %48 = vector.load %arg22[%c0_48, %c0_49, %c0_50] : memref<4x10x128xf32, #tpu.memory_space<vmem>>, vector<4x10x128xf32>
    %c0_51 = arith.constant 0 : index
    %c0_52 = arith.constant 0 : index
    %49 = vector.load %arg23[%c0_51, %c0_52] : memref<8x128xf32, #tpu.memory_space<vmem>>, vector<8x128xf32>
    %c0_53 = arith.constant 0 : index
    %c0_54 = arith.constant 0 : index
    %50 = vector.load %arg24[%c0_53, %c0_54] : memref<128x256xf32, #tpu.memory_space<vmem>>, vector<128x256xf32>
    %c0_55 = arith.constant 0 : index
    %c0_56 = arith.constant 0 : index
    %51 = vector.load %arg25[%c0_55, %c0_56] : memref<1x256xf32, #tpu.memory_space<vmem>>, vector<1x256xf32>
    %c0_57 = arith.constant 0 : index
    %c0_58 = arith.constant 0 : index
    %52 = vector.load %arg26[%c0_57, %c0_58] : memref<256x128xf32, #tpu.memory_space<vmem>>, vector<256x128xf32>
    %c0_59 = arith.constant 0 : index
    %c0_60 = arith.constant 0 : index
    %53 = vector.load %arg27[%c0_59, %c0_60] : memref<1x128xf32, #tpu.memory_space<vmem>>, vector<1x128xf32>
    %c0_61 = arith.constant 0 : index
    %c0_62 = arith.constant 0 : index
    %54 = vector.load %arg28[%c0_61, %c0_62] : memref<128x256xf32, #tpu.memory_space<vmem>>, vector<128x256xf32>
    %c0_63 = arith.constant 0 : index
    %c0_64 = arith.constant 0 : index
    %55 = vector.load %arg29[%c0_63, %c0_64] : memref<1x256xf32, #tpu.memory_space<vmem>>, vector<1x256xf32>
    %c0_65 = arith.constant 0 : index
    %c0_66 = arith.constant 0 : index
    %56 = vector.load %arg30[%c0_65, %c0_66] : memref<256x128xf32, #tpu.memory_space<vmem>>, vector<256x128xf32>
    %c0_67 = arith.constant 0 : index
    %c0_68 = arith.constant 0 : index
    %57 = vector.load %arg31[%c0_67, %c0_68] : memref<1x128xf32, #tpu.memory_space<vmem>>, vector<1x128xf32>
    %58 = vector.extract_strided_slice %49 {offsets = [0, 0], sizes = [1, 128], strides = [1, 1]} : vector<8x128xf32> to vector<1x128xf32>
    %59 = vector.extract_strided_slice %49 {offsets = [1, 0], sizes = [1, 128], strides = [1, 1]} : vector<8x128xf32> to vector<1x128xf32>
    %60 = vector.extract_strided_slice %49 {offsets = [2, 0], sizes = [1, 128], strides = [1, 1]} : vector<8x128xf32> to vector<1x128xf32>
    %61 = vector.extract_strided_slice %49 {offsets = [3, 0], sizes = [1, 128], strides = [1, 1]} : vector<8x128xf32> to vector<1x128xf32>
    %62 = vector.extract_strided_slice %49 {offsets = [4, 0], sizes = [1, 128], strides = [1, 1]} : vector<8x128xf32> to vector<1x128xf32>
    %63 = vector.extract_strided_slice %49 {offsets = [5, 0], sizes = [1, 128], strides = [1, 1]} : vector<8x128xf32> to vector<1x128xf32>
    %64 = vector.extract_strided_slice %49 {offsets = [6, 0], sizes = [1, 128], strides = [1, 1]} : vector<8x128xf32> to vector<1x128xf32>
    %65 = vector.extract_strided_slice %49 {offsets = [7, 0], sizes = [1, 128], strides = [1, 1]} : vector<8x128xf32> to vector<1x128xf32>
    %cst_69 = arith.constant dense<0.000000e+00> : vector<16x384xf32>
    %66 = tpu.matmul %31, %34, %cst_69 {dimension_numbers = #tpu.dot_dimension_numbers<[1], [0], [0], [1], [0, 0, 1, 1], [], []>} : vector<16x128xf32>, vector<128x384xf32>, vector<16x384xf32> -> vector<16x384xf32>
    %67 = vector.broadcast %35 : vector<1x384xf32> to vector<16x384xf32>
    %68 = arith.addf %66, %67 : vector<16x384xf32>
    %69 = vector.extract_strided_slice %68 {offsets = [0, 0], sizes = [16, 128], strides = [1, 1]} : vector<16x384xf32> to vector<16x128xf32>
    %70 = vector.shape_cast %69 : vector<16x128xf32> to vector<4x4x128xf32>
    %71 = vector.extract_strided_slice %68 {offsets = [0, 128], sizes = [16, 128], strides = [1, 1]} : vector<16x384xf32> to vector<16x128xf32>
    %72 = vector.shape_cast %71 : vector<16x128xf32> to vector<4x4x128xf32>
    %73 = vector.extract_strided_slice %68 {offsets = [0, 256], sizes = [16, 128], strides = [1, 1]} : vector<16x384xf32> to vector<16x128xf32>
    %74 = vector.shape_cast %73 : vector<16x128xf32> to vector<4x4x128xf32>
    %75 = vector.extract_strided_slice %70 {offsets = [0, 0, 0], sizes = [4, 4, 32], strides = [1, 1, 1]} : vector<4x4x128xf32> to vector<4x4x32xf32>
    %76 = vector.extract_strided_slice %72 {offsets = [0, 0, 0], sizes = [4, 4, 32], strides = [1, 1, 1]} : vector<4x4x128xf32> to vector<4x4x32xf32>
    %77 = vector.extract_strided_slice %74 {offsets = [0, 0, 0], sizes = [4, 4, 32], strides = [1, 1, 1]} : vector<4x4x128xf32> to vector<4x4x32xf32>
    "tpu.trace_start"() <{level = 10 : i32, message = "bqd,bkd->bqk"}> : () -> ()
    %cst_70 = arith.constant dense<0.000000e+00> : vector<4x4x4xf32>
    %78 = tpu.matmul %75, %76, %cst_70 {dimension_numbers = #tpu.dot_dimension_numbers<[2], [2], [1], [1], [0, 0, 0, 1, 1, 1], [0], [0]>} : vector<4x4x32xf32>, vector<4x4x32xf32>, vector<4x4x4xf32> -> vector<4x4x4xf32>
    "tpu.trace_stop"() : () -> ()
    %cst_71 = arith.constant 0.176776692 : f32
    %79 = vector.broadcast %cst_71 : f32 to vector<4x4x4xf32>
    %80 = arith.mulf %78, %79 : vector<4x4x4xf32>
    %cst_72 = arith.constant dense<0xFF800000> : vector<4x4xf32>
    %81 = vector.multi_reduction <maximumf>, %80, %cst_72 [2] : vector<4x4x4xf32> to vector<4x4xf32>
    %82 = vector.shape_cast %81 : vector<4x4xf32> to vector<4x4x1xf32>
    %83 = vector.broadcast %82 : vector<4x4x1xf32> to vector<4x4x4xf32>
    %84 = arith.subf %80, %83 : vector<4x4x4xf32>
    %85 = math.exp %84 : vector<4x4x4xf32>
    %cst_73 = arith.constant dense<0.000000e+00> : vector<4x4xf32>
    %86 = vector.multi_reduction <add>, %85, %cst_73 [2] : vector<4x4x4xf32> to vector<4x4xf32>
    %87 = vector.shape_cast %86 : vector<4x4xf32> to vector<4x4x1xf32>
    %88 = tpu.reciprocal %87 {approx = true} : vector<4x4x1xf32> -> vector<4x4x1xf32>
    %89 = vector.broadcast %88 : vector<4x4x1xf32> to vector<4x4x4xf32>
    %90 = arith.mulf %85, %89 : vector<4x4x4xf32>
    "tpu.trace_start"() <{level = 10 : i32, message = "bqk,bkd->bqd"}> : () -> ()
    %cst_74 = arith.constant dense<0.000000e+00> : vector<4x4x32xf32>
    %91 = tpu.matmul %90, %77, %cst_74 {dimension_numbers = #tpu.dot_dimension_numbers<[2], [1], [1], [2], [0, 0, 0, 1, 1, 2], [0], [0]>} : vector<4x4x4xf32>, vector<4x4x32xf32>, vector<4x4x32xf32> -> vector<4x4x32xf32>
    "tpu.trace_stop"() : () -> ()
    %92 = vector.extract_strided_slice %70 {offsets = [0, 0, 32], sizes = [4, 4, 32], strides = [1, 1, 1]} : vector<4x4x128xf32> to vector<4x4x32xf32>
    %93 = vector.extract_strided_slice %72 {offsets = [0, 0, 32], sizes = [4, 4, 32], strides = [1, 1, 1]} : vector<4x4x128xf32> to vector<4x4x32xf32>
    %94 = vector.extract_strided_slice %74 {offsets = [0, 0, 32], sizes = [4, 4, 32], strides = [1, 1, 1]} : vector<4x4x128xf32> to vector<4x4x32xf32>
    "tpu.trace_start"() <{level = 10 : i32, message = "bqd,bkd->bqk"}> : () -> ()
    %cst_75 = arith.constant dense<0.000000e+00> : vector<4x4x4xf32>
    %95 = tpu.matmul %92, %93, %cst_75 {dimension_numbers = #tpu.dot_dimension_numbers<[2], [2], [1], [1], [0, 0, 0, 1, 1, 1], [0], [0]>} : vector<4x4x32xf32>, vector<4x4x32xf32>, vector<4x4x4xf32> -> vector<4x4x4xf32>
    "tpu.trace_stop"() : () -> ()
    %cst_76 = arith.constant 0.176776692 : f32
    %96 = vector.broadcast %cst_76 : f32 to vector<4x4x4xf32>
    %97 = arith.mulf %95, %96 : vector<4x4x4xf32>
    %cst_77 = arith.constant dense<0xFF800000> : vector<4x4xf32>
    %98 = vector.multi_reduction <maximumf>, %97, %cst_77 [2] : vector<4x4x4xf32> to vector<4x4xf32>
    %99 = vector.shape_cast %98 : vector<4x4xf32> to vector<4x4x1xf32>
    %100 = vector.broadcast %99 : vector<4x4x1xf32> to vector<4x4x4xf32>
    %101 = arith.subf %97, %100 : vector<4x4x4xf32>
    %102 = math.exp %101 : vector<4x4x4xf32>
    %cst_78 = arith.constant dense<0.000000e+00> : vector<4x4xf32>
    %103 = vector.multi_reduction <add>, %102, %cst_78 [2] : vector<4x4x4xf32> to vector<4x4xf32>
    %104 = vector.shape_cast %103 : vector<4x4xf32> to vector<4x4x1xf32>
    %105 = tpu.reciprocal %104 {approx = true} : vector<4x4x1xf32> -> vector<4x4x1xf32>
    %106 = vector.broadcast %105 : vector<4x4x1xf32> to vector<4x4x4xf32>
    %107 = arith.mulf %102, %106 : vector<4x4x4xf32>
    "tpu.trace_start"() <{level = 10 : i32, message = "bqk,bkd->bqd"}> : () -> ()
    %cst_79 = arith.constant dense<0.000000e+00> : vector<4x4x32xf32>
    %108 = tpu.matmul %107, %94, %cst_79 {dimension_numbers = #tpu.dot_dimension_numbers<[2], [1], [1], [2], [0, 0, 0, 1, 1, 2], [0], [0]>} : vector<4x4x4xf32>, vector<4x4x32xf32>, vector<4x4x32xf32> -> vector<4x4x32xf32>
    "tpu.trace_stop"() : () -> ()
    %109 = vector.extract_strided_slice %70 {offsets = [0, 0, 64], sizes = [4, 4, 32], strides = [1, 1, 1]} : vector<4x4x128xf32> to vector<4x4x32xf32>
    %110 = vector.extract_strided_slice %72 {offsets = [0, 0, 64], sizes = [4, 4, 32], strides = [1, 1, 1]} : vector<4x4x128xf32> to vector<4x4x32xf32>
    %111 = vector.extract_strided_slice %74 {offsets = [0, 0, 64], sizes = [4, 4, 32], strides = [1, 1, 1]} : vector<4x4x128xf32> to vector<4x4x32xf32>
    "tpu.trace_start"() <{level = 10 : i32, message = "bqd,bkd->bqk"}> : () -> ()
    %cst_80 = arith.constant dense<0.000000e+00> : vector<4x4x4xf32>
    %112 = tpu.matmul %109, %110, %cst_80 {dimension_numbers = #tpu.dot_dimension_numbers<[2], [2], [1], [1], [0, 0, 0, 1, 1, 1], [0], [0]>} : vector<4x4x32xf32>, vector<4x4x32xf32>, vector<4x4x4xf32> -> vector<4x4x4xf32>
    "tpu.trace_stop"() : () -> ()
    %cst_81 = arith.constant 0.176776692 : f32
    %113 = vector.broadcast %cst_81 : f32 to vector<4x4x4xf32>
    %114 = arith.mulf %112, %113 : vector<4x4x4xf32>
    %cst_82 = arith.constant dense<0xFF800000> : vector<4x4xf32>
    %115 = vector.multi_reduction <maximumf>, %114, %cst_82 [2] : vector<4x4x4xf32> to vector<4x4xf32>
    %116 = vector.shape_cast %115 : vector<4x4xf32> to vector<4x4x1xf32>
    %117 = vector.broadcast %116 : vector<4x4x1xf32> to vector<4x4x4xf32>
    %118 = arith.subf %114, %117 : vector<4x4x4xf32>
    %119 = math.exp %118 : vector<4x4x4xf32>
    %cst_83 = arith.constant dense<0.000000e+00> : vector<4x4xf32>
    %120 = vector.multi_reduction <add>, %119, %cst_83 [2] : vector<4x4x4xf32> to vector<4x4xf32>
    %121 = vector.shape_cast %120 : vector<4x4xf32> to vector<4x4x1xf32>
    %122 = tpu.reciprocal %121 {approx = true} : vector<4x4x1xf32> -> vector<4x4x1xf32>
    %123 = vector.broadcast %122 : vector<4x4x1xf32> to vector<4x4x4xf32>
    %124 = arith.mulf %119, %123 : vector<4x4x4xf32>
    "tpu.trace_start"() <{level = 10 : i32, message = "bqk,bkd->bqd"}> : () -> ()
    %cst_84 = arith.constant dense<0.000000e+00> : vector<4x4x32xf32>
    %125 = tpu.matmul %124, %111, %cst_84 {dimension_numbers = #tpu.dot_dimension_numbers<[2], [1], [1], [2], [0, 0, 0, 1, 1, 2], [0], [0]>} : vector<4x4x4xf32>, vector<4x4x32xf32>, vector<4x4x32xf32> -> vector<4x4x32xf32>
    "tpu.trace_stop"() : () -> ()
    %126 = vector.extract_strided_slice %70 {offsets = [0, 0, 96], sizes = [4, 4, 32], strides = [1, 1, 1]} : vector<4x4x128xf32> to vector<4x4x32xf32>
    %127 = vector.extract_strided_slice %72 {offsets = [0, 0, 96], sizes = [4, 4, 32], strides = [1, 1, 1]} : vector<4x4x128xf32> to vector<4x4x32xf32>
    %128 = vector.extract_strided_slice %74 {offsets = [0, 0, 96], sizes = [4, 4, 32], strides = [1, 1, 1]} : vector<4x4x128xf32> to vector<4x4x32xf32>
    "tpu.trace_start"() <{level = 10 : i32, message = "bqd,bkd->bqk"}> : () -> ()
    %cst_85 = arith.constant dense<0.000000e+00> : vector<4x4x4xf32>
    %129 = tpu.matmul %126, %127, %cst_85 {dimension_numbers = #tpu.dot_dimension_numbers<[2], [2], [1], [1], [0, 0, 0, 1, 1, 1], [0], [0]>} : vector<4x4x32xf32>, vector<4x4x32xf32>, vector<4x4x4xf32> -> vector<4x4x4xf32>
    "tpu.trace_stop"() : () -> ()
    %cst_86 = arith.constant 0.176776692 : f32
    %130 = vector.broadcast %cst_86 : f32 to vector<4x4x4xf32>
    %131 = arith.mulf %129, %130 : vector<4x4x4xf32>
    %cst_87 = arith.constant dense<0xFF800000> : vector<4x4xf32>
    %132 = vector.multi_reduction <maximumf>, %131, %cst_87 [2] : vector<4x4x4xf32> to vector<4x4xf32>
    %133 = vector.shape_cast %132 : vector<4x4xf32> to vector<4x4x1xf32>
    %134 = vector.broadcast %133 : vector<4x4x1xf32> to vector<4x4x4xf32>
    %135 = arith.subf %131, %134 : vector<4x4x4xf32>
    %136 = math.exp %135 : vector<4x4x4xf32>
    %cst_88 = arith.constant dense<0.000000e+00> : vector<4x4xf32>
    %137 = vector.multi_reduction <add>, %136, %cst_88 [2] : vector<4x4x4xf32> to vector<4x4xf32>
    %138 = vector.shape_cast %137 : vector<4x4xf32> to vector<4x4x1xf32>
    %139 = tpu.reciprocal %138 {approx = true} : vector<4x4x1xf32> -> vector<4x4x1xf32>
    %140 = vector.broadcast %139 : vector<4x4x1xf32> to vector<4x4x4xf32>
    %141 = arith.mulf %136, %140 : vector<4x4x4xf32>
    "tpu.trace_start"() <{level = 10 : i32, message = "bqk,bkd->bqd"}> : () -> ()
    %cst_89 = arith.constant dense<0.000000e+00> : vector<4x4x32xf32>
    %142 = tpu.matmul %141, %128, %cst_89 {dimension_numbers = #tpu.dot_dimension_numbers<[2], [1], [1], [2], [0, 0, 0, 1, 1, 2], [0], [0]>} : vector<4x4x4xf32>, vector<4x4x32xf32>, vector<4x4x32xf32> -> vector<4x4x32xf32>
    "tpu.trace_stop"() : () -> ()
    %143 = tpu.concatenate %91, %108, %125, %142 in 2 : vector<4x4x32xf32>, vector<4x4x32xf32>, vector<4x4x32xf32>, vector<4x4x32xf32> -> vector<4x4x128xf32>
    %144 = vector.shape_cast %143 : vector<4x4x128xf32> to vector<16x128xf32>
    %cst_90 = arith.constant dense<0.000000e+00> : vector<16x128xf32>
    %145 = tpu.matmul %144, %36, %cst_90 {dimension_numbers = #tpu.dot_dimension_numbers<[1], [0], [0], [1], [0, 0, 1, 1], [], []>} : vector<16x128xf32>, vector<128x128xf32>, vector<16x128xf32> -> vector<16x128xf32>
    %146 = vector.broadcast %37 : vector<1x128xf32> to vector<16x128xf32>
    %147 = arith.addf %145, %146 : vector<16x128xf32>
    %148 = arith.addf %31, %147 : vector<16x128xf32>
    %cst_91 = arith.constant dense<0.000000e+00> : vector<16xf32>
    %149 = vector.multi_reduction <add>, %148, %cst_91 [1] : vector<16x128xf32> to vector<16xf32>
    %150 = vector.shape_cast %149 : vector<16xf32> to vector<16x1xf32>
    %cst_92 = arith.constant 1.280000e+02 : f32
    %151 = vector.broadcast %cst_92 : f32 to vector<16x1xf32>
    %152 = arith.divf %150, %151 : vector<16x1xf32>
    %153 = vector.broadcast %152 : vector<16x1xf32> to vector<16x128xf32>
    %154 = arith.subf %148, %153 : vector<16x128xf32>
    %155 = arith.mulf %154, %154 : vector<16x128xf32>
    %cst_93 = arith.constant dense<0.000000e+00> : vector<16xf32>
    %156 = vector.multi_reduction <add>, %155, %cst_93 [1] : vector<16x128xf32> to vector<16xf32>
    %157 = vector.shape_cast %156 : vector<16xf32> to vector<16x1xf32>
    %cst_94 = arith.constant 1.280000e+02 : f32
    %158 = vector.broadcast %cst_94 : f32 to vector<16x1xf32>
    %159 = arith.divf %157, %158 : vector<16x1xf32>
    %160 = vector.broadcast %152 : vector<16x1xf32> to vector<16x128xf32>
    %161 = arith.subf %148, %160 : vector<16x128xf32>
    %cst_95 = arith.constant 9.99999974E-6 : f32
    %162 = vector.broadcast %cst_95 : f32 to vector<16x1xf32>
    %163 = arith.addf %159, %162 : vector<16x1xf32>
    %164 = math.rsqrt %163 : vector<16x1xf32>
    %165 = vector.broadcast %164 : vector<16x1xf32> to vector<16x128xf32>
    %166 = arith.mulf %161, %165 : vector<16x128xf32>
    %167 = vector.broadcast %58 : vector<1x128xf32> to vector<16x128xf32>
    %168 = arith.mulf %166, %167 : vector<16x128xf32>
    %169 = vector.broadcast %59 : vector<1x128xf32> to vector<16x128xf32>
    %170 = arith.addf %168, %169 : vector<16x128xf32>
    %cst_96 = arith.constant dense<0.000000e+00> : vector<16x256xf32>
    %171 = tpu.matmul %170, %50, %cst_96 {dimension_numbers = #tpu.dot_dimension_numbers<[1], [0], [0], [1], [0, 0, 1, 1], [], []>} : vector<16x128xf32>, vector<128x256xf32>, vector<16x256xf32> -> vector<16x256xf32>
    %172 = vector.broadcast %51 : vector<1x256xf32> to vector<16x256xf32>
    %173 = arith.addf %171, %172 : vector<16x256xf32>
    %cst_97 = arith.constant 5.000000e-01 : f32
    %174 = vector.broadcast %cst_97 : f32 to vector<16x256xf32>
    %175 = arith.mulf %174, %173 : vector<16x256xf32>
    %cst_98 = arith.constant 4.471500e-02 : f32
    %176 = vector.broadcast %cst_98 : f32 to vector<16x256xf32>
    %177 = arith.mulf %176, %173 : vector<16x256xf32>
    %178 = arith.mulf %177, %173 : vector<16x256xf32>
    %179 = arith.mulf %178, %173 : vector<16x256xf32>
    %180 = arith.addf %173, %179 : vector<16x256xf32>
    %cst_99 = arith.constant 0.797884583 : f32
    %181 = vector.broadcast %cst_99 : f32 to vector<16x256xf32>
    %182 = arith.mulf %181, %180 : vector<16x256xf32>
    %183 = math.tanh %182 : vector<16x256xf32>
    %cst_100 = arith.constant 1.000000e+00 : f32
    %184 = vector.broadcast %cst_100 : f32 to vector<16x256xf32>
    %185 = arith.addf %184, %183 : vector<16x256xf32>
    %186 = arith.mulf %175, %185 : vector<16x256xf32>
    %cst_101 = arith.constant dense<0.000000e+00> : vector<16x128xf32>
    %187 = tpu.matmul %186, %52, %cst_101 {dimension_numbers = #tpu.dot_dimension_numbers<[1], [0], [0], [1], [0, 0, 1, 1], [], []>} : vector<16x256xf32>, vector<256x128xf32>, vector<16x128xf32> -> vector<16x128xf32>
    %188 = vector.broadcast %53 : vector<1x128xf32> to vector<16x128xf32>
    %189 = arith.addf %187, %188 : vector<16x128xf32>
    %190 = arith.addf %170, %189 : vector<16x128xf32>
    %cst_102 = arith.constant dense<0.000000e+00> : vector<16xf32>
    %191 = vector.multi_reduction <add>, %190, %cst_102 [1] : vector<16x128xf32> to vector<16xf32>
    %192 = vector.shape_cast %191 : vector<16xf32> to vector<16x1xf32>
    %cst_103 = arith.constant 1.280000e+02 : f32
    %193 = vector.broadcast %cst_103 : f32 to vector<16x1xf32>
    %194 = arith.divf %192, %193 : vector<16x1xf32>
    %195 = vector.broadcast %194 : vector<16x1xf32> to vector<16x128xf32>
    %196 = arith.subf %190, %195 : vector<16x128xf32>
    %197 = arith.mulf %196, %196 : vector<16x128xf32>
    %cst_104 = arith.constant dense<0.000000e+00> : vector<16xf32>
    %198 = vector.multi_reduction <add>, %197, %cst_104 [1] : vector<16x128xf32> to vector<16xf32>
    %199 = vector.shape_cast %198 : vector<16xf32> to vector<16x1xf32>
    %cst_105 = arith.constant 1.280000e+02 : f32
    %200 = vector.broadcast %cst_105 : f32 to vector<16x1xf32>
    %201 = arith.divf %199, %200 : vector<16x1xf32>
    %202 = vector.broadcast %194 : vector<16x1xf32> to vector<16x128xf32>
    %203 = arith.subf %190, %202 : vector<16x128xf32>
    %cst_106 = arith.constant 9.99999974E-6 : f32
    %204 = vector.broadcast %cst_106 : f32 to vector<16x1xf32>
    %205 = arith.addf %201, %204 : vector<16x1xf32>
    %206 = math.rsqrt %205 : vector<16x1xf32>
    %207 = vector.broadcast %206 : vector<16x1xf32> to vector<16x128xf32>
    %208 = arith.mulf %203, %207 : vector<16x128xf32>
    %209 = vector.broadcast %60 : vector<1x128xf32> to vector<16x128xf32>
    %210 = arith.mulf %208, %209 : vector<16x128xf32>
    %211 = vector.broadcast %61 : vector<1x128xf32> to vector<16x128xf32>
    %212 = arith.addf %210, %211 : vector<16x128xf32>
    %cst_107 = arith.constant dense<0.000000e+00> : vector<16x128xf32>
    %213 = tpu.matmul %32, %212, %cst_107 {dimension_numbers = #tpu.dot_dimension_numbers<[1], [0], [0], [1], [0, 0, 1, 1], [], []>} : vector<16x16xf32>, vector<16x128xf32>, vector<16x128xf32> -> vector<16x128xf32>
    %cst_108 = arith.constant dense<0.000000e+00> : vector<16x384xf32>
    %214 = tpu.matmul %213, %40, %cst_108 {dimension_numbers = #tpu.dot_dimension_numbers<[1], [0], [0], [1], [0, 0, 1, 1], [], []>} : vector<16x128xf32>, vector<128x384xf32>, vector<16x384xf32> -> vector<16x384xf32>
    %215 = vector.broadcast %41 : vector<1x384xf32> to vector<16x384xf32>
    %216 = arith.addf %214, %215 : vector<16x384xf32>
    %217 = vector.extract_strided_slice %216 {offsets = [0, 0], sizes = [16, 128], strides = [1, 1]} : vector<16x384xf32> to vector<16x128xf32>
    %218 = vector.shape_cast %217 : vector<16x128xf32> to vector<4x4x128xf32>
    %219 = vector.extract_strided_slice %216 {offsets = [0, 128], sizes = [16, 128], strides = [1, 1]} : vector<16x384xf32> to vector<16x128xf32>
    %220 = vector.shape_cast %219 : vector<16x128xf32> to vector<4x4x128xf32>
    %221 = vector.extract_strided_slice %216 {offsets = [0, 256], sizes = [16, 128], strides = [1, 1]} : vector<16x384xf32> to vector<16x128xf32>
    %222 = vector.shape_cast %221 : vector<16x128xf32> to vector<4x4x128xf32>
    %223 = vector.shape_cast %48 : vector<4x10x128xf32> to vector<40x128xf32>
    %cst_109 = arith.constant dense<0.000000e+00> : vector<40x128xf32>
    %224 = tpu.matmul %223, %38, %cst_109 {dimension_numbers = #tpu.dot_dimension_numbers<[1], [0], [0], [1], [0, 0, 1, 1], [], []>} : vector<40x128xf32>, vector<128x128xf32>, vector<40x128xf32> -> vector<40x128xf32>
    %225 = vector.broadcast %39 : vector<1x128xf32> to vector<40x128xf32>
    %226 = arith.addf %224, %225 : vector<40x128xf32>
    %227 = vector.shape_cast %226 : vector<40x128xf32> to vector<4x10x128xf32>
    %228 = vector.extract_strided_slice %227 {offsets = [0, 0, 0], sizes = [4, 10, 32], strides = [1, 1, 1]} : vector<4x10x128xf32> to vector<4x10x32xf32>
    %229 = vector.extract_strided_slice %218 {offsets = [0, 0, 0], sizes = [4, 4, 32], strides = [1, 1, 1]} : vector<4x4x128xf32> to vector<4x4x32xf32>
    %230 = vector.extract_strided_slice %220 {offsets = [0, 0, 0], sizes = [4, 4, 32], strides = [1, 1, 1]} : vector<4x4x128xf32> to vector<4x4x32xf32>
    "tpu.trace_start"() <{level = 10 : i32, message = "bqd,bkd->bqk"}> : () -> ()
    %cst_110 = arith.constant dense<0.000000e+00> : vector<4x10x4xf32>
    %231 = tpu.matmul %228, %229, %cst_110 {dimension_numbers = #tpu.dot_dimension_numbers<[2], [2], [1], [1], [0, 0, 0, 1, 1, 1], [0], [0]>} : vector<4x10x32xf32>, vector<4x4x32xf32>, vector<4x10x4xf32> -> vector<4x10x4xf32>
    "tpu.trace_stop"() : () -> ()
    %cst_111 = arith.constant 0.176776692 : f32
    %232 = vector.broadcast %cst_111 : f32 to vector<4x10x4xf32>
    %233 = arith.mulf %231, %232 : vector<4x10x4xf32>
    %cst_112 = arith.constant dense<0xFF800000> : vector<4x10xf32>
    %234 = vector.multi_reduction <maximumf>, %233, %cst_112 [2] : vector<4x10x4xf32> to vector<4x10xf32>
    %235 = vector.shape_cast %234 : vector<4x10xf32> to vector<4x10x1xf32>
    %236 = vector.broadcast %235 : vector<4x10x1xf32> to vector<4x10x4xf32>
    %237 = arith.subf %233, %236 : vector<4x10x4xf32>
    %238 = math.exp %237 : vector<4x10x4xf32>
    %cst_113 = arith.constant dense<0.000000e+00> : vector<4x10xf32>
    %239 = vector.multi_reduction <add>, %238, %cst_113 [2] : vector<4x10x4xf32> to vector<4x10xf32>
    %240 = vector.shape_cast %239 : vector<4x10xf32> to vector<4x10x1xf32>
    %241 = tpu.reciprocal %240 {approx = true} : vector<4x10x1xf32> -> vector<4x10x1xf32>
    %242 = vector.broadcast %241 : vector<4x10x1xf32> to vector<4x10x4xf32>
    %243 = arith.mulf %238, %242 : vector<4x10x4xf32>
    "tpu.trace_start"() <{level = 10 : i32, message = "bqk,bkd->bqd"}> : () -> ()
    %cst_114 = arith.constant dense<0.000000e+00> : vector<4x10x32xf32>
    %244 = tpu.matmul %243, %230, %cst_114 {dimension_numbers = #tpu.dot_dimension_numbers<[2], [1], [1], [2], [0, 0, 0, 1, 1, 2], [0], [0]>} : vector<4x10x4xf32>, vector<4x4x32xf32>, vector<4x10x32xf32> -> vector<4x10x32xf32>
    "tpu.trace_stop"() : () -> ()
    %245 = vector.extract_strided_slice %227 {offsets = [0, 0, 32], sizes = [4, 10, 32], strides = [1, 1, 1]} : vector<4x10x128xf32> to vector<4x10x32xf32>
    %246 = vector.extract_strided_slice %218 {offsets = [0, 0, 32], sizes = [4, 4, 32], strides = [1, 1, 1]} : vector<4x4x128xf32> to vector<4x4x32xf32>
    %247 = vector.extract_strided_slice %220 {offsets = [0, 0, 32], sizes = [4, 4, 32], strides = [1, 1, 1]} : vector<4x4x128xf32> to vector<4x4x32xf32>
    "tpu.trace_start"() <{level = 10 : i32, message = "bqd,bkd->bqk"}> : () -> ()
    %cst_115 = arith.constant dense<0.000000e+00> : vector<4x10x4xf32>
    %248 = tpu.matmul %245, %246, %cst_115 {dimension_numbers = #tpu.dot_dimension_numbers<[2], [2], [1], [1], [0, 0, 0, 1, 1, 1], [0], [0]>} : vector<4x10x32xf32>, vector<4x4x32xf32>, vector<4x10x4xf32> -> vector<4x10x4xf32>
    "tpu.trace_stop"() : () -> ()
    %cst_116 = arith.constant 0.176776692 : f32
    %249 = vector.broadcast %cst_116 : f32 to vector<4x10x4xf32>
    %250 = arith.mulf %248, %249 : vector<4x10x4xf32>
    %cst_117 = arith.constant dense<0xFF800000> : vector<4x10xf32>
    %251 = vector.multi_reduction <maximumf>, %250, %cst_117 [2] : vector<4x10x4xf32> to vector<4x10xf32>
    %252 = vector.shape_cast %251 : vector<4x10xf32> to vector<4x10x1xf32>
    %253 = vector.broadcast %252 : vector<4x10x1xf32> to vector<4x10x4xf32>
    %254 = arith.subf %250, %253 : vector<4x10x4xf32>
    %255 = math.exp %254 : vector<4x10x4xf32>
    %cst_118 = arith.constant dense<0.000000e+00> : vector<4x10xf32>
    %256 = vector.multi_reduction <add>, %255, %cst_118 [2] : vector<4x10x4xf32> to vector<4x10xf32>
    %257 = vector.shape_cast %256 : vector<4x10xf32> to vector<4x10x1xf32>
    %258 = tpu.reciprocal %257 {approx = true} : vector<4x10x1xf32> -> vector<4x10x1xf32>
    %259 = vector.broadcast %258 : vector<4x10x1xf32> to vector<4x10x4xf32>
    %260 = arith.mulf %255, %259 : vector<4x10x4xf32>
    "tpu.trace_start"() <{level = 10 : i32, message = "bqk,bkd->bqd"}> : () -> ()
    %cst_119 = arith.constant dense<0.000000e+00> : vector<4x10x32xf32>
    %261 = tpu.matmul %260, %247, %cst_119 {dimension_numbers = #tpu.dot_dimension_numbers<[2], [1], [1], [2], [0, 0, 0, 1, 1, 2], [0], [0]>} : vector<4x10x4xf32>, vector<4x4x32xf32>, vector<4x10x32xf32> -> vector<4x10x32xf32>
    "tpu.trace_stop"() : () -> ()
    %262 = vector.extract_strided_slice %227 {offsets = [0, 0, 64], sizes = [4, 10, 32], strides = [1, 1, 1]} : vector<4x10x128xf32> to vector<4x10x32xf32>
    %263 = vector.extract_strided_slice %218 {offsets = [0, 0, 64], sizes = [4, 4, 32], strides = [1, 1, 1]} : vector<4x4x128xf32> to vector<4x4x32xf32>
    %264 = vector.extract_strided_slice %220 {offsets = [0, 0, 64], sizes = [4, 4, 32], strides = [1, 1, 1]} : vector<4x4x128xf32> to vector<4x4x32xf32>
    "tpu.trace_start"() <{level = 10 : i32, message = "bqd,bkd->bqk"}> : () -> ()
    %cst_120 = arith.constant dense<0.000000e+00> : vector<4x10x4xf32>
    %265 = tpu.matmul %262, %263, %cst_120 {dimension_numbers = #tpu.dot_dimension_numbers<[2], [2], [1], [1], [0, 0, 0, 1, 1, 1], [0], [0]>} : vector<4x10x32xf32>, vector<4x4x32xf32>, vector<4x10x4xf32> -> vector<4x10x4xf32>
    "tpu.trace_stop"() : () -> ()
    %cst_121 = arith.constant 0.176776692 : f32
    %266 = vector.broadcast %cst_121 : f32 to vector<4x10x4xf32>
    %267 = arith.mulf %265, %266 : vector<4x10x4xf32>
    %cst_122 = arith.constant dense<0xFF800000> : vector<4x10xf32>
    %268 = vector.multi_reduction <maximumf>, %267, %cst_122 [2] : vector<4x10x4xf32> to vector<4x10xf32>
    %269 = vector.shape_cast %268 : vector<4x10xf32> to vector<4x10x1xf32>
    %270 = vector.broadcast %269 : vector<4x10x1xf32> to vector<4x10x4xf32>
    %271 = arith.subf %267, %270 : vector<4x10x4xf32>
    %272 = math.exp %271 : vector<4x10x4xf32>
    %cst_123 = arith.constant dense<0.000000e+00> : vector<4x10xf32>
    %273 = vector.multi_reduction <add>, %272, %cst_123 [2] : vector<4x10x4xf32> to vector<4x10xf32>
    %274 = vector.shape_cast %273 : vector<4x10xf32> to vector<4x10x1xf32>
    %275 = tpu.reciprocal %274 {approx = true} : vector<4x10x1xf32> -> vector<4x10x1xf32>
    %276 = vector.broadcast %275 : vector<4x10x1xf32> to vector<4x10x4xf32>
    %277 = arith.mulf %272, %276 : vector<4x10x4xf32>
    "tpu.trace_start"() <{level = 10 : i32, message = "bqk,bkd->bqd"}> : () -> ()
    %cst_124 = arith.constant dense<0.000000e+00> : vector<4x10x32xf32>
    %278 = tpu.matmul %277, %264, %cst_124 {dimension_numbers = #tpu.dot_dimension_numbers<[2], [1], [1], [2], [0, 0, 0, 1, 1, 2], [0], [0]>} : vector<4x10x4xf32>, vector<4x4x32xf32>, vector<4x10x32xf32> -> vector<4x10x32xf32>
    "tpu.trace_stop"() : () -> ()
    %279 = vector.extract_strided_slice %227 {offsets = [0, 0, 96], sizes = [4, 10, 32], strides = [1, 1, 1]} : vector<4x10x128xf32> to vector<4x10x32xf32>
    %280 = vector.extract_strided_slice %218 {offsets = [0, 0, 96], sizes = [4, 4, 32], strides = [1, 1, 1]} : vector<4x4x128xf32> to vector<4x4x32xf32>
    %281 = vector.extract_strided_slice %220 {offsets = [0, 0, 96], sizes = [4, 4, 32], strides = [1, 1, 1]} : vector<4x4x128xf32> to vector<4x4x32xf32>
    "tpu.trace_start"() <{level = 10 : i32, message = "bqd,bkd->bqk"}> : () -> ()
    %cst_125 = arith.constant dense<0.000000e+00> : vector<4x10x4xf32>
    %282 = tpu.matmul %279, %280, %cst_125 {dimension_numbers = #tpu.dot_dimension_numbers<[2], [2], [1], [1], [0, 0, 0, 1, 1, 1], [0], [0]>} : vector<4x10x32xf32>, vector<4x4x32xf32>, vector<4x10x4xf32> -> vector<4x10x4xf32>
    "tpu.trace_stop"() : () -> ()
    %cst_126 = arith.constant 0.176776692 : f32
    %283 = vector.broadcast %cst_126 : f32 to vector<4x10x4xf32>
    %284 = arith.mulf %282, %283 : vector<4x10x4xf32>
    %cst_127 = arith.constant dense<0xFF800000> : vector<4x10xf32>
    %285 = vector.multi_reduction <maximumf>, %284, %cst_127 [2] : vector<4x10x4xf32> to vector<4x10xf32>
    %286 = vector.shape_cast %285 : vector<4x10xf32> to vector<4x10x1xf32>
    %287 = vector.broadcast %286 : vector<4x10x1xf32> to vector<4x10x4xf32>
    %288 = arith.subf %284, %287 : vector<4x10x4xf32>
    %289 = math.exp %288 : vector<4x10x4xf32>
    %cst_128 = arith.constant dense<0.000000e+00> : vector<4x10xf32>
    %290 = vector.multi_reduction <add>, %289, %cst_128 [2] : vector<4x10x4xf32> to vector<4x10xf32>
    %291 = vector.shape_cast %290 : vector<4x10xf32> to vector<4x10x1xf32>
    %292 = tpu.reciprocal %291 {approx = true} : vector<4x10x1xf32> -> vector<4x10x1xf32>
    %293 = vector.broadcast %292 : vector<4x10x1xf32> to vector<4x10x4xf32>
    %294 = arith.mulf %289, %293 : vector<4x10x4xf32>
    "tpu.trace_start"() <{level = 10 : i32, message = "bqk,bkd->bqd"}> : () -> ()
    %cst_129 = arith.constant dense<0.000000e+00> : vector<4x10x32xf32>
    %295 = tpu.matmul %294, %281, %cst_129 {dimension_numbers = #tpu.dot_dimension_numbers<[2], [1], [1], [2], [0, 0, 0, 1, 1, 2], [0], [0]>} : vector<4x10x4xf32>, vector<4x4x32xf32>, vector<4x10x32xf32> -> vector<4x10x32xf32>
    "tpu.trace_stop"() : () -> ()
    %296 = tpu.concatenate %244, %261, %278, %295 in 2 : vector<4x10x32xf32>, vector<4x10x32xf32>, vector<4x10x32xf32>, vector<4x10x32xf32> -> vector<4x10x128xf32>
    %297 = vector.shape_cast %296 : vector<4x10x128xf32> to vector<40x128xf32>
    %cst_130 = arith.constant dense<0.000000e+00> : vector<40x128xf32>
    %298 = tpu.matmul %297, %42, %cst_130 {dimension_numbers = #tpu.dot_dimension_numbers<[1], [0], [0], [1], [0, 0, 1, 1], [], []>} : vector<40x128xf32>, vector<128x128xf32>, vector<40x128xf32> -> vector<40x128xf32>
    %299 = vector.broadcast %43 : vector<1x128xf32> to vector<40x128xf32>
    %300 = arith.addf %298, %299 : vector<40x128xf32>
    %cst_131 = arith.constant dense<0.000000e+00> : vector<40x256xf32>
    %301 = tpu.matmul %300, %44, %cst_131 {dimension_numbers = #tpu.dot_dimension_numbers<[1], [0], [0], [1], [0, 0, 1, 1], [], []>} : vector<40x128xf32>, vector<128x256xf32>, vector<40x256xf32> -> vector<40x256xf32>
    %302 = vector.broadcast %45 : vector<1x256xf32> to vector<40x256xf32>
    %303 = arith.addf %301, %302 : vector<40x256xf32>
    %304 = vector.extract_strided_slice %303 {offsets = [0, 0], sizes = [40, 128], strides = [1, 1]} : vector<40x256xf32> to vector<40x128xf32>
    %305 = vector.shape_cast %304 : vector<40x128xf32> to vector<4x10x128xf32>
    %306 = vector.extract_strided_slice %303 {offsets = [0, 128], sizes = [40, 128], strides = [1, 1]} : vector<40x256xf32> to vector<40x128xf32>
    %307 = vector.shape_cast %306 : vector<40x128xf32> to vector<4x10x128xf32>
    %308 = vector.extract_strided_slice %222 {offsets = [0, 0, 0], sizes = [4, 4, 32], strides = [1, 1, 1]} : vector<4x4x128xf32> to vector<4x4x32xf32>
    %309 = vector.extract_strided_slice %305 {offsets = [0, 0, 0], sizes = [4, 10, 32], strides = [1, 1, 1]} : vector<4x10x128xf32> to vector<4x10x32xf32>
    %310 = vector.extract_strided_slice %307 {offsets = [0, 0, 0], sizes = [4, 10, 32], strides = [1, 1, 1]} : vector<4x10x128xf32> to vector<4x10x32xf32>
    "tpu.trace_start"() <{level = 10 : i32, message = "bqd,bkd->bqk"}> : () -> ()
    %cst_132 = arith.constant dense<0.000000e+00> : vector<4x4x10xf32>
    %311 = tpu.matmul %308, %309, %cst_132 {dimension_numbers = #tpu.dot_dimension_numbers<[2], [2], [1], [1], [0, 0, 0, 1, 1, 1], [0], [0]>} : vector<4x4x32xf32>, vector<4x10x32xf32>, vector<4x4x10xf32> -> vector<4x4x10xf32>
    "tpu.trace_stop"() : () -> ()
    %cst_133 = arith.constant 0.176776692 : f32
    %312 = vector.broadcast %cst_133 : f32 to vector<4x4x10xf32>
    %313 = arith.mulf %311, %312 : vector<4x4x10xf32>
    %cst_134 = arith.constant dense<0xFF800000> : vector<4x4xf32>
    %314 = vector.multi_reduction <maximumf>, %313, %cst_134 [2] : vector<4x4x10xf32> to vector<4x4xf32>
    %315 = vector.shape_cast %314 : vector<4x4xf32> to vector<4x4x1xf32>
    %316 = vector.broadcast %315 : vector<4x4x1xf32> to vector<4x4x10xf32>
    %317 = arith.subf %313, %316 : vector<4x4x10xf32>
    %318 = math.exp %317 : vector<4x4x10xf32>
    %cst_135 = arith.constant dense<0.000000e+00> : vector<4x4xf32>
    %319 = vector.multi_reduction <add>, %318, %cst_135 [2] : vector<4x4x10xf32> to vector<4x4xf32>
    %320 = vector.shape_cast %319 : vector<4x4xf32> to vector<4x4x1xf32>
    %321 = tpu.reciprocal %320 {approx = true} : vector<4x4x1xf32> -> vector<4x4x1xf32>
    %322 = vector.broadcast %321 : vector<4x4x1xf32> to vector<4x4x10xf32>
    %323 = arith.mulf %318, %322 : vector<4x4x10xf32>
    "tpu.trace_start"() <{level = 10 : i32, message = "bqk,bkd->bqd"}> : () -> ()
    %cst_136 = arith.constant dense<0.000000e+00> : vector<4x4x32xf32>
    %324 = tpu.matmul %323, %310, %cst_136 {dimension_numbers = #tpu.dot_dimension_numbers<[2], [1], [1], [2], [0, 0, 0, 1, 1, 2], [0], [0]>} : vector<4x4x10xf32>, vector<4x10x32xf32>, vector<4x4x32xf32> -> vector<4x4x32xf32>
    "tpu.trace_stop"() : () -> ()
    %325 = vector.extract_strided_slice %222 {offsets = [0, 0, 32], sizes = [4, 4, 32], strides = [1, 1, 1]} : vector<4x4x128xf32> to vector<4x4x32xf32>
    %326 = vector.extract_strided_slice %305 {offsets = [0, 0, 32], sizes = [4, 10, 32], strides = [1, 1, 1]} : vector<4x10x128xf32> to vector<4x10x32xf32>
    %327 = vector.extract_strided_slice %307 {offsets = [0, 0, 32], sizes = [4, 10, 32], strides = [1, 1, 1]} : vector<4x10x128xf32> to vector<4x10x32xf32>
    "tpu.trace_start"() <{level = 10 : i32, message = "bqd,bkd->bqk"}> : () -> ()
    %cst_137 = arith.constant dense<0.000000e+00> : vector<4x4x10xf32>
    %328 = tpu.matmul %325, %326, %cst_137 {dimension_numbers = #tpu.dot_dimension_numbers<[2], [2], [1], [1], [0, 0, 0, 1, 1, 1], [0], [0]>} : vector<4x4x32xf32>, vector<4x10x32xf32>, vector<4x4x10xf32> -> vector<4x4x10xf32>
    "tpu.trace_stop"() : () -> ()
    %cst_138 = arith.constant 0.176776692 : f32
    %329 = vector.broadcast %cst_138 : f32 to vector<4x4x10xf32>
    %330 = arith.mulf %328, %329 : vector<4x4x10xf32>
    %cst_139 = arith.constant dense<0xFF800000> : vector<4x4xf32>
    %331 = vector.multi_reduction <maximumf>, %330, %cst_139 [2] : vector<4x4x10xf32> to vector<4x4xf32>
    %332 = vector.shape_cast %331 : vector<4x4xf32> to vector<4x4x1xf32>
    %333 = vector.broadcast %332 : vector<4x4x1xf32> to vector<4x4x10xf32>
    %334 = arith.subf %330, %333 : vector<4x4x10xf32>
    %335 = math.exp %334 : vector<4x4x10xf32>
    %cst_140 = arith.constant dense<0.000000e+00> : vector<4x4xf32>
    %336 = vector.multi_reduction <add>, %335, %cst_140 [2] : vector<4x4x10xf32> to vector<4x4xf32>
    %337 = vector.shape_cast %336 : vector<4x4xf32> to vector<4x4x1xf32>
    %338 = tpu.reciprocal %337 {approx = true} : vector<4x4x1xf32> -> vector<4x4x1xf32>
    %339 = vector.broadcast %338 : vector<4x4x1xf32> to vector<4x4x10xf32>
    %340 = arith.mulf %335, %339 : vector<4x4x10xf32>
    "tpu.trace_start"() <{level = 10 : i32, message = "bqk,bkd->bqd"}> : () -> ()
    %cst_141 = arith.constant dense<0.000000e+00> : vector<4x4x32xf32>
    %341 = tpu.matmul %340, %327, %cst_141 {dimension_numbers = #tpu.dot_dimension_numbers<[2], [1], [1], [2], [0, 0, 0, 1, 1, 2], [0], [0]>} : vector<4x4x10xf32>, vector<4x10x32xf32>, vector<4x4x32xf32> -> vector<4x4x32xf32>
    "tpu.trace_stop"() : () -> ()
    %342 = vector.extract_strided_slice %222 {offsets = [0, 0, 64], sizes = [4, 4, 32], strides = [1, 1, 1]} : vector<4x4x128xf32> to vector<4x4x32xf32>
    %343 = vector.extract_strided_slice %305 {offsets = [0, 0, 64], sizes = [4, 10, 32], strides = [1, 1, 1]} : vector<4x10x128xf32> to vector<4x10x32xf32>
    %344 = vector.extract_strided_slice %307 {offsets = [0, 0, 64], sizes = [4, 10, 32], strides = [1, 1, 1]} : vector<4x10x128xf32> to vector<4x10x32xf32>
    "tpu.trace_start"() <{level = 10 : i32, message = "bqd,bkd->bqk"}> : () -> ()
    %cst_142 = arith.constant dense<0.000000e+00> : vector<4x4x10xf32>
    %345 = tpu.matmul %342, %343, %cst_142 {dimension_numbers = #tpu.dot_dimension_numbers<[2], [2], [1], [1], [0, 0, 0, 1, 1, 1], [0], [0]>} : vector<4x4x32xf32>, vector<4x10x32xf32>, vector<4x4x10xf32> -> vector<4x4x10xf32>
    "tpu.trace_stop"() : () -> ()
    %cst_143 = arith.constant 0.176776692 : f32
    %346 = vector.broadcast %cst_143 : f32 to vector<4x4x10xf32>
    %347 = arith.mulf %345, %346 : vector<4x4x10xf32>
    %cst_144 = arith.constant dense<0xFF800000> : vector<4x4xf32>
    %348 = vector.multi_reduction <maximumf>, %347, %cst_144 [2] : vector<4x4x10xf32> to vector<4x4xf32>
    %349 = vector.shape_cast %348 : vector<4x4xf32> to vector<4x4x1xf32>
    %350 = vector.broadcast %349 : vector<4x4x1xf32> to vector<4x4x10xf32>
    %351 = arith.subf %347, %350 : vector<4x4x10xf32>
    %352 = math.exp %351 : vector<4x4x10xf32>
    %cst_145 = arith.constant dense<0.000000e+00> : vector<4x4xf32>
    %353 = vector.multi_reduction <add>, %352, %cst_145 [2] : vector<4x4x10xf32> to vector<4x4xf32>
    %354 = vector.shape_cast %353 : vector<4x4xf32> to vector<4x4x1xf32>
    %355 = tpu.reciprocal %354 {approx = true} : vector<4x4x1xf32> -> vector<4x4x1xf32>
    %356 = vector.broadcast %355 : vector<4x4x1xf32> to vector<4x4x10xf32>
    %357 = arith.mulf %352, %356 : vector<4x4x10xf32>
    "tpu.trace_start"() <{level = 10 : i32, message = "bqk,bkd->bqd"}> : () -> ()
    %cst_146 = arith.constant dense<0.000000e+00> : vector<4x4x32xf32>
    %358 = tpu.matmul %357, %344, %cst_146 {dimension_numbers = #tpu.dot_dimension_numbers<[2], [1], [1], [2], [0, 0, 0, 1, 1, 2], [0], [0]>} : vector<4x4x10xf32>, vector<4x10x32xf32>, vector<4x4x32xf32> -> vector<4x4x32xf32>
    "tpu.trace_stop"() : () -> ()
    %359 = vector.extract_strided_slice %222 {offsets = [0, 0, 96], sizes = [4, 4, 32], strides = [1, 1, 1]} : vector<4x4x128xf32> to vector<4x4x32xf32>
    %360 = vector.extract_strided_slice %305 {offsets = [0, 0, 96], sizes = [4, 10, 32], strides = [1, 1, 1]} : vector<4x10x128xf32> to vector<4x10x32xf32>
    %361 = vector.extract_strided_slice %307 {offsets = [0, 0, 96], sizes = [4, 10, 32], strides = [1, 1, 1]} : vector<4x10x128xf32> to vector<4x10x32xf32>
    "tpu.trace_start"() <{level = 10 : i32, message = "bqd,bkd->bqk"}> : () -> ()
    %cst_147 = arith.constant dense<0.000000e+00> : vector<4x4x10xf32>
    %362 = tpu.matmul %359, %360, %cst_147 {dimension_numbers = #tpu.dot_dimension_numbers<[2], [2], [1], [1], [0, 0, 0, 1, 1, 1], [0], [0]>} : vector<4x4x32xf32>, vector<4x10x32xf32>, vector<4x4x10xf32> -> vector<4x4x10xf32>
    "tpu.trace_stop"() : () -> ()
    %cst_148 = arith.constant 0.176776692 : f32
    %363 = vector.broadcast %cst_148 : f32 to vector<4x4x10xf32>
    %364 = arith.mulf %362, %363 : vector<4x4x10xf32>
    %cst_149 = arith.constant dense<0xFF800000> : vector<4x4xf32>
    %365 = vector.multi_reduction <maximumf>, %364, %cst_149 [2] : vector<4x4x10xf32> to vector<4x4xf32>
    %366 = vector.shape_cast %365 : vector<4x4xf32> to vector<4x4x1xf32>
    %367 = vector.broadcast %366 : vector<4x4x1xf32> to vector<4x4x10xf32>
    %368 = arith.subf %364, %367 : vector<4x4x10xf32>
    %369 = math.exp %368 : vector<4x4x10xf32>
    %cst_150 = arith.constant dense<0.000000e+00> : vector<4x4xf32>
    %370 = vector.multi_reduction <add>, %369, %cst_150 [2] : vector<4x4x10xf32> to vector<4x4xf32>
    %371 = vector.shape_cast %370 : vector<4x4xf32> to vector<4x4x1xf32>
    %372 = tpu.reciprocal %371 {approx = true} : vector<4x4x1xf32> -> vector<4x4x1xf32>
    %373 = vector.broadcast %372 : vector<4x4x1xf32> to vector<4x4x10xf32>
    %374 = arith.mulf %369, %373 : vector<4x4x10xf32>
    "tpu.trace_start"() <{level = 10 : i32, message = "bqk,bkd->bqd"}> : () -> ()
    %cst_151 = arith.constant dense<0.000000e+00> : vector<4x4x32xf32>
    %375 = tpu.matmul %374, %361, %cst_151 {dimension_numbers = #tpu.dot_dimension_numbers<[2], [1], [1], [2], [0, 0, 0, 1, 1, 2], [0], [0]>} : vector<4x4x10xf32>, vector<4x10x32xf32>, vector<4x4x32xf32> -> vector<4x4x32xf32>
    "tpu.trace_stop"() : () -> ()
    %376 = tpu.concatenate %324, %341, %358, %375 in 2 : vector<4x4x32xf32>, vector<4x4x32xf32>, vector<4x4x32xf32>, vector<4x4x32xf32> -> vector<4x4x128xf32>
    %377 = vector.shape_cast %376 : vector<4x4x128xf32> to vector<16x128xf32>
    %cst_152 = arith.constant dense<0.000000e+00> : vector<16x128xf32>
    %378 = tpu.matmul %377, %46, %cst_152 {dimension_numbers = #tpu.dot_dimension_numbers<[1], [0], [0], [1], [0, 0, 1, 1], [], []>} : vector<16x128xf32>, vector<128x128xf32>, vector<16x128xf32> -> vector<16x128xf32>
    %379 = vector.broadcast %47 : vector<1x128xf32> to vector<16x128xf32>
    %380 = arith.addf %378, %379 : vector<16x128xf32>
    %381 = arith.addf %213, %380 : vector<16x128xf32>
    %cst_153 = arith.constant dense<0.000000e+00> : vector<16xf32>
    %382 = vector.multi_reduction <add>, %381, %cst_153 [1] : vector<16x128xf32> to vector<16xf32>
    %383 = vector.shape_cast %382 : vector<16xf32> to vector<16x1xf32>
    %cst_154 = arith.constant 1.280000e+02 : f32
    %384 = vector.broadcast %cst_154 : f32 to vector<16x1xf32>
    %385 = arith.divf %383, %384 : vector<16x1xf32>
    %386 = vector.broadcast %385 : vector<16x1xf32> to vector<16x128xf32>
    %387 = arith.subf %381, %386 : vector<16x128xf32>
    %388 = arith.mulf %387, %387 : vector<16x128xf32>
    %cst_155 = arith.constant dense<0.000000e+00> : vector<16xf32>
    %389 = vector.multi_reduction <add>, %388, %cst_155 [1] : vector<16x128xf32> to vector<16xf32>
    %390 = vector.shape_cast %389 : vector<16xf32> to vector<16x1xf32>
    %cst_156 = arith.constant 1.280000e+02 : f32
    %391 = vector.broadcast %cst_156 : f32 to vector<16x1xf32>
    %392 = arith.divf %390, %391 : vector<16x1xf32>
    %393 = vector.broadcast %385 : vector<16x1xf32> to vector<16x128xf32>
    %394 = arith.subf %381, %393 : vector<16x128xf32>
    %cst_157 = arith.constant 9.99999974E-6 : f32
    %395 = vector.broadcast %cst_157 : f32 to vector<16x1xf32>
    %396 = arith.addf %392, %395 : vector<16x1xf32>
    %397 = math.rsqrt %396 : vector<16x1xf32>
    %398 = vector.broadcast %397 : vector<16x1xf32> to vector<16x128xf32>
    %399 = arith.mulf %394, %398 : vector<16x128xf32>
    %400 = vector.broadcast %62 : vector<1x128xf32> to vector<16x128xf32>
    %401 = arith.mulf %399, %400 : vector<16x128xf32>
    %402 = vector.broadcast %63 : vector<1x128xf32> to vector<16x128xf32>
    %403 = arith.addf %401, %402 : vector<16x128xf32>
    %cst_158 = arith.constant dense<0.000000e+00> : vector<16x256xf32>
    %404 = tpu.matmul %403, %54, %cst_158 {dimension_numbers = #tpu.dot_dimension_numbers<[1], [0], [0], [1], [0, 0, 1, 1], [], []>} : vector<16x128xf32>, vector<128x256xf32>, vector<16x256xf32> -> vector<16x256xf32>
    %405 = vector.broadcast %55 : vector<1x256xf32> to vector<16x256xf32>
    %406 = arith.addf %404, %405 : vector<16x256xf32>
    %cst_159 = arith.constant 5.000000e-01 : f32
    %407 = vector.broadcast %cst_159 : f32 to vector<16x256xf32>
    %408 = arith.mulf %407, %406 : vector<16x256xf32>
    %cst_160 = arith.constant 4.471500e-02 : f32
    %409 = vector.broadcast %cst_160 : f32 to vector<16x256xf32>
    %410 = arith.mulf %409, %406 : vector<16x256xf32>
    %411 = arith.mulf %410, %406 : vector<16x256xf32>
    %412 = arith.mulf %411, %406 : vector<16x256xf32>
    %413 = arith.addf %406, %412 : vector<16x256xf32>
    %cst_161 = arith.constant 0.797884583 : f32
    %414 = vector.broadcast %cst_161 : f32 to vector<16x256xf32>
    %415 = arith.mulf %414, %413 : vector<16x256xf32>
    %416 = math.tanh %415 : vector<16x256xf32>
    %cst_162 = arith.constant 1.000000e+00 : f32
    %417 = vector.broadcast %cst_162 : f32 to vector<16x256xf32>
    %418 = arith.addf %417, %416 : vector<16x256xf32>
    %419 = arith.mulf %408, %418 : vector<16x256xf32>
    %cst_163 = arith.constant dense<0.000000e+00> : vector<16x128xf32>
    %420 = tpu.matmul %419, %56, %cst_163 {dimension_numbers = #tpu.dot_dimension_numbers<[1], [0], [0], [1], [0, 0, 1, 1], [], []>} : vector<16x256xf32>, vector<256x128xf32>, vector<16x128xf32> -> vector<16x128xf32>
    %421 = vector.broadcast %57 : vector<1x128xf32> to vector<16x128xf32>
    %422 = arith.addf %420, %421 : vector<16x128xf32>
    %423 = arith.addf %403, %422 : vector<16x128xf32>
    %cst_164 = arith.constant dense<0.000000e+00> : vector<16xf32>
    %424 = vector.multi_reduction <add>, %423, %cst_164 [1] : vector<16x128xf32> to vector<16xf32>
    %425 = vector.shape_cast %424 : vector<16xf32> to vector<16x1xf32>
    %cst_165 = arith.constant 1.280000e+02 : f32
    %426 = vector.broadcast %cst_165 : f32 to vector<16x1xf32>
    %427 = arith.divf %425, %426 : vector<16x1xf32>
    %428 = vector.broadcast %427 : vector<16x1xf32> to vector<16x128xf32>
    %429 = arith.subf %423, %428 : vector<16x128xf32>
    %430 = arith.mulf %429, %429 : vector<16x128xf32>
    %cst_166 = arith.constant dense<0.000000e+00> : vector<16xf32>
    %431 = vector.multi_reduction <add>, %430, %cst_166 [1] : vector<16x128xf32> to vector<16xf32>
    %432 = vector.shape_cast %431 : vector<16xf32> to vector<16x1xf32>
    %cst_167 = arith.constant 1.280000e+02 : f32
    %433 = vector.broadcast %cst_167 : f32 to vector<16x1xf32>
    %434 = arith.divf %432, %433 : vector<16x1xf32>
    %435 = vector.broadcast %427 : vector<16x1xf32> to vector<16x128xf32>
    %436 = arith.subf %423, %435 : vector<16x128xf32>
    %cst_168 = arith.constant 9.99999974E-6 : f32
    %437 = vector.broadcast %cst_168 : f32 to vector<16x1xf32>
    %438 = arith.addf %434, %437 : vector<16x1xf32>
    %439 = math.rsqrt %438 : vector<16x1xf32>
    %440 = vector.broadcast %439 : vector<16x1xf32> to vector<16x128xf32>
    %441 = arith.mulf %436, %440 : vector<16x128xf32>
    %442 = vector.broadcast %64 : vector<1x128xf32> to vector<16x128xf32>
    %443 = arith.mulf %441, %442 : vector<16x128xf32>
    %444 = vector.broadcast %65 : vector<1x128xf32> to vector<16x128xf32>
    %445 = arith.addf %443, %444 : vector<16x128xf32>
    %cst_169 = arith.constant dense<0.000000e+00> : vector<16x128xf32>
    %446 = tpu.matmul %33, %445, %cst_169 {dimension_numbers = #tpu.dot_dimension_numbers<[1], [0], [0], [1], [0, 0, 1, 1], [], []>} : vector<16x16xf32>, vector<16x128xf32>, vector<16x128xf32> -> vector<16x128xf32>
    %447 = vector.shape_cast %446 : vector<16x128xf32> to vector<4x4x128xf32>
    %c0_170 = arith.constant 0 : index
    %c0_171 = arith.constant 0 : index
    %c0_172 = arith.constant 0 : index
    %c0_173 = arith.constant 0 : index
    %448 = vector.load %arg32[%c0_170, %c0_171, %c0_172, %c0_173] : memref<1x4x4x128xf32, #tpu.memory_space<vmem>>, vector<1x4x4x128xf32>
    %449 = vector.shape_cast %448 : vector<1x4x4x128xf32> to vector<4x4x128xf32>
    %450 = vector.shape_cast %447 : vector<4x4x128xf32> to vector<1x4x4x128xf32>
    tpu.vector_store %arg32[%c0_170, %c0_171, %c0_172, %c0_173], %450 {strides = array<i32>} : memref<1x4x4x128xf32, #tpu.memory_space<vmem>>, vector<1x4x4x128xf32>,
    return
  }
  func.func @transform_0(%arg0: i32) -> (i32, i32, i32, i32) {
    %c0_i32 = arith.constant 0 : i32
    %c0_i32_0 = arith.constant 0 : i32
    %c0_i32_1 = arith.constant 0 : i32
    %c0_i32_2 = arith.constant 0 : i32
    return %arg0, %c0_i32, %c0_i32_0, %c0_i32_1 : i32, i32, i32, i32
  }
  func.func @transform_1(%arg0: i32) -> (i32, i32) {
    %c0_i32 = arith.constant 0 : i32
    %c0_i32_0 = arith.constant 0 : i32
    %c0_i32_1 = arith.constant 0 : i32
    return %c0_i32, %c0_i32_0 : i32, i32
  }
  func.func @transform_2(%arg0: i32) -> (i32, i32) {
    %c0_i32 = arith.constant 0 : i32
    %c0_i32_0 = arith.constant 0 : i32
    %c0_i32_1 = arith.constant 0 : i32
    return %c0_i32, %c0_i32_0 : i32, i32
  }
  func.func @transform_3(%arg0: i32) -> (i32, i32) {
    %c0_i32 = arith.constant 0 : i32
    %c0_i32_0 = arith.constant 0 : i32
    %c0_i32_1 = arith.constant 0 : i32
    return %c0_i32, %c0_i32_0 : i32, i32
  }
  func.func @transform_4(%arg0: i32) -> (i32, i32) {
    %c0_i32 = arith.constant 0 : i32
    %c0_i32_0 = arith.constant 0 : i32
    %c0_i32_1 = arith.constant 0 : i32
    return %c0_i32, %c0_i32_0 : i32, i32
  }
  func.func @transform_5(%arg0: i32) -> (i32, i32) {
    %c0_i32 = arith.constant 0 : i32
    %c0_i32_0 = arith.constant 0 : i32
    %c0_i32_1 = arith.constant 0 : i32
    return %c0_i32, %c0_i32_0 : i32, i32
  }
  func.func @transform_6(%arg0: i32) -> (i32, i32) {
    %c0_i32 = arith.constant 0 : i32
    %c0_i32_0 = arith.constant 0 : i32
    %c0_i32_1 = arith.constant 0 : i32
    return %c0_i32, %c0_i32_0 : i32, i32
  }
  func.func @transform_7(%arg0: i32) -> (i32, i32) {
    %c0_i32 = arith.constant 0 : i32
    %c0_i32_0 = arith.constant 0 : i32
    %c0_i32_1 = arith.constant 0 : i32
    return %c0_i32, %c0_i32_0 : i32, i32
  }
  func.func @transform_8(%arg0: i32) -> (i32, i32) {
    %c0_i32 = arith.constant 0 : i32
    %c0_i32_0 = arith.constant 0 : i32
    %c0_i32_1 = arith.constant 0 : i32
    return %c0_i32, %c0_i32_0 : i32, i32
  }
  func.func @transform_9(%arg0: i32) -> (i32, i32) {
    %c0_i32 = arith.constant 0 : i32
    %c0_i32_0 = arith.constant 0 : i32
    %c0_i32_1 = arith.constant 0 : i32
    return %c0_i32, %c0_i32_0 : i32, i32
  }
  func.func @transform_10(%arg0: i32) -> (i32, i32) {
    %c0_i32 = arith.constant 0 : i32
    %c0_i32_0 = arith.constant 0 : i32
    %c0_i32_1 = arith.constant 0 : i32
    return %c0_i32, %c0_i32_0 : i32, i32
  }
  func.func @transform_11(%arg0: i32) -> (i32, i32) {
    %c0_i32 = arith.constant 0 : i32
    %c0_i32_0 = arith.constant 0 : i32
    %c0_i32_1 = arith.constant 0 : i32
    return %c0_i32, %c0_i32_0 : i32, i32
  }
  func.func @transform_12(%arg0: i32) -> (i32, i32) {
    %c0_i32 = arith.constant 0 : i32
    %c0_i32_0 = arith.constant 0 : i32
    %c0_i32_1 = arith.constant 0 : i32
    return %c0_i32, %c0_i32_0 : i32, i32
  }
  func.func @transform_13(%arg0: i32) -> (i32, i32) {
    %c0_i32 = arith.constant 0 : i32
    %c0_i32_0 = arith.constant 0 : i32
    %c0_i32_1 = arith.constant 0 : i32
    return %c0_i32, %c0_i32_0 : i32, i32
  }
  func.func @transform_14(%arg0: i32) -> (i32, i32) {
    %c0_i32 = arith.constant 0 : i32
    %c0_i32_0 = arith.constant 0 : i32
    %c0_i32_1 = arith.constant 0 : i32
    return %c0_i32, %c0_i32_0 : i32, i32
  }
  func.func @transform_15(%arg0: i32) -> (i32, i32) {
    %c0_i32 = arith.constant 0 : i32
    %c0_i32_0 = arith.constant 0 : i32
    %c0_i32_1 = arith.constant 0 : i32
    return %c0_i32, %c0_i32_0 : i32, i32
  }
  func.func @transform_16(%arg0: i32) -> (i32, i32) {
    %c0_i32 = arith.constant 0 : i32
    %c0_i32_0 = arith.constant 0 : i32
    %c0_i32_1 = arith.constant 0 : i32
    return %c0_i32, %c0_i32_0 : i32, i32
  }
  func.func @transform_17(%arg0: i32) -> (i32, i32) {
    %c0_i32 = arith.constant 0 : i32
    %c0_i32_0 = arith.constant 0 : i32
    %c0_i32_1 = arith.constant 0 : i32
    return %c0_i32, %c0_i32_0 : i32, i32
  }
  func.func @transform_18(%arg0: i32) -> (i32, i32) {
    %c0_i32 = arith.constant 0 : i32
    %c0_i32_0 = arith.constant 0 : i32
    %c0_i32_1 = arith.constant 0 : i32
    return %c0_i32, %c0_i32_0 : i32, i32
  }
  func.func @transform_19(%arg0: i32) -> (i32, i32) {
    %c0_i32 = arith.constant 0 : i32
    %c0_i32_0 = arith.constant 0 : i32
    %c0_i32_1 = arith.constant 0 : i32
    return %c0_i32, %c0_i32_0 : i32, i32
  }
  func.func @transform_20(%arg0: i32) -> (i32, i32) {
    %c0_i32 = arith.constant 0 : i32
    %c0_i32_0 = arith.constant 0 : i32
    %c0_i32_1 = arith.constant 0 : i32
    return %c0_i32, %c0_i32_0 : i32, i32
  }
  func.func @transform_21(%arg0: i32) -> (i32, i32, i32) {
    %c0_i32 = arith.constant 0 : i32
    %c0_i32_0 = arith.constant 0 : i32
    %c0_i32_1 = arith.constant 0 : i32
    %c0_i32_2 = arith.constant 0 : i32
    return %c0_i32, %c0_i32_0, %c0_i32_1 : i32, i32, i32
  }
  func.func @transform_22(%arg0: i32) -> (i32, i32) {
    %c0_i32 = arith.constant 0 : i32
    %c0_i32_0 = arith.constant 0 : i32
    %c0_i32_1 = arith.constant 0 : i32
    return %c0_i32, %c0_i32_0 : i32, i32
  }
  func.func @transform_23(%arg0: i32) -> (i32, i32) {
    %c0_i32 = arith.constant 0 : i32
    %c0_i32_0 = arith.constant 0 : i32
    %c0_i32_1 = arith.constant 0 : i32
    return %c0_i32, %c0_i32_0 : i32, i32
  }
  func.func @transform_24(%arg0: i32) -> (i32, i32) {
    %c0_i32 = arith.constant 0 : i32
    %c0_i32_0 = arith.constant 0 : i32
    %c0_i32_1 = arith.constant 0 : i32
    return %c0_i32, %c0_i32_0 : i32, i32
  }
  func.func @transform_25(%arg0: i32) -> (i32, i32) {
    %c0_i32 = arith.constant 0 : i32
    %c0_i32_0 = arith.constant 0 : i32
    %c0_i32_1 = arith.constant 0 : i32
    return %c0_i32, %c0_i32_0 : i32, i32
  }
  func.func @transform_26(%arg0: i32) -> (i32, i32) {
    %c0_i32 = arith.constant 0 : i32
    %c0_i32_0 = arith.constant 0 : i32
    %c0_i32_1 = arith.constant 0 : i32
    return %c0_i32, %c0_i32_0 : i32, i32
  }
  func.func @transform_27(%arg0: i32) -> (i32, i32) {
    %c0_i32 = arith.constant 0 : i32
    %c0_i32_0 = arith.constant 0 : i32
    %c0_i32_1 = arith.constant 0 : i32
    return %c0_i32, %c0_i32_0 : i32, i32
  }
  func.func @transform_28(%arg0: i32) -> (i32, i32) {
    %c0_i32 = arith.constant 0 : i32
    %c0_i32_0 = arith.constant 0 : i32
    %c0_i32_1 = arith.constant 0 : i32
    return %c0_i32, %c0_i32_0 : i32, i32
  }
  func.func @transform_29(%arg0: i32) -> (i32, i32) {
    %c0_i32 = arith.constant 0 : i32
    %c0_i32_0 = arith.constant 0 : i32
    %c0_i32_1 = arith.constant 0 : i32
    return %c0_i32, %c0_i32_0 : i32, i32
  }
  func.func @transform_30(%arg0: i32) -> (i32, i32) {
    %c0_i32 = arith.constant 0 : i32
    %c0_i32_0 = arith.constant 0 : i32
    %c0_i32_1 = arith.constant 0 : i32
    return %c0_i32, %c0_i32_0 : i32, i32
  }
  func.func @transform_31(%arg0: i32) -> (i32, i32, i32, i32) {
    %c0_i32 = arith.constant 0 : i32
    %c0_i32_0 = arith.constant 0 : i32
    %c0_i32_1 = arith.constant 0 : i32
    %c0_i32_2 = arith.constant 0 : i32
    return %arg0, %c0_i32, %c0_i32_0, %c0_i32_1 : i32, i32, i32, i32
  }
}

</mosaic_0001>

<bundles_post_ra>
// kernel: tpu_custom_call.1
= control target key start
LH: loop header
LB: loop body
LE: loop exit
PB: predicated region body
PF: predicated region fallthrough
CT: control target
= control target key end

     0   :  { %s17030_s6 = smov 1   ;;  %s17031_s10 = smov 2   ;;  %s19552_s0 = inlined_call_operand.smem [shape: u32[32], index: -1, kind: input, shape index: {}] }
   0x1   :  { %s17108_s5 = sld [smem:[%s19552_s0]]   ;;  %s17032_s14 = smov 3  }
   0x2   :  { %s17113_s9 = sld [smem:[%s19552_s0 + %s17030_s6]]   ;;  %s17033_s18 = smov 4  }
   0x3   :  { %s17118_s13 = sld [smem:[%s19552_s0 + %s17031_s10]]   ;;  %s17034_s22 = smov 5  }
   0x4   :  { %s17123_s17 = sld [smem:[%s19552_s0 + %s17032_s14]]   ;;  %s17035_s26 = smov 6  }
   0x5   :  { %s17128_s21 = sld [smem:[%s19552_s0 + %s17033_s18]]   ;;  %s17036_s30 = smov 7  }
   0x6   :  { %s17133_s25 = sld [smem:[%s19552_s0 + %s17034_s22]]   ;;  %s17037_s4 = smov 8  }
   0x7   :  { %19591 = sst [smem:[#allocation48_spill]] %s17108_s5  ;;  %s17038_s10 = smov 9  }
   0x8   :  { %19592 = sst [smem:[#allocation49_spill]] %s17113_s9  ;;  %s17039_s15 = smov 10  }
   0x9   :  { %19593 = sst [smem:[#allocation50_spill]] %s17118_s13  ;;  %s17040_s20 = smov 11  }
   0xa   :  { %19594 = sst [smem:[#allocation51_spill]] %s17123_s17  ;;  %s17042_s1 = smov 13  }
   0xb   :  { %s17138_s29 = sld [smem:[%s19552_s0 + %s17035_s26]]   ;;  %s17041_s26 = smov 12  }
   0xc   :  { %s17143_s3 = sld [smem:[%s19552_s0 + %s17036_s30]]   ;;  %s17043_s7 = smov 14  }
   0xd   :  { %s17148_s8 = sld [smem:[%s19552_s0 + %s17037_s4]]   ;;  %s17045_s22 = smov 16  }
   0xe   :  { %s17153_s14 = sld [smem:[%s19552_s0 + %s17038_s10]]   ;;  %s17046_s28 = smov 17  }
   0xf   :  { %s17158_s19 = sld [smem:[%s19552_s0 + %s17039_s15]]   ;;  %s17044_s15 = smov 15  }
  0x10   :  { %s17163_s24 = sld [smem:[%s19552_s0 + %s17040_s20]]  }
  0x11   :  { %s17168_s30 = sld [smem:[%s19552_s0 + %s17041_s26]]  }
  0x12   :  { %19595 = sst [smem:[#allocation52_spill]] %s17143_s3 }
  0x13   :  { %19596 = sst [smem:[#allocation53_spill]] %s17148_s8 }
  0x14   :  { %19597 = sst [smem:[#allocation54_spill]] %s17153_s14 }
  0x15   :  { %19598 = sst [smem:[#allocation55_spill]] %s17158_s19 }
  0x16   :  { %s17173_s6 = sld [smem:[%s19552_s0 + %s17042_s1]]  }
  0x17   :  { %19599 = sst [smem:[#allocation56_spill]] %s17168_s30 }
  0x18   :  { %s17178_s12 = sld [smem:[%s19552_s0 + %s17043_s7]]   ;;  %s17047_s7 = smov 18  }
  0x19   :  { %s17183_s20 = sld [smem:[%s19552_s0 + %s17044_s15]]   ;;  %s17048_s15 = smov 19  }
  0x1a   :  { %s17188_s27 = sld [smem:[%s19552_s0 + %s17045_s22]]   ;;  %s17049_s22 = smov 20  }
  0x1b   :  { %s17193_s4 = sld [smem:[%s19552_s0 + %s17046_s28]]   ;;  %s17050_s28 = smov 21  }
  0x1c   :  { %19600 = sst [smem:[#allocation57_spill]] %s17173_s6 }
  0x1d   :  { %s17203_s14 = sld [smem:[%s19552_s0 + %s17048_s15]]   ;;  %s17052_s15 = smov 23  }
  0x1e   :  { %19601 = sst [smem:[#allocation58_spill]] %s17178_s12 }
  0x1f   :  { %19602 = sst [smem:[#allocation59_spill]] %s17183_s20 }
  0x20   :  { %s17198_s12 = sld [smem:[%s19552_s0 + %s17047_s7]]   ;;  %s17051_s7 = smov 22  }
  0x21   :  { %19603 = sst [smem:[#allocation60_spill]] %s17193_s4 }
  0x22   :  { %s17208_s17 = sld [smem:[%s19552_s0 + %s17049_s22]]   ;;  %s17053_s22 = smov 24  }
  0x23   :  { %19605 = sst [smem:[#allocation62_spill]] %s17203_s14 }
  0x24   :  { %s17213_s5 = sld [smem:[%s19552_s0 + %s17050_s28]]   ;;  %s17054_s28 = smov 25  }
  0x25   :  { %s17223_s4 = sld [smem:[%s19552_s0 + %s17052_s15]]   ;;  %s17056_s15 = smov 27  }
  0x26   :  { %19604 = sst [smem:[#allocation61_spill]] %s17198_s12 }
  0x27   :  { %s17218_s12 = sld [smem:[%s19552_s0 + %s17051_s7]]   ;;  %s17055_s7 = smov 26  }
  0x28   :  { %19606 = sst [smem:[#allocation63_spill]] %s17208_s17 }
  0x29   :  { %s17228_s17 = sld [smem:[%s19552_s0 + %s17053_s22]]   ;;  %s17057_s22 = smov 28  }
  0x2a   :  { %19607 = sst [smem:[#allocation64_spill]] %s17213_s5 }
  0x2b   :  { %19609 = sst [smem:[#allocation66_spill]] %s17223_s4 }
  0x2c   :  { %s17233_s5 = sld [smem:[%s19552_s0 + %s17054_s28]]   ;;  %s17058_s28 = smov 29  }
  0x2d   :  { %19608 = sst [smem:[#allocation65_spill]] %s17218_s12 }
  0x2e   :  { %s17238_s12 = sld [smem:[%s19552_s0 + %s17055_s7]]   ;;  %s17059_s7 = smov 30  }
  0x2f   :  { %19610 = sst [smem:[#allocation67_spill]] %s17228_s17 }
  0x30   :  { %s17243_s20 = sld [smem:[%s19552_s0 + %s17056_s15]]   ;;  %s17060_s15 = smov 31  }
  0x31   :  { %s17248_s17 = sld [smem:[%s19552_s0 + %s17057_s22]]  }
  0x32   :  { %19611 = sst [smem:[#allocation68_spill]] %s17233_s5 }
  0x33   :  { %s17253_s5 = sld [smem:[%s19552_s0 + %s17058_s28]]  }
  0x34   :  { %19612 = sst [smem:[#allocation69_spill]] %s17238_s12 }
  0x35   :  { %s17258_s12 = sld [smem:[%s19552_s0 + %s17059_s7]]  }
  0x36   :  { %19613 = sst [smem:[#allocation70_spill]] %s17243_s20 }
  0x37   :  { %s17263_s30 = sld [smem:[%s19552_s0 + %s17060_s15]]  }
  0x39   :  { %19614 = sst [smem:[#allocation71_spill]] %s17253_s5 }
  0x3b   :  { %19615 = sst [smem:[#allocation72_spill]] %s17258_s12 }
  0x3d   :  { %19616 = sst [smem:[#allocation73_spill]] %s17263_s30 }
  0x3e   :  { %68 = vsyncpa [#allocation3], 0 }
  0x3f   :  { %70 = vsyncpa [#allocation3 + $0x1], 0 }
  0x40   :  { %71 = vsyncpa [#allocation6], 0 }
  0x41   :  { %72 = vsyncpa [#allocation9], 0 }
  0x42   :  { %73 = vsyncpa [#allocation12], 0 }
  0x43   :  { %74 = vsyncpa [#allocation15], 0 }
  0x44   :  { %75 = vsyncpa [#allocation18], 0 }
  0x45   :  { %76 = vsyncpa [#allocation21], 0 }
  0x46   :  { %77 = vsyncpa [#allocation24], 0 }
  0x47   :  { %78 = vsyncpa [#allocation27], 0 }
  0x48   :  { %79 = vsyncpa [#allocation30], 0 }
  0x49   :  { %80 = vsyncpa [#allocation33], 0 }
  0x4a   :  { %81 = vsyncpa [#allocation4], 0 }
  0x4b   :  { %83 = vsyncpa [#allocation4 + $0x1], 0  ;;  %s17265_s22 = smov 0   ;;  %s17267_s23 = smov 0  }
  0x4c   :  { %s17269_s0 = smov 0   ;;  %s17271_s26 = smov 0  }
  0x4d LB: > { %s19617_s20 = sld [smem:[#allocation70_spill]]  ;;  %s19618_s19 = sld [smem:[#allocation55_spill]]  ;;  %s17020_s23 = sphi %s17267_s23, %s19688_s23   ;;  %s17016_s22 = sphi %s17265_s22, %s19687_s22   ;;  %s17028_s26 = sphi %s17271_s26, %s19690_s26   ;;  %s17024_s0 = sphi %s17269_s0, %s19689_s0  }
  0x4e   : > { %s19619_s14 = sld [smem:[#allocation62_spill]]  ;;  %s19620_s13 = sld [smem:[#allocation50_spill]] }
  0x4f   : > { %s19621_s5 = sld [smem:[#allocation71_spill]]  ;;  %s19622_s3 = sld [smem:[#allocation52_spill]] }
  0x50   : > { %s19623_s6 = sld [smem:[#allocation57_spill]]  ;;  %s19624_s4 = sld [smem:[#allocation66_spill]] }
  0x51   : > { %s19625_s8 = sld [smem:[#allocation53_spill]]  ;;  %s19626_s9 = sld [smem:[#allocation49_spill]] }
  0x52   : > { %s17061_s28 = smov [#allocation5]   ;;  %s17286_s2 = sadd.s32 4294967295, %s17028_s26  }
  0x53   : > { %s788_s1 = sshll.u32 %s17061_s28, 4  ;;  %p13453_p0 = scmp.ge.s32.totalorder %s17028_s26, 1  ;;  %s17291_s1 = int_to_ptr.vmem [resolvable:$true] %s788_s1 }
  0x54   : > { %p19564_p1 = scmp.eq.s32.totalorder %s17286_s2, 0  ;;  %p776_p2 = scmp.lt.s32.totalorder %s17028_s26, 3 }
  0x55   : > { %s17062_s10 = smov [#allocation8]   ;;  %s17063_s16 = smov [#allocation11]  }
  0x56   : > { %p17293_p3 = pnand %p13453_p0, %p776_p2  ;;  %s818_s11 = sshll.u32 %s17062_s10, 4  ;;  %s17306_s11 = int_to_ptr.vmem [resolvable:$true] %s818_s11 }
  0x57   : > { %s842_s18 = sshll.u32 %s17063_s16, 4  ;;  %s16332_s28 = scalar_lea.hbm %s19626_s9, 256  ;;  %s17308_s18 = int_to_ptr.vmem [resolvable:$true] %s842_s18 }
  0x58   : > { %s19627_s7 = scalar_select %p17293_p3, 1, 0 }
  0x59   : > { %p15699_p5 = pneg %p17293_p3  ;;  %p16333_p7 = scmp.ne.s32.totalorder %s19626_s9, %s16332_s28 }
  0x5a   : > { %p16339_p11 = scmp.lt.u32.totalorder %s16332_s28, %s19626_s9 }
  0x5b   : > { %p17302_p6 = pnand %p15699_p5, %p19564_p1 }
  0x5d   : > { %p17314_p8 = pneg %p17302_p6 }
  0x5f   : > { %p16335_p9 = pnand %p17314_p8, %p16333_p7 }
  0x61   : > { %p16336_p10 = pneg %p16335_p9 }
  0x63   : > { %p16341_p12 = pnand %p16339_p11, %p16336_p10 }
  0x65   : > { %16344 = shalt.err (!%p16341_p12)
}
  0x66   : > { %s16345_s10 = scalar_lea.vmem %s17291_s1, 256  ;;  %p16353_p5 = scmp.lt.s32.totalorder %s17291_s1, %s17291_s1 }
  0x67   : > { %p16346_p13 = scmp.ne.s32.totalorder %s17291_s1, %s16345_s10  ;;  %p16354_p4 = scmp.lt.s32.totalorder %s16345_s10, %s16345_s10 }
  0x69   : > { %p16348_p0 = pnand %p16346_p13, %p17314_p8  ;;  %p16355_p1 = por %p16354_p4, %p16353_p5 }
  0x6b   : > { %p16349_p2 = pneg %p16348_p0 }
  0x6d   : > { %p16356_p3 = pnand %p16355_p1, %p16349_p2 }
  0x6f   : > { %16359 = shalt.err (!%p16356_p3)
}
  0x70   : > { %s19566_s16 = smov 128   ;;  %s19568_s28 = smov 8  }
  0x71   : > { %15702 = dma.hbm_to_vmem [thread:$0]  (!%p17302_p6), %s19626_s9, 256, %s17291_s1, [#allocation6], %s19566_s16, %s19566_s16, %s19568_s28  }
  0x72   : > { %s16360_s12 = scalar_lea.hbm %s17128_s21, 32 }
  0x73   : > { %p16361_p7 = scmp.ne.s32.totalorder %s17128_s21, %s16360_s12  ;;  %p16367_p3 = scmp.lt.u32.totalorder %s16360_s12, %s17128_s21 }
  0x75   : > { %p16363_p4 = pnand %p16361_p7, %p17314_p8 }
  0x77   : > { %p16364_p1 = pneg %p16363_p4 }
  0x79   : > { %p16369_p9 = pnand %p16367_p3, %p16364_p1 }
  0x7b   : > { %16372 = shalt.err (!%p16369_p9)
}
  0x7c   : > { %s16373_s10 = scalar_lea.vmem %s17306_s11, 32  ;;  %p16381_p13 = scmp.lt.s32.totalorder %s17306_s11, %s17306_s11 }
  0x7d   : > { %p16374_p10 = scmp.ne.s32.totalorder %s17306_s11, %s16373_s10  ;;  %p16382_p0 = scmp.lt.s32.totalorder %s16373_s10, %s16373_s10 }
  0x7f   : > { %p16376_p11 = pnand %p16374_p10, %p17314_p8  ;;  %p16383_p2 = por %p16382_p0, %p16381_p13 }
  0x81   : > { %p16377_p12 = pneg %p16376_p11 }
  0x83   : > { %p16384_p5 = pnand %p16383_p2, %p16377_p12 }
  0x85   : > { %16387 = shalt.err (!%p16384_p5)
}
  0x86   : > { %15708 = dma.hbm_to_vmem [thread:$0]  (!%p17302_p6), %s17128_s21, 32, %s17306_s11, [#allocation9]  }
  0x87   : > { %s16388_s12 = scalar_lea.hbm %s17138_s29, 16 }
  0x88   : > { %p16389_p7 = scmp.ne.s32.totalorder %s17138_s29, %s16388_s12  ;;  %p16395_p3 = scmp.lt.u32.totalorder %s16388_s12, %s17138_s29 }
  0x8a   : > { %p16391_p4 = pnand %p16389_p7, %p17314_p8 }
  0x8c   : > { %p16392_p1 = pneg %p16391_p4 }
  0x8e   : > { %p16397_p9 = pnand %p16395_p3, %p16392_p1 }
  0x90   : > { %16400 = shalt.err (!%p16397_p9)
}
  0x91   : > { %s16401_s1 = scalar_lea.vmem %s17308_s18, 16  ;;  %s16408_s10 = scalar_lea.vmem %s17308_s18, 32 }
  0x92   : > { %p16402_p10 = scmp.ne.s32.totalorder %s17308_s18, %s16401_s1  ;;  %p16409_p13 = scmp.lt.s32.totalorder %s17308_s18, %s17308_s18 }
  0x93   : > { %p16410_p0 = scmp.lt.s32.totalorder %s16408_s10, %s16401_s1 }
  0x94   : > { %p16404_p11 = pnand %p16402_p10, %p17314_p8 }
  0x95   : > { %p16411_p2 = por %p16410_p0, %p16409_p13 }
  0x96   : > { %p16405_p12 = pneg %p16404_p11 }
  0x98   : > { %p16412_p5 = pnand %p16411_p2, %p16405_p12 }
  0x9a   : > { %16415 = shalt.err (!%p16412_p5)
}
  0x9b   : > { %15714 = dma.hbm_to_vmem [thread:$0]  (!%p17302_p6), %s17138_s29, 16, %s17308_s18, [#allocation12]  }
  0x9c   : > { %s17066_s11 = smov [#allocation14]   ;;  %s17067_s16 = smov [#allocation17]  }
  0x9d   : > { %s866_s12 = sshll.u32 %s17066_s11, 4  ;;  %s890_s28 = sshll.u32 %s17067_s16, 4  ;;  %s867_s12 = int_to_ptr.vmem [resolvable:$true] %s866_s12  ;;  %s891_s28 = int_to_ptr.vmem [resolvable:$true] %s890_s28 }
  0x9e   : > { %s16416_s9 = scalar_lea.hbm %s19625_s8, 48 }
  0x9f   : > { %p16417_p7 = scmp.ne.s32.totalorder %s19625_s8, %s16416_s9  ;;  %p16423_p3 = scmp.lt.u32.totalorder %s16416_s9, %s19625_s8 }
  0xa1   : > { %p16419_p4 = pnand %p16417_p7, %p17314_p8 }
  0xa3   : > { %p16420_p1 = pneg %p16419_p4 }
  0xa5   : > { %p16425_p9 = pnand %p16423_p3, %p16420_p1 }
  0xa7   : > { %16428 = shalt.err (!%p16425_p9)
}
  0xa8   : > { %s16429_s1 = scalar_lea.vmem %s867_s12, 48  ;;  %s16436_s18 = scalar_lea.vmem %s867_s12, 64 }
  0xa9   : > { %p16430_p10 = scmp.ne.s32.totalorder %s867_s12, %s16429_s1  ;;  %p16437_p13 = scmp.lt.s32.totalorder %s867_s12, %s867_s12 }
  0xaa   : > { %p16438_p0 = scmp.lt.s32.totalorder %s16436_s18, %s16429_s1 }
  0xab   : > { %p16432_p11 = pnand %p16430_p10, %p17314_p8 }
  0xac   : > { %p16439_p2 = por %p16438_p0, %p16437_p13 }
  0xad   : > { %p16433_p12 = pneg %p16432_p11 }
  0xaf   : > { %p16440_p5 = pnand %p16439_p2, %p16433_p12 }
  0xb1   : > { %16443 = shalt.err (!%p16440_p5)
}
  0xb2   : > { %15720 = dma.hbm_to_vmem [thread:$0]  (!%p17302_p6), %s19625_s8, 48, %s867_s12, [#allocation15]  }
  0xb3   : > { %s16444_s9 = scalar_lea.hbm %s17163_s24, 2048 }
  0xb4   : > { %p16445_p7 = scmp.ne.s32.totalorder %s17163_s24, %s16444_s9  ;;  %p16451_p3 = scmp.lt.u32.totalorder %s16444_s9, %s17163_s24 }
  0xb6   : > { %p16447_p4 = pnand %p16445_p7, %p17314_p8 }
  0xb8   : > { %p16448_p1 = pneg %p16447_p4 }
  0xba   : > { %p16453_p9 = pnand %p16451_p3, %p16448_p1 }
  0xbc   : > { %16456 = shalt.err (!%p16453_p9)
}
  0xbd   : > { %s16457_s16 = scalar_lea.vmem %s891_s28, 2048  ;;  %p16465_p13 = scmp.lt.s32.totalorder %s891_s28, %s891_s28 }
  0xbe   : > { %p16458_p10 = scmp.ne.s32.totalorder %s891_s28, %s16457_s16  ;;  %p16466_p0 = scmp.lt.s32.totalorder %s16457_s16, %s16457_s16 }
  0xc0   : > { %p16460_p11 = pnand %p16458_p10, %p17314_p8  ;;  %p16467_p2 = por %p16466_p0, %p16465_p13 }
  0xc2   : > { %p16461_p12 = pneg %p16460_p11 }
  0xc4   : > { %p16468_p5 = pnand %p16467_p2, %p16461_p12 }
  0xc6   : > { %16471 = shalt.err (!%p16468_p5)
}
  0xc7   : > { %s19630_s10 = smov 8   ;;  %s19631_s11 = smov 128  }
  0xc8   : > { %15726 = dma.hbm_to_vmem [thread:$0]  (!%p17302_p6), %s17163_s24, 2048, %s891_s28, [#allocation18], %s19631_s11, %s19631_s11, %s19630_s10  }
  0xc9   : > { %s17068_s12 = smov [#allocation20]   ;;  %s17069_s18 = smov [#allocation23]  }
  0xca   : > { %s914_s1 = sshll.u32 %s17068_s12, 4  ;;  %s944_s9 = sshll.u32 %s17069_s18, 4  ;;  %s915_s1 = int_to_ptr.vmem [resolvable:$true] %s914_s1  ;;  %s945_s9 = int_to_ptr.vmem [resolvable:$true] %s944_s9 }
  0xcb   : > { %s16472_s16 = scalar_lea.hbm %s19623_s6, 6144 }
  0xcc   : > { %p16473_p7 = scmp.ne.s32.totalorder %s19623_s6, %s16472_s16  ;;  %p16479_p3 = scmp.lt.u32.totalorder %s16472_s16, %s19623_s6 }
  0xce   : > { %p16475_p4 = pnand %p16473_p7, %p17314_p8 }
  0xd0   : > { %p16476_p1 = pneg %p16475_p4 }
  0xd2   : > { %p16481_p9 = pnand %p16479_p3, %p16476_p1 }
  0xd4   : > { %16484 = shalt.err (!%p16481_p9)
}
  0xd5   : > { %s16485_s8 = scalar_lea.vmem %s915_s1, 6144  ;;  %p16493_p13 = scmp.lt.s32.totalorder %s915_s1, %s915_s1 }
  0xd6   : > { %p16486_p10 = scmp.ne.s32.totalorder %s915_s1, %s16485_s8  ;;  %p16494_p0 = scmp.lt.s32.totalorder %s16485_s8, %s16485_s8 }
  0xd8   : > { %p16488_p11 = pnand %p16486_p10, %p17314_p8  ;;  %p16495_p2 = por %p16494_p0, %p16493_p13 }
  0xda   : > { %p16489_p12 = pneg %p16488_p11 }
  0xdc   : > { %p16496_p5 = pnand %p16495_p2, %p16489_p12 }
  0xde   : > { %16499 = shalt.err (!%p16496_p5)
}
  0xdf   : > { %s19572_s28 = smov 384   ;;  %s19573_s12 = smov 24  }
  0xe0   : > { %15732 = dma.hbm_to_vmem [thread:$0]  (!%p17302_p6), %s19623_s6, 6144, %s915_s1, [#allocation21], %s19572_s28, %s19572_s28, %s19573_s12  }
  0xe1   : > { %s16500_s18 = scalar_lea.hbm %s17188_s27, 16 }
  0xe2   : > { %p16501_p7 = scmp.ne.s32.totalorder %s17188_s27, %s16500_s18  ;;  %p16507_p3 = scmp.lt.u32.totalorder %s16500_s18, %s17188_s27 }
  0xe4   : > { %p16503_p4 = pnand %p16501_p7, %p17314_p8 }
  0xe6   : > { %p16504_p1 = pneg %p16503_p4 }
  0xe8   : > { %p16509_p9 = pnand %p16507_p3, %p16504_p1 }
  0xea   : > { %16512 = shalt.err (!%p16509_p9)
}
  0xeb   : > { %s16513_s8 = scalar_lea.vmem %s945_s9, 16  ;;  %s16520_s16 = scalar_lea.vmem %s945_s9, 32 }
  0xec   : > { %p16514_p10 = scmp.ne.s32.totalorder %s945_s9, %s16513_s8  ;;  %p16521_p13 = scmp.lt.s32.totalorder %s945_s9, %s945_s9 }
  0xed   : > { %p16522_p0 = scmp.lt.s32.totalorder %s16520_s16, %s16513_s8 }
  0xee   : > { %p16516_p11 = pnand %p16514_p10, %p17314_p8 }
  0xef   : > { %p16523_p2 = por %p16522_p0, %p16521_p13 }
  0xf0   : > { %p16517_p12 = pneg %p16516_p11 }
  0xf2   : > { %p16524_p5 = pnand %p16523_p2, %p16517_p12 }
  0xf4   : > { %16527 = shalt.err (!%p16524_p5)
}
  0xf5   : > { %15738 = dma.hbm_to_vmem [thread:$0]  (!%p17302_p6), %s17188_s27, 16, %s945_s9, [#allocation24]  }
  0xf6   : > { %s17072_s1 = smov [#allocation26]   ;;  %s16528_s28 = scalar_lea.hbm %s19619_s14, 2048 }
  0xf7   : > { %s970_s18 = sshll.u32 %s17072_s1, 4  ;;  %p16529_p7 = scmp.ne.s32.totalorder %s19619_s14, %s16528_s28  ;;  %s971_s18 = int_to_ptr.vmem [resolvable:$true] %s970_s18 }
  0xf8   : > { %p16535_p3 = scmp.lt.u32.totalorder %s16528_s28, %s19619_s14 }
  0xf9   : > { %p16531_p4 = pnand %p16529_p7, %p17314_p8 }
  0xfb   : > { %p16532_p1 = pneg %p16531_p4 }
  0xfd   : > { %p16537_p9 = pnand %p16535_p3, %p16532_p1 }
  0xff   : > { %16540 = shalt.err (!%p16537_p9)
}
 0x100   : > { %s16541_s8 = scalar_lea.vmem %s971_s18, 2048  ;;  %p16549_p13 = scmp.lt.s32.totalorder %s971_s18, %s971_s18 }
 0x101   : > { %p16542_p10 = scmp.ne.s32.totalorder %s971_s18, %s16541_s8  ;;  %p16550_p0 = scmp.lt.s32.totalorder %s16541_s8, %s16541_s8 }
 0x103   : > { %p16544_p11 = pnand %p16542_p10, %p17314_p8  ;;  %p16551_p2 = por %p16550_p0, %p16549_p13 }
 0x105   : > { %p16545_p12 = pneg %p16544_p11 }
 0x107   : > { %p16552_p5 = pnand %p16551_p2, %p16545_p12 }
 0x109   : > { %16555 = shalt.err (!%p16552_p5)
}
 0x10a   : > { %15744 = dma.hbm_to_vmem [thread:$0]  (!%p17302_p6), %s19619_s14, 2048, %s971_s18, [#allocation27], %s19631_s11, %s19631_s11, %s19630_s10  }
 0x10b   : > { %s17073_s9 = smov [#allocation29]   ;;  %s17074_s16 = smov [#allocation32]  }
 0x10c   : > { %s1000_s28 = sshll.u32 %s17073_s9, 4  ;;  %s1032_s1 = sshll.u32 %s17074_s16, 4  ;;  %s1001_s28 = int_to_ptr.vmem [resolvable:$true] %s1000_s28  ;;  %s17424_s1 = int_to_ptr.vmem [resolvable:$true] %s1032_s1 }
 0x10d   : > { %s16556_s8 = scalar_lea.hbm %s19624_s4, 4096 }
 0x10e   : > { %p16557_p7 = scmp.ne.s32.totalorder %s19624_s4, %s16556_s8  ;;  %p16563_p3 = scmp.lt.u32.totalorder %s16556_s8, %s19624_s4 }
 0x110   : > { %p16559_p4 = pnand %p16557_p7, %p17314_p8 }
 0x112   : > { %p16560_p1 = pneg %p16559_p4 }
 0x114   : > { %p16565_p9 = pnand %p16563_p3, %p16560_p1 }
 0x116   : > { %16568 = shalt.err (!%p16565_p9)
}
 0x117   : > { %s16569_s12 = scalar_lea.vmem %s1001_s28, 4096  ;;  %p16577_p13 = scmp.lt.s32.totalorder %s1001_s28, %s1001_s28 }
 0x118   : > { %p16570_p10 = scmp.ne.s32.totalorder %s1001_s28, %s16569_s12  ;;  %p16578_p0 = scmp.lt.s32.totalorder %s16569_s12, %s16569_s12 }
 0x11a   : > { %p16572_p11 = pnand %p16570_p10, %p17314_p8  ;;  %p16579_p2 = por %p16578_p0, %p16577_p13 }
 0x11c   : > { %p16573_p12 = pneg %p16572_p11 }
 0x11e   : > { %p16580_p5 = pnand %p16579_p2, %p16573_p12 }
 0x120   : > { %16583 = shalt.err (!%p16580_p5)
}
 0x121   : > { %s19576_s18 = smov 256   ;;  %s19577_s9 = smov 16  }
 0x122   : > { %15750 = dma.hbm_to_vmem [thread:$0]  (!%p17302_p6), %s19624_s4, 4096, %s1001_s28, [#allocation30], %s19576_s18, %s19576_s18, %s19577_s9  }
 0x123   : > { %s16584_s16 = scalar_lea.hbm %s19617_s20, 4096 }
 0x124   : > { %p16585_p7 = scmp.ne.s32.totalorder %s19617_s20, %s16584_s16  ;;  %p16591_p3 = scmp.lt.u32.totalorder %s16584_s16, %s19617_s20 }
 0x126   : > { %p16587_p4 = pnand %p16585_p7, %p17314_p8 }
 0x128   : > { %p16588_p1 = pneg %p16587_p4 }
 0x12a   : > { %p16593_p9 = pnand %p16591_p3, %p16588_p1 }
 0x12c   : > { %16596 = shalt.err (!%p16593_p9)
}
 0x12d   : > { %s16597_s12 = scalar_lea.vmem %s17424_s1, 4096  ;;  %p16605_p13 = scmp.lt.s32.totalorder %s17424_s1, %s17424_s1 }
 0x12e   : > { %p16598_p10 = scmp.ne.s32.totalorder %s17424_s1, %s16597_s12  ;;  %p16606_p0 = scmp.lt.s32.totalorder %s16597_s12, %s16597_s12 }
 0x130   : > { %p16600_p11 = pnand %p16598_p10, %p17314_p8  ;;  %p16607_p2 = por %p16606_p0, %p16605_p13 }
 0x132   : > { %p16601_p12 = pneg %p16600_p11 }
 0x134   : > { %p16608_p5 = pnand %p16607_p2, %p16601_p12 }
 0x136   : > { %16611 = shalt.err (!%p16608_p5)
}
 0x137   : > { %15756 = dma.hbm_to_vmem [thread:$0]  (!%p17302_p6), %s19617_s20, 4096, %s17424_s1, [#allocation33], %s19576_s18, %s19576_s18, %s19577_s9  }
 0x138   : > { %s17077_s28 = smov [#allocation7]   ;;  %s17078_s16 = smov [#allocation10]  }
 0x139   : > { %s801_s8 = sshll.u32 %s17077_s28, 4  ;;  %s828_s4 = sshll.u32 %s17078_s16, 4  ;;  %s802_s8 = int_to_ptr.vmem [resolvable:$true] %s801_s8  ;;  %s17457_s4 = int_to_ptr.vmem [resolvable:$true] %s828_s4 }
 0x13a   : > { %s16612_s12 = scalar_lea.hbm %s19620_s13, 256 }
 0x13b   : > { %p16613_p7 = scmp.ne.s32.totalorder %s19620_s13, %s16612_s12  ;;  %p16619_p3 = scmp.lt.u32.totalorder %s16612_s12, %s19620_s13 }
 0x13d   : > { %p16615_p4 = pnand %p16613_p7, %p17314_p8 }
 0x13f   : > { %p16616_p1 = pneg %p16615_p4 }
 0x141   : > { %p16621_p9 = pnand %p16619_p3, %p16616_p1 }
 0x143   : > { %16624 = shalt.err (!%p16621_p9)
}
 0x144   : > { %s16625_s6 = scalar_lea.vmem %s802_s8, 256  ;;  %p16633_p13 = scmp.lt.s32.totalorder %s802_s8, %s802_s8 }
 0x145   : > { %p16626_p10 = scmp.ne.s32.totalorder %s802_s8, %s16625_s6  ;;  %p16634_p0 = scmp.lt.s32.totalorder %s16625_s6, %s16625_s6 }
 0x147   : > { %p16628_p11 = pnand %p16626_p10, %p17314_p8  ;;  %p16635_p2 = por %p16634_p0, %p16633_p13 }
 0x149   : > { %p16629_p12 = pneg %p16628_p11 }
 0x14b   : > { %p16636_p5 = pnand %p16635_p2, %p16629_p12 }
 0x14d   : > { %16639 = shalt.err (!%p16636_p5)
}
 0x14e   : > { %15705 = dma.hbm_to_vmem [thread:$0]  (!%p17302_p6), %s19620_s13, 256, %s802_s8, [#allocation6], %s19631_s11, %s19631_s11, %s19630_s10  }
 0x14f   : > { %s16640_s1 = scalar_lea.hbm %s17133_s25, 4096 }
 0x150   : > { %p16641_p7 = scmp.ne.s32.totalorder %s17133_s25, %s16640_s1  ;;  %p16647_p3 = scmp.lt.u32.totalorder %s16640_s1, %s17133_s25 }
 0x152   : > { %p16643_p4 = pnand %p16641_p7, %p17314_p8 }
 0x154   : > { %p16644_p1 = pneg %p16643_p4 }
 0x156   : > { %p16649_p9 = pnand %p16647_p3, %p16644_p1 }
 0x158   : > { %16652 = shalt.err (!%p16649_p9)
}
 0x159   : > { %s16653_s6 = scalar_lea.vmem %s17457_s4, 4096  ;;  %p16661_p13 = scmp.lt.s32.totalorder %s17457_s4, %s17457_s4 }
 0x15a   : > { %p16654_p10 = scmp.ne.s32.totalorder %s17457_s4, %s16653_s6  ;;  %p16662_p0 = scmp.lt.s32.totalorder %s16653_s6, %s16653_s6 }
 0x15c   : > { %p16656_p11 = pnand %p16654_p10, %p17314_p8  ;;  %p16663_p2 = por %p16662_p0, %p16661_p13 }
 0x15e   : > { %p16657_p12 = pneg %p16656_p11 }
 0x160   : > { %p16664_p5 = pnand %p16663_p2, %p16657_p12 }
 0x162   : > { %16667 = shalt.err (!%p16664_p5)
}
 0x163   : > { %15711 = dma.hbm_to_vmem [thread:$0]  (!%p17302_p6), %s17133_s25, 4096, %s17457_s4, [#allocation9], %s19631_s11, %s19631_s11, %s19630_s10  }
 0x164   : > { %s17079_s28 = smov [#allocation13]   ;;  %s17080_s16 = smov [#allocation16]  }
 0x165   : > { %s852_s8 = sshll.u32 %s17079_s28, 4  ;;  %s880_s12 = sshll.u32 %s17080_s16, 4  ;;  %s853_s8 = int_to_ptr.vmem [resolvable:$true] %s852_s8  ;;  %s17490_s12 = int_to_ptr.vmem [resolvable:$true] %s880_s12 }
 0x166   : > { %s16668_s1 = scalar_lea.hbm %s19622_s3, 6144 }
 0x167   : > { %p16669_p7 = scmp.ne.s32.totalorder %s19622_s3, %s16668_s1  ;;  %p16675_p3 = scmp.lt.u32.totalorder %s16668_s1, %s19622_s3 }
 0x169   : > { %p16671_p4 = pnand %p16669_p7, %p17314_p8 }
 0x16b   : > { %p16672_p1 = pneg %p16671_p4 }
 0x16d   : > { %p16677_p9 = pnand %p16675_p3, %p16672_p1 }
 0x16f   : > { %16680 = shalt.err (!%p16677_p9)
}
 0x170   : > { %s16681_s6 = scalar_lea.vmem %s853_s8, 6144  ;;  %p16689_p13 = scmp.lt.s32.totalorder %s853_s8, %s853_s8 }
 0x171   : > { %p16682_p10 = scmp.ne.s32.totalorder %s853_s8, %s16681_s6  ;;  %p16690_p0 = scmp.lt.s32.totalorder %s16681_s6, %s16681_s6 }
 0x173   : > { %p16684_p11 = pnand %p16682_p10, %p17314_p8  ;;  %p16691_p2 = por %p16690_p0, %p16689_p13 }
 0x175   : > { %p16685_p12 = pneg %p16684_p11 }
 0x177   : > { %p16692_p5 = pnand %p16691_p2, %p16685_p12 }
 0x179   : > { %16695 = shalt.err (!%p16692_p5)
}
 0x17a   : > { %s19632_s4 = smov 24   ;;  %s19633_s28 = smov 384  }
 0x17b   : > { %15717 = dma.hbm_to_vmem [thread:$0]  (!%p17302_p6), %s19622_s3, 6144, %s853_s8, [#allocation12], %s19633_s28, %s19633_s28, %s19632_s4  }
 0x17c   : > { %s16696_s16 = scalar_lea.hbm %s19618_s19, 16 }
 0x17d   : > { %p16697_p7 = scmp.ne.s32.totalorder %s19618_s19, %s16696_s16  ;;  %p16703_p3 = scmp.lt.u32.totalorder %s16696_s16, %s19618_s19 }
 0x17f   : > { %p16699_p4 = pnand %p16697_p7, %p17314_p8 }
 0x181   : > { %p16700_p1 = pneg %p16699_p4 }
 0x183   : > { %p16705_p9 = pnand %p16703_p3, %p16700_p1 }
 0x185   : > { %16708 = shalt.err (!%p16705_p9)
}
 0x186   : > { %s16709_s1 = scalar_lea.vmem %s17490_s12, 16  ;;  %s16716_s6 = scalar_lea.vmem %s17490_s12, 32 }
 0x187   : > { %p16710_p10 = scmp.ne.s32.totalorder %s17490_s12, %s16709_s1  ;;  %p16717_p13 = scmp.lt.s32.totalorder %s17490_s12, %s17490_s12 }
 0x188   : > { %p16718_p0 = scmp.lt.s32.totalorder %s16716_s6, %s16709_s1 }
 0x189   : > { %p16712_p11 = pnand %p16710_p10, %p17314_p8 }
 0x18a   : > { %p16719_p2 = por %p16718_p0, %p16717_p13 }
 0x18b   : > { %p16713_p12 = pneg %p16712_p11 }
 0x18d   : > { %p16720_p5 = pnand %p16719_p2, %p16713_p12 }
 0x18f   : > { %16723 = shalt.err (!%p16720_p5)
}
 0x190   : > { %s19634_s8 = sld [smem:[#allocation56_spill]]  ;;  %s17081_s4 = smov [#allocation19]  }
 0x191   : > { %15723 = dma.hbm_to_vmem [thread:$0]  (!%p17302_p6), %s19618_s19, 16, %s17490_s12, [#allocation15]  }
 0x192   : > { %s904_s28 = sshll.u32 %s17081_s4, 4  ;;  %s17082_s16 = smov [#allocation22]   ;;  %s905_s28 = int_to_ptr.vmem [resolvable:$true] %s904_s28 }
 0x193   : > { %s930_s18 = sshll.u32 %s17082_s16, 4  ;;  %s17521_s18 = int_to_ptr.vmem [resolvable:$true] %s930_s18 }
 0x196   : > { %s16724_s1 = scalar_lea.hbm %s19634_s8, 16 }
 0x197   : > { %p16725_p7 = scmp.ne.s32.totalorder %s19634_s8, %s16724_s1  ;;  %p16731_p3 = scmp.lt.u32.totalorder %s16724_s1, %s19634_s8 }
 0x199   : > { %p16727_p4 = pnand %p16725_p7, %p17314_p8 }
 0x19b   : > { %p16728_p1 = pneg %p16727_p4 }
 0x19d   : > { %p16733_p9 = pnand %p16731_p3, %p16728_p1 }
 0x19f   : > { %16736 = shalt.err (!%p16733_p9)
}
 0x1a0   : > { %s16737_s6 = scalar_lea.vmem %s905_s28, 16  ;;  %s16744_s12 = scalar_lea.vmem %s905_s28, 32 }
 0x1a1   : > { %p16738_p10 = scmp.ne.s32.totalorder %s905_s28, %s16737_s6  ;;  %p16745_p13 = scmp.lt.s32.totalorder %s905_s28, %s905_s28 }
 0x1a2   : > { %p16746_p0 = scmp.lt.s32.totalorder %s16744_s12, %s16737_s6 }
 0x1a3   : > { %p16740_p11 = pnand %p16738_p10, %p17314_p8 }
 0x1a4   : > { %p16747_p2 = por %p16746_p0, %p16745_p13 }
 0x1a5   : > { %p16741_p12 = pneg %p16740_p11 }
 0x1a7   : > { %p16748_p5 = pnand %p16747_p2, %p16741_p12 }
 0x1a9   : > { %16751 = shalt.err (!%p16748_p5)
}
 0x1aa   : > { %s19635_s4 = sld [smem:[#allocation59_spill]] }
 0x1ab   : > { %15729 = dma.hbm_to_vmem [thread:$0]  (!%p17302_p6), %s19634_s8, 16, %s905_s28, [#allocation18]  }
 0x1b0   : > { %s16752_s16 = scalar_lea.hbm %s19635_s4, 2048 }
 0x1b1   : > { %p16753_p7 = scmp.ne.s32.totalorder %s19635_s4, %s16752_s16  ;;  %p16759_p3 = scmp.lt.u32.totalorder %s16752_s16, %s19635_s4 }
 0x1b3   : > { %p16755_p4 = pnand %p16753_p7, %p17314_p8 }
 0x1b5   : > { %p16756_p1 = pneg %p16755_p4 }
 0x1b7   : > { %p16761_p9 = pnand %p16759_p3, %p16756_p1 }
 0x1b9   : > { %16764 = shalt.err (!%p16761_p9)
}
 0x1ba   : > { %s16765_s1 = scalar_lea.vmem %s17521_s18, 2048  ;;  %p16773_p13 = scmp.lt.s32.totalorder %s17521_s18, %s17521_s18 }
 0x1bb   : > { %p16766_p10 = scmp.ne.s32.totalorder %s17521_s18, %s16765_s1  ;;  %p16774_p0 = scmp.lt.s32.totalorder %s16765_s1, %s16765_s1 }
 0x1bd   : > { %p16768_p11 = pnand %p16766_p10, %p17314_p8  ;;  %p16775_p2 = por %p16774_p0, %p16773_p13 }
 0x1bf   : > { %p16769_p12 = pneg %p16768_p11 }
 0x1c1   : > { %p16776_p5 = pnand %p16775_p2, %p16769_p12 }
 0x1c3   : > { %16779 = shalt.err (!%p16776_p5)
}
 0x1c4   : > { %s19636_s28 = sld [smem:[#allocation60_spill]]  ;;  %s17083_s6 = smov [#allocation25]  }
 0x1c5   : > { %15735 = dma.hbm_to_vmem [thread:$0]  (!%p17302_p6), %s19635_s4, 2048, %s17521_s18, [#allocation21], %s19631_s11, %s19631_s11, %s19630_s10  }
 0x1c6   : > { %s954_s12 = sshll.u32 %s17083_s6, 4  ;;  %s17084_s16 = smov [#allocation28]   ;;  %s955_s12 = int_to_ptr.vmem [resolvable:$true] %s954_s12 }
 0x1c7   : > { %s984_s9 = sshll.u32 %s17084_s16, 4  ;;  %s17551_s9 = int_to_ptr.vmem [resolvable:$true] %s984_s9 }
 0x1ca   : > { %s16780_s1 = scalar_lea.hbm %s19636_s28, 4096 }
 0x1cb   : > { %p16781_p7 = scmp.ne.s32.totalorder %s19636_s28, %s16780_s1  ;;  %p16787_p3 = scmp.lt.u32.totalorder %s16780_s1, %s19636_s28 }
 0x1cd   : > { %p16783_p4 = pnand %p16781_p7, %p17314_p8 }
 0x1cf   : > { %p16784_p1 = pneg %p16783_p4 }
 0x1d1   : > { %p16789_p9 = pnand %p16787_p3, %p16784_p1 }
 0x1d3   : > { %16792 = shalt.err (!%p16789_p9)
}
 0x1d4   : > { %s16793_s3 = scalar_lea.vmem %s955_s12, 4096  ;;  %p16801_p13 = scmp.lt.s32.totalorder %s955_s12, %s955_s12 }
 0x1d5   : > { %p16794_p10 = scmp.ne.s32.totalorder %s955_s12, %s16793_s3  ;;  %p16802_p0 = scmp.lt.s32.totalorder %s16793_s3, %s16793_s3 }
 0x1d7   : > { %p16796_p11 = pnand %p16794_p10, %p17314_p8  ;;  %p16803_p2 = por %p16802_p0, %p16801_p13 }
 0x1d9   : > { %p16797_p12 = pneg %p16796_p11 }
 0x1db   : > { %p16804_p5 = pnand %p16803_p2, %p16797_p12 }
 0x1dd   : > { %16807 = shalt.err (!%p16804_p5)
}
 0x1de   : > { %s19637_s18 = smov 16   ;;  %s19638_s6 = smov 256  }
 0x1df   : > { %s19639_s16 = sld [smem:[#allocation63_spill]] }
 0x1e0   : > { %15741 = dma.hbm_to_vmem [thread:$0]  (!%p17302_p6), %s19636_s28, 4096, %s955_s12, [#allocation24], %s19638_s6, %s19638_s6, %s19637_s18  }
 0x1e5   : > { %s16808_s1 = scalar_lea.hbm %s19639_s16, 16 }
 0x1e6   : > { %p16809_p7 = scmp.ne.s32.totalorder %s19639_s16, %s16808_s1  ;;  %p16815_p3 = scmp.lt.u32.totalorder %s16808_s1, %s19639_s16 }
 0x1e8   : > { %p16811_p4 = pnand %p16809_p7, %p17314_p8 }
 0x1ea   : > { %p16812_p1 = pneg %p16811_p4 }
 0x1ec   : > { %p16817_p9 = pnand %p16815_p3, %p16812_p1 }
 0x1ee   : > { %16820 = shalt.err (!%p16817_p9)
}
 0x1ef   : > { %s16821_s3 = scalar_lea.vmem %s17551_s9, 16  ;;  %s16828_s4 = scalar_lea.vmem %s17551_s9, 32 }
 0x1f0   : > { %p16822_p10 = scmp.ne.s32.totalorder %s17551_s9, %s16821_s3  ;;  %p16829_p13 = scmp.lt.s32.totalorder %s17551_s9, %s17551_s9 }
 0x1f1   : > { %p16830_p0 = scmp.lt.s32.totalorder %s16828_s4, %s16821_s3 }
 0x1f2   : > { %p16824_p11 = pnand %p16822_p10, %p17314_p8 }
 0x1f3   : > { %p16831_p2 = por %p16830_p0, %p16829_p13 }
 0x1f4   : > { %p16825_p12 = pneg %p16824_p11 }
 0x1f6   : > { %p16832_p5 = pnand %p16831_p2, %p16825_p12 }
 0x1f8   : > { %16835 = shalt.err (!%p16832_p5)
}
 0x1f9   : > { %s19640_s12 = sld [smem:[#allocation68_spill]]  ;;  %s17085_s18 = smov [#allocation31]  }
 0x1fa   : > { %15747 = dma.hbm_to_vmem [thread:$0]  (!%p17302_p6), %s19639_s16, 16, %s17551_s9, [#allocation27]  }
 0x1fb   : > { %s1016_s6 = sshll.u32 %s17085_s18, 4  ;;  %s17086_s1 = smov [#allocation34]   ;;  %s1017_s6 = int_to_ptr.vmem [resolvable:$true] %s1016_s6 }
 0x1fc   : > { %s1048_s8 = sshll.u32 %s17086_s1, 4  ;;  %s17582_s8 = int_to_ptr.vmem [resolvable:$true] %s1048_s8 }
 0x1ff   : > { %s16836_s4 = scalar_lea.hbm %s19640_s12, 4096 }
 0x200   : > { %p16837_p7 = scmp.ne.s32.totalorder %s19640_s12, %s16836_s4  ;;  %p16843_p3 = scmp.lt.u32.totalorder %s16836_s4, %s19640_s12 }
 0x202   : > { %p16839_p4 = pnand %p16837_p7, %p17314_p8 }
 0x204   : > { %p16840_p1 = pneg %p16839_p4 }
 0x206   : > { %p16845_p9 = pnand %p16843_p3, %p16840_p1 }
 0x208   : > { %16848 = shalt.err (!%p16845_p9)
}
 0x209   : > { %s16849_s3 = scalar_lea.vmem %s1017_s6, 4096  ;;  %p16857_p13 = scmp.lt.s32.totalorder %s1017_s6, %s1017_s6 }
 0x20a   : > { %p16850_p10 = scmp.ne.s32.totalorder %s1017_s6, %s16849_s3  ;;  %p16858_p0 = scmp.lt.s32.totalorder %s16849_s3, %s16849_s3 }
 0x20c   : > { %p16852_p11 = pnand %p16850_p10, %p17314_p8  ;;  %p16859_p2 = por %p16858_p0, %p16857_p13 }
 0x20e   : > { %p16853_p12 = pneg %p16852_p11 }
 0x210   : > { %p16860_p5 = pnand %p16859_p2, %p16853_p12 }
 0x212   : > { %16863 = shalt.err (!%p16860_p5)
}
 0x213   : > { %15753 = dma.hbm_to_vmem [thread:$0]  (!%p17302_p6), %s19640_s12, 4096, %s1017_s6, [#allocation30], %s19631_s11, %s19631_s11, %s19630_s10  }
 0x214   : > { %s16864_s9 = scalar_lea.hbm %s19621_s5, 4096 }
 0x215   : > { %p16865_p7 = scmp.ne.s32.totalorder %s19621_s5, %s16864_s9  ;;  %p16871_p3 = scmp.lt.u32.totalorder %s16864_s9, %s19621_s5 }
 0x217   : > { %p16867_p4 = pnand %p16865_p7, %p17314_p8 }
 0x219   : > { %p16868_p1 = pneg %p16867_p4 }
 0x21b   : > { %p16873_p9 = pnand %p16871_p3, %p16868_p1 }
 0x21d   : > { %16876 = shalt.err (!%p16873_p9)
}
 0x21e   : > { %s16877_s18 = scalar_lea.vmem %s17582_s8, 4096  ;;  %p16885_p13 = scmp.lt.s32.totalorder %s17582_s8, %s17582_s8 }
 0x21f   : > { %p16878_p10 = scmp.ne.s32.totalorder %s17582_s8, %s16877_s18  ;;  %p16886_p0 = scmp.lt.s32.totalorder %s16877_s18, %s16877_s18 }
 0x221   : > { %p16880_p11 = pnand %p16878_p10, %p17314_p8  ;;  %p16887_p2 = por %p16886_p0, %p16885_p13 }
 0x223   : > { %p16881_p12 = pneg %p16880_p11 }
 0x225   : > { %p16888_p5 = pnand %p16887_p2, %p16881_p12 }
 0x227   : > { %16891 = shalt.err (!%p16888_p5)
}
 0x228   : > { %15759 = dma.hbm_to_vmem [thread:$0]  (!%p17302_p6), %s19621_s5, 4096, %s17582_s8, [#allocation33], %s19631_s11, %s19631_s11, %s19630_s10  }
 0x229   : > { %s13452_s30 = sadd.s32 4294967294, %s17028_s26   ;;  %s17617_s15 = sadd.s32 1, %s17028_s26  }
 0x22a   : > { %s93_s6 = ssub.s32 %s17028_s26, %s17617_s15  ;;  %s96_s1 = sadd.s32 1, %s17024_s0 }
 0x22b   : > { %s19641_s4 = sld [smem:[#allocation48_spill]]  ;;  %p94_p8 = scmp.eq.s32.totalorder %s93_s6, 0 }
 0x22c   : > { %p103_p7 = scmp.ne.s32.totalorder %s17024_s0, %s17020_s23  ;;  %p104_p4 = scmp.eq.s32.totalorder %s17028_s26, 0 }
 0x22d   : > { %p109_p1 = scmp.ne.s32.totalorder %s17020_s23, %s17016_s22  ;;  %p19643_p9 = scmp.eq.s32.totalorder %s17286_s2, 0 }
 0x22e   : > { %s17628_s3 = scalar_select %p94_p8, %s17024_s0, %s96_s1  }
 0x22f   : > { %p17630_p3 = por %p104_p4, %p103_p7  ;;  %p17636_p6 = por %p19643_p9, %p109_p1 }
 0x230   : > { %p763_p10 = scmp.eq.s32.totalorder %s17286_s2, 1  ;;  %p769_p11 = scmp.eq.s32.totalorder %s13452_s30, 1 }
 0x231   : > { %s19644_s8 = scalar_select %p17636_p6, 1, 0 }
 0x232   : > { %p15788_p12 = scmp.lt.s32.totalorder %s17028_s26, 2  ;;  %s1065_s18 = sand.u32 1, %s17024_s0  }
 0x233   : > { %p17643_p13 = por %p763_p10, %p103_p7  ;;  %p17647_p0 = por %p769_p11, %p109_p1 }
 0x234   : > { %s13475_s5 = sshll.u32 %s1065_s18, 5  ;;  %s13761_s12 = sshll.u32 %s17028_s26, 9 }
 0x235   : > { %s19645_s6 = scalar_select %p17643_p13, 1, 0 }
 0x236   : > { %s19646_s1 = scalar_select %p17647_p0, 1, 0 }
 0x237   : > { %s17653_s13 = scalar_lea.hbm %s19641_s4, %s13761_s12  ;;  %s1069_s30 = scalar_lea.vmem [#allocation2], %s13475_s5 }
 0x238   : > { %s1076_s14 = sshll.u32 %s1069_s30, 4  ;;  %p17659_p2 = pnand %p15788_p12, %p17630_p3  ;;  %s17655_s14 = int_to_ptr.vmem [resolvable:$true] %s1076_s14 }
 0x239   : > { %s17663_s19 = scalar_lea.sflag [#allocation3], %s1065_s18  ;;  %s16892_s20 = scalar_lea.hbm %s17653_s13, 512 }
 0x23a   : > { %p16893_p5 = scmp.ne.s32.totalorder %s17653_s13, %s16892_s20  ;;  %p16894_p8 = pneg %p17659_p2 }
 0x23b   : > { %s16897_s5 = scalar_lea.hbm %s19641_s4, 1024  ;;  %p16898_p1 = scmp.lt.u32.totalorder %s17653_s13, %s19641_s4 }
 0x23c   : > { %p16895_p7 = pnand %p16894_p8, %p16893_p5  ;;  %p16899_p9 = scmp.lt.u32.totalorder %s16897_s5, %s16892_s20 }
 0x23d   : > { %p16901_p3 = scmp.lt.u32.totalorder %s16892_s20, %s17653_s13 }
 0x23e   : > { %p16896_p4 = pneg %p16895_p7  ;;  %p16900_p10 = por %p16899_p9, %p16898_p1 }
 0x240   : > { %p16902_p11 = por %p16901_p3, %p16900_p10 }
 0x242   : > { %p16903_p12 = pnand %p16902_p11, %p16896_p4 }
 0x244   : > { %16906 = shalt.err (!%p16903_p12)
}
 0x245   : > { %s16907_s12 = scalar_lea.vmem %s17655_s14, 512  ;;  %s17087_s9 = smov [#allocation2]  }
 0x246   : > { %p16908_p0 = scmp.ne.s32.totalorder %s17655_s14, %s16907_s12  ;;  %s16912_s18 = sshll.u32 %s17087_s9, 4  ;;  %s16913_s18 = int_to_ptr.vmem [resolvable:$false] %s16912_s18 }
 0x247   : > { %s16914_s30 = scalar_lea.vmem %s16913_s18, 1024  ;;  %p16915_p5 = scmp.lt.s32.totalorder %s17655_s14, %s16913_s18 }
 0x248   : > { %p16910_p13 = pnand %p16908_p0, %p16894_p8  ;;  %p16916_p7 = scmp.lt.s32.totalorder %s16914_s30, %s16907_s12 }
 0x24a   : > { %p16911_p6 = pneg %p16910_p13  ;;  %p16917_p1 = por %p16916_p7, %p16915_p5 }
 0x24c   : > { %p16918_p9 = pnand %p16917_p1, %p16911_p6 }
 0x24e   : > { %16921 = shalt.err (!%p16918_p9)
}
 0x24f   : > { %15763 = dma.hbm_to_vmem [thread:$0]  (!%p17659_p2), %s17653_s13, 512, %s17655_s14, %s17663_s19, %s19631_s11, %s19631_s11, %s19630_s10  }
 0x250   : > { %p19648_p13 = scmp.ne.s32.totalorder %s19627_s7, 0 }
 0x251   : > { %s17693_s20 = sand.u32 (!%p19648_p13), 1, %s17020_s23   ;;  %p19649_p6 = scmp.ne.s32.totalorder (!%p19648_p13), %s19644_s8, 0 }
 0x252   : > { %1088 = sbr.rel (%p19648_p13) target bundleno = 13097 (0x3329), region = 144  ;;  %s13479_s5 = sshll.u32 (!%p19648_p13), %s17693_s20, 5 }
 0x253   : > { %s1091_s12 = scalar_lea.sflag (!%p19648_p13), [#allocation3], %s17693_s20  ;;  %s1094_s9 = scalar_lea.vmem (!%p19648_p13), [#allocation2], %s13479_s5 }
 0x259   : > { %16967 = dma.done.wait (%p19649_p6), %s1091_s12, 512  }
 0x25a   : > { %16969 = vsyncadd (%p19649_p6), %s1091_s12, 4294966784  ;;  %p19650_p0 = scmp.eq.s32.totalorder %s17286_s2, 0 }
 0x25c   : > { %16971 = dma.done.wait (%p19650_p0), [#allocation6], 512   ;;  %p19651_p2 = pmov %p19650_p0 }
 0x25d   : > { %p19652_p8 = pmov %p19650_p0 }
 0x25e   : > { %16973 = vsyncadd (%p19651_p2), [#allocation6], 4294966784 }
 0x25f   : > { %16975 = dma.done.wait (%p19652_p8), [#allocation9], 4128   ;;  %p19653_p4 = pmov %p19650_p0 }
 0x260   : > { %p19654_p10 = pmov %p19650_p0 }
 0x261   : > { %16977 = vsyncadd (%p19653_p4), [#allocation9], 4294963168 }
 0x262   : > { %16979 = dma.done.wait (%p19654_p10), [#allocation12], 6160   ;;  %p19655_p3 = pmov %p19650_p0 }
 0x263   : > { %p19656_p11 = pmov %p19650_p0 }
 0x264   : > { %16981 = vsyncadd (%p19655_p3), [#allocation12], 4294961136 }
 0x265   : > { %16983 = dma.done.wait (%p19656_p11), [#allocation15], 64   ;;  %p19657_p12 = pmov %p19650_p0 }
 0x266   : > { %p19658_p5 = pmov %p19650_p0 }
 0x267   : > { %16985 = vsyncadd (%p19657_p12), [#allocation15], 4294967232 }
 0x268   : > { %16987 = dma.done.wait (%p19658_p5), [#allocation18], 2064   ;;  %p19659_p7 = pmov %p19650_p0 }
 0x269   : > { %p19660_p1 = pmov %p19650_p0 }
 0x26a   : > { %16989 = vsyncadd (%p19659_p7), [#allocation18], 4294965232 }
 0x26b   : > { %16991 = dma.done.wait (%p19660_p1), [#allocation21], 8192   ;;  %p19661_p9 = pmov %p19650_p0 }
 0x26c   : > { %p19662_p13 = pmov %p19650_p0 }
 0x26d   : > { %16993 = vsyncadd (%p19661_p9), [#allocation21], 4294959104 }
 0x26e   : > { %16995 = dma.done.wait (%p19662_p13), [#allocation24], 4112   ;;  %p19663_p6 = pmov %p19650_p0 }
 0x270   : > { %16997 = vsyncadd (%p19663_p6), [#allocation24], 4294963184 }
 0x271   : > { %16999 = dma.done.wait (%p19650_p0), [#allocation27], 2064   ;;  %p19664_p2 = pmov %p19650_p0 }
 0x272   : > { %p19665_p8 = pmov %p19650_p0 }
 0x273   : > { %17001 = vsyncadd (%p19664_p2), [#allocation27], 4294965232 }
 0x274   : > { %17003 = dma.done.wait (%p19665_p8), [#allocation30], 8192   ;;  %p19666_p4 = pmov %p19650_p0 }
 0x275   : > { %p19667_p10 = pmov %p19650_p0 }
 0x276   : > { %17005 = vsyncadd (%p19666_p4), [#allocation30], 4294959104 }
 0x277   : > { %17007 = dma.done.wait (%p19667_p10), [#allocation33], 8192   ;;  %p19668_p3 = pmov %p19650_p0 }
 0x278   : > { %v1253_v0 = vld [vmem:[%s1094_s9] sm:$0xff]  ;;  %v1254_v1 = vld [vmem:[%s1094_s9 + $0x8] sm:$0xff]  ;;  %v1255_v2 = vld [vmem:[%s1094_s9 + $0x10] sm:$0xff]  ;;  %v17088_v22 = vmov 839922192   ;;  %v1318_v24 = vlaneseq  ;;  %s19669_s13 = sld [smem:[#allocation51_spill]] }
 0x279   : > { %17009 = vsyncadd (%p19668_p3), [#allocation33], 4294959104  ;;  %v1296_v3 = vcombine.low %v1253_v0, %v1254_v1  ;;  %v1297_v4 = vcombine.high %v1253_v0, %v1254_v1  ;;  %v1256_v5 = vld [vmem:[%s1094_s9 + $0x18] sm:$0xff]  ;;  %v1275_v10 = vld [vmem:[#allocation10 + $0x80] sm:$0xff]  ;;  %v1316_v23 = vunpack.c.l.s4 %v17088_v22  ;;  %v17089_v25 = vmov 1985246804  }
 0x27a   : > { %v1298_v6 = vcombine.low %v1255_v2, %v1256_v5  ;;  %v1299_v7 = vcombine.high %v1255_v2, %v1256_v5  ;;  %v1276_v11 = vld [vmem:[#allocation10 + $0x88] sm:$0xff]  ;;  %v1259_v12 = vld [vmem:[#allocation10] sm:$0xff]  ;;  %v1277_v15 = vld [vmem:[#allocation10 + $0x90] sm:$0xff]  ;;  %v1323_v26 = vunpack.c.l.s4 %v17089_v25  ;;  %v17741_v28 = vshrl.u32 %v1318_v24, 7  ;;  %s17092_s14 = smov 96   ;;  %s19590_s19 = smov 64  }
 0x27b   : > { %v1304_v8 = vadd.f32 %v1297_v4, %v1296_v3  ;;  %v15047_v13 = vpack.c.bf16 %v1276_v11, %v1275_v10  ;;  %v1260_v14 = vld [vmem:[#allocation10 + $0x8] sm:$0xff]  ;;  %v1278_v16 = vld [vmem:[#allocation10 + $0x98] sm:$0xff]  ;;  %v1261_v19 = vld [vmem:[#allocation10 + $0x10] sm:$0xff]  ;;  %v1317_v27 = vunpack.c.0.s8 %v1316_v23  ;;  %vm17091_vm0 = vmmov 0   ;;  %s17094_s7 = smov 32   ;;  %s19670_s10 = sld [smem:[#allocation54_spill]] }
 0x27c   : > { %v1307_v9 = vadd.f32 %v1299_v7, %v1298_v6  ;;  %v15049_v17 = vpack.c.bf16 %v1260_v14, %v1259_v12  ;;  %v15051_v18 = vpack.c.bf16 %v1278_v16, %v1277_v15  ;;  %v1262_v20 = vld [vmem:[#allocation10 + $0x18] sm:$0xff]  ;;  %v1324_v29 = vunpack.c.0.s8 %v1323_v26  ;;  %v1279_v54 = vld [vmem:[#allocation10 + $0xa0] sm:$0xff]  ;;  %v1280_v55 = vld [vmem:[#allocation10 + $0xa8] sm:$0xff]  ;;  %s19671_s11 = sld [smem:[#allocation65_spill]]  ;;  %s19672_s16 = sld [smem:[#allocation67_spill]] }
 0x27d   : > { %1305 = vadd.xlane.f32.xlu0 %v1304_v8  ;;  %15048 = vmatprep.subr.bf16.mxu0 %v15047_v13  ;;  %v15053_v21 = vpack.c.bf16 %v1262_v20, %v1261_v19  ;;  %v17744_v30 = vsub.s32 %v1317_v27, %v17741_v28  ;;  %v15055_v56 = vpack.c.bf16 %v1280_v55, %v1279_v54  ;;  %v1263_v57 = vld [vmem:[#allocation10 + $0x20] sm:$0xff]  ;;  %v1264_v58 = vld [vmem:[#allocation10 + $0x28] sm:$0xff]  ;;  %v1281_v60 = vld [vmem:[#allocation10 + $0xb0] sm:$0xff]  ;;  %vm2068_vm1 = vcmask 261120   ;;  %s19673_s8 = sld [smem:[#allocation69_spill]]  ;;  %s19674_s18 = sld [smem:[#allocation64_spill]] }
 0x27e   : > { %15050 = vmatpush3.bf16.msra.mxu0 %v15049_v17  ;;  %v17747_v31 = vsub.s32 %v1324_v29, %v17741_v28  ;;  %v15057_v59 = vpack.c.bf16 %v1264_v58, %v1263_v57  ;;  %v1282_v61 = vld [vmem:[#allocation10 + $0xb8] sm:$0xff]  ;;  %v1265_v63 = vld [vmem:[#allocation10 + $0x30] sm:$0xff]  ;;  %v1284_v3 = vld [vmem:[#allocation10 + $0xc8] sm:$0xff]  ;;  %vm2418_vm2 = vcmask 1043456   ;;  %vm2369_vm3 = vcmask 27648   ;;  %s19675_s30 = sld [smem:[#allocation58_spill]] }
 0x27f   : > { %15052 = vmatprep.subr.bf16.mxu0 %v15051_v18  ;;  %v15059_v62 = vpack.c.bf16 %v1282_v61, %v1281_v60  ;;  %v1268_v6 = vld [vmem:[#allocation10 + $0x48] sm:$0xff]  ;;  %v1285_v7 = vld [vmem:[#allocation10 + $0xd0] sm:$0xff]  ;;  %v1270_v11 = vld [vmem:[#allocation10 + $0x58] sm:$0xff]  ;;  %vm2414_vm4 = vcmask 31744   ;;  %vm4772_vm5 = vcmask 523264   ;;  %vm4777_vm6 = vcmask 785408  }
 0x280   : > { %v1269_v10 = vld [vmem:[#allocation10 + $0x50] sm:$0xff]  ;;  %v1287_v13 = vld [vmem:[#allocation10 + $0xe0] sm:$0xff]  ;;  %v1288_v14 = vld [vmem:[#allocation10 + $0xe8] sm:$0xff]  ;;  %vm5149_vm7 = vcmask 130048   ;;  %vm6222_vm8 = vcmask 25600   ;;  %s19676_s5 = sld [smem:[#allocation61_spill]] }
 0x281   : > { %1308 = vadd.xlane.f32.xlu0 %v1307_v9  ;;  %v1286_v9 = vld [vmem:[#allocation10 + $0xd8] sm:$0xff]  ;;  %v15069_v15 = vpack.c.bf16 %v1270_v11, %v1269_v10  ;;  %v15071_v16 = vpack.c.bf16 %v1288_v14, %v1287_v13  ;;  %v1271_v17 = vld [vmem:[#allocation10 + $0x60] sm:$0xff]  ;;  %v1272_v18 = vld [vmem:[#allocation10 + $0x68] sm:$0xff]  ;;  %vm10166_vm10 = vcmask 1041408   ;;  %vm17097_vm11 = vmmov 1   ;;  %s19681_s12 = sld [smem:[#allocation72_spill]] }
 0x282   : > { %15054 = vmatpush3.bf16.msra.mxu0 %v15053_v21  ;;  %v15067_v12 = vpack.c.bf16 %v1286_v9, %v1285_v7  ;;  %v1289_v19 = vld [vmem:[#allocation10 + $0xf0] sm:$0xff]  ;;  %v1290_v20 = vld [vmem:[#allocation10 + $0xf8] sm:$0xff]  ;;  %v15073_v21 = vpack.c.bf16 %v1272_v18, %v1271_v17  ;;  %v1552_v27 = vld [vmem:[#allocation13 + $0x20] sm:$0xff]  ;;  %vm10092_vm13 = vcmask 76800   ;;  %vm10162_vm14 = vcmask 80896   ;;  %s19682_s9 = sld [smem:[#allocation73_spill]] }
 0x283   : > { %15056 = vmatprep.subr.bf16.mxu0 %v15055_v56  ;;  %v15075_v22 = vpack.c.bf16 %v1290_v20, %v1289_v19  ;;  %v1273_v23 = vld [vmem:[#allocation10 + $0x70] sm:$0xff]  ;;  %v1274_v24 = vld [vmem:[#allocation10 + $0x78] sm:$0xff]  ;;  %v1548_v29 = vld [vmem:[#allocation13] sm:$0xff]  ;;  %v17773_v20 = vsub.s32 0, %v17741_v28  ;;  %p19683_p12 = scmp.ne.s32.totalorder %s19645_s6, 0 }
 0x284   : > { %v15077_v25 = vpack.c.bf16 %v1274_v24, %v1273_v23  ;;  %v1549_v26 = vld [vmem:[#allocation13 + $0x8] sm:$0xff]  ;;  %v1570_v54 = vld [vmem:[#allocation13 + $0xb0] sm:$0xff]  ;;  %v1576_v60 = vld [vmem:[#allocation13 + $0xe0] sm:$0xff] }
 0x285   : > { %v1566_v57 = vld [vmem:[#allocation13 + $0x90] sm:$0xff]  ;;  %v1569_v58 = vld [vmem:[#allocation13 + $0xa8] sm:$0xff]  ;;  %v1584_v11 = vld [vmem:[#allocation13 + $0x120] sm:$0xff] }
 0x286   : > { %15058 = vmatpush3.bf16.msra.mxu0 %v15057_v59  ;;  %v1573_v59 = vld [vmem:[#allocation13 + $0xc8] sm:$0xff]  ;;  %v15093_v61 = vpack.c.bf16 %v1569_v58, %v1566_v57  ;;  %v1258_v23 = vld [vmem:[#allocation8] sm:$0x3]  ;;  %vm19008_vm9 = vmpackc.low %vm2068_vm1, %vm2068_vm1 }
 0x287   : > { %15060 = vmatprep.subr.bf16.mxu0 %v15059_v62  ;;  %v15095_v62 = vpack.c.bf16 %v1576_v60, %v1573_v59  ;;  %v1585_v7 = vld [vmem:[#allocation13 + $0x128] sm:$0xff]  ;;  %vm19108_vm12 = vmpackc.low %vm10166_vm10, %vm17097_vm11 }
 0x30a   : > { %v1306_v32 = vpop.xlane.xlu0 %1305 }
 0x30b   : > { %v1311_v33 = vmul.f32 0.00390625, %v1306_v32  ;;  %v15079_v32 = vpack.c.bf16 %v1552_v27, %v1549_v26  ;;  %v1438_v26 = vrot.slane %v1258_v23, %v17773_v20 }
 0x30d   : > { %v1321_v34 = vrot.slane %v1311_v33, %v17744_v30  ;;  %v1328_v35 = vrot.slane %v1311_v33, %v17747_v31  ;;  %v1551_v33 = vld [vmem:[#allocation13 + $0x18] sm:$0xff]  ;;  %15080 = vmatprep.subr.bf16.mxu1 %v15079_v32 }
 0x30e   : > { %v1309_v36 = vpop.xlane.xlu0 %1308 }
 0x30f   : > { %v17751_v37 = vsub.f32 %v1253_v0, %v1321_v34  ;;  %v17753_v38 = vsub.f32 %v1254_v1, %v1328_v35  ;;  %v1312_v39 = vmul.f32 0.00390625, %v1309_v36  ;;  %v1266_v0 = vld [vmem:[#allocation10 + $0x38] sm:$0xff]  ;;  %v15081_v36 = vpack.c.bf16 %v1551_v33, %v1548_v29 }
 0x310   : > { %v15061_v1 = vpack.c.bf16 %v1266_v0, %v1265_v63  ;;  %v1555_v34 = vld [vmem:[#allocation13 + $0x38] sm:$0xff]  ;;  %v1558_v35 = vld [vmem:[#allocation13 + $0x50] sm:$0xff]  ;;  %v1572_v63 = vld [vmem:[#allocation13 + $0xc0] sm:$0xff] }
 0x311   : > { %v1335_v40 = vrot.slane %v1312_v39, %v17744_v30  ;;  %v1342_v41 = vrot.slane %v1312_v39, %v17747_v31  ;;  %v1351_v42 = vmul.f32 %v17751_v37, %v17751_v37  ;;  %v1352_v43 = vmul.f32 %v17753_v38, %v17753_v38  ;;  %15082 = vmatpush1.bf16.msra.mxu1 %v15081_v36  ;;  %v1575_v0 = vld [vmem:[#allocation13 + $0xd8] sm:$0xff] }
 0x312   : > { %15062 = vmatpush3.bf16.msra.mxu0 %v15061_v1  ;;  %v15083_v39 = vpack.c.bf16 %v1558_v35, %v1555_v34  ;;  %v1579_v1 = vld [vmem:[#allocation13 + $0xf8] sm:$0xff] }
 0x313   : > { %v17761_v44 = vsub.f32 %v1255_v2, %v1335_v40  ;;  %v17763_v45 = vsub.f32 %v1256_v5, %v1342_v41  ;;  %v1359_v46 = vcombine.low %v1351_v42, %v1352_v43  ;;  %v1360_v47 = vcombine.high %v1351_v42, %v1352_v43  ;;  %v1283_v2 = vld [vmem:[#allocation10 + $0xc0] sm:$0xff]  ;;  %v1550_v40 = vld [vmem:[#allocation13 + $0x10] sm:$0xff]  ;;  %v1553_v41 = vld [vmem:[#allocation13 + $0x28] sm:$0xff] }
 0x314   : > { %v15063_v4 = vpack.c.bf16 %v1284_v3, %v1283_v2  ;;  %v1267_v5 = vld [vmem:[#allocation10 + $0x40] sm:$0xff]  ;;  %v1554_v42 = vld [vmem:[#allocation13 + $0x30] sm:$0xff]  ;;  %v17769_v43 = vpack.c.bf16 %v1553_v41, %v1550_v40  ;;  %15084 = vmatprep.subr.bf16.mxu1 %v15083_v39  ;;  %v15097_v3 = vpack.c.bf16 %v1575_v0, %v1572_v63 }
 0x315   : > { %v1367_v48 = vadd.f32 %v1360_v47, %v1359_v46  ;;  %v1353_v49 = vmul.f32 %v17761_v44, %v17761_v44  ;;  %v1354_v50 = vmul.f32 %v17763_v45, %v17763_v45  ;;  %v15065_v8 = vpack.c.bf16 %v1268_v6, %v1267_v5  ;;  %v1557_v46 = vld [vmem:[#allocation13 + $0x48] sm:$0xff]  ;;  %v1582_v2 = vld [vmem:[#allocation13 + $0x110] sm:$0xff]  ;;  %v1571_v63 = vld [vmem:[#allocation13 + $0xb8] sm:$0xff] }
 0x316   : > { %15064 = vmatprep.subr.bf16.mxu0 %v15063_v4  ;;  %v1561_v47 = vld [vmem:[#allocation13 + $0x68] sm:$0xff]  ;;  %v15099_v4 = vpack.c.bf16 %v1582_v2, %v1579_v1  ;;  %v1578_v5 = vld [vmem:[#allocation13 + $0xf0] sm:$0xff] }
 0x317   : > { %1368 = vadd.xlane.f32.xlu1 %v1367_v48  ;;  %v1361_v51 = vcombine.low %v1353_v49, %v1354_v50  ;;  %v1362_v52 = vcombine.high %v1353_v49, %v1354_v50  ;;  %15066 = vmatpush3.bf16.msra.mxu0 %v15065_v8  ;;  %v1564_v48 = vld [vmem:[#allocation13 + $0x80] sm:$0xff]  ;;  %v15085_v49 = vpack.c.bf16 %v1557_v46, %v1554_v42  ;;  %v1581_v6 = vld [vmem:[#allocation13 + $0x108] sm:$0xff]  ;;  %v1574_v1 = vld [vmem:[#allocation13 + $0xd0] sm:$0xff] }
 0x318   : > { %15068 = vmatprep.subr.bf16.mxu0 %v15067_v12  ;;  %v15087_v50 = vpack.c.bf16 %v1564_v48, %v1561_v47  ;;  %v1588_v8 = vld [vmem:[#allocation13 + $0x140] sm:$0xff]  ;;  %v15101_v9 = vpack.c.bf16 %v1581_v6, %v1578_v5  ;;  %v1587_v12 = vld [vmem:[#allocation13 + $0x138] sm:$0xff]  ;;  %v1577_v2 = vld [vmem:[#allocation13 + $0xe8] sm:$0xff] }
 0x319   : > { %v1370_v53 = vadd.f32 %v1362_v52, %v1361_v51  ;;  %v1560_v51 = vld [vmem:[#allocation13 + $0x60] sm:$0xff]  ;;  %v1563_v52 = vld [vmem:[#allocation13 + $0x78] sm:$0xff]  ;;  %15086 = vmatpush1.bf16.msra.mxu1 %v15085_v49  ;;  %v15103_v10 = vpack.c.bf16 %v1588_v8, %v1585_v7  ;;  %v15105_v13 = vpack.c.bf16 %v1587_v12, %v1584_v11  ;;  %v1594_v7 = vld [vmem:[#allocation13 + $0x170] sm:$0xff] }
 0x31a   : > { %v15089_v55 = vpack.c.bf16 %v1563_v52, %v1560_v51  ;;  %15088 = vmatprep.subr.bf16.mxu1 %v15087_v50  ;;  %v1583_v5 = vld [vmem:[#allocation13 + $0x118] sm:$0xff]  ;;  %v1586_v8 = vld [vmem:[#allocation13 + $0x130] sm:$0xff] }
 0x31b   : > { %1371 = vadd.xlane.f32.xlu1 %v1370_v53  ;;  %15070 = vmatpush3.bf16.msra.mxu0 %v15069_v15  ;;  %v1567_v53 = vld [vmem:[#allocation13 + $0x98] sm:$0xff]  ;;  %v1590_v11 = vld [vmem:[#allocation13 + $0x150] sm:$0xff] }
 0x31c   : > { %15072 = vmatprep.subr.bf16.mxu0 %v15071_v16  ;;  %v15091_v56 = vpack.c.bf16 %v1570_v54, %v1567_v53  ;;  %v1556_v54 = vld [vmem:[#allocation13 + $0x40] sm:$0xff] }
 0x31d   : > { %15090 = vmatpush1.bf16.msra.mxu1 %v15089_v55  ;;  %v1559_v55 = vld [vmem:[#allocation13 + $0x58] sm:$0xff] }
 0x31e   : > { %15092 = vmatprep.subr.bf16.mxu1 %v15091_v56  ;;  %v15115_v58 = vpack.c.bf16 %v1559_v55, %v1556_v54 }
 0x31f   : > { %15074 = vmatpush3.bf16.msra.mxu0 %v15073_v21  ;;  %v17776_v21 = vsub.s32 1, %v17741_v28 }
 0x320   : > { %15076 = vmatprep.subr.bf16.mxu0 %v15075_v22  ;;  %v1257_v22 = vld [vmem:[%s19669_s13] sm:$0x3]  ;;  %s13500_s13 = sshll.u32 %s17693_s20, 4 }
 0x321   : > { %15094 = vmatpush1.bf16.msra.mxu1 %v15093_v61  ;;  %v1421_v24 = vrot.slane %v1257_v22, %v17773_v20  ;;  %v1442_v27 = vrot.slane %v1258_v23, %v17776_v21  ;;  %v1562_v61 = vld [vmem:[#allocation13 + $0x70] sm:$0xff] }
 0x322   : > { %15096 = vmatprep.subr.bf16.mxu1 %v15095_v62 }
 0x323   : > { %15078 = vmatpush3.bf16.msra.mxu0 %v15077_v25  ;;  %v1425_v25 = vrot.slane %v1257_v22, %v17776_v21  ;;  %v1443_v40 = vcombine.low %v1438_v26, %v1442_v27  ;;  %v1444_v41 = vcombine.high %v1438_v26, %v1442_v27  ;;  %v13501_v22 = vld [vmem:[#allocation11] ss:$0 sm:$0xff] }
 0x324   : > { %15112 = vmatprep.subr.bf16.mxu0 %v17769_v43 }
 0x325   : > { %15098 = vmatpush1.bf16.msra.mxu1 %v15097_v3  ;;  %v1426_v34 = vcombine.low %v1421_v24, %v1425_v25  ;;  %v1427_v35 = vcombine.high %v1421_v24, %v1425_v25  ;;  %v15127_v3 = vpack.c.bf16 %v1577_v2, %v1574_v1 }
 0x326   : > { %15100 = vmatprep.subr.bf16.mxu1 %v15099_v4  ;;  %v1580_v4 = vld [vmem:[#allocation13 + $0x100] sm:$0xff] }
 0x327   : > { %v15131_v6 = vpack.c.bf16 %v1583_v5, %v1580_v4 }
 0x329   : > { %15102 = vmatpush1.bf16.msra.mxu1 %v15101_v9 }
 0x32a   : > { %15104 = vmatprep.subr.bf16.mxu1 %v15103_v10  ;;  %v1589_v10 = vld [vmem:[#allocation13 + $0x148] sm:$0xff] }
 0x32b   : > { %v15135_v12 = vpack.c.bf16 %v1589_v10, %v1586_v8 }
 0x32d   : > { %15106 = vmatpush1.bf16.msra.mxu1 %v15105_v13  ;;  %v1593_v13 = vld [vmem:[#allocation13 + $0x168] sm:$0xff] }
 0x3a4   : > { %v1369_v14 = vpop.xlane.xlu1 %1368 }
 0x3a5   : > { %v1373_v15 = vmul.f32 0.00390625, %v1369_v14  ;;  %v15109_v14 = vpack.c.bf16 %v1593_v13, %v1590_v11 }
 0x3a7   : > { %v1375_v16 = vadd.f32 1e-05, %v1373_v15  ;;  %v1592_v15 = vld [vmem:[#allocation13 + $0x160] sm:$0xff] }
 0x3a8   : > { %v1372_v17 = vpop.xlane.xlu1 %1371 }
 0x3a9   : > { %16038 = vrsqrt.f32 %v1375_v16  ;;  %v1374_v18 = vmul.f32 0.00390625, %v1372_v17  ;;  %v1595_v16 = vld [vmem:[#allocation13 + $0x178] sm:$0xff] }
 0x3aa   : > { %v15139_v17 = vpack.c.bf16 %v1595_v16, %v1592_v15 }
 0x3ab   : > { %v1376_v19 = vadd.f32 1e-05, %v1374_v18  ;;  %v17090_v18 = vmov 0.0  }
 0x3ac   : > { %1968 = vmatprep.mubr.f32.mxu1 %v17090_v18 }
 0x3ad   : > { %16040 = vrsqrt.f32 %v1376_v19 }
 0x3b3   : > { %v16039_v29 = vpop.eup %16038 }
 0x3b4   : > { %v1387_v32 = vrot.slane %v16039_v29, %v17744_v30  ;;  %v1394_v33 = vrot.slane %v16039_v29, %v17747_v31 }
 0x3b6   : > { %v1413_v36 = vmul.f32 %v1387_v32, %v17751_v37  ;;  %v1414_v39 = vmul.f32 %v1394_v33, %v17753_v38  ;;  %v1596_v33 = vld [vmem:[#allocation14] sm:$0x7] }
 0x3b7   : > { %v16041_v42 = vpop.eup %16040 }
 0x3b8   : > { %v1430_v46 = vmul.f32 %v1426_v34, %v1413_v36  ;;  %v1431_v47 = vmul.f32 %v1427_v35, %v1414_v39  ;;  %v1401_v48 = vrot.slane %v16041_v42, %v17744_v30  ;;  %v1408_v49 = vrot.slane %v16041_v42, %v17747_v31  ;;  %v1565_v30 = vld [vmem:[#allocation13 + $0x88] sm:$0xff] }
 0x3b9   : > { %v1892_v36 = vrot.slane %v1596_v33, %v17773_v20 }
 0x3ba   : > { %v1447_v50 = vadd.f32 %v1443_v40, %v1430_v46  ;;  %v1448_v51 = vadd.f32 %v1444_v41, %v1431_v47  ;;  %v1415_v52 = vmul.f32 %v1401_v48, %v17761_v44  ;;  %v1416_v53 = vmul.f32 %v1408_v49, %v17763_v45  ;;  %v1568_v45 = vld [vmem:[#allocation13 + $0xa0] sm:$0xff] }
 0x3bb   : > { %v15119_v44 = vpack.c.bf16 %v1565_v30, %v1562_v61  ;;  %v15123_v0 = vpack.c.bf16 %v1571_v63, %v1568_v45 }
 0x3bc   : > { %v1462_v37 = vcombine.high %v1447_v50, %v1448_v51  ;;  %v1461_v56 = vcombine.low %v1447_v50, %v1448_v51  ;;  %v1432_v38 = vmul.f32 %v1426_v34, %v1415_v52  ;;  %v1433_v57 = vmul.f32 %v1427_v35, %v1416_v53 }
 0x3bd   : > { %v17809_v34 = vsub.s32 2, %v17741_v28  ;;  %v1896_v35 = vrot.slane %v1596_v33, %v17776_v21 }
 0x3be   : > { %1533 = vmatprep.mubr.f32.mxu0 %v1462_v37  ;;  %v1449_v59 = vadd.f32 %v1443_v40, %v1432_v38  ;;  %v1450_v60 = vadd.f32 %v1444_v41, %v1433_v57 }
 0x3bf   : > { %1534 = vmatmul.mubr.f32.vlgmr.msra.gmra.mrb[0].mxu0 %v1461_v56  ;;  %v1900_v41 = vrot.slane %v1596_v33, %v17809_v34 }
 0x3c0   : > { %v1464_v31 = vcombine.high %v1449_v59, %v1450_v60  ;;  %v1463_v62 = vcombine.low %v1449_v59, %v1450_v60  ;;  %15114 = vmatpush3.bf16.msra.mxu0 %v17769_v43  ;;  %v1591_v43 = vld [vmem:[#allocation13 + $0x158] sm:$0xff] }
 0x3c1   : > { %15116 = vmatprep.subr.bf16.mxu0 %v15115_v58  ;;  %v15107_v9 = vpack.c.bf16 %v1594_v7, %v1591_v43 }
 0x3c2   : > { %1538 = vmatprep.mubr.f32.mxu0 %v1464_v31 }
 0x3c3   : > { %1539 = vmatmul.mubr.f32.gmra.mrb[2].mxu0 %v1463_v62  ;;  %15108 = vmatprep.subr.bf16.mxu1 %v15107_v9 }
 0x3c4   : > { %15118 = vmatpush3.bf16.msra.mxu0 %v15115_v58  ;;  %15110 = vmatpush1.bf16.msra.mxu1 %v15109_v14 }
 0x3c5   : > { %15120 = vmatprep.subr.bf16.mxu0 %v15119_v44  ;;  %14295 = vmatprep.subr.mxu1 %v17090_v18 }
 0x3c8   : > { %15122 = vmatpush3.bf16.msra.mxu0 %v15119_v44 }
 0x3c9   : > { %15124 = vmatprep.subr.bf16.mxu0 %v15123_v0 }
 0x3cc   : > { %15126 = vmatpush3.bf16.msra.mxu0 %v15123_v0 }
 0x3cd   : > { %15128 = vmatprep.subr.bf16.mxu0 %v15127_v3 }
 0x3d0   : > { %15130 = vmatpush3.bf16.msra.mxu0 %v15127_v3 }
 0x3d1   : > { %15132 = vmatprep.subr.bf16.mxu0 %v15131_v6 }
 0x3d4   : > { %15134 = vmatpush3.bf16.msra.mxu0 %v15131_v6 }
 0x3d5   : > { %15136 = vmatprep.subr.bf16.mxu0 %v15135_v12 }
 0x3d8   : > { %15138 = vmatpush3.bf16.msra.mxu0 %v15135_v12 }
 0x3d9   : > { %15140 = vmatprep.subr.bf16.mxu0 %v15139_v17 }
 0x3dc   : > { %15142 = vmatpush3.bf16.msra.mxu0 %v15139_v17 }
 0x3dd   : > { %14290 = vmatprep.subr.mxu0 %v17090_v18 }
 0x492   : > { %v13795_v19 = vpop.f32.mrb[0].mxu0 }
 0x493   : > { %v13796_v23 = vpop.f32.mrb[1].mxu0 }
 0x494   : > { %v13797_v24 = vadd.f32 %v13796_v23, %v13795_v19 }
 0x496   : > { %v17795_v25 = vadd.f32 %v13797_v24, %v13501_v22  ;;  %v13798_v26 = vpop.f32.mrb[2].mxu0 }
 0x497   : > { %v13799_v27 = vpop.f32.mrb[3].mxu0 }
 0x498   : > { %v13800_v29 = vadd.f32 %v13799_v27, %v13798_v26  ;;  %1969 = vmatmul.mubr.f32.vlgmr.msra.gmra.mrb[0].mxu1 %v17795_v25  ;;  %14287 = vmatprep.mubr.f32.mxu0 %v17795_v25 }
 0x499   : > { %1974 = vmatprep.mubr.f32.mxu1 %v17090_v18 }
 0x49a   : > { %v17800_v32 = vadd.f32 %v13800_v29, %v13501_v22 }
 0x49c   : > { %1975 = vmatmul.mubr.f32.gmra.mrb[2].mxu1 %v17800_v32  ;;  %14288 = vmatmul.mubr.f32.vlgmr.msra.gmra.mrb[4].mxu0 %v17800_v32 }
 0x49d   : > { %14292 = vmatprep.mubr.msk.f32.mxu0 %vm17091_vm0, %v17090_v18  ;;  %14297 = vmatprep.mubr.msk.f32.mxu1 %vm17091_vm0, %v17090_v18 }
 0x56b   : > { %v1970_v39 = vpop.f32.mrb[0].mxu1 }
 0x56c   : > { %v1972_v40 = vpop.f32.mrb[1].mxu1  ;;  %v17816_v46 = vadd.f32 %v1970_v39, %v1892_v36 }
 0x56d   : > { %v17814_v42 = vadd.f32 %v1972_v40, %v1896_v35 }
 0x56e   : > { %v17831_v53 = vcombine.high %v17816_v46, %v17816_v46 }
 0x56f   : > { %v1976_v47 = vpop.f32.mrb[2].mxu1  ;;  %v14289_v48 = vpop.f32.mrb[4].mxu0  ;;  %14291 = vmatpush3.xpose.msk.msra.mxu0 %vm2068_vm1, %v17814_v42  ;;  %v17822_v49 = vcombine.high %v17814_v42, %v17814_v42 }
 0x570   : > { %v17824_v50 = vadd.f32 %v14289_v48, %v1900_v41  ;;  %v1978_v51 = vpop.f32.mrb[3].mxu1  ;;  %v2047_v52 = vpop.f32.mrb[5].mxu0  ;;  %14325 = vmatprep.subr.mxu0 %v17090_v18  ;;  %v17852_v37 = vadd.f32 %v1976_v47, %v1892_v36 }
 0x571   : > { %14296 = vmatpush3.xpose.msk.msra.mxu1 %vm2068_vm1, %v17822_v49  ;;  %v17840_v55 = vadd.f32 %v1978_v51, %v1896_v35  ;;  %v17871_v57 = vadd.f32 %v2047_v52, %v1900_v41 }
 0x572   : > { %14293 = vmatmul.mubr.msk.f32.vlgmr.msra.gmra.mrb[6].mxu0 %vm2068_vm1, %v17816_v46  ;;  %14300 = vmatprep.subr.mxu1 %v17090_v18  ;;  %v17838_v54 = vcombine.high %v17824_v50, %v17824_v50  ;;  %v17868_v38 = vcombine.high %v17852_v37, %v17852_v37 }
 0x573   : > { %14327 = vmatprep.mubr.msk.f32.mxu0 %vm17091_vm0, %v17090_v18  ;;  %v17858_v56 = vcombine.high %v17840_v55, %v17840_v55  ;;  %v17906_v47 = vcombine.high %v17871_v57, %v17871_v57 }
 0x574   : > { %14298 = vmatmul.mubr.msk.f32.vlgmr.msra.gmra.mrb[4].mxu1 %vm2068_vm1, %v17831_v53  ;;  %14326 = vmatpush3.msk.msra.mxu0 %vm2418_vm2, %v17838_v54 }
 0x575   : > { %14301 = vmatpush3.xpose.msk.msra.mxu1 %vm2068_vm1, %v17840_v55  ;;  %14302 = vmatprep.mubr.msk.f32.mxu1 %vm17091_vm0, %v17090_v18 }
 0x576   : > { %14305 = vmatprep.subr.mxu1 %v17090_v18  ;;  %14335 = vmatprep.subr.mxu0 %v17090_v18 }
 0x578   : > { %14303 = vmatmul.mubr.msk.f32.vlgmr.msra.gmra.mrb[6].mxu1 %vm2068_vm1, %v17852_v37 }
 0x579   : > { %14306 = vmatpush3.xpose.msk.msra.mxu1 %vm2068_vm1, %v17858_v56  ;;  %14307 = vmatprep.mubr.msk.f32.mxu1 %vm17091_vm0, %v17090_v18 }
 0x57a   : > { %14310 = vmatprep.subr.mxu1 %v17090_v18 }
 0x57c   : > { %14308 = vmatmul.mubr.msk.f32.vlgmr.msra.gmra.mrb[8].mxu1 %vm2068_vm1, %v17868_v38 }
 0x57d   : > { %14311 = vmatpush3.msk.msra.mxu1 %vm2418_vm2, %v17871_v57  ;;  %14312 = vmatprep.mubr.msk.f32.mxu1 %vm17091_vm0, %v17090_v18 }
 0x57e   : > { %14315 = vmatprep.subr.mxu1 %v17090_v18 }
 0x645   : > { %v2139_v58 = vpop.f32.mrb[6].mxu0 }
 0x646   : > { %v2365_v59 = vmul.f32 0.17677669, %v2139_v58  ;;  %v14294_v60 = vpop.f32.mrb[7].mxu0 }
 0x647   : > { %v2213_v61 = vpop.f32.mrb[4].mxu1 }
 0x648   : > { %v2366_v30 = vmul.f32 0.17677669, %v2213_v61  ;;  %v14299_v31 = vpop.f32.mrb[5].mxu1  ;;  %v2370_v62 = vsel %vm2369_vm3, %v2365_v59, -inf }
 0x649   : > { %2371 = vmax.xlane.f32.xlu0 %v2370_v62 }
 0x64a   : > { %v2373_v44 = vsel %vm2369_vm3, %v2366_v30, -inf }
 0x64b   : > { %2374 = vmax.xlane.f32.xlu1 %v2373_v44  ;;  %v2287_v45 = vpop.f32.mrb[6].mxu1 }
 0x64c   : > { %v2367_v63 = vmul.f32 0.17677669, %v2287_v45  ;;  %v14304_v0 = vpop.f32.mrb[7].mxu1 }
 0x64e   : > { %v2376_v1 = vsel %vm2369_vm3, %v2367_v63, -inf }
 0x64f   : > { %2377 = vmax.xlane.f32.xlu0 %v2376_v1  ;;  %v2361_v2 = vpop.f32.mrb[8].mxu1 }
 0x650   : > { %v2368_v3 = vmul.f32 0.17677669, %v2361_v2  ;;  %v14309_v4 = vpop.f32.mrb[9].mxu1 }
 0x652   : > { %v2379_v5 = vsel %vm2369_vm3, %v2368_v3, -inf }
 0x653   : > { %2380 = vmax.xlane.f32.xlu1 %v2379_v5 }
 0x6d6   : > { %v2372_v6 = vpop.xlane.xlu0 %2371 }
 0x6d7   : > { %v2382_v43 = vsub.f32 %v2365_v59, %v2372_v6 }
 0x6d8   : > { %v2375_v7 = vpop.xlane.xlu1 %2374 }
 0x6d9   : > { %v2386_v8 = vmul.f32 1.442695, %v2382_v43  ;;  %v2383_v9 = vsub.f32 %v2366_v30, %v2375_v7 }
 0x6db   : > { %16042 = vpow2.f32 %v2386_v8  ;;  %v2388_v10 = vmul.f32 1.442695, %v2383_v9 }
 0x6dc   : > { %v2378_v11 = vpop.xlane.xlu0 %2377 }
 0x6dd   : > { %16044 = vpow2.f32 %v2388_v10  ;;  %v2384_v12 = vsub.f32 %v2367_v63, %v2378_v11 }
 0x6df   : > { %v2390_v13 = vmul.f32 1.442695, %v2384_v12 }
 0x6e0   : > { %v2381_v23 = vpop.xlane.xlu1 %2380 }
 0x6e1   : > { %16046 = vpow2.f32 %v2390_v13  ;;  %v2385_v24 = vsub.f32 %v2368_v3, %v2381_v23 }
 0x6e3   : > { %v2392_v26 = vmul.f32 1.442695, %v2385_v24 }
 0x6e5   : > { %v16043_v14 = vpop.eup %16042  ;;  %16048 = vpow2.f32 %v2392_v26 }
 0x6e6   : > { %v2394_v15 = vsel %vm2369_vm3, %v16043_v14, 0.0 }
 0x6e7   : > { %v16045_v16 = vpop.eup %16044  ;;  %2395 = vadd.xlane.f32.xlu0 %v2394_v15 }
 0x6e8   : > { %v2397_v17 = vsel %vm2369_vm3, %v16045_v16, 0.0 }
 0x6e9   : > { %2398 = vadd.xlane.f32.xlu1 %v2397_v17 }
 0x6eb   : > { %v16047_v19 = vpop.eup %16046 }
 0x6ec   : > { %v2400_v22 = vsel %vm2369_vm3, %v16047_v19, 0.0 }
 0x6ed   : > { %2401 = vadd.xlane.f32.xlu0 %v2400_v22 }
 0x6ef   : > { %v16049_v27 = vpop.eup %16048 }
 0x6f0   : > { %v2403_v29 = vsel %vm2369_vm3, %v16049_v27, 0.0 }
 0x6fa   : > { %2796 = vrot.lane.b32.xlu1 %v17822_v49, %s17092_s14 }
 0x6fe   : > { %2716 = vrot.lane.b32.xlu1 %v17816_v46, %s17092_s14 }
 0x702   : > { %2794 = vrot.lane.b32.xlu1 %v17831_v53, %s17092_s14 }
 0x703   : > { %2718 = vrot.lane.b32.xlu0 %v17814_v42, %s17092_s14 }
 0x707   : > { %2874 = vrot.lane.b32.xlu0 %v17840_v55, %s17092_s14 }
 0x70b   : > { %2872 = vrot.lane.b32.xlu0 %v17852_v37, %s17092_s14 }
 0x726   : > { %2404 = vadd.xlane.f32.xlu1 %v2403_v29 }
 0x737   : > { %2952 = vrot.lane.b32.xlu1 %v17858_v56, %s17092_s14 }
 0x73b   : > { %2950 = vrot.lane.b32.xlu1 %v17868_v38, %s17092_s14 }
 0x774   : > { %v2396_v33 = vpop.xlane.xlu0 %2395 }
 0x775   : > { %16050 = vrcp.f32 %v2396_v33 }
 0x776   : > { %v2399_v35 = vpop.xlane.xlu1 %2398 }
 0x777   : > { %16052 = vrcp.f32 %v2399_v35 }
 0x77a   : > { %v2402_v36 = vpop.xlane.xlu0 %2401  ;;  %v2797_v59 = vpop.permute.xlu1 %2796 }
 0x77b   : > { %16054 = vrcp.f32 %v2402_v36 }
 0x77e   : > { %v2719_v52 = vpop.permute.xlu0 %2718  ;;  %v2717_v61 = vpop.permute.xlu1 %2716 }
 0x77f   : > { %v16051_v39 = vpop.eup %16050 }
 0x780   : > { %v2410_v40 = vmul.f32 %v16051_v39, %v16043_v14 }
 0x781   : > { %v16053_v41 = vpop.eup %16052 }
 0x782   : > { %14313 = vmatmul.mubr.msk.f32.vlgmr.msra.gmra.mrb[10].mxu1 %vm2414_vm4, %v2410_v40  ;;  %v2411_v48 = vmul.f32 %v16053_v41, %v16045_v16  ;;  %v2875_v60 = vpop.permute.xlu0 %2874  ;;  %v2795_v31 = vpop.permute.xlu1 %2794 }
 0x783   : > { %14316 = vmatpush3.msk.msra.mxu1 %vm2418_vm2, %v17906_v47  ;;  %14317 = vmatprep.mubr.msk.f32.mxu1 %vm17091_vm0, %v17090_v18 }
 0x784   : > { %14320 = vmatprep.subr.mxu1 %v17090_v18 }
 0x785   : > { %v16055_v51 = vpop.eup %16054 }
 0x786   : > { %14318 = vmatmul.mubr.msk.f32.vlgmr.msra.gmra.mrb[12].mxu1 %vm2414_vm4, %v2411_v48  ;;  %v2412_v58 = vmul.f32 %v16055_v51, %v16047_v19  ;;  %v2873_v30 = vpop.permute.xlu0 %2872 }
 0x787   : > { %14321 = vmatpush3.msk.msra.mxu1 %vm2418_vm2, %v17824_v50  ;;  %14322 = vmatprep.mubr.msk.f32.mxu1 %vm17091_vm0, %v17090_v18 }
 0x788   : > { %14330 = vmatprep.subr.mxu1 %v17090_v18 }
 0x78a   : > { %14323 = vmatmul.mubr.msk.f32.vlgmr.msra.gmra.mrb[14].mxu1 %vm2414_vm4, %v2412_v58 }
 0x78b   : > { %14332 = vmatprep.mubr.msk.f32.mxu1 %vm17091_vm0, %v17090_v18 }
 0x78e   : > { %14331 = vmatpush3.xpose.msk.msra.mxu1 %vm2068_vm1, %v2719_v52 }
 0x78f   : > { %14340 = vmatprep.subr.mxu1 %v17090_v18 }
 0x791   : > { %14333 = vmatmul.mubr.msk.f32.vlgmr.msra.gmra.mrb[16].mxu1 %vm2068_vm1, %v2717_v61 }
 0x792   : > { %14341 = vmatpush3.xpose.msk.msra.mxu1 %vm2068_vm1, %v2875_v60  ;;  %14342 = vmatprep.mubr.msk.f32.mxu1 %vm17091_vm0, %v17090_v18 }
 0x793   : > { %14350 = vmatprep.subr.mxu1 %v17090_v18 }
 0x795   : > { %14343 = vmatmul.mubr.msk.f32.vlgmr.msra.gmra.mrb[18].mxu1 %vm2068_vm1, %v2873_v30 }
 0x796   : > { %14352 = vmatprep.mubr.msk.f32.mxu1 %vm17091_vm0, %v17090_v18 }
 0x7b3   : > { %v2405_v62 = vpop.xlane.xlu1 %2404 }
 0x7b4   : > { %16056 = vrcp.f32 %v2405_v62 }
 0x7b7   : > { %v2953_v63 = vpop.permute.xlu1 %2952 }
 0x7bb   : > { %v2951_v0 = vpop.permute.xlu1 %2950 }
 0x7be   : > { %v16057_v44 = vpop.eup %16056 }
 0x7bf   : > { %v2413_v45 = vmul.f32 %v16057_v44, %v16049_v27 }
 0x7c1   : > { %14328 = vmatmul.mubr.msk.f32.vlgmr.msra.gmra.mrb[8].mxu0 %vm2414_vm4, %v2413_v45 }
 0x7c2   : > { %14336 = vmatpush3.xpose.msk.msra.mxu0 %vm2068_vm1, %v2797_v59  ;;  %14337 = vmatprep.mubr.msk.f32.mxu0 %vm17091_vm0, %v17090_v18 }
 0x7c3   : > { %14345 = vmatprep.subr.mxu0 %v17090_v18 }
 0x7c5   : > { %14338 = vmatmul.mubr.msk.f32.vlgmr.msra.gmra.mrb[10].mxu0 %vm2068_vm1, %v2795_v31 }
 0x7c6   : > { %14346 = vmatpush3.xpose.msk.msra.mxu0 %vm2068_vm1, %v2953_v63  ;;  %14347 = vmatprep.mubr.msk.f32.mxu0 %vm17091_vm0, %v17090_v18 }
 0x7c7   : > { %14355 = vmatprep.subr.mxu0 %v17090_v18 }
 0x7c9   : > { %14348 = vmatmul.mubr.msk.f32.vlgmr.msra.gmra.mrb[12].mxu0 %vm2068_vm1, %v2951_v0 }
 0x7ca   : > { %14357 = vmatprep.mubr.msk.f32.mxu0 %vm17091_vm0, %v17090_v18 }
 0x855   : > { %v17946_v1 = vpop.f32.mrb[10].mxu1 }
 0x856   : > { %v14314_v2 = vpop.f32.mrb[11].mxu1 }
 0x859   : > { %v17948_v3 = vpop.f32.mrb[12].mxu1 }
 0x85a   : > { %v14319_v4 = vpop.f32.mrb[13].mxu1 }
 0x85d   : > { %v17950_v5 = vpop.f32.mrb[14].mxu1 }
 0x85e   : > { %v14324_v6 = vpop.f32.mrb[15].mxu1 }
 0x864   : > { %v2790_v43 = vpop.f32.mrb[16].mxu1 }
 0x865   : > { %v3028_v7 = vmul.f32 0.17677669, %v2790_v43  ;;  %v14334_v8 = vpop.f32.mrb[17].mxu1 }
 0x867   : > { %v3032_v9 = vsel %vm2369_vm3, %v3028_v7, -inf }
 0x868   : > { %3033 = vmax.xlane.f32.xlu0 %v3032_v9  ;;  %v2946_v10 = vpop.f32.mrb[18].mxu1 }
 0x869   : > { %v3030_v11 = vmul.f32 0.17677669, %v2946_v10  ;;  %v14344_v12 = vpop.f32.mrb[19].mxu1 }
 0x86b   : > { %v3038_v13 = vsel %vm2369_vm3, %v3030_v11, -inf }
 0x86c   : > { %3039 = vmax.xlane.f32.xlu0 %v3038_v13 }
 0x894   : > { %v17954_v14 = vpop.f32.mrb[8].mxu0 }
 0x895   : > { %v14329_v15 = vpop.f32.mrb[9].mxu0 }
 0x898   : > { %v2868_v16 = vpop.f32.mrb[10].mxu0 }
 0x899   : > { %v3029_v17 = vmul.f32 0.17677669, %v2868_v16  ;;  %v14339_v19 = vpop.f32.mrb[11].mxu0 }
 0x89b   : > { %v3035_v22 = vsel %vm2369_vm3, %v3029_v17, -inf }
 0x89c   : > { %3036 = vmax.xlane.f32.xlu1 %v3035_v22  ;;  %v3024_v23 = vpop.f32.mrb[12].mxu0 }
 0x89d   : > { %v3031_v24 = vmul.f32 0.17677669, %v3024_v23  ;;  %v14349_v26 = vpop.f32.mrb[13].mxu0 }
 0x89f   : > { %v3041_v27 = vsel %vm2369_vm3, %v3031_v24, -inf }
 0x8a0   : > { %3042 = vmax.xlane.f32.xlu0 %v3041_v27 }
 0x8ad   : > { %3153 = vrot.lane.b32.xlu1 %v17906_v47, %s17092_s14 }
 0x8b1   : > { %3230 = vrot.lane.b32.xlu1 %v17824_v50, %s17092_s14 }
 0x8b5   : > { %3307 = vrot.lane.b32.xlu1 %v17838_v54, %s17092_s14 }
 0x8b6   : > { %3076 = vrot.lane.b32.xlu0 %v17871_v57, %s17092_s14 }
 0x8b9   : > { %3464 = vrot.lane.b32.xlu1 %v17822_v49, %s19590_s19 }
 0x8ba   : > { %3386 = vrot.lane.b32.xlu0 %v17814_v42, %s19590_s19 }
 0x8f5   : > { %v3034_v29 = vpop.xlane.xlu0 %3033 }
 0x8f6   : > { %v3044_v33 = vsub.f32 %v3028_v7, %v3034_v29 }
 0x8f8   : > { %v3048_v35 = vmul.f32 1.442695, %v3044_v33 }
 0x8f9   : > { %v3040_v36 = vpop.xlane.xlu0 %3039 }
 0x8fa   : > { %16058 = vpow2.f32 %v3048_v35  ;;  %v3046_v39 = vsub.f32 %v3030_v11, %v3040_v36 }
 0x8fc   : > { %v3052_v40 = vmul.f32 1.442695, %v3046_v39 }
 0x8fe   : > { %16060 = vpow2.f32 %v3052_v40 }
 0x904   : > { %v16059_v41 = vpop.eup %16058 }
 0x905   : > { %v3056_v48 = vsel %vm2369_vm3, %v16059_v41, 0.0 }
 0x906   : > { %3057 = vadd.xlane.f32.xlu0 %v3056_v48 }
 0x908   : > { %v16061_v51 = vpop.eup %16060 }
 0x909   : > { %v3062_v52 = vsel %vm2369_vm3, %v16061_v51, 0.0 }
 0x90a   : > { %3063 = vadd.xlane.f32.xlu0 %v3062_v52 }
 0x920   : > { %3384 = vrot.lane.b32.xlu0 %v17816_v46, %s19590_s19 }
 0x924   : > { %3542 = vrot.lane.b32.xlu0 %v17840_v55, %s19590_s19 }
 0x928   : > { %3540 = vrot.lane.b32.xlu0 %v17852_v37, %s19590_s19 }
 0x929   : > { %v3037_v58 = vpop.xlane.xlu1 %3036 }
 0x92a   : > { %v3045_v59 = vsub.f32 %v3029_v17, %v3037_v58 }
 0x92c   : > { %v3050_v60 = vmul.f32 1.442695, %v3045_v59  ;;  %3744 = vrot.lane.b32.xlu0 %v17871_v57, %s19590_s19 }
 0x92d   : > { %v3154_v61 = vpop.permute.xlu1 %3153  ;;  %v3043_v30 = vpop.xlane.xlu0 %3042 }
 0x92e   : > { %16062 = vpow2.f32 %v3050_v60  ;;  %14356 = vmatpush3.msk.msra.mxu0 %vm2418_vm2, %v3154_v61  ;;  %v3047_v45 = vsub.f32 %v3031_v24, %v3043_v30 }
 0x92f   : > { %14365 = vmatprep.subr.mxu0 %v17090_v18 }
 0x930   : > { %v3054_v63 = vmul.f32 1.442695, %v3047_v45 }
 0x931   : > { %v3077_v31 = vpop.permute.xlu0 %3076  ;;  %v3231_v10 = vpop.permute.xlu1 %3230 }
 0x932   : > { %14351 = vmatpush3.msk.msra.mxu1 %vm2418_vm2, %v3077_v31  ;;  %16064 = vpow2.f32 %v3054_v63 }
 0x933   : > { %14360 = vmatprep.subr.mxu1 %v17090_v18 }
 0x935   : > { %v3387_v4 = vpop.permute.xlu0 %3386  ;;  %v3308_v17 = vpop.permute.xlu1 %3307 }
 0x938   : > { %v16063_v62 = vpop.eup %16062 }
 0x939   : > { %v3059_v44 = vsel %vm2369_vm3, %v16063_v62, 0.0  ;;  %v3465_v19 = vpop.permute.xlu1 %3464 }
 0x93a   : > { %3060 = vadd.xlane.f32.xlu1 %v3059_v44 }
 0x93c   : > { %v16065_v0 = vpop.eup %16064 }
 0x93d   : > { %v3065_v2 = vsel %vm2369_vm3, %v16065_v0, 0.0 }
 0x94b   : > { %3462 = vrot.lane.b32.xlu1 %v17831_v53, %s19590_s19 }
 0x96f   : > { %3066 = vadd.xlane.f32.xlu1 %v3065_v2 }
 0x980   : > { %3620 = vrot.lane.b32.xlu1 %v17858_v56, %s19590_s19 }
 0x984   : > { %3618 = vrot.lane.b32.xlu1 %v17868_v38, %s19590_s19 }
 0x988   : > { %3821 = vrot.lane.b32.xlu1 %v17906_v47, %s19590_s19 }
 0x98c   : > { %3898 = vrot.lane.b32.xlu1 %v17824_v50, %s19590_s19 }
 0x990   : > { %3975 = vrot.lane.b32.xlu1 %v17838_v54, %s19590_s19 }
 0x993   : > { %v3058_v6 = vpop.xlane.xlu0 %3057 }
 0x994   : > { %16066 = vrcp.f32 %v3058_v6 }
 0x997   : > { %v3064_v43 = vpop.xlane.xlu0 %3063 }
 0x998   : > { %16068 = vrcp.f32 %v3064_v43 }
 0x99b   : > { %v3385_v8 = vpop.permute.xlu0 %3384 }
 0x99e   : > { %v16067_v7 = vpop.eup %16066 }
 0x99f   : > { %v3072_v9 = vmul.f32 %v16067_v7, %v16059_v41  ;;  %v3543_v13 = vpop.permute.xlu0 %3542 }
 0x9a1   : > { %14353 = vmatmul.mubr.msk.f32.vlgmr.msra.gmra.mrb[20].mxu1 %vm2414_vm4, %v3072_v9 }
 0x9a2   : > { %v16069_v11 = vpop.eup %16068  ;;  %14361 = vmatpush3.msk.msra.mxu1 %vm2418_vm2, %v3231_v10  ;;  %14362 = vmatprep.mubr.msk.f32.mxu1 %vm17091_vm0, %v17090_v18 }
 0x9a3   : > { %v3074_v12 = vmul.f32 %v16069_v11, %v16061_v51  ;;  %14370 = vmatprep.subr.mxu1 %v17090_v18  ;;  %v3541_v15 = vpop.permute.xlu0 %3540 }
 0x9a5   : > { %14363 = vmatmul.mubr.msk.f32.vlgmr.msra.gmra.mrb[22].mxu1 %vm2414_vm4, %v3074_v12 }
 0x9a6   : > { %14372 = vmatprep.mubr.msk.f32.mxu1 %vm17091_vm0, %v17090_v18 }
 0x9a7   : > { %v3745_v16 = vpop.permute.xlu0 %3744 }
 0x9a9   : > { %14371 = vmatpush3.xpose.msk.msra.mxu1 %vm2068_vm1, %v3387_v4 }
 0x9aa   : > { %14380 = vmatprep.subr.mxu1 %v17090_v18 }
 0x9ac   : > { %14373 = vmatmul.mubr.msk.f32.vlgmr.msra.gmra.mrb[24].mxu1 %vm2068_vm1, %v3385_v8 }
 0x9ad   : > { %14381 = vmatpush3.xpose.msk.msra.mxu1 %vm2068_vm1, %v3543_v13  ;;  %14382 = vmatprep.mubr.msk.f32.mxu1 %vm17091_vm0, %v17090_v18 }
 0x9ae   : > { %14390 = vmatprep.subr.mxu1 %v17090_v18 }
 0x9b0   : > { %14383 = vmatmul.mubr.msk.f32.vlgmr.msra.gmra.mrb[26].mxu1 %vm2068_vm1, %v3541_v15 }
 0x9b1   : > { %14391 = vmatpush3.msk.msra.mxu1 %vm2418_vm2, %v3745_v16  ;;  %14392 = vmatprep.mubr.msk.f32.mxu1 %vm17091_vm0, %v17090_v18 }
 0x9b2   : > { %14400 = vmatprep.subr.mxu1 %v17090_v18 }
 0x9c7   : > { %v3061_v22 = vpop.xlane.xlu1 %3060 }
 0x9c8   : > { %16070 = vrcp.f32 %v3061_v22 }
 0x9cb   : > { %v3463_v26 = vpop.permute.xlu1 %3462 }
 0x9d2   : > { %v16071_v23 = vpop.eup %16070 }
 0x9d3   : > { %v3073_v24 = vmul.f32 %v16071_v23, %v16063_v62 }
 0x9d5   : > { %14358 = vmatmul.mubr.msk.f32.vlgmr.msra.gmra.mrb[14].mxu0 %vm2414_vm4, %v3073_v24 }
 0x9d6   : > { %14366 = vmatpush3.msk.msra.mxu0 %vm2418_vm2, %v3308_v17  ;;  %14367 = vmatprep.mubr.msk.f32.mxu0 %vm17091_vm0, %v17090_v18 }
 0x9d7   : > { %14375 = vmatprep.subr.mxu0 %v17090_v18 }
 0x9fc   : > { %v3067_v27 = vpop.xlane.xlu1 %3066 }
 0x9fd   : > { %16072 = vrcp.f32 %v3067_v27 }
 0xa00   : > { %v3621_v29 = vpop.permute.xlu1 %3620 }
 0xa04   : > { %v3619_v36 = vpop.permute.xlu1 %3618 }
 0xa07   : > { %v16073_v33 = vpop.eup %16072 }
 0xa08   : > { %v3075_v35 = vmul.f32 %v16073_v33, %v16065_v0  ;;  %v3822_v39 = vpop.permute.xlu1 %3821 }
 0xa0a   : > { %14368 = vmatmul.mubr.msk.f32.vlgmr.msra.gmra.mrb[16].mxu0 %vm2414_vm4, %v3075_v35 }
 0xa0b   : > { %14376 = vmatpush3.xpose.msk.msra.mxu0 %vm2068_vm1, %v3465_v19  ;;  %14377 = vmatprep.mubr.msk.f32.mxu0 %vm17091_vm0, %v17090_v18 }
 0xa0c   : > { %14385 = vmatprep.subr.mxu0 %v17090_v18 }
 0xa0e   : > { %14378 = vmatmul.mubr.msk.f32.vlgmr.msra.gmra.mrb[18].mxu0 %vm2068_vm1, %v3463_v26 }
 0xa0f   : > { %14386 = vmatpush3.xpose.msk.msra.mxu0 %vm2068_vm1, %v3621_v29  ;;  %14387 = vmatprep.mubr.msk.f32.mxu0 %vm17091_vm0, %v17090_v18 }
 0xa10   : > { %14395 = vmatprep.subr.mxu0 %v17090_v18 }
 0xa12   : > { %14388 = vmatmul.mubr.msk.f32.vlgmr.msra.gmra.mrb[20].mxu0 %vm2068_vm1, %v3619_v36 }
 0xa13   : > { %14396 = vmatpush3.msk.msra.mxu0 %vm2418_vm2, %v3822_v39  ;;  %14397 = vmatprep.mubr.msk.f32.mxu0 %vm17091_vm0, %v17090_v18 }
 0xa14   : > { %14405 = vmatprep.subr.mxu0 %v17090_v18 }
 0xa74   : > { %v18038_v40 = vpop.f32.mrb[20].mxu1 }
 0xa75   : > { %v14354_v41 = vpop.f32.mrb[21].mxu1 }
 0xa78   : > { %v18040_v48 = vpop.f32.mrb[22].mxu1 }
 0xa79   : > { %v14364_v51 = vpop.f32.mrb[23].mxu1 }
 0xa7f   : > { %v3458_v52 = vpop.f32.mrb[24].mxu1 }
 0xa80   : > { %v3696_v58 = vmul.f32 0.17677669, %v3458_v52  ;;  %v14374_v59 = vpop.f32.mrb[25].mxu1 }
 0xa82   : > { %v3700_v60 = vsel %vm2369_vm3, %v3696_v58, -inf }
 0xa83   : > { %3701 = vmax.xlane.f32.xlu0 %v3700_v60  ;;  %v3614_v61 = vpop.f32.mrb[26].mxu1 }
 0xa84   : > { %v3698_v30 = vmul.f32 0.17677669, %v3614_v61  ;;  %v14384_v31 = vpop.f32.mrb[27].mxu1 }
 0xa86   : > { %v3706_v62 = vsel %vm2369_vm3, %v3698_v30, -inf }
 0xa87   : > { %3707 = vmax.xlane.f32.xlu0 %v3706_v62 }
 0xaa8   : > { %v18044_v44 = vpop.f32.mrb[14].mxu0 }
 0xaa9   : > { %v14359_v45 = vpop.f32.mrb[15].mxu0 }
 0xadd   : > { %v18046_v63 = vpop.f32.mrb[16].mxu0 }
 0xade   : > { %v14369_v0 = vpop.f32.mrb[17].mxu0 }
 0xae1   : > { %v3536_v2 = vpop.f32.mrb[18].mxu0 }
 0xae2   : > { %v3697_v4 = vmul.f32 0.17677669, %v3536_v2  ;;  %v14379_v6 = vpop.f32.mrb[19].mxu0 }
 0xae4   : > { %v3703_v43 = vsel %vm2369_vm3, %v3697_v4, -inf }
 0xae5   : > { %3704 = vmax.xlane.f32.xlu1 %v3703_v43  ;;  %v3692_v7 = vpop.f32.mrb[20].mxu0 }
 0xae6   : > { %v3699_v8 = vmul.f32 0.17677669, %v3692_v7  ;;  %v14389_v9 = vpop.f32.mrb[21].mxu0 }
 0xae8   : > { %v3709_v10 = vsel %vm2369_vm3, %v3699_v8, -inf }
 0xae9   : > { %3710 = vmax.xlane.f32.xlu0 %v3709_v10 }
 0xaf6   : > { %4132 = vrot.lane.b32.xlu1 %v17822_v49, %s17094_s7 }
 0xafa   : > { %4130 = vrot.lane.b32.xlu1 %v17831_v53, %s17094_s7 }
 0xaff   : > { %4054 = vrot.lane.b32.xlu0 %v17814_v42, %s17094_s7  ;;  %v3899_v42 = vpop.permute.xlu1 %3898 }
 0xb03   : > { %v3976_v23 = vpop.permute.xlu1 %3975 }
 0xb10   : > { %v3702_v11 = vpop.xlane.xlu0 %3701 }
 0xb11   : > { %v3712_v12 = vsub.f32 %v3696_v58, %v3702_v11 }
 0xb13   : > { %v3716_v13 = vmul.f32 1.442695, %v3712_v12 }
 0xb14   : > { %v3708_v17 = vpop.xlane.xlu0 %3707 }
 0xb15   : > { %16074 = vpow2.f32 %v3716_v13  ;;  %v3714_v19 = vsub.f32 %v3698_v30, %v3708_v17 }
 0xb17   : > { %v3720_v49 = vmul.f32 1.442695, %v3714_v19 }
 0xb19   : > { %16076 = vpow2.f32 %v3720_v49 }
 0xb1f   : > { %v16075_v15 = vpop.eup %16074 }
 0xb20   : > { %v3724_v16 = vsel %vm2369_vm3, %v16075_v15, 0.0 }
 0xb21   : > { %3725 = vadd.xlane.f32.xlu0 %v3724_v16 }
 0xb23   : > { %v16077_v22 = vpop.eup %16076 }
 0xb24   : > { %v3730_v53 = vsel %vm2369_vm3, %v16077_v22, 0.0 }
 0xb37   : > { %4052 = vrot.lane.b32.xlu0 %v17816_v46, %s17094_s7 }
 0xb56   : > { %3731 = vadd.xlane.f32.xlu0 %v3730_v53 }
 0xb6c   : > { %4210 = vrot.lane.b32.xlu0 %v17840_v55, %s17094_s7 }
 0xb70   : > { %4208 = vrot.lane.b32.xlu0 %v17852_v37, %s17094_s7 }
 0xb72   : > { %v3705_v24 = vpop.xlane.xlu1 %3704 }
 0xb73   : > { %v3713_v26 = vsub.f32 %v3697_v4, %v3705_v24 }
 0xb75   : > { %v3718_v27 = vmul.f32 1.442695, %v3713_v26 }
 0xb76   : > { %v3711_v33 = vpop.xlane.xlu0 %3710  ;;  %v4133_v30 = vpop.permute.xlu1 %4132 }
 0xb77   : > { %16078 = vpow2.f32 %v3718_v27  ;;  %v3715_v35 = vsub.f32 %v3699_v8, %v3711_v33 }
 0xb79   : > { %v3722_v36 = vmul.f32 1.442695, %v3715_v35 }
 0xb7a   : > { %v4055_v55 = vpop.permute.xlu0 %4054  ;;  %v4131_v31 = vpop.permute.xlu1 %4130 }
 0xb7b   : > { %16080 = vpow2.f32 %v3722_v36 }
 0xb81   : > { %v16079_v46 = vpop.eup %16078 }
 0xb82   : > { %v3727_v29 = vsel %vm2369_vm3, %v16079_v46, 0.0 }
 0xb83   : > { %3728 = vadd.xlane.f32.xlu1 %v3727_v29 }
 0xb85   : > { %v16081_v41 = vpop.eup %16080 }
 0xb86   : > { %v3733_v37 = vsel %vm2369_vm3, %v16081_v41, 0.0 }
 0xb94   : > { %4288 = vrot.lane.b32.xlu1 %v17858_v56, %s17094_s7 }
 0xbae   : > { %v3726_v39 = vpop.xlane.xlu0 %3725 }
 0xbaf   : > { %16082 = vrcp.f32 %v3726_v39 }
 0xbb2   : > { %v4053_v56 = vpop.permute.xlu0 %4052 }
 0xbb8   : > { %3734 = vadd.xlane.f32.xlu1 %v3733_v37 }
 0xbb9   : > { %v16083_v51 = vpop.eup %16082 }
 0xbba   : > { %v3740_v52 = vmul.f32 %v16083_v51, %v16075_v15 }
 0xbbc   : > { %14393 = vmatmul.mubr.msk.f32.vlgmr.msra.gmra.mrb[28].mxu1 %vm2414_vm4, %v3740_v52 }
 0xbbd   : > { %14401 = vmatpush3.msk.msra.mxu1 %vm2418_vm2, %v3899_v42  ;;  %14402 = vmatprep.mubr.msk.f32.mxu1 %vm17091_vm0, %v17090_v18 }
 0xbbe   : > { %14410 = vmatprep.subr.mxu1 %v17090_v18 }
 0xbc9   : > { %4286 = vrot.lane.b32.xlu1 %v17868_v38, %s17094_s7 }
 0xbe3   : > { %v3732_v58 = vpop.xlane.xlu0 %3731 }
 0xbe4   : > { %16084 = vrcp.f32 %v3732_v58 }
 0xbe7   : > { %v4211_v61 = vpop.permute.xlu0 %4210 }
 0xbeb   : > { %v4209_v38 = vpop.permute.xlu0 %4208 }
 0xbee   : > { %v16085_v59 = vpop.eup %16084 }
 0xbef   : > { %v3742_v60 = vmul.f32 %v16085_v59, %v16077_v22 }
 0xbf1   : > { %14403 = vmatmul.mubr.msk.f32.vlgmr.msra.gmra.mrb[30].mxu1 %vm2414_vm4, %v3742_v60 }
 0xbf2   : > { %14411 = vmatpush3.xpose.msk.msra.mxu1 %vm2068_vm1, %v4055_v55  ;;  %14412 = vmatprep.mubr.msk.f32.mxu1 %vm17091_vm0, %v17090_v18 }
 0xbf3   : > { %14420 = vmatprep.subr.mxu1 %v17090_v18 }
 0xbf5   : > { %14413 = vmatmul.mubr.msk.f32.vlgmr.msra.gmra.mrb[32].mxu1 %vm2068_vm1, %v4053_v56 }
 0xbf6   : > { %14421 = vmatpush3.xpose.msk.msra.mxu1 %vm2068_vm1, %v4211_v61  ;;  %14422 = vmatprep.mubr.msk.f32.mxu1 %vm17091_vm0, %v17090_v18 }
 0xbf7   : > { %14430 = vmatprep.subr.mxu1 %v17090_v18 }
 0xbf9   : > { %14423 = vmatmul.mubr.msk.f32.vlgmr.msra.gmra.mrb[34].mxu1 %vm2068_vm1, %v4209_v38 }
 0xbfa   : > { %14432 = vmatprep.mubr.msk.f32.mxu1 %vm17091_vm0, %v17090_v18 }
 0xc10   : > { %v3729_v62 = vpop.xlane.xlu1 %3728 }
 0xc11   : > { %16086 = vrcp.f32 %v3729_v62 }
 0xc14   : > { %v4289_v2 = vpop.permute.xlu1 %4288 }
 0xc1b   : > { %v16087_v45 = vpop.eup %16086 }
 0xc1c   : > { %v3741_v0 = vmul.f32 %v16087_v45, %v16079_v46 }
 0xc1e   : > { %14398 = vmatmul.mubr.msk.f32.vlgmr.msra.gmra.mrb[22].mxu0 %vm2414_vm4, %v3741_v0 }
 0xc1f   : > { %14406 = vmatpush3.msk.msra.mxu0 %vm2418_vm2, %v3976_v23  ;;  %14407 = vmatprep.mubr.msk.f32.mxu0 %vm17091_vm0, %v17090_v18 }
 0xc20   : > { %14415 = vmatprep.subr.mxu0 %v17090_v18 }
 0xc45   : > { %v3735_v4 = vpop.xlane.xlu1 %3734 }
 0xc46   : > { %16088 = vrcp.f32 %v3735_v4 }
 0xc49   : > { %v4287_v7 = vpop.permute.xlu1 %4286 }
 0xc50   : > { %v16089_v6 = vpop.eup %16088 }
 0xc51   : > { %v3743_v43 = vmul.f32 %v16089_v6, %v16081_v41 }
 0xc53   : > { %14408 = vmatmul.mubr.msk.f32.vlgmr.msra.gmra.mrb[24].mxu0 %vm2414_vm4, %v3743_v43 }
 0xc54   : > { %14416 = vmatpush3.xpose.msk.msra.mxu0 %vm2068_vm1, %v4133_v30  ;;  %14417 = vmatprep.mubr.msk.f32.mxu0 %vm17091_vm0, %v17090_v18 }
 0xc55   : > { %14425 = vmatprep.subr.mxu0 %v17090_v18 }
 0xc57   : > { %14418 = vmatmul.mubr.msk.f32.vlgmr.msra.gmra.mrb[26].mxu0 %vm2068_vm1, %v4131_v31 }
 0xc58   : > { %14426 = vmatpush3.xpose.msk.msra.mxu0 %vm2068_vm1, %v4289_v2  ;;  %14427 = vmatprep.mubr.msk.f32.mxu0 %vm17091_vm0, %v17090_v18 }
 0xc59   : > { %14435 = vmatprep.subr.mxu0 %v17090_v18 }
 0xc5b   : > { %14428 = vmatmul.mubr.msk.f32.vlgmr.msra.gmra.mrb[28].mxu0 %vm2068_vm1, %v4287_v7 }
 0xc5c   : > { %14437 = vmatprep.mubr.msk.f32.mxu0 %vm17091_vm0, %v17090_v18 }
 0xc8f   : > { %v3817_v8 = vpop.f32.mrb[28].mxu1 }
 0xc90   : > { %v14394_v9 = vpop.f32.mrb[29].mxu1 }
 0xcc4   : > { %v3971_v10 = vpop.f32.mrb[30].mxu1 }
 0xcc5   : > { %v14404_v11 = vpop.f32.mrb[31].mxu1 }
 0xcc8   : > { %v4126_v12 = vpop.f32.mrb[32].mxu1 }
 0xcc9   : > { %v4364_v13 = vmul.f32 0.17677669, %v4126_v12  ;;  %v14414_v15 = vpop.f32.mrb[33].mxu1 }
 0xccb   : > { %v4368_v16 = vsel %vm2369_vm3, %v4364_v13, -inf }
 0xccc   : > { %4369 = vmax.xlane.f32.xlu0 %v4368_v16  ;;  %v4282_v17 = vpop.f32.mrb[34].mxu1 }
 0xccd   : > { %v4366_v19 = vmul.f32 0.17677669, %v4282_v17  ;;  %v14424_v49 = vpop.f32.mrb[35].mxu1 }
 0xcce   : > { %v1598_v49 = vld [vmem:[%s19670_s10 + $0x8] sm:$0xff] }
 0xccf   : > { %v4374_v22 = vsel %vm2369_vm3, %v4366_v19, -inf }
 0xcd0   : > { %4375 = vmax.xlane.f32.xlu0 %v4374_v22  ;;  %v1599_v22 = vld [vmem:[%s19670_s10 + $0x10] sm:$0xff] }
 0xcf1   : > { %v3894_v53 = vpop.f32.mrb[22].mxu0 }
 0xcf2   : > { %v14399_v42 = vpop.f32.mrb[23].mxu0 }
 0xcf3   : > { %v1600_v42 = vld [vmem:[%s19670_s10 + $0x18] sm:$0xff] }
 0xd26   : > { %v4048_v23 = vpop.f32.mrb[24].mxu0 }
 0xd27   : > { %v14409_v24 = vpop.f32.mrb[25].mxu0 }
 0xd28   : > { %v1601_v24 = vld [vmem:[%s19670_s10 + $0x20] sm:$0xff] }
 0xd2a   : > { %v4204_v26 = vpop.f32.mrb[26].mxu0 }
 0xd2b   : > { %v4365_v27 = vmul.f32 0.17677669, %v4204_v26  ;;  %v14419_v46 = vpop.f32.mrb[27].mxu0  ;;  %v1602_v26 = vld [vmem:[%s19670_s10 + $0x28] sm:$0xff] }
 0xd2c   : > { %v15151_v46 = vpack.c.bf16 %v1602_v26, %v1601_v24  ;;  %v1757_v24 = vld [vmem:[#allocation29 + $0x8] sm:$0xff]  ;;  %v1759_v26 = vld [vmem:[#allocation29 + $0x18] sm:$0xff] }
 0xd2d   : > { %v4371_v29 = vsel %vm2369_vm3, %v4365_v27, -inf }
 0xd2e   : > { %4372 = vmax.xlane.f32.xlu1 %v4371_v29  ;;  %v4360_v33 = vpop.f32.mrb[28].mxu0 }
 0xd2f   : > { %v4367_v35 = vmul.f32 0.17677669, %v4360_v33  ;;  %v14429_v36 = vpop.f32.mrb[29].mxu0  ;;  %v1603_v33 = vld [vmem:[%s19670_s10 + $0x30] sm:$0xff] }
 0xd31   : > { %v4377_v55 = vsel %vm2369_vm3, %v4367_v35, -inf }
 0xd32   : > { %4378 = vmax.xlane.f32.xlu0 %v4377_v55 }
 0xd59   : > { %v4370_v39 = vpop.xlane.xlu0 %4369 }
 0xd5a   : > { %v4380_v41 = vsub.f32 %v4364_v13, %v4370_v39 }
 0xd5c   : > { %v4384_v37 = vmul.f32 1.442695, %v4380_v41  ;;  %v1605_v41 = vld [vmem:[%s19670_s10 + $0x40] sm:$0xff] }
 0xd5d   : > { %v4376_v51 = vpop.xlane.xlu0 %4375 }
 0xd5e   : > { %16090 = vpow2.f32 %v4384_v37  ;;  %v4382_v52 = vsub.f32 %v4366_v19, %v4376_v51  ;;  %v1597_v19 = vld [vmem:[%s19670_s10] sm:$0xff]  ;;  %v1606_v37 = vld [vmem:[%s19670_s10 + $0x48] sm:$0xff] }
 0xd5f   : > { %v15159_v51 = vpack.c.bf16 %v1606_v37, %v1605_v41  ;;  %v1762_v41 = vld [vmem:[#allocation29 + $0x30] sm:$0xff]  ;;  %v1765_v37 = vld [vmem:[#allocation29 + $0x48] sm:$0xff] }
 0xd60   : > { %v4388_v56 = vmul.f32 1.442695, %v4382_v52  ;;  %v1607_v52 = vld [vmem:[%s19670_s10 + $0x50] sm:$0xff] }
 0xd62   : > { %16092 = vpow2.f32 %v4388_v56  ;;  %v1608_v56 = vld [vmem:[%s19670_s10 + $0x58] sm:$0xff] }
 0xd68   : > { %v16091_v58 = vpop.eup %16090 }
 0xd69   : > { %v4392_v59 = vsel %vm2369_vm3, %v16091_v58, 0.0 }
 0xd6a   : > { %4393 = vadd.xlane.f32.xlu0 %v4392_v59  ;;  %v1609_v59 = vld [vmem:[%s19670_s10 + $0x60] sm:$0xff] }
 0xd6c   : > { %v16093_v60 = vpop.eup %16092 }
 0xd6d   : > { %v4398_v61 = vsel %vm2369_vm3, %v16093_v60, 0.0 }
 0xd6e   : > { %4399 = vadd.xlane.f32.xlu0 %v4398_v61 }
 0xd84   : > { %4412 = vrot.lane.b32.xlu0 %v17871_v57, %s17094_s7 }
 0xd88   : > { %4724 = vrot.lane.b32.xlu0 %v18038_v40, %s17094_s7 }
 0xd8c   : > { %4728 = vrot.lane.b32.xlu0 %v18040_v48, %s17094_s7 }
 0xd90   : > { %4740 = vrot.lane.b32.xlu0 %v3817_v8, %s19590_s19 }
 0xd94   : > { %4744 = vrot.lane.b32.xlu0 %v3971_v10, %s19590_s19 }
 0xdbb   : > { %v4373_v38 = vpop.xlane.xlu1 %4372 }
 0xdbc   : > { %v4381_v30 = vsub.f32 %v4365_v27, %v4373_v38  ;;  %v1611_v38 = vld [vmem:[%s19670_s10 + $0x70] sm:$0xff] }
 0xdbe   : > { %v4386_v31 = vmul.f32 1.442695, %v4381_v30  ;;  %v1612_v30 = vld [vmem:[%s19670_s10 + $0x78] sm:$0xff] }
 0xdbf   : > { %v4379_v57 = vpop.xlane.xlu0 %4378 }
 0xdc0   : > { %16094 = vpow2.f32 %v4386_v31  ;;  %v4383_v40 = vsub.f32 %v4367_v35, %v4379_v57  ;;  %v1604_v35 = vld [vmem:[%s19670_s10 + $0x38] sm:$0xff]  ;;  %v15171_v31 = vpack.c.bf16 %v1612_v30, %v1611_v38 }
 0xdc1   : > { %v15155_v55 = vpack.c.bf16 %v1604_v35, %v1603_v33  ;;  %v1761_v33 = vld [vmem:[#allocation29 + $0x28] sm:$0xff]  ;;  %v1763_v35 = vld [vmem:[#allocation29 + $0x38] sm:$0xff] }
 0xdc2   : > { %v4390_v48 = vmul.f32 1.442695, %v4383_v40 }
 0xdc4   : > { %16096 = vpow2.f32 %v4390_v48 }
 0xdca   : > { %v16095_v62 = vpop.eup %16094 }
 0xdcb   : > { %v4395_v45 = vsel %vm2369_vm3, %v16095_v62, 0.0 }
 0xdcc   : > { %4396 = vadd.xlane.f32.xlu1 %v4395_v45 }
 0xdce   : > { %v16097_v6 = vpop.eup %16096 }
 0xddd   : > { %4489 = vrot.lane.b32.xlu1 %v17906_v47, %s17094_s7  ;;  %v4401_v47 = vsel %vm2369_vm3, %v16097_v6, 0.0 }
 0xde1   : > { %4566 = vrot.lane.b32.xlu1 %v17824_v50, %s17094_s7 }
 0xdf7   : > { %v4394_v0 = vpop.xlane.xlu0 %4393 }
 0xdf8   : > { %16098 = vrcp.f32 %v4394_v0 }
 0xdfb   : > { %v4400_v2 = vpop.xlane.xlu0 %4399 }
 0xdfc   : > { %16100 = vrcp.f32 %v4400_v2 }
 0xdff   : > { %v4413_v4 = vpop.permute.xlu0 %4412 }
 0xe00   : > { %14431 = vmatpush3.msk.msra.mxu1 %vm2418_vm2, %v4413_v4 }
 0xe01   : > { %14440 = vmatprep.subr.mxu1 %v17090_v18 }
 0xe02   : > { %v16099_v43 = vpop.eup %16098 }
 0xe03   : > { %v4408_v7 = vmul.f32 %v16099_v43, %v16091_v58  ;;  %v15163_v58 = vpack.c.bf16 %v1608_v56, %v1607_v52  ;;  %v4725_v57 = vpop.permute.xlu0 %4724  ;;  %v1764_v52 = vld [vmem:[#allocation29 + $0x40] sm:$0xff]  ;;  %v1766_v56 = vld [vmem:[#allocation29 + $0x50] sm:$0xff] }
 0xe05   : > { %14433 = vmatmul.mubr.msk.f32.vlgmr.msra.gmra.mrb[36].mxu1 %vm2414_vm4, %v4408_v7  ;;  %4402 = vadd.xlane.f32.xlu1 %v4401_v47  ;;  %v4768_v47 = vsel %vm2068_vm1, %v17946_v1, %v4725_v57  ;;  %v1769_v57 = vld [vmem:[#allocation29 + $0x68] sm:$0xff] }
 0xe06   : > { %14442 = vmatprep.mubr.msk.f32.mxu1 %vm17091_vm0, %v17090_v18  ;;  %v16101_v9 = vpop.eup %16100 }
 0xe07   : > { %v4410_v10 = vmul.f32 %v16101_v9, %v16093_v60  ;;  %v1610_v60 = vld [vmem:[%s19670_s10 + $0x68] sm:$0xff]  ;;  %v4729_v48 = vpop.permute.xlu0 %4728 }
 0xe08   : > { %v15167_v61 = vpack.c.bf16 %v1610_v60, %v1609_v59 }
 0xe0b   : > { %v4741_v2 = vpop.permute.xlu0 %4740 }
 0xe16   : > { %4643 = vrot.lane.b32.xlu1 %v17838_v54, %s17094_s7 }
 0xe1a   : > { %4726 = vrot.lane.b32.xlu1 %v18044_v44, %s17094_s7 }
 0xe1e   : > { %4730 = vrot.lane.b32.xlu1 %v18046_v63, %s17094_s7 }
 0xe22   : > { %4742 = vrot.lane.b32.xlu1 %v3894_v53, %s19590_s19  ;;  %v15143_v53 = vpack.c.bf16 %v1598_v49, %v1597_v19  ;;  %v13566_v49 = vld [vmem:[#allocation16] ss:$0 sm:$0xff] }
 0xe26   : > { %4746 = vrot.lane.b32.xlu1 %v4048_v23, %s19590_s19  ;;  %v15147_v23 = vpack.c.bf16 %v1600_v42, %v1599_v22 }
 0xe59   : > { %v4397_v50 = vpop.xlane.xlu1 %4396 }
 0xe5a   : > { %16102 = vrcp.f32 %v4397_v50 }
 0xe5d   : > { %v4490_v8 = vpop.permute.xlu1 %4489 }
 0xe5e   : > { %14436 = vmatpush3.msk.msra.mxu0 %vm2418_vm2, %v4490_v8  ;;  %v4773_v8 = vsel %vm4772_vm5, %v4768_v47, %v4741_v2  ;;  %v1770_v2 = vld [vmem:[#allocation29 + $0x70] sm:$0xff]  ;;  %v1772_v47 = vld [vmem:[#allocation29 + $0x80] sm:$0xff] }
 0xe5f   : > { %14445 = vmatprep.subr.mxu0 %v17090_v18 }
 0xe61   : > { %v4567_v54 = vpop.permute.xlu1 %4566 }
 0xe62   : > { %14441 = vmatpush3.msk.msra.mxu1 %vm2418_vm2, %v4567_v54 }
 0xe63   : > { %14443 = vmatmul.mubr.msk.f32.vlgmr.msra.gmra.mrb[38].mxu1 %vm2414_vm4, %v4410_v10  ;;  %15144 = vmatprep.subr.bf16.mxu1 %v15143_v53 }
 0xe64   : > { %v16103_v44 = vpop.eup %16102  ;;  %15146 = vmatpush3.bf16.msra.mxu1 %v15143_v53 }
 0xe65   : > { %v4409_v63 = vmul.f32 %v16103_v44, %v16095_v62  ;;  %15148 = vmatprep.subr.bf16.mxu1 %v15147_v23 }
 0xe67   : > { %14438 = vmatmul.mubr.msk.f32.vlgmr.msra.gmra.mrb[30].mxu0 %vm2414_vm4, %v4409_v63 }
 0xe68   : > { %14447 = vmatprep.mubr.msk.f32.mxu0 %vm17091_vm0, %v17090_v18  ;;  %15150 = vmatpush3.bf16.msra.mxu1 %v15147_v23 }
 0xe69   : > { %15152 = vmatprep.subr.bf16.mxu1 %v15151_v46 }
 0xe6c   : > { %15154 = vmatpush3.bf16.msra.mxu1 %v15151_v46  ;;  %v15175_v46 = vpack.c.bf16 %v1759_v26, %v1757_v24  ;;  %v1790_v26 = vld [vmem:[#allocation31 + $0x8] sm:$0xff] }
 0xe6d   : > { %15156 = vmatprep.subr.bf16.mxu1 %v15155_v55 }
 0xe70   : > { %15158 = vmatpush3.bf16.msra.mxu1 %v15155_v55  ;;  %v15179_v55 = vpack.c.bf16 %v1763_v35, %v1761_v33 }
 0xe71   : > { %15160 = vmatprep.subr.bf16.mxu1 %v15159_v51 }
 0xe74   : > { %15162 = vmatpush3.bf16.msra.mxu1 %v15159_v51  ;;  %v1767_v51 = vld [vmem:[#allocation29 + $0x58] sm:$0xff] }
 0xe75   : > { %15164 = vmatprep.subr.bf16.mxu1 %v15163_v58 }
 0xe78   : > { %15166 = vmatpush3.bf16.msra.mxu1 %v15163_v58  ;;  %v15185_v58 = vpack.c.bf16 %v1766_v56, %v1764_v52 }
 0xe79   : > { %15168 = vmatprep.subr.bf16.mxu1 %v15167_v61 }
 0xe7c   : > { %15170 = vmatpush3.bf16.msra.mxu1 %v15167_v61 }
 0xe7d   : > { %15172 = vmatprep.subr.bf16.mxu1 %v15171_v31 }
 0xe80   : > { %15174 = vmatpush3.bf16.msra.mxu1 %v15171_v31 }
 0xe92   : > { %v4403_v11 = vpop.xlane.xlu1 %4402 }
 0xe93   : > { %16104 = vrcp.f32 %v4403_v11 }
 0xe96   : > { %v4644_v12 = vpop.permute.xlu1 %4643 }
 0xe97   : > { %14446 = vmatpush3.msk.msra.mxu0 %vm2418_vm2, %v4644_v12  ;;  %v4770_v12 = vsel %vm2068_vm1, %v17950_v5, %v4729_v48 }
 0xe98   : > { %15176 = vmatprep.subr.bf16.mxu0 %v15175_v46 }
 0xe9a   : > { %v4727_v40 = vpop.permute.xlu1 %4726 }
 0xe9b   : > { %v4769_v50 = vsel %vm2068_vm1, %v17948_v3, %v4727_v40  ;;  %v1771_v40 = vld [vmem:[#allocation29 + $0x78] sm:$0xff] }
 0xe9c   : > { %v15187_v48 = vpack.c.bf16 %v1771_v40, %v1769_v57  ;;  %v1809_v40 = vld [vmem:[#allocation31 + $0xa0] sm:$0xff] }
 0xe9d   : > { %v16105_v13 = vpop.eup %16104 }
 0xe9e   : > { %v4411_v15 = vmul.f32 %v16105_v13, %v16097_v6  ;;  %v4731_v0 = vpop.permute.xlu1 %4730  ;;  %v4745_v6 = vpop.permute.xlu0 %4744 }
 0xe9f   : > { %v4771_v1 = vsel %vm2068_vm1, %v17954_v14, %v4731_v0  ;;  %v4775_v3 = vsel %vm4772_vm5, %v4770_v12, %v4745_v6  ;;  %v1768_v0 = vld [vmem:[#allocation29 + $0x60] sm:$0xff]  ;;  %v1773_v6 = vld [vmem:[#allocation29 + $0x88] sm:$0xff]  ;;  %v1783_v12 = vld [vmem:[#allocation29 + $0xd8] sm:$0xff] }
 0xea0   : > { %14448 = vmatmul.mubr.msk.f32.vlgmr.msra.gmra.mrb[32].mxu0 %vm2414_vm4, %v4411_v15 }
 0xea1   : > { %4983 = vmatprep.mubr.f32.mxu0 %v17090_v18 }
 0xea2   : > { %v4743_v4 = vpop.permute.xlu1 %4742 }
 0xea3   : > { %v4774_v9 = vsel %vm4772_vm5, %v4769_v50, %v4743_v4  ;;  %v15189_v4 = vpack.c.bf16 %v1770_v2, %v1768_v0  ;;  %v1774_v50 = vld [vmem:[#allocation29 + $0x90] sm:$0xff]  ;;  %v1793_v0 = vld [vmem:[#allocation31 + $0x20] sm:$0xff]  ;;  %v1794_v2 = vld [vmem:[#allocation31 + $0x28] sm:$0xff] }
 0xea6   : > { %v4747_v43 = vpop.permute.xlu1 %4746 }
 0xea7   : > { %v4776_v13 = vsel %vm4772_vm5, %v4771_v1, %v4747_v43  ;;  %v1775_v43 = vld [vmem:[#allocation29 + $0x98] sm:$0xff] }
 0xed8   : > { %v4485_v16 = vpop.f32.mrb[36].mxu1 }
 0xed9   : > { %4756 = vrot.lane.b32.xlu0 %v4485_v16, %s17092_s14  ;;  %v14434_v17 = vpop.f32.mrb[37].mxu1 }
 0xf36   : > { %v4639_v27 = vpop.f32.mrb[38].mxu1 }
 0xf37   : > { %4760 = vrot.lane.b32.xlu0 %v4639_v27, %s17092_s14  ;;  %v14444_v29 = vpop.f32.mrb[39].mxu1  ;;  %v1756_v27 = vld [vmem:[#allocation29] sm:$0xff] }
 0xf38   : > { %v1758_v29 = vld [vmem:[#allocation29 + $0x10] sm:$0xff] }
 0xf3a   : > { %v4562_v36 = vpop.f32.mrb[30].mxu0 }
 0xf3b   : > { %v14439_v39 = vpop.f32.mrb[31].mxu0  ;;  %4758 = vrot.lane.b32.xlu1 %v4562_v36, %s17092_s14  ;;  %v15177_v36 = vpack.c.bf16 %v1758_v29, %v1756_v27 }
 0xf3c   : > { %v1760_v39 = vld [vmem:[#allocation29 + $0x20] sm:$0xff] }
 0xf3d   : > { %15178 = vmatpush1.bf16.msra.mxu0 %v15177_v36 }
 0xf3e   : > { %15180 = vmatprep.subr.bf16.mxu0 %v15179_v55 }
 0xf4b   : > { %v4757_v7 = vpop.permute.xlu0 %4756 }
 0xf4c   : > { %v4778_v10 = vsel %vm4777_vm6, %v4773_v8, %v4757_v7  ;;  %v15191_v7 = vpack.c.bf16 %v1775_v43, %v1773_v6  ;;  %v15193_v8 = vpack.c.bf16 %v1774_v50, %v1772_v47  ;;  %v1811_v6 = vld [vmem:[#allocation31 + $0xb0] sm:$0xff]  ;;  %v1812_v43 = vld [vmem:[#allocation31 + $0xb8] sm:$0xff] }
 0xf4d   : > { %v15219_v47 = vpack.c.bf16 %v1812_v43, %v1811_v6  ;;  %v1796_v50 = vld [vmem:[#allocation31 + $0x38] sm:$0xff] }
 0xf73   : > { %v4716_v62 = vpop.f32.mrb[32].mxu0 }
 0xf74   : > { %4762 = vrot.lane.b32.xlu1 %v4716_v62, %s17092_s14  ;;  %v14449_v45 = vpop.f32.mrb[33].mxu0 }
 0xfa9   : > { %v4761_v11 = vpop.permute.xlu0 %4760 }
 0xfaa   : > { %v4780_v16 = vsel %vm4777_vm6, %v4775_v3, %v4761_v11  ;;  %v1781_v11 = vld [vmem:[#allocation29 + $0xc8] sm:$0xff] }
 0xfab   : > { %v15199_v3 = vpack.c.bf16 %v1783_v12, %v1781_v11  ;;  %v1815_v11 = vld [vmem:[#allocation31 + $0xd0] sm:$0xff]  ;;  %v1816_v12 = vld [vmem:[#allocation31 + $0xd8] sm:$0xff] }
 0xfad   : > { %v4759_v54 = vpop.permute.xlu1 %4758 }
 0xfae   : > { %v4779_v44 = vsel %vm4777_vm6, %v4774_v9, %v4759_v54  ;;  %v1777_v9 = vld [vmem:[#allocation29 + $0xa8] sm:$0xff]  ;;  %v1779_v54 = vld [vmem:[#allocation29 + $0xb8] sm:$0xff] }
 0xfaf   : > { %v4792_v63 = vcombine.low %v4778_v10, %v4779_v44  ;;  %v1776_v10 = vld [vmem:[#allocation29 + $0xa0] sm:$0xff]  ;;  %v15195_v44 = vpack.c.bf16 %v1779_v54, %v1777_v9  ;;  %v1814_v9 = vld [vmem:[#allocation31 + $0xc8] sm:$0xff] }
 0xfb1   : > { %14482 = vmatprep.mubr.f32.mxu1 %v4792_v63  ;;  %v1778_v63 = vld [vmem:[#allocation29 + $0xb0] sm:$0xff] }
 0xfb2   : > { %v15197_v1 = vpack.c.bf16 %v1778_v63, %v1776_v10  ;;  %v1798_v63 = vld [vmem:[#allocation31 + $0x48] sm:$0xff] }
 0xfe6   : > { %v4763_v15 = vpop.permute.xlu1 %4762 }
 0xfe7   : > { %v4781_v17 = vsel %vm4777_vm6, %v4776_v13, %v4763_v15  ;;  %v1780_v13 = vld [vmem:[#allocation29 + $0xc0] sm:$0xff]  ;;  %v1782_v15 = vld [vmem:[#allocation29 + $0xd0] sm:$0xff] }
 0xfe8   : > { %v4793_v19 = vcombine.low %v4780_v16, %v4781_v17  ;;  %v1785_v16 = vld [vmem:[#allocation29 + $0xe8] sm:$0xff]  ;;  %v1787_v17 = vld [vmem:[#allocation29 + $0xf8] sm:$0xff] }
 0xfea   : > { %14483 = vmatmul.mubr.f32.vlgmr.msra.gmra.mrb[40].mxu1 %v4793_v19  ;;  %v15201_v19 = vpack.c.bf16 %v1782_v15, %v1780_v13  ;;  %v1799_v13 = vld [vmem:[#allocation31 + $0x50] sm:$0xff]  ;;  %v1800_v15 = vld [vmem:[#allocation31 + $0x58] sm:$0xff] }
0x10bd   : > { %v14484_v22 = vpop.f32.mrb[40].mxu1 }
0x10be   : > { %v4868_v53 = vadd.f32 %v14484_v22, %v13566_v49  ;;  %v4862_v42 = vpop.f32.mrb[41].mxu1  ;;  %v1784_v22 = vld [vmem:[#allocation29 + $0xe0] sm:$0xff] }
0x10bf   : > { %v4863_v23 = vadd.f32 %v13566_v49, %v4862_v42  ;;  %v15203_v49 = vpack.c.bf16 %v1787_v17, %v1785_v16  ;;  %v1817_v16 = vld [vmem:[#allocation31 + $0xe0] sm:$0xff]  ;;  %v1818_v17 = vld [vmem:[#allocation31 + $0xe8] sm:$0xff] }
0x10c0   : > { %v4872_v5 = vadd.f32 %v4868_v53, %v17800_v32  ;;  %v15181_v32 = vpack.c.bf16 %v1762_v41, %v1760_v39  ;;  %v1786_v53 = vld [vmem:[#allocation29 + $0xf0] sm:$0xff] }
0x10c1   : > { %v4871_v14 = vadd.f32 %v4863_v23, %v17795_v25  ;;  %v15183_v25 = vpack.c.bf16 %v1767_v51, %v1765_v37  ;;  %v15205_v42 = vpack.c.bf16 %v1786_v53, %v1784_v22  ;;  %v1805_v23 = vld [vmem:[#allocation31 + $0x80] sm:$0xff]  ;;  %v18196_v39 = vld [vmem:[%s19671_s11] sm:$0xff]  ;;  %v1802_v53 = vld [vmem:[#allocation31 + $0x68] sm:$0xff] }
0x10c2   : > { %4875 = vadd.xlane.f32.xlu1 %v4872_v5  ;;  %15182 = vmatpush1.bf16.msra.mxu0 %v15181_v32  ;;  %v4899_v41 = vrot.slane %v18196_v39, %v17773_v20  ;;  %v4905_v32 = vrot.slane %v18196_v39, %v17776_v21  ;;  %v1801_v22 = vld [vmem:[#allocation31 + $0x60] sm:$0xff] }
0x10c3   : > { %4873 = vadd.xlane.f32.xlu0 %v4871_v14  ;;  %15184 = vmatprep.subr.bf16.mxu0 %v15183_v25 }
0x10c6   : > { %15186 = vmatpush1.bf16.msra.mxu0 %v15185_v58 }
0x10c7   : > { %15188 = vmatprep.subr.bf16.mxu0 %v15187_v48  ;;  %v1810_v48 = vld [vmem:[#allocation31 + $0xa8] sm:$0xff] }
0x10ca   : > { %15190 = vmatpush1.bf16.msra.mxu0 %v15189_v4  ;;  %v15217_v4 = vpack.c.bf16 %v1794_v2, %v1793_v0 }
0x10cb   : > { %15192 = vmatprep.subr.bf16.mxu0 %v15191_v7  ;;  %v1795_v7 = vld [vmem:[#allocation31 + $0x30] sm:$0xff] }
0x10cc   : > { %v15221_v54 = vpack.c.bf16 %v1796_v50, %v1795_v7 }
0x10ce   : > { %15194 = vmatpush1.bf16.msra.mxu0 %v15193_v8  ;;  %v1813_v8 = vld [vmem:[#allocation31 + $0xc0] sm:$0xff] }
0x10cf   : > { %15196 = vmatprep.subr.bf16.mxu0 %v15195_v44  ;;  %v15223_v10 = vpack.c.bf16 %v1814_v9, %v1813_v8  ;;  %v1797_v44 = vld [vmem:[#allocation31 + $0x40] sm:$0xff] }
0x10d2   : > { %15198 = vmatpush1.bf16.msra.mxu0 %v15197_v1  ;;  %v15225_v1 = vpack.c.bf16 %v1798_v63, %v1797_v44 }
0x10d3   : > { %15200 = vmatprep.subr.bf16.mxu0 %v15199_v3  ;;  %v15227_v3 = vpack.c.bf16 %v1816_v12, %v1815_v11 }
0x10d6   : > { %15202 = vmatpush1.bf16.msra.mxu0 %v15201_v19  ;;  %v15229_v19 = vpack.c.bf16 %v1800_v15, %v1799_v13 }
0x10d7   : > { %15204 = vmatprep.subr.bf16.mxu0 %v15203_v49  ;;  %v15231_v49 = vpack.c.bf16 %v1818_v17, %v1817_v16 }
0x10da   : > { %15206 = vmatpush1.bf16.msra.mxu0 %v15205_v42  ;;  %v1819_v42 = vld [vmem:[#allocation31 + $0xf0] sm:$0xff] }
0x114f   : > { %v4876_v59 = vpop.xlane.xlu1 %4875 }
0x1150   : > { %v4874_v60 = vpop.xlane.xlu0 %4873  ;;  %v4879_v61 = vmul.f32 0.0078125, %v4876_v59 }
0x1151   : > { %v4878_v38 = vmul.f32 0.0078125, %v4874_v60 }
0x1152   : > { %v18191_v62 = vsub.f32 %v4872_v5, %v4879_v61  ;;  %v1806_v5 = vld [vmem:[#allocation31 + $0x88] sm:$0xff]  ;;  %v1807_v61 = vld [vmem:[#allocation31 + $0x90] sm:$0xff] }
0x1153   : > { %v18187_v30 = vsub.f32 %v4871_v14, %v4878_v38  ;;  %v1789_v14 = vld [vmem:[#allocation31] sm:$0xff]  ;;  %v15207_v24 = vpack.c.bf16 %v1806_v5, %v1805_v23  ;;  %v1808_v38 = vld [vmem:[#allocation31 + $0x98] sm:$0xff]  ;;  %v15233_v5 = vpack.c.bf16 %v1802_v53, %v1801_v22  ;;  %v13567_v53 = vld [vmem:[%s19673_s8] ss:$0 sm:$0xff] }
0x1154   : > { %v4883_v45 = vmul.f32 %v18191_v62, %v18191_v62  ;;  %v15209_v27 = vpack.c.bf16 %v1790_v26, %v1789_v14  ;;  %v1820_v23 = vld [vmem:[#allocation31 + $0xf8] sm:$0xff] }
0x1155   : > { %v4882_v31 = vmul.f32 %v18187_v30, %v18187_v30  ;;  %15208 = vmatprep.subr.bf16.mxu1 %v15207_v24  ;;  %v15235_v14 = vpack.c.bf16 %v1820_v23, %v1819_v42  ;;  %v1803_v24 = vld [vmem:[#allocation31 + $0x70] sm:$0xff]  ;;  %v1804_v26 = vld [vmem:[#allocation31 + $0x78] sm:$0xff] }
0x1156   : > { %15210 = vmatpush3.bf16.msra.mxu1 %v15209_v27  ;;  %v15237_v27 = vpack.c.bf16 %v1804_v26, %v1803_v24 }
0x1157   : > { %4884 = vadd.xlane.f32.xlu0 %v4882_v31  ;;  %v1791_v31 = vld [vmem:[#allocation31 + $0x10] sm:$0xff] }
0x115b   : > { %4886 = vadd.xlane.f32.xlu0 %v4883_v45  ;;  %v1792_v45 = vld [vmem:[#allocation31 + $0x18] sm:$0xff] }
0x115c   : > { %v15213_v57 = vpack.c.bf16 %v1792_v45, %v1791_v31 }
0x11e4   : > { %v4885_v46 = vpop.xlane.xlu0 %4884 }
0x11e5   : > { %v4888_v29 = vmul.f32 0.0078125, %v4885_v46  ;;  %v1788_v46 = vld [vmem:[%s19672_s16] sm:$0x3]  ;;  %s13762_s16 = sshll.u32 %s17286_s2, 8  ;;  %s17098_s2 = smov [#allocation35]  }
0x11e6   : > { %s19510_s8 = scalar_lea.hbm %s19682_s9, %s13762_s16 }
0x11e7   : > { %v4890_v33 = vadd.f32 1e-05, %v4888_v29  ;;  %v4912_v29 = vrot.slane %v1788_v46, %v17773_v20 }
0x11e8   : > { %v4887_v35 = vpop.xlane.xlu0 %4886 }
0x11e9   : > { %16106 = vrsqrt.f32 %v4890_v33  ;;  %v4889_v36 = vmul.f32 0.0078125, %v4887_v35  ;;  %v4916_v33 = vrot.slane %v1788_v46, %v17776_v21 }
0x11eb   : > { %v4891_v55 = vadd.f32 1e-05, %v4889_v36 }
0x11ed   : > { %16108 = vrsqrt.f32 %v4891_v55 }
0x11f3   : > { %v16107_v37 = vpop.eup %16106 }
0x11f4   : > { %v4894_v51 = vmul.f32 %v16107_v37, %v18187_v30  ;;  %v15211_v30 = vpack.c.bf16 %v1808_v38, %v1807_v61 }
0x11f6   : > { %v4900_v25 = vmul.f32 %v4899_v41, %v4894_v51  ;;  %15212 = vmatprep.subr.bf16.mxu1 %v15211_v30 }
0x11f7   : > { %v16109_v52 = vpop.eup %16108  ;;  %15214 = vmatpush3.bf16.msra.mxu1 %v15213_v57 }
0x11f8   : > { %v18203_v56 = vadd.f32 %v4905_v32, %v4900_v25  ;;  %v4895_v58 = vmul.f32 %v16109_v52, %v18191_v62  ;;  %v15215_v62 = vpack.c.bf16 %v1810_v48, %v1809_v40 }
0x11fa   : > { %4984 = vmatmul.mubr.f32.vlgmr.msra.gmra.mrb[34].mxu0 %v18203_v56  ;;  %v4901_v59 = vmul.f32 %v4899_v41, %v4895_v58  ;;  %15216 = vmatprep.subr.bf16.mxu1 %v15215_v62 }
0x11fb   : > { %4989 = vmatprep.mubr.f32.mxu0 %v17090_v18  ;;  %15218 = vmatpush3.bf16.msra.mxu1 %v15217_v4 }
0x11fc   : > { %v18208_v60 = vadd.f32 %v4905_v32, %v4901_v59  ;;  %15220 = vmatprep.subr.bf16.mxu1 %v15219_v47 }
0x11fe   : > { %4990 = vmatmul.mubr.f32.gmra.mrb[36].mxu0 %v18208_v60 }
0x11ff   : > { %15222 = vmatpush3.bf16.msra.mxu1 %v15221_v54 }
0x1200   : > { %15224 = vmatprep.subr.bf16.mxu1 %v15223_v10 }
0x1203   : > { %15226 = vmatpush3.bf16.msra.mxu1 %v15225_v1 }
0x1204   : > { %15228 = vmatprep.subr.bf16.mxu1 %v15227_v3 }
0x1207   : > { %15230 = vmatpush3.bf16.msra.mxu1 %v15229_v19 }
0x1208   : > { %15232 = vmatprep.subr.bf16.mxu1 %v15231_v49 }
0x120b   : > { %15234 = vmatpush3.bf16.msra.mxu1 %v15233_v5 }
0x120c   : > { %15236 = vmatprep.subr.bf16.mxu1 %v15235_v14 }
0x120f   : > { %15238 = vmatpush3.bf16.msra.mxu1 %v15237_v27 }
0x12cd   : > { %v4985_v35 = vpop.f32.mrb[34].mxu0 }
0x12ce   : > { %v4986_v36 = vadd.f32 %v4985_v35, %v4912_v29  ;;  %v4987_v55 = vpop.f32.mrb[35].mxu0 }
0x12cf   : > { %v4988_v41 = vadd.f32 %v4987_v55, %v4916_v33 }
0x12d0   : > { %v5000_v37 = vmul.f32 0.044715, %v4986_v36  ;;  %v4996_v63 = vmul.f32 0.5, %v4986_v36 }
0x12d1   : > { %v5001_v51 = vmul.f32 0.044715, %v4988_v41  ;;  %v4991_v32 = vpop.f32.mrb[36].mxu0  ;;  %v4997_v10 = vmul.f32 0.5, %v4988_v41 }
0x12d2   : > { %v5004_v25 = vmul.f32 %v5000_v37, %v4986_v36  ;;  %v4992_v52 = vadd.f32 %v4991_v32, %v4912_v29  ;;  %v4993_v58 = vpop.f32.mrb[37].mxu0 }
0x12d3   : > { %v5005_v59 = vmul.f32 %v5001_v51, %v4988_v41  ;;  %v4994_v61 = vadd.f32 %v4993_v58, %v4916_v33 }
0x12d4   : > { %v5008_v38 = vmul.f32 %v5004_v25, %v4986_v36  ;;  %v5002_v30 = vmul.f32 0.044715, %v4992_v52  ;;  %v4998_v17 = vmul.f32 0.5, %v4992_v52  ;;  %v1544_v25 = vld [vmem:[#allocation5] sm:$0xff] }
0x12d5   : > { %v5003_v31 = vmul.f32 0.044715, %v4994_v61  ;;  %v5009_v45 = vmul.f32 %v5005_v59, %v4988_v41  ;;  %v4999_v15 = vmul.f32 0.5, %v4994_v61  ;;  %14489 = vmatprep.mubr.msk.f32.mxu0 %vm5149_vm7, %v1544_v25  ;;  %v1642_v59 = vld [vmem:[#allocation20 + $0x58] sm:$0xff]  ;;  %v1643_v25 = vld [vmem:[#allocation20 + $0x60] sm:$0xff] }
0x12d6   : > { %v5012_v57 = vadd.f32 %v5008_v38, %v4986_v36  ;;  %v5006_v40 = vmul.f32 %v5002_v30, %v4992_v52  ;;  %v1645_v38 = vld [vmem:[#allocation20 + $0x70] sm:$0xff]  ;;  %v1648_v30 = vld [vmem:[#allocation20 + $0x88] sm:$0xff] }
0x12d7   : > { %v5007_v48 = vmul.f32 %v5003_v31, %v4994_v61  ;;  %v5013_v62 = vadd.f32 %v5009_v45, %v4988_v41  ;;  %v15283_v31 = vpack.c.bf16 %v1648_v30, %v1645_v38  ;;  %v1651_v45 = vld [vmem:[#allocation20 + $0xa0] sm:$0xff]  ;;  %v1652_v38 = vld [vmem:[#allocation20 + $0xa8] sm:$0xff] }
0x12d8   : > { %v5016_v0 = vmul.f32 0.7978846, %v5012_v57  ;;  %v5010_v2 = vmul.f32 %v5006_v40, %v4992_v52  ;;  %v1654_v57 = vld [vmem:[#allocation20 + $0xb8] sm:$0xff]  ;;  %v1656_v30 = vld [vmem:[#allocation20 + $0xc8] sm:$0xff] }
0x12d9   : > { %v5017_v4 = vmul.f32 0.7978846, %v5013_v62  ;;  %v5011_v6 = vmul.f32 %v5007_v48, %v4994_v61  ;;  %v15287_v40 = vpack.c.bf16 %v1654_v57, %v1651_v45  ;;  %v1657_v48 = vld [vmem:[#allocation20 + $0xd0] sm:$0xff]  ;;  %v1660_v62 = vld [vmem:[#allocation20 + $0xe8] sm:$0xff] }
0x12da   : > { %16110 = vtanh.f32 %v5016_v0  ;;  %v5014_v43 = vadd.f32 %v5010_v2, %v4992_v52  ;;  %v1636_v52 = vld [vmem:[#allocation20 + $0x28] sm:$0xff]  ;;  %v15291_v0 = vpack.c.bf16 %v1660_v62, %v1657_v48  ;;  %v1663_v2 = vld [vmem:[#allocation20 + $0x100] sm:$0xff]  ;;  %v1658_v48 = vld [vmem:[#allocation20 + $0xd8] sm:$0xff] }
0x12db   : > { %16112 = vtanh.f32 %v5017_v4  ;;  %v5015_v7 = vadd.f32 %v5011_v6, %v4994_v61  ;;  %v1666_v4 = vld [vmem:[#allocation20 + $0x118] sm:$0xff] }
0x12dc   : > { %v5018_v47 = vmul.f32 0.7978846, %v5014_v43  ;;  %v15295_v6 = vpack.c.bf16 %v1666_v4, %v1663_v2  ;;  %v1669_v43 = vld [vmem:[#allocation20 + $0x130] sm:$0xff]  ;;  %v1662_v62 = vld [vmem:[#allocation20 + $0xf8] sm:$0xff] }
0x12dd   : > { %v5019_v50 = vmul.f32 0.7978846, %v5015_v7  ;;  %v1672_v7 = vld [vmem:[#allocation20 + $0x148] sm:$0xff] }
0x12de   : > { %16114 = vtanh.f32 %v5018_v47  ;;  %v15299_v47 = vpack.c.bf16 %v1672_v7, %v1669_v43  ;;  %v1664_v43 = vld [vmem:[#allocation20 + $0x108] sm:$0xff] }
0x12df   : > { %16116 = vtanh.f32 %v5019_v50  ;;  %v1675_v50 = vld [vmem:[#allocation20 + $0x160] sm:$0xff]  ;;  %v1668_v7 = vld [vmem:[#allocation20 + $0x128] sm:$0xff] }
0x12e4   : > { %v16111_v8 = vpop.eup %16110 }
0x12e5   : > { %v16113_v9 = vpop.eup %16112  ;;  %v5024_v54 = vadd.f32 1.0, %v16111_v8  ;;  %v1678_v8 = vld [vmem:[#allocation20 + $0x178] sm:$0xff] }
0x12e6   : > { %v5025_v44 = vadd.f32 1.0, %v16113_v9  ;;  %v15303_v9 = vpack.c.bf16 %v1678_v8, %v1675_v50 }
0x12e7   : > { %v5028_v3 = vmul.f32 %v5024_v54, %v4996_v63 }
0x12e8   : > { %v16115_v11 = vpop.eup %16114  ;;  %v5029_v12 = vmul.f32 %v5025_v44, %v4997_v10 }
0x12e9   : > { %v16117_v1 = vpop.eup %16116  ;;  %v5026_v13 = vadd.f32 1.0, %v16115_v11 }
0x12ea   : > { %5102 = vmatprep.mubr.f32.mxu1 %v5029_v12  ;;  %v5027_v16 = vadd.f32 1.0, %v16117_v1 }
0x12eb   : > { %5103 = vmatmul.mubr.f32.vlgmr.msra.gmra.mrb[42].mxu1 %v5028_v3  ;;  %v5030_v49 = vmul.f32 %v5026_v13, %v4998_v17  ;;  %v5140_v13 = vrot.slane %v18196_v39, %v17809_v34 }
0x12ec   : > { %v5031_v19 = vmul.f32 %v5027_v16, %v4999_v15  ;;  %v5145_v15 = vsub.s32 3, %v17741_v28 }
0x12ee   : > { %5107 = vmatprep.mubr.f32.mxu1 %v5031_v19 }
0x12ef   : > { %5108 = vmatmul.mubr.f32.gmra.mrb[44].mxu1 %v5030_v49  ;;  %v5146_v49 = vrot.slane %v18196_v39, %v5145_v15  ;;  %v1644_v39 = vld [vmem:[#allocation20 + $0x68] sm:$0xff]  ;;  %v1614_v15 = vld [vmem:[#allocation17] sm:$0xff] }
0x13be   : > { %v13933_v22 = vpop.f32.mrb[42].mxu1 }
0x13bf   : > { %v13934_v42 = vpop.f32.mrb[43].mxu1 }
0x13c0   : > { %v13935_v23 = vadd.f32 %v13934_v42, %v13933_v22  ;;  %v1635_v42 = vld [vmem:[#allocation20 + $0x20] sm:$0xff] }
0x13c2   : > { %v5105_v5 = vadd.f32 %v13935_v23, %v13567_v53  ;;  %v13936_v14 = vpop.f32.mrb[44].mxu1 }
0x13c3   : > { %v13937_v24 = vpop.f32.mrb[45].mxu1 }
0x13c4   : > { %v13938_v26 = vadd.f32 %v13937_v24, %v13936_v14  ;;  %v5113_v27 = vadd.f32 %v5105_v5, %v18203_v56  ;;  %v1633_v56 = vld [vmem:[#allocation20 + $0x10] sm:$0xff] }
0x13c5   : > { %v15275_v58 = vpack.c.bf16 %v1636_v52, %v1633_v56  ;;  %v1646_v56 = vld [vmem:[#allocation20 + $0x78] sm:$0xff] }
0x13c6   : > { %v5110_v46 = vadd.f32 %v13938_v26, %v13567_v53  ;;  %5115 = vadd.xlane.f32.xlu0 %v5113_v27  ;;  %v1632_v53 = vld [vmem:[#allocation20 + $0x8] sm:$0xff]  ;;  %v1631_v26 = vld [vmem:[#allocation20] sm:$0xff]  ;;  %v1650_v52 = vld [vmem:[#allocation20 + $0x98] sm:$0xff] }
0x13c7   : > { %15276 = vmatprep.subr.bf16.mxu1 %v15275_v58  ;;  %v15243_v24 = vpack.c.bf16 %v1635_v42, %v1632_v53  ;;  %v17096_v42 = vmov 1983009808  }
0x13c8   : > { %v5114_v29 = vadd.f32 %v5110_v46, %v18208_v60  ;;  %15278 = vmatpush3.bf16.msra.mxu1 %v15275_v58  ;;  %v1639_v60 = vld [vmem:[#allocation20 + $0x40] sm:$0xff]  ;;  %v1638_v46 = vld [vmem:[#allocation20 + $0x38] sm:$0xff]  ;;  %v1653_v58 = vld [vmem:[#allocation20 + $0xb0] sm:$0xff] }
0x13c9   : > { %v15279_v61 = vpack.c.bf16 %v1642_v59, %v1639_v60  ;;  %v15253_v60 = vpack.c.bf16 %v1646_v56, %v1643_v25  ;;  %v15255_v59 = vpack.c.bf16 %v1653_v58, %v1650_v52  ;;  %v1624_v56 = vld [vmem:[#allocation17 + $0x50] sm:$0xff]  ;;  %v1625_v52 = vld [vmem:[#allocation17 + $0x58] sm:$0xff] }
0x13ca   : > { %5117 = vadd.xlane.f32.xlu1 %v5114_v29 }
0x13cb   : > { %15280 = vmatprep.subr.bf16.mxu1 %v15279_v61 }
0x13cc   : > { %15282 = vmatpush3.bf16.msra.mxu1 %v15279_v61  ;;  %v1649_v61 = vld [vmem:[#allocation20 + $0x90] sm:$0xff] }
0x13cd   : > { %15284 = vmatprep.subr.bf16.mxu1 %v15283_v31  ;;  %v15257_v45 = vpack.c.bf16 %v1652_v38, %v1649_v61  ;;  %v1751_v38 = vld [vmem:[%s19674_s18 + $0x20] sm:$0xff] }
0x13d0   : > { %15286 = vmatpush3.bf16.msra.mxu1 %v15283_v31  ;;  %v1659_v31 = vld [vmem:[#allocation20 + $0xe0] sm:$0xff] }
0x13d1   : > { %15288 = vmatprep.subr.bf16.mxu1 %v15287_v40  ;;  %v15259_v57 = vpack.c.bf16 %v1659_v31, %v1656_v30  ;;  %v15323_v30 = vpack.c.bf16 %v1625_v52, %v1624_v56  ;;  %v1626_v31 = vld [vmem:[#allocation17 + $0x60] sm:$0xff] }
0x13d4   : > { %15290 = vmatpush3.bf16.msra.mxu1 %v15287_v40  ;;  %v1655_v40 = vld [vmem:[#allocation20 + $0xc0] sm:$0xff] }
0x13d5   : > { %15292 = vmatprep.subr.bf16.mxu1 %v15291_v0  ;;  %v15261_v2 = vpack.c.bf16 %v1658_v48, %v1655_v40 }
0x13d8   : > { %15294 = vmatpush3.bf16.msra.mxu1 %v15291_v0  ;;  %v1665_v0 = vld [vmem:[#allocation20 + $0x110] sm:$0xff] }
0x13d9   : > { %15296 = vmatprep.subr.bf16.mxu1 %v15295_v6  ;;  %v15263_v4 = vpack.c.bf16 %v1665_v0, %v1662_v62 }
0x13dc   : > { %15298 = vmatpush3.bf16.msra.mxu1 %v15295_v6  ;;  %v1661_v6 = vld [vmem:[#allocation20 + $0xf0] sm:$0xff] }
0x13dd   : > { %15300 = vmatprep.subr.bf16.mxu1 %v15299_v47  ;;  %v15265_v50 = vpack.c.bf16 %v1664_v43, %v1661_v6  ;;  %v1753_v43 = vld [vmem:[%s19674_s18 + $0x30] sm:$0xff] }
0x13e0   : > { %15302 = vmatpush3.bf16.msra.mxu1 %v15299_v47  ;;  %v1671_v47 = vld [vmem:[#allocation20 + $0x140] sm:$0xff] }
0x13e1   : > { %15304 = vmatprep.subr.bf16.mxu1 %v15303_v9  ;;  %v15267_v8 = vpack.c.bf16 %v1671_v47, %v1668_v7  ;;  %v1628_v7 = vld [vmem:[#allocation17 + $0x70] sm:$0xff]  ;;  %v1629_v47 = vld [vmem:[#allocation17 + $0x78] sm:$0xff] }
0x13e4   : > { %15306 = vmatpush3.bf16.msra.mxu1 %v15303_v9  ;;  %v1667_v9 = vld [vmem:[#allocation20 + $0x120] sm:$0xff] }
0x1453   : > { %v5116_v33 = vpop.xlane.xlu0 %5115 }
0x1454   : > { %v5119_v35 = vmul.f32 0.0078125, %v5116_v33  ;;  %v1545_v33 = vld [vmem:[#allocation5 + $0x8] sm:$0xff] }
0x1456   : > { %v5121_v36 = vsub.f32 %v5113_v27, %v5119_v35  ;;  %v1634_v27 = vld [vmem:[#allocation20 + $0x18] sm:$0xff] }
0x1457   : > { %v5118_v55 = vpop.xlane.xlu1 %5117  ;;  %v15245_v35 = vpack.c.bf16 %v1634_v27, %v1631_v26 }
0x1458   : > { %v5120_v41 = vmul.f32 0.0078125, %v5118_v55  ;;  %v5123_v37 = vmul.f32 %v5121_v36, %v5121_v36  ;;  %v1637_v55 = vld [vmem:[#allocation20 + $0x30] sm:$0xff] }
0x145a   : > { %5125 = vadd.xlane.f32.xlu0 %v5123_v37  ;;  %v5122_v51 = vsub.f32 %v5114_v29, %v5120_v41  ;;  %v1641_v29 = vld [vmem:[#allocation20 + $0x50] sm:$0xff]  ;;  %v1640_v41 = vld [vmem:[#allocation20 + $0x48] sm:$0xff]  ;;  %v1647_v37 = vld [vmem:[#allocation20 + $0x80] sm:$0xff] }
0x145c   : > { %v5124_v32 = vmul.f32 %v5122_v51, %v5122_v51 }
0x145e   : > { %5127 = vadd.xlane.f32.xlu1 %v5124_v32  ;;  %v15251_v32 = vpack.c.bf16 %v1647_v37, %v1644_v39  ;;  %v1623_v39 = vld [vmem:[#allocation17 + $0x48] sm:$0xff] }
0x14e7   : > { %v5126_v54 = vpop.xlane.xlu0 %5125 }
0x14e8   : > { %v5129_v10 = vmul.f32 0.0078125, %v5126_v54  ;;  %v1670_v54 = vld [vmem:[#allocation20 + $0x138] sm:$0xff] }
0x14ea   : > { %v5131_v44 = vadd.f32 1e-05, %v5129_v10  ;;  %v1674_v10 = vld [vmem:[#allocation20 + $0x158] sm:$0xff] }
0x14eb   : > { %v5128_v63 = vpop.xlane.xlu1 %5127 }
0x14ec   : > { %16118 = vrsqrt.f32 %v5131_v44  ;;  %v5130_v11 = vmul.f32 0.0078125, %v5128_v63  ;;  %v1677_v44 = vld [vmem:[#allocation20 + $0x170] sm:$0xff]  ;;  %v15269_v63 = vpack.c.bf16 %v1670_v54, %v1667_v9 }
0x14ee   : > { %v5132_v12 = vadd.f32 1e-05, %v5130_v11  ;;  %v15271_v11 = vpack.c.bf16 %v1677_v44, %v1674_v10 }
0x14f0   : > { %16120 = vrsqrt.f32 %v5132_v12  ;;  %v1673_v12 = vld [vmem:[#allocation20 + $0x150] sm:$0xff] }
0x14f6   : > { %v16119_v1 = vpop.eup %16118 }
0x14f7   : > { %v5135_v3 = vmul.f32 %v16119_v1, %v5121_v36  ;;  %v15247_v36 = vpack.c.bf16 %v1641_v29, %v1638_v46  ;;  %v1676_v1 = vld [vmem:[#allocation20 + $0x168] sm:$0xff]  ;;  %v1747_v46 = vld [vmem:[%s19674_s18] sm:$0xff] }
0x14f8   : > { %v1620_v29 = vld [vmem:[#allocation17 + $0x30] sm:$0xff] }
0x14f9   : > { %v5141_v19 = vmul.f32 %v5140_v13, %v5135_v3  ;;  %v15273_v3 = vpack.c.bf16 %v1676_v1, %v1673_v12  ;;  %v5491_v12 = vcombine.high %v1753_v43, %v1753_v43  ;;  %v15329_v1 = vpack.c.bf16 %v1629_v47, %v1628_v7 }
0x14fa   : > { %v16121_v16 = vpop.eup %16120 }
0x14fb   : > { %v5136_v17 = vmul.f32 %v16121_v16, %v5122_v51  ;;  %v5147_v23 = vadd.f32 %v5146_v49, %v5141_v19  ;;  %v15249_v51 = vpack.c.bf16 %v1640_v41, %v1637_v55  ;;  %v1615_v16 = vld [vmem:[#allocation17 + $0x8] sm:$0xff]  ;;  %v1622_v41 = vld [vmem:[#allocation17 + $0x40] sm:$0xff] }
0x14fc   : > { %v15320_v25 = vpack.c.bf16 %v1623_v39, %v1622_v41 }
0x14fd   : > { %v5142_v22 = vmul.f32 %v5140_v13, %v5136_v17  ;;  %v17095_v13 = vmov 0.0|0.0   ;;  %v15308_v17 = vpack.c.bf16 %v1615_v16, %v1614_v15 }
0x14ff   : > { %v5148_v5 = vadd.f32 %v5146_v49, %v5142_v22  ;;  %v1616_v49 = vld [vmem:[#allocation17 + $0x10] sm:$0xff]  ;;  %v1617_v22 = vld [vmem:[#allocation17 + $0x18] sm:$0xff] }
0x1501   : > { %v15239_v14 = vpack.c.bf16 %v5148_v5, %v5147_v23  ;;  %v5421_v23 = vunpack.c.l.s4 %v17096_v42  ;;  %v15311_v5 = vpack.c.bf16 %v1617_v22, %v1616_v49 }
0x1503   : > { %15240 = vmatprep.subr.bf16.mxu0 %v15239_v14  ;;  %v5422_v26 = vunpack.c.0.s8 %v5421_v23 }
0x1504   : > { %15242 = vmatpush3.bf16.msra.mxu0 %v15239_v14  ;;  %v1618_v14 = vld [vmem:[#allocation17 + $0x20] sm:$0xff] }
0x1505   : > { %15244 = vmatprep.subr.bf16.mxu0 %v15243_v24  ;;  %v1619_v24 = vld [vmem:[#allocation17 + $0x28] sm:$0xff] }
0x1506   : > { %v15314_v27 = vpack.c.bf16 %v1619_v24, %v1618_v14 }
0x1507   : > { %14490 = vmatmul.mubr.msk.f32.vlgmr.msra.gmra.mrb[38].mxu0 %vm5149_vm7, %v1545_v33  ;;  %v1621_v33 = vld [vmem:[#allocation17 + $0x38] sm:$0xff] }
0x1508   : > { %15246 = vmatpush1.bf16.msra.mxu0 %v15245_v35  ;;  %5311 = vmatprep.mubr.f32.mxu0 %v17090_v18  ;;  %v18240_v35 = vsub.s32 %v5422_v26, %v17741_v28  ;;  %v15317_v55 = vpack.c.bf16 %v1621_v33, %v1620_v29 }
0x1509   : > { %15248 = vmatprep.subr.bf16.mxu0 %v15247_v36  ;;  %v5419_v36 = vcombine.high %v1747_v46, %v1747_v46 }
0x150a   : > { %v5426_v37 = vrot.slane %v1747_v46, %v18240_v35  ;;  %v5474_v48 = vrot.slane %v1751_v38, %v18240_v35  ;;  %v5498_v42 = vrot.slane %v1753_v43, %v18240_v35  ;;  %v5505_v23 = vrot.slane %v5491_v12, %v18240_v35 }
0x150c   : > { %15250 = vmatpush1.bf16.msra.mxu0 %v15249_v51  ;;  %v5433_v51 = vrot.slane %v5419_v36, %v18240_v35  ;;  %v5482_v54 = vcombine.high %v5474_v48, %v5474_v48  ;;  %v5506_v29 = vcombine.high %v5498_v42, %v5498_v42  ;;  %v5507_v33 = vcombine.high %v5505_v23, %v5505_v23  ;;  %v13573_v36 = vld.sshfl [vmem:[%s19674_s18 + $0x38] sm:$0x3 pattern:$0x76325410] }
0x150d   : > { %15252 = vmatprep.subr.bf16.mxu0 %v15251_v32  ;;  %v1749_v32 = vld [vmem:[%s19674_s18 + $0x10] sm:$0xff] }
0x150e   : > { %v5443_v58 = vcombine.high %v1749_v32, %v1749_v32  ;;  %v5435_v61 = vcombine.high %v5433_v51, %v5433_v51 }
0x1510   : > { %15254 = vmatpush1.bf16.msra.mxu0 %v15253_v60  ;;  %v5450_v60 = vrot.slane %v1749_v32, %v18240_v35  ;;  %v5522_v0 = vcombine.low %v5433_v51, %v5435_v61  ;;  %v5590_v51 = vcombine.low %v5507_v33, %v13573_v36 }
0x1511   : > { %15256 = vmatprep.subr.bf16.mxu0 %v15255_v59  ;;  %v5434_v59 = vcombine.high %v5426_v37, %v5426_v37 }
0x1512   : > { %v5458_v40 = vcombine.high %v5450_v60, %v5450_v60  ;;  %v5536_v44 = vrot.slane %v5522_v0, %v18240_v35  ;;  %v5604_v56 = vrot.slane %v5590_v51, %v18240_v35 }
0x1513   : > { %v5521_v62 = vcombine.low %v5426_v37, %v5434_v59  ;;  %v5589_v37 = vcombine.low %v5506_v29, %v5505_v23 }
0x1514   : > { %15258 = vmatpush1.bf16.msra.mxu0 %v15257_v45  ;;  %v1627_v45 = vld [vmem:[#allocation17 + $0x68] sm:$0xff] }
0x1515   : > { %15260 = vmatprep.subr.bf16.mxu0 %v15259_v57  ;;  %v5457_v57 = vrot.slane %v5443_v58, %v18240_v35  ;;  %v15326_v6 = vpack.c.bf16 %v1627_v45, %v1626_v31  ;;  %v5529_v10 = vrot.slane %v5521_v62, %v18240_v35  ;;  %v1679_v58 = vld [vmem:[%s19675_s30] sm:$0x7] }
0x1517   : > { %v5459_v9 = vcombine.high %v5457_v57, %v5457_v57  ;;  %v5537_v49 = vcombine.low %v5529_v10, %v5536_v44 }
0x1518   : > { %15262 = vmatpush1.bf16.msra.mxu0 %v15261_v2  ;;  %v13570_v2 = vld.sshfl [vmem:[%s19674_s18 + $0x8] sm:$0x3 pattern:$0x76325410] }
0x1519   : > { %15264 = vmatprep.subr.bf16.mxu0 %v15263_v4  ;;  %v5467_v4 = vcombine.high %v1751_v38, %v1751_v38 }
0x151c   : > { %15266 = vmatpush1.bf16.msra.mxu0 %v15265_v50  ;;  %v5538_v50 = vcombine.low %v13570_v2, %v5450_v60  ;;  %v5235_v60 = vrot.slane %v1679_v58, %v17773_v20  ;;  %v13574_v2 = vld [vmem:[#allocation19] ss:$0 sm:$0xff] }
0x151d   : > { %15268 = vmatprep.subr.bf16.mxu0 %v15267_v8  ;;  %v5539_v8 = vcombine.low %v5458_v40, %v5457_v57  ;;  %v18297_v57 = vrot.slane %v1679_v58, %v17776_v21 }
0x151f   : > { %v5553_v15 = vrot.slane %v5539_v8, %v18240_v35 }
0x1520   : > { %15270 = vmatpush1.bf16.msra.mxu0 %v15269_v63  ;;  %v13571_v63 = vld.sshfl [vmem:[%s19674_s18 + $0x18] sm:$0x3 pattern:$0x76325410] }
0x1521   : > { %15272 = vmatprep.subr.bf16.mxu0 %v15271_v11  ;;  %v5481_v11 = vrot.slane %v5467_v4, %v18240_v35  ;;  %v5555_v16 = vcombine.low %v5459_v9, %v13571_v63 }
0x1523   : > { %v5483_v22 = vcombine.high %v5481_v11, %v5481_v11  ;;  %v5563_v24 = vrot.slane %v5555_v16, %v18240_v35 }
0x1524   : > { %15274 = vmatpush1.bf16.msra.mxu0 %v15273_v3  ;;  %v5546_v3 = vrot.slane %v5538_v50, %v18240_v35 }
0x1525   : > { %15307 = vmatprep.subr.bf16.mxu0 %v17095_v13 }
0x1526   : > { %v5554_v14 = vcombine.low %v5546_v3, %v5553_v15 }
0x15da   : > { %v18225_v19 = vpop.f32.mrb[38].mxu0 }
0x15db   : > { %v18227_v53 = vpop.f32.mrb[39].mxu0 }
0x15dc   : > { %5312 = vmatmul.mubr.f32.vlgmr.msra.gmra.mrb[40].mxu0 %v18227_v53  ;;  %14524 = vmatprep.mubr.f32.mxu1 %v18227_v53 }
0x15dd   : > { %15309 = vmatpush3.bf16.msra.mxu0 %v15308_v17  ;;  %14525 = vmatmul.mubr.f32.vlgmr.msra.gmra.mrb[46].mxu1 %v18225_v19  ;;  %v5556_v17 = vcombine.low %v5474_v48, %v5482_v54 }
0x15de   : > { %5317 = vmatprep.mubr.f32.mxu0 %v17090_v18  ;;  %15310 = vmatprep.subr.bf16.mxu0 %v17095_v13 }
0x15df   : > { %v5570_v26 = vrot.slane %v5556_v17, %v18240_v35 }
0x15e0   : > { %5318 = vmatmul.mubr.f32.gmra.mrb[42].mxu0 %v18225_v19 }
0x15e1   : > { %15312 = vmatpush3.bf16.msra.mxu0 %v15311_v5  ;;  %14559 = vmatprep.mubr.msk.f32.mxu0 %vm17091_vm0, %v17090_v18  ;;  %v13572_v5 = vld.sshfl [vmem:[%s19674_s18 + $0x28] sm:$0x3 pattern:$0x76325410] }
0x15e2   : > { %15313 = vmatprep.subr.bf16.mxu0 %v17095_v13  ;;  %v5573_v46 = vcombine.low %v13572_v5, %v5498_v42 }
0x15e4   : > { %v5587_v39 = vrot.slane %v5573_v46, %v18240_v35 }
0x15e5   : > { %15315 = vmatpush3.bf16.msra.mxu0 %v15314_v27  ;;  %v5572_v27 = vcombine.low %v5481_v11, %v5483_v22 }
0x15e6   : > { %15316 = vmatprep.subr.bf16.mxu0 %v17095_v13 }
0x15e7   : > { %v5580_v41 = vrot.slane %v5572_v27, %v18240_v35 }
0x15e9   : > { %15318 = vmatpush3.bf16.msra.mxu0 %v15317_v55  ;;  %v5571_v55 = vcombine.low %v5563_v24, %v5570_v26  ;;  %v5588_v32 = vcombine.low %v5580_v41, %v5587_v39 }
0x15ea   : > { %15319 = vmatprep.subr.bf16.mxu0 %v17095_v13 }
0x15ed   : > { %15321 = vmatpush3.bf16.msra.mxu0 %v15320_v25  ;;  %v5597_v25 = vrot.slane %v5589_v37, %v18240_v35 }
0x15ee   : > { %15322 = vmatprep.subr.bf16.mxu0 %v17095_v13 }
0x15ef   : > { %v5605_v52 = vcombine.low %v5597_v25, %v5604_v56 }
0x15f1   : > { %15324 = vmatpush3.bf16.msra.mxu0 %v15323_v30 }
0x15f2   : > { %15325 = vmatprep.subr.bf16.mxu0 %v17095_v13 }
0x15f5   : > { %15327 = vmatpush3.bf16.msra.mxu0 %v15326_v6 }
0x15f6   : > { %15328 = vmatprep.subr.bf16.mxu0 %v17095_v13 }
0x15f9   : > { %15330 = vmatpush3.bf16.msra.mxu0 %v15329_v1 }
0x15fc   : > { %14560 = vmatmul.mubr.f32.vlgmr.msra.gmra.mrb[44].mxu0 %v5537_v49 }
0x15fd   : > { %14562 = vmatprep.mubr.msk.f32.mxu0 %vm17091_vm0, %v17090_v18 }
0x1600   : > { %14563 = vmatmul.mubr.f32.gmra.mrb[46].mxu0 %v5554_v14 }
0x1601   : > { %14565 = vmatprep.mubr.msk.f32.mxu0 %vm17091_vm0, %v17090_v18 }
0x1604   : > { %14566 = vmatmul.mubr.f32.gmra.mrb[48].mxu0 %v5571_v55 }
0x1605   : > { %14568 = vmatprep.mubr.msk.f32.mxu0 %vm17091_vm0, %v17090_v18 }
0x1608   : > { %14569 = vmatmul.mubr.f32.gmra.mrb[50].mxu0 %v5588_v32 }
0x1609   : > { %14571 = vmatprep.mubr.msk.f32.mxu0 %vm17091_vm0, %v17090_v18 }
0x160c   : > { %14572 = vmatmul.mubr.f32.gmra.mrb[52].mxu0 %v5605_v52 }
0x16af   : > { %v5313_v59 = vpop.f32.mrb[40].mxu0 }
0x16b0   : > { %v18282_v61 = vadd.f32 %v5313_v59, %v5235_v60  ;;  %v18284_v38 = vpop.f32.mrb[41].mxu0  ;;  %v18286_v30 = vpop.f32.mrb[46].mxu1 }
0x16b1   : > { %v18288_v31 = vpop.f32.mrb[47].mxu1 }
0x16b2   : > { %14574 = vmatprep.subr.msk.mxu1 %vm2068_vm1, %v18282_v61  ;;  %v18294_v45 = vcombine.high %v18282_v61, %v18282_v61 }
0x16b3   : > { %v5319_v40 = vpop.f32.mrb[42].mxu0  ;;  %14575 = vmatpush3.xpose.msk.msra.mxu1 %vm2068_vm1, %v18282_v61 }
0x16b4   : > { %v5321_v48 = vpop.f32.mrb[43].mxu0  ;;  %14579 = vmatprep.subr.msk.mxu1 %vm2068_vm1, %v18294_v45  ;;  %v18330_v51 = vadd.f32 %v5319_v40, %v5235_v60 }
0x16b5   : > { %v18304_v62 = vadd.f32 %v5321_v48, %v18297_v57 }
0x16b7   : > { %v18308_v0 = vcombine.high %v18304_v62, %v18304_v62 }
0x16b9   : > { %14609 = vmatprep.subr.msk.mxu0 %vm2418_vm2, %v18308_v0 }
0x16ba   : > { %14610 = vmatpush3.msk.msra.mxu0 %vm2418_vm2, %v18308_v0 }
0x16cf   : > { %v5677_v4 = vpop.f32.mrb[44].mxu0 }
0x16d0   : > { %v5678_v6 = vadd.f32 %v13574_v2, %v5677_v4  ;;  %v14561_v43 = vpop.f32.mrb[45].mxu0 }
0x16d2   : > { %v5706_v7 = vcombine.high %v5678_v6, %v5678_v6  ;;  %v5713_v47 = vrot.slane %v5678_v6, %v18240_v35 }
0x16d3   : > { %v5682_v50 = vpop.f32.mrb[46].mxu0 }
0x16d4   : > { %v5720_v8 = vrot.slane %v5706_v7, %v18240_v35  ;;  %v5721_v9 = vcombine.high %v5713_v47, %v5713_v47  ;;  %v5683_v54 = vadd.f32 %v13574_v2, %v5682_v50  ;;  %v14564_v10 = vpop.f32.mrb[47].mxu0 }
0x16d6   : > { %v5722_v44 = vcombine.high %v5720_v8, %v5720_v8  ;;  %v5791_v63 = vcombine.low %v5713_v47, %v5721_v9  ;;  %v5723_v11 = vcombine.high %v5683_v54, %v5683_v54  ;;  %v5730_v12 = vrot.slane %v5683_v54, %v18240_v35 }
0x16d7   : > { %v5687_v1 = vpop.f32.mrb[48].mxu0  ;;  %v18356_v54 = vcombine.high %v18330_v51, %v18330_v51 }
0x16d8   : > { %v5792_v3 = vcombine.low %v5720_v8, %v5722_v44  ;;  %v5737_v15 = vrot.slane %v5723_v11, %v18240_v35  ;;  %v5738_v16 = vcombine.high %v5730_v12, %v5730_v12  ;;  %v14567_v17 = vpop.f32.mrb[49].mxu0  ;;  %v5688_v49 = vadd.f32 %v13574_v2, %v5687_v1 }
0x16d9   : > { %v5799_v22 = vrot.slane %v5791_v63, %v18240_v35  ;;  %v18324_v33 = vrot.slane %v5730_v12, %v18240_v35 }
0x16da   : > { %v5806_v42 = vrot.slane %v5792_v3, %v18240_v35  ;;  %v5739_v23 = vcombine.high %v5737_v15, %v5737_v15  ;;  %v5896_v5 = vcombine.low %v5738_v16, %v5737_v15  ;;  %v5740_v14 = vcombine.high %v5688_v49, %v5688_v49 }
0x16db   : > { %v5747_v24 = vrot.slane %v5688_v49, %v18240_v35  ;;  %v5692_v26 = vpop.f32.mrb[50].mxu0  ;;  %v18371_v3 = vadd.f32 %v18284_v38, %v18297_v57 }
0x16dc   : > { %v5693_v27 = vadd.f32 %v13574_v2, %v5692_v26  ;;  %v14570_v46 = vpop.f32.mrb[51].mxu0  ;;  %v18321_v29 = vcombine.low %v5799_v22, %v5806_v42  ;;  %v5754_v36 = vrot.slane %v5740_v14, %v18240_v35  ;;  %v5904_v32 = vrot.slane %v5896_v5, %v18240_v35 }
0x16dd   : > { %v5897_v55 = vcombine.low %v5739_v23, %v5747_v24  ;;  %v5755_v41 = vcombine.high %v5747_v24, %v5747_v24  ;;  %v18392_v38 = vcombine.high %v18371_v3, %v18371_v3 }
0x16de   : > { %v5757_v39 = vcombine.high %v5693_v27, %v5693_v27  ;;  %v5764_v37 = vrot.slane %v5693_v27, %v18240_v35  ;;  %14576 = vmatprep.mubr.msk.f32.mxu1 %vm2068_vm1, %v18321_v29  ;;  %v5756_v25 = vcombine.high %v5754_v36, %v5754_v36 }
0x16df   : > { %v5911_v56 = vrot.slane %v5897_v55, %v18240_v35  ;;  %v5697_v52 = vpop.f32.mrb[52].mxu0  ;;  %14577 = vmatmul.mubr.msk.f32.vlgmr.msra.gmra.mrb[48].mxu1 %vm2068_vm1, %v18324_v33  ;;  %v18344_v40 = vrot.slane %v5755_v41, %v18240_v35 }
0x16e0   : > { %v5771_v58 = vrot.slane %v5757_v39, %v18240_v35  ;;  %v5772_v59 = vcombine.high %v5764_v37, %v5764_v37  ;;  %v5698_v48 = vadd.f32 %v13574_v2, %v5697_v52  ;;  %14580 = vmatpush3.xpose.msk.msra.mxu1 %vm2068_vm1, %v18294_v45  ;;  %v14573_v4 = vpop.f32.mrb[53].mxu0  ;;  %v6001_v6 = vcombine.low %v5754_v36, %v5756_v25 }
0x16e1   : > { %14584 = vmatprep.subr.msk.mxu1 %vm2068_vm1, %v18330_v51  ;;  %v18341_v60 = vcombine.low %v5904_v32, %v5911_v56 }
0x16e2   : > { %v6002_v43 = vcombine.low %v5764_v37, %v5772_v59  ;;  %v5773_v7 = vcombine.high %v5771_v58, %v5771_v58  ;;  %v5774_v47 = vcombine.high %v5698_v48, %v5698_v48  ;;  %v5781_v50 = vrot.slane %v5698_v48, %v18240_v35 }
0x16e3   : > { %14581 = vmatprep.mubr.msk.f32.mxu1 %vm2068_vm1, %v18341_v60  ;;  %v6009_v2 = vrot.slane %v6001_v6, %v18240_v35  ;;  %v18365_v12 = vrot.slane %v5771_v58, %v18240_v35 }
0x16e4   : > { %v6016_v8 = vrot.slane %v6002_v43, %v18240_v35  ;;  %v5788_v9 = vrot.slane %v5774_v47, %v18240_v35  ;;  %14582 = vmatmul.mubr.msk.f32.vlgmr.msra.gmra.mrb[50].mxu1 %vm2068_vm1, %v18344_v40  ;;  %v5789_v10 = vcombine.high %v5781_v50, %v5781_v50  ;;  %v6106_v44 = vcombine.low %v5773_v7, %v5781_v50 }
0x16e5   : > { %14585 = vmatpush3.xpose.msk.msra.mxu1 %vm2068_vm1, %v18330_v51 }
0x16e6   : > { %v5790_v63 = vcombine.high %v5788_v9, %v5788_v9  ;;  %14589 = vmatprep.subr.msk.mxu1 %vm2068_vm1, %v18356_v54  ;;  %v18362_v11 = vcombine.low %v6009_v2, %v6016_v8  ;;  %v6107_v1 = vcombine.low %v5789_v10, %v5788_v9  ;;  %v6114_v15 = vrot.slane %v6106_v44, %v18240_v35 }
0x16e8   : > { %14586 = vmatprep.mubr.msk.f32.mxu1 %vm2068_vm1, %v18362_v11  ;;  %v6121_v16 = vrot.slane %v6107_v1, %v18240_v35  ;;  %v18378_v17 = vrot.slane %v5790_v63, %v18240_v35 }
0x16e9   : > { %14587 = vmatmul.mubr.msk.f32.vlgmr.msra.gmra.mrb[52].mxu1 %vm2068_vm1, %v18365_v12 }
0x16ea   : > { %14590 = vmatpush3.xpose.msk.msra.mxu1 %vm2068_vm1, %v18356_v54  ;;  %v18384_v49 = vcombine.low %v6114_v15, %v6121_v16 }
0x16eb   : > { %14594 = vmatprep.subr.msk.mxu1 %vm2418_vm2, %v18371_v3 }
0x16ec   : > { %14591 = vmatprep.mubr.msk.f32.mxu1 %vm2068_vm1, %v18384_v49 }
0x16ed   : > { %14592 = vmatmul.mubr.msk.f32.vlgmr.msra.gmra.mrb[54].mxu1 %vm2068_vm1, %v18378_v17 }
0x16ee   : > { %14595 = vmatpush3.msk.msra.mxu1 %vm2418_vm2, %v18371_v3 }
0x16ef   : > { %14599 = vmatprep.subr.msk.mxu1 %vm2418_vm2, %v18392_v38 }
0x17b2   : > { %v14578_v57 = vpop.f32.mrb[48].mxu1 }
0x17b3   : > { %v6212_v22 = vmul.f32 0.17677669, %v14578_v57  ;;  %v5887_v42 = vpop.f32.mrb[49].mxu1 }
0x17b4   : > { %v6211_v23 = vmul.f32 0.17677669, %v5887_v42 }
0x17b5   : > { %v6223_v5 = vsel %vm6222_vm8, %v6212_v22, -inf }
0x17b6   : > { %6224 = vmax.xlane.f32.xlu1 %v6223_v5  ;;  %v6219_v14 = vsel %vm2414_vm4, %v6211_v23, -inf }
0x17b7   : > { %v14583_v24 = vpop.f32.mrb[50].mxu1  ;;  %6220 = vmax.xlane.f32.xlu0 %v6219_v14 }
0x17b8   : > { %v6214_v26 = vmul.f32 0.17677669, %v14583_v24  ;;  %v5992_v27 = vpop.f32.mrb[51].mxu1 }
0x17b9   : > { %v6213_v46 = vmul.f32 0.17677669, %v5992_v27 }
0x17ba   : > { %v6229_v36 = vsel %vm6222_vm8, %v6214_v26, -inf }
0x17bb   : > { %6230 = vmax.xlane.f32.xlu1 %v6229_v36  ;;  %v6226_v55 = vsel %vm2414_vm4, %v6213_v46, -inf }
0x17bc   : > { %6227 = vmax.xlane.f32.xlu0 %v6226_v55  ;;  %v14588_v41 = vpop.f32.mrb[52].mxu1 }
0x17bd   : > { %v6216_v39 = vmul.f32 0.17677669, %v14588_v41  ;;  %v6097_v37 = vpop.f32.mrb[53].mxu1 }
0x17be   : > { %v6215_v32 = vmul.f32 0.17677669, %v6097_v37 }
0x17bf   : > { %v6235_v25 = vsel %vm6222_vm8, %v6216_v39, -inf }
0x17c0   : > { %6236 = vmax.xlane.f32.xlu1 %v6235_v25  ;;  %v6232_v56 = vsel %vm2414_vm4, %v6215_v32, -inf  ;;  %v14593_v52 = vpop.f32.mrb[54].mxu1 }
0x17c1   : > { %6233 = vmax.xlane.f32.xlu0 %v6232_v56  ;;  %v6218_v58 = vmul.f32 0.17677669, %v14593_v52  ;;  %v6202_v59 = vpop.f32.mrb[55].mxu1 }
0x17c2   : > { %v6217_v48 = vmul.f32 0.17677669, %v6202_v59 }
0x17c3   : > { %v6241_v4 = vsel %vm6222_vm8, %v6218_v58, -inf }
0x17c4   : > { %6242 = vmax.xlane.f32.xlu1 %v6241_v4  ;;  %v6238_v6 = vsel %vm2414_vm4, %v6217_v48, -inf }
0x17c5   : > { %6239 = vmax.xlane.f32.xlu0 %v6238_v6 }
0x17d5   : > { %6640 = vrot.lane.b32.xlu1 %v18321_v29, %s17092_s14 }
0x17d9   : > { %6642 = vrot.lane.b32.xlu1 %v18324_v33, %s17092_s14 }
0x17db   : > { %6644 = vrot.lane.b32.xlu0 %v18282_v61, %s17092_s14 }
0x17dd   : > { %6818 = vrot.lane.b32.xlu1 %v18330_v51, %s17092_s14 }
0x1843   : > { %v6225_v43 = vpop.xlane.xlu1 %6224 }
0x1844   : > { %v6245_v7 = vsub.f32 %v6212_v22, %v6225_v43  ;;  %v6221_v47 = vpop.xlane.xlu0 %6220 }
0x1845   : > { %v6244_v50 = vsub.f32 %v6211_v23, %v6221_v47 }
0x1846   : > { %v6254_v2 = vmul.f32 1.442695, %v6245_v7 }
0x1847   : > { %v6252_v8 = vmul.f32 1.442695, %v6244_v50 }
0x1848   : > { %16122 = vpow2.f32 %v6254_v2  ;;  %v6231_v9 = vpop.xlane.xlu1 %6230 }
0x1849   : > { %16124 = vpow2.f32 %v6252_v8  ;;  %v6247_v10 = vsub.f32 %v6214_v26, %v6231_v9  ;;  %v6228_v44 = vpop.xlane.xlu0 %6227 }
0x184a   : > { %v6246_v63 = vsub.f32 %v6213_v46, %v6228_v44 }
0x184b   : > { %v6258_v1 = vmul.f32 1.442695, %v6247_v10 }
0x184c   : > { %v6256_v15 = vmul.f32 1.442695, %v6246_v63 }
0x184d   : > { %16126 = vpow2.f32 %v6258_v1  ;;  %v6237_v16 = vpop.xlane.xlu1 %6236 }
0x184e   : > { %16128 = vpow2.f32 %v6256_v15  ;;  %v6249_v57 = vsub.f32 %v6216_v39, %v6237_v16  ;;  %v6234_v42 = vpop.xlane.xlu0 %6233 }
0x184f   : > { %v6248_v5 = vsub.f32 %v6215_v32, %v6234_v42 }
0x1850   : > { %v6262_v14 = vmul.f32 1.442695, %v6249_v57 }
0x1851   : > { %v6260_v22 = vmul.f32 1.442695, %v6248_v5  ;;  %v6243_v56 = vpop.xlane.xlu1 %6242 }
0x1852   : > { %v16123_v24 = vpop.eup %16122  ;;  %16130 = vpow2.f32 %v6262_v14  ;;  %v6240_v52 = vpop.xlane.xlu0 %6239  ;;  %v6251_v59 = vsub.f32 %v6218_v58, %v6243_v56 }
0x1853   : > { %v16125_v23 = vpop.eup %16124  ;;  %16132 = vpow2.f32 %v6260_v22  ;;  %v6271_v27 = vsel %vm6222_vm8, %v16123_v24, 0.0  ;;  %v6250_v4 = vsub.f32 %v6217_v48, %v6240_v52 }
0x1854   : > { %6272 = vadd.xlane.f32.xlu1 %v6271_v27  ;;  %v6268_v26 = vsel %vm2414_vm4, %v16125_v23, 0.0  ;;  %v6266_v6 = vmul.f32 1.442695, %v6251_v59 }
0x1855   : > { %6269 = vadd.xlane.f32.xlu0 %v6268_v26  ;;  %v6264_v43 = vmul.f32 1.442695, %v6250_v4  ;;  %v6641_v58 = vpop.permute.xlu1 %6640 }
0x1856   : > { %16134 = vpow2.f32 %v6266_v6  ;;  %v6645_v9 = vpop.permute.xlu0 %6644 }
0x1857   : > { %v18416_v46 = vpop.eup %16126  ;;  %16136 = vpow2.f32 %v6264_v43 }
0x1858   : > { %v16129_v36 = vpop.eup %16128  ;;  %v6277_v55 = vsel %vm6222_vm8, %v18416_v46, 0.0 }
0x1859   : > { %6278 = vadd.xlane.f32.xlu1 %v6277_v55  ;;  %v6274_v41 = vsel %vm2414_vm4, %v16129_v36, 0.0  ;;  %v6643_v48 = vpop.permute.xlu1 %6642 }
0x185a   : > { %6275 = vadd.xlane.f32.xlu0 %v6274_v41 }
0x185c   : > { %v18421_v39 = vpop.eup %16130 }
0x185d   : > { %v18423_v37 = vpop.eup %16132  ;;  %v6283_v32 = vsel %vm6222_vm8, %v18421_v39, 0.0  ;;  %v6819_v8 = vpop.permute.xlu1 %6818 }
0x185e   : > { %6284 = vadd.xlane.f32.xlu1 %v6283_v32  ;;  %v6280_v25 = vsel %vm2414_vm4, %v18423_v37, 0.0 }
0x185f   : > { %6281 = vadd.xlane.f32.xlu0 %v6280_v25 }
0x1860   : > { %v18433_v7 = vpop.eup %16134 }
0x1861   : > { %v18435_v47 = vpop.eup %16136  ;;  %v6289_v50 = vsel %vm6222_vm8, %v18433_v7, 0.0 }
0x1862   : > { %v6286_v2 = vsel %vm2414_vm4, %v18435_v47, 0.0 }
0x186f   : > { %6814 = vrot.lane.b32.xlu1 %v18362_v11, %s17092_s14 }
0x1875   : > { %6731 = vrot.lane.b32.xlu0 %v18294_v45, %s17092_s14 }
0x1893   : > { %6290 = vadd.xlane.f32.xlu1 %v6289_v50 }
0x1894   : > { %6287 = vadd.xlane.f32.xlu0 %v6286_v2 }
0x18a4   : > { %6727 = vrot.lane.b32.xlu1 %v18341_v60, %s17092_s14 }
0x18a8   : > { %6905 = vrot.lane.b32.xlu1 %v18356_v54, %s17092_s14 }
0x18aa   : > { %6816 = vrot.lane.b32.xlu0 %v18365_v12, %s17092_s14 }
0x18ac   : > { %6903 = vrot.lane.b32.xlu1 %v18378_v17, %s17092_s14 }
0x18ae   : > { %6729 = vrot.lane.b32.xlu0 %v18344_v40, %s17092_s14 }
0x18b2   : > { %6901 = vrot.lane.b32.xlu0 %v18384_v49, %s17092_s14 }
0x18e1   : > { %v6273_v10 = vpop.xlane.xlu1 %6272 }
0x18e2   : > { %16138 = vrcp.f32 %v6273_v10  ;;  %v6270_v44 = vpop.xlane.xlu0 %6269 }
0x18e3   : > { %16140 = vrcp.f32 %v6270_v44 }
0x18e6   : > { %v6279_v63 = vpop.xlane.xlu1 %6278 }
0x18e7   : > { %16142 = vrcp.f32 %v6279_v63  ;;  %v6276_v1 = vpop.xlane.xlu0 %6275 }
0x18e8   : > { %16144 = vrcp.f32 %v6276_v1 }
0x18eb   : > { %v6285_v15 = vpop.xlane.xlu1 %6284 }
0x18ec   : > { %v16139_v16 = vpop.eup %16138  ;;  %16146 = vrcp.f32 %v6285_v15  ;;  %v6282_v57 = vpop.xlane.xlu0 %6281 }
0x18ed   : > { %v16141_v42 = vpop.eup %16140  ;;  %16148 = vrcp.f32 %v6282_v57  ;;  %v6301_v14 = vmul.f32 %v16139_v16, %v16123_v24 }
0x18ee   : > { %v6300_v5 = vmul.f32 %v16141_v42, %v16125_v23 }
0x18f0   : > { %14596 = vmatprep.mubr.msk.f32.mxu1 %vm2414_vm4, %v6300_v5  ;;  %v6732_v22 = vpop.permute.xlu0 %6731 }
0x18f1   : > { %v16143_v27 = vpop.eup %16142  ;;  %14597 = vmatmul.mubr.msk.f32.vlgmr.msra.gmra.mrb[56].mxu1 %vm2414_vm4, %v6301_v14  ;;  %14619 = vmatprep.subr.msk.mxu0 %vm2068_vm1, %v6732_v22 }
0x18f2   : > { %v16145_v26 = vpop.eup %16144  ;;  %14600 = vmatpush3.msk.msra.mxu1 %vm2418_vm2, %v18392_v38  ;;  %v6303_v41 = vmul.f32 %v16143_v27, %v18416_v46  ;;  %v6815_v46 = vpop.permute.xlu1 %6814 }
0x18f3   : > { %14604 = vmatprep.subr.msk.mxu1 %vm2418_vm2, %v18304_v62  ;;  %v6302_v55 = vmul.f32 %v16145_v26, %v16129_v36 }
0x18f5   : > { %14601 = vmatprep.mubr.msk.f32.mxu1 %vm2414_vm4, %v6302_v55 }
0x18f6   : > { %v16147_v24 = vpop.eup %16146  ;;  %14602 = vmatmul.mubr.msk.f32.vlgmr.msra.gmra.mrb[58].mxu1 %vm2414_vm4, %v6303_v41 }
0x18f7   : > { %v16149_v23 = vpop.eup %16148  ;;  %14605 = vmatpush3.msk.msra.mxu1 %vm2418_vm2, %v18304_v62  ;;  %v6305_v25 = vmul.f32 %v16147_v24, %v18421_v39 }
0x18f8   : > { %14614 = vmatprep.subr.msk.mxu1 %vm2068_vm1, %v6645_v9  ;;  %v6304_v32 = vmul.f32 %v16149_v23, %v18423_v37 }
0x18fa   : > { %14606 = vmatprep.mubr.msk.f32.mxu1 %vm2414_vm4, %v6304_v32 }
0x18fb   : > { %14607 = vmatmul.mubr.msk.f32.vlgmr.msra.gmra.mrb[60].mxu1 %vm2414_vm4, %v6305_v25 }
0x18fc   : > { %14616 = vmatprep.mubr.msk.f32.mxu1 %vm2068_vm1, %v6641_v58 }
0x18fe   : > { %14615 = vmatpush3.xpose.msk.msra.mxu1 %vm2068_vm1, %v6645_v9 }
0x18ff   : > { %14624 = vmatprep.subr.msk.mxu1 %vm2068_vm1, %v6819_v8 }
0x1901   : > { %14617 = vmatmul.mubr.msk.f32.vlgmr.msra.gmra.mrb[62].mxu1 %vm2068_vm1, %v6643_v48 }
0x1902   : > { %14625 = vmatpush3.xpose.msk.msra.mxu1 %vm2068_vm1, %v6819_v8  ;;  %14626 = vmatprep.mubr.msk.f32.mxu1 %vm2068_vm1, %v6815_v46 }
0x1920   : > { %v6291_v36 = vpop.xlane.xlu1 %6290 }
0x1921   : > { %16150 = vrcp.f32 %v6291_v36  ;;  %v6288_v39 = vpop.xlane.xlu0 %6287 }
0x1922   : > { %16152 = vrcp.f32 %v6288_v39 }
0x1924   : > { %v6728_v52 = vpop.permute.xlu1 %6727 }
0x1925   : > { %v6817_v37 = vpop.permute.xlu0 %6816 }
0x1926   : > { %14627 = vmatmul.mubr.msk.f32.vlgmr.msra.gmra.mrb[64].mxu1 %vm2068_vm1, %v6817_v37 }
0x1928   : > { %v6906_v50 = vpop.permute.xlu1 %6905 }
0x1929   : > { %v6730_v43 = vpop.permute.xlu0 %6729 }
0x192b   : > { %v16151_v56 = vpop.eup %16150 }
0x192c   : > { %v16153_v59 = vpop.eup %16152  ;;  %v6307_v6 = vmul.f32 %v16151_v56, %v18433_v7  ;;  %v6904_v7 = vpop.permute.xlu1 %6903 }
0x192d   : > { %v6306_v4 = vmul.f32 %v16153_v59, %v18435_v47  ;;  %v6902_v2 = vpop.permute.xlu0 %6901 }
0x192f   : > { %14611 = vmatprep.mubr.msk.f32.mxu0 %vm2414_vm4, %v6306_v4 }
0x1930   : > { %14612 = vmatmul.mubr.msk.f32.vlgmr.msra.gmra.mrb[54].mxu0 %vm2414_vm4, %v6307_v6 }
0x1931   : > { %14620 = vmatpush3.xpose.msk.msra.mxu0 %vm2068_vm1, %v6732_v22  ;;  %14621 = vmatprep.mubr.msk.f32.mxu0 %vm2068_vm1, %v6728_v52 }
0x1932   : > { %14629 = vmatprep.subr.msk.mxu0 %vm2068_vm1, %v6906_v50 }
0x1934   : > { %14622 = vmatmul.mubr.msk.f32.vlgmr.msra.gmra.mrb[56].mxu0 %vm2068_vm1, %v6730_v43 }
0x1935   : > { %14630 = vmatpush3.xpose.msk.msra.mxu0 %vm2068_vm1, %v6906_v50  ;;  %14631 = vmatprep.mubr.msk.f32.mxu0 %vm2068_vm1, %v6902_v2 }
0x1938   : > { %14632 = vmatmul.mubr.msk.f32.vlgmr.msra.gmra.mrb[58].mxu0 %vm2068_vm1, %v6904_v7 }
0x19c4   : > { %v18488_v47 = vpop.f32.mrb[56].mxu1 }
0x19c5   : > { %v18490_v58 = vpop.f32.mrb[57].mxu1 }
0x19c9   : > { %v18492_v48 = vpop.f32.mrb[58].mxu1 }
0x19ca   : > { %v18494_v8 = vpop.f32.mrb[59].mxu1 }
0x19ce   : > { %v18496_v9 = vpop.f32.mrb[60].mxu1 }
0x19cf   : > { %v18498_v10 = vpop.f32.mrb[61].mxu1 }
0x19d4   : > { %v14618_v44 = vpop.f32.mrb[62].mxu1 }
0x19d5   : > { %v6989_v63 = vmul.f32 0.17677669, %v14618_v44  ;;  %v6718_v1 = vpop.f32.mrb[63].mxu1 }
0x19d6   : > { %v6988_v15 = vmul.f32 0.17677669, %v6718_v1 }
0x19d7   : > { %v6999_v16 = vsel %vm6222_vm8, %v6989_v63, -inf }
0x19d8   : > { %7000 = vmax.xlane.f32.xlu1 %v6999_v16  ;;  %v6996_v57 = vsel %vm2414_vm4, %v6988_v15, -inf }
0x19d9   : > { %6997 = vmax.xlane.f32.xlu0 %v6996_v57 }
0x19f9   : > { %v14628_v42 = vpop.f32.mrb[64].mxu1 }
0x19fa   : > { %v6993_v5 = vmul.f32 0.17677669, %v14628_v42  ;;  %v6892_v14 = vpop.f32.mrb[65].mxu1 }
0x19fb   : > { %v6992_v22 = vmul.f32 0.17677669, %v6892_v14 }
0x19fc   : > { %v7011_v27 = vsel %vm6222_vm8, %v6993_v5, -inf }
0x19fd   : > { %7012 = vmax.xlane.f32.xlu0 %v7011_v27  ;;  %v7008_v26 = vsel %vm2414_vm4, %v6992_v22, -inf }
0x1a01   : > { %7009 = vmax.xlane.f32.xlu0 %v7008_v26 }
0x1a03   : > { %v18504_v55 = vpop.f32.mrb[54].mxu0 }
0x1a04   : > { %v18506_v41 = vpop.f32.mrb[55].mxu0 }
0x1a07   : > { %v14623_v24 = vpop.f32.mrb[56].mxu0 }
0x1a08   : > { %v6991_v23 = vmul.f32 0.17677669, %v14623_v24  ;;  %v6805_v32 = vpop.f32.mrb[57].mxu0 }
0x1a09   : > { %v6990_v25 = vmul.f32 0.17677669, %v6805_v32 }
0x1a0a   : > { %v7005_v46 = vsel %vm6222_vm8, %v6991_v23, -inf }
0x1a0b   : > { %7006 = vmax.xlane.f32.xlu1 %v7005_v46  ;;  %v14633_v36 = vpop.f32.mrb[58].mxu0  ;;  %v7002_v39 = vsel %vm2414_vm4, %v6990_v25, -inf }
0x1a0c   : > { %v6995_v37 = vmul.f32 0.17677669, %v14633_v36  ;;  %7003 = vmax.xlane.f32.xlu0 %v7002_v39  ;;  %v6979_v56 = vpop.f32.mrb[59].mxu0 }
0x1a0d   : > { %v6994_v52 = vmul.f32 0.17677669, %v6979_v56 }
0x1a0e   : > { %v7017_v59 = vsel %vm6222_vm8, %v6995_v37, -inf }
0x1a0f   : > { %7018 = vmax.xlane.f32.xlu1 %v7017_v59  ;;  %v7014_v4 = vsel %vm2414_vm4, %v6994_v52, -inf }
0x1a10   : > { %7015 = vmax.xlane.f32.xlu0 %v7014_v4 }
0x1a20   : > { %7254 = vrot.lane.b32.xlu1 %v18304_v62, %s17092_s14 }
0x1a24   : > { %7169 = vrot.lane.b32.xlu1 %v18392_v38, %s17092_s14 }
0x1a26   : > { %7084 = vrot.lane.b32.xlu0 %v18371_v3, %s17092_s14 }
0x1a28   : > { %7428 = vrot.lane.b32.xlu1 %v18282_v61, %s19590_s19 }
0x1a2a   : > { %7339 = vrot.lane.b32.xlu0 %v18308_v0, %s17092_s14 }
0x1a2c   : > { %7424 = vrot.lane.b32.xlu1 %v18321_v29, %s19590_s19 }
0x1a2e   : > { %7426 = vrot.lane.b32.xlu0 %v18324_v33, %s19590_s19 }
0x1a30   : > { %7602 = vrot.lane.b32.xlu1 %v18330_v51, %s19590_s19 }
0x1a32   : > { %7515 = vrot.lane.b32.xlu0 %v18294_v45, %s19590_s19 }
0x1a34   : > { %7598 = vrot.lane.b32.xlu1 %v18362_v11, %s19590_s19 }
0x1a65   : > { %v7001_v6 = vpop.xlane.xlu1 %7000 }
0x1a66   : > { %v7021_v43 = vsub.f32 %v6989_v63, %v7001_v6  ;;  %v6998_v50 = vpop.xlane.xlu0 %6997 }
0x1a67   : > { %v7020_v2 = vsub.f32 %v6988_v15, %v6998_v50 }
0x1a68   : > { %v7030_v7 = vmul.f32 1.442695, %v7021_v43 }
0x1a69   : > { %v7028_v44 = vmul.f32 1.442695, %v7020_v2 }
0x1a6a   : > { %16154 = vpow2.f32 %v7030_v7 }
0x1a6b   : > { %16156 = vpow2.f32 %v7028_v44 }
0x1a74   : > { %v18532_v1 = vpop.eup %16154 }
0x1a75   : > { %v18534_v16 = vpop.eup %16156  ;;  %v7047_v57 = vsel %vm6222_vm8, %v18532_v1, 0.0 }
0x1a76   : > { %7048 = vadd.xlane.f32.xlu1 %v7047_v57  ;;  %v7044_v42 = vsel %vm2414_vm4, %v18534_v16, 0.0 }
0x1a77   : > { %7045 = vadd.xlane.f32.xlu0 %v7044_v42 }
0x1a8a   : > { %v7013_v14 = vpop.xlane.xlu0 %7012 }
0x1a8b   : > { %v7025_v63 = vsub.f32 %v6993_v5, %v7013_v14 }
0x1a8d   : > { %v7038_v27 = vmul.f32 1.442695, %v7025_v63 }
0x1a8e   : > { %v7010_v15 = vpop.xlane.xlu0 %7009 }
0x1a8f   : > { %16158 = vpow2.f32 %v7038_v27  ;;  %v7024_v26 = vsub.f32 %v6992_v22, %v7010_v15 }
0x1a91   : > { %v7036_v24 = vmul.f32 1.442695, %v7024_v26 }
0x1a93   : > { %16160 = vpow2.f32 %v7036_v24 }
0x1a98   : > { %v7007_v32 = vpop.xlane.xlu1 %7006 }
0x1a99   : > { %v18540_v46 = vpop.eup %16158  ;;  %v7023_v36 = vsub.f32 %v6991_v23, %v7007_v32  ;;  %v7004_v39 = vpop.xlane.xlu0 %7003 }
0x1a9a   : > { %v7022_v56 = vsub.f32 %v6990_v25, %v7004_v39  ;;  %v7059_v59 = vsel %vm6222_vm8, %v18540_v46, 0.0 }
0x1a9b   : > { %v7034_v4 = vmul.f32 1.442695, %v7023_v36  ;;  %7060 = vadd.xlane.f32.xlu1 %v7059_v59 }
0x1a9c   : > { %v7032_v6 = vmul.f32 1.442695, %v7022_v56  ;;  %v7019_v43 = vpop.xlane.xlu1 %7018 }
0x1a9d   : > { %v18544_v5 = vpop.eup %16160  ;;  %16162 = vpow2.f32 %v7034_v4  ;;  %v7027_v50 = vsub.f32 %v6995_v37, %v7019_v43  ;;  %v7016_v22 = vpop.xlane.xlu0 %7015 }
0x1a9e   : > { %16164 = vpow2.f32 %v7032_v6  ;;  %v7026_v2 = vsub.f32 %v6994_v52, %v7016_v22  ;;  %v7056_v7 = vsel %vm2414_vm4, %v18544_v5, 0.0 }
0x1a9f   : > { %v7042_v23 = vmul.f32 1.442695, %v7027_v50  ;;  %7057 = vadd.xlane.f32.xlu0 %v7056_v7 }
0x1aa0   : > { %v7040_v25 = vmul.f32 1.442695, %v7026_v2  ;;  %v7255_v44 = vpop.permute.xlu1 %7254 }
0x1aa1   : > { %16166 = vpow2.f32 %v7042_v23  ;;  %v7085_v57 = vpop.permute.xlu0 %7084 }
0x1aa2   : > { %16168 = vpow2.f32 %v7040_v25  ;;  %14634 = vmatprep.subr.msk.mxu1 %vm2418_vm2, %v7085_v57 }
0x1aa3   : > { %14635 = vmatpush3.msk.msra.mxu1 %vm2418_vm2, %v7085_v57 }
0x1aa4   : > { %v7170_v42 = vpop.permute.xlu1 %7169  ;;  %14644 = vmatprep.subr.msk.mxu1 %vm2418_vm2, %v7255_v44 }
0x1aa5   : > { %14639 = vmatprep.subr.msk.mxu0 %vm2418_vm2, %v7170_v42  ;;  %v18552_v37 = vpop.permute.xlu0 %7339 }
0x1aa6   : > { %14640 = vmatpush3.msk.msra.mxu0 %vm2418_vm2, %v7170_v42 }
0x1aa7   : > { %v18555_v52 = vpop.eup %16162  ;;  %14649 = vmatprep.subr.msk.mxu0 %vm2418_vm2, %v18552_v37 }
0x1aa8   : > { %v18559_v14 = vpop.eup %16164  ;;  %v7053_v63 = vsel %vm6222_vm8, %v18555_v52, 0.0  ;;  %v7429_v36 = vpop.permute.xlu1 %7428 }
0x1aa9   : > { %7054 = vadd.xlane.f32.xlu1 %v7053_v63  ;;  %v7050_v27 = vsel %vm2414_vm4, %v18559_v14, 0.0  ;;  %v7427_v59 = vpop.permute.xlu0 %7426 }
0x1aaa   : > { %7051 = vadd.xlane.f32.xlu0 %v7050_v27 }
0x1aab   : > { %v18565_v15 = vpop.eup %16166 }
0x1aac   : > { %v18567_v26 = vpop.eup %16168  ;;  %v7065_v24 = vsel %vm6222_vm8, %v18565_v15, 0.0  ;;  %v7425_v39 = vpop.permute.xlu1 %7424 }
0x1aad   : > { %7066 = vadd.xlane.f32.xlu1 %v7065_v24  ;;  %v7062_v32 = vsel %vm2414_vm4, %v18567_v26, 0.0  ;;  %v7516_v6 = vpop.permute.xlu0 %7515 }
0x1aae   : > { %7063 = vadd.xlane.f32.xlu0 %v7062_v32 }
0x1ab0   : > { %v7603_v56 = vpop.permute.xlu1 %7602 }
0x1ab4   : > { %v7599_v4 = vpop.permute.xlu1 %7598 }
0x1abe   : > { %7511 = vrot.lane.b32.xlu1 %v18341_v60, %s19590_s19 }
0x1ac2   : > { %7689 = vrot.lane.b32.xlu1 %v18356_v54, %s19590_s19 }
0x1ac4   : > { %7600 = vrot.lane.b32.xlu0 %v18365_v12, %s19590_s19 }
0x1ac6   : > { %7687 = vrot.lane.b32.xlu1 %v18378_v17, %s19590_s19 }
0x1ac8   : > { %7513 = vrot.lane.b32.xlu0 %v18344_v40, %s19590_s19 }
0x1acc   : > { %7685 = vrot.lane.b32.xlu0 %v18384_v49, %s19590_s19 }
0x1b03   : > { %v7049_v43 = vpop.xlane.xlu1 %7048 }
0x1b04   : > { %16170 = vrcp.f32 %v7049_v43  ;;  %v7046_v50 = vpop.xlane.xlu0 %7045 }
0x1b05   : > { %16172 = vrcp.f32 %v7046_v50 }
0x1b0e   : > { %v16171_v22 = vpop.eup %16170 }
0x1b0f   : > { %v16173_v2 = vpop.eup %16172  ;;  %v7077_v23 = vmul.f32 %v16171_v22, %v18532_v1 }
0x1b10   : > { %v7076_v7 = vmul.f32 %v16173_v2, %v18534_v16 }
0x1b12   : > { %14636 = vmatprep.mubr.msk.f32.mxu1 %vm2414_vm4, %v7076_v7 }
0x1b13   : > { %14637 = vmatmul.mubr.msk.f32.vlgmr.msra.gmra.mrb[66].mxu1 %vm2414_vm4, %v7077_v23 }
0x1b14   : > { %14645 = vmatpush3.msk.msra.mxu1 %vm2418_vm2, %v7255_v44 }
0x1b15   : > { %14654 = vmatprep.subr.msk.mxu1 %vm2068_vm1, %v7429_v36 }
0x1b28   : > { %v7061_v25 = vpop.xlane.xlu1 %7060 }
0x1b29   : > { %16174 = vrcp.f32 %v7061_v25 }
0x1b2c   : > { %v7058_v57 = vpop.xlane.xlu0 %7057 }
0x1b2d   : > { %16176 = vrcp.f32 %v7058_v57 }
0x1b33   : > { %v16175_v42 = vpop.eup %16174 }
0x1b34   : > { %v7081_v16 = vmul.f32 %v16175_v42, %v18540_v46 }
0x1b36   : > { %v7055_v63 = vpop.xlane.xlu1 %7054 }
0x1b37   : > { %v16177_v27 = vpop.eup %16176  ;;  %16178 = vrcp.f32 %v7055_v63  ;;  %v7052_v24 = vpop.xlane.xlu0 %7051 }
0x1b38   : > { %16180 = vrcp.f32 %v7052_v24  ;;  %v7080_v1 = vmul.f32 %v16177_v27, %v18544_v5 }
0x1b3a   : > { %v7067_v32 = vpop.xlane.xlu1 %7066  ;;  %14646 = vmatprep.mubr.msk.f32.mxu1 %vm2414_vm4, %v7080_v1 }
0x1b3b   : > { %16182 = vrcp.f32 %v7067_v32  ;;  %14647 = vmatmul.mubr.msk.f32.vlgmr.msra.gmra.mrb[68].mxu1 %vm2414_vm4, %v7081_v16  ;;  %v7064_v44 = vpop.xlane.xlu0 %7063 }
0x1b3c   : > { %14655 = vmatpush3.xpose.msk.msra.mxu1 %vm2068_vm1, %v7429_v36  ;;  %16184 = vrcp.f32 %v7064_v44  ;;  %14656 = vmatprep.mubr.msk.f32.mxu1 %vm2068_vm1, %v7425_v39 }
0x1b3d   : > { %14664 = vmatprep.subr.msk.mxu1 %vm2068_vm1, %v7603_v56 }
0x1b3f   : > { %14657 = vmatmul.mubr.msk.f32.vlgmr.msra.gmra.mrb[70].mxu1 %vm2068_vm1, %v7427_v59  ;;  %v7601_v43 = vpop.permute.xlu0 %7600  ;;  %v7512_v59 = vpop.permute.xlu1 %7511 }
0x1b40   : > { %14665 = vmatpush3.xpose.msk.msra.mxu1 %vm2068_vm1, %v7603_v56  ;;  %14666 = vmatprep.mubr.msk.f32.mxu1 %vm2068_vm1, %v7599_v4 }
0x1b41   : > { %v16179_v46 = vpop.eup %16178 }
0x1b42   : > { %v16181_v5 = vpop.eup %16180  ;;  %v7079_v36 = vmul.f32 %v16179_v46, %v18555_v52 }
0x1b43   : > { %14667 = vmatmul.mubr.msk.f32.vlgmr.msra.gmra.mrb[72].mxu1 %vm2068_vm1, %v7601_v43  ;;  %v7078_v50 = vmul.f32 %v16181_v5, %v18559_v14  ;;  %v7514_v52 = vpop.permute.xlu0 %7513  ;;  %v7690_v14 = vpop.permute.xlu1 %7689 }
0x1b45   : > { %v16183_v22 = vpop.eup %16182  ;;  %14641 = vmatprep.mubr.msk.f32.mxu0 %vm2414_vm4, %v7078_v50 }
0x1b46   : > { %v16185_v39 = vpop.eup %16184  ;;  %14642 = vmatmul.mubr.msk.f32.vlgmr.msra.gmra.mrb[60].mxu0 %vm2414_vm4, %v7079_v36  ;;  %v7083_v4 = vmul.f32 %v16183_v22, %v18565_v15 }
0x1b47   : > { %14650 = vmatpush3.msk.msra.mxu0 %vm2418_vm2, %v18552_v37  ;;  %v7082_v56 = vmul.f32 %v16185_v39, %v18567_v26  ;;  %v7686_v37 = vpop.permute.xlu0 %7685  ;;  %v7688_v15 = vpop.permute.xlu1 %7687 }
0x1b48   : > { %14659 = vmatprep.subr.msk.mxu0 %vm2068_vm1, %v7516_v6 }
0x1b49   : > { %14651 = vmatprep.mubr.msk.f32.mxu0 %vm2414_vm4, %v7082_v56 }
0x1b4a   : > { %14652 = vmatmul.mubr.msk.f32.vlgmr.msra.gmra.mrb[62].mxu0 %vm2414_vm4, %v7083_v4 }
0x1b4b   : > { %14661 = vmatprep.mubr.msk.f32.mxu0 %vm2068_vm1, %v7512_v59 }
0x1b4e   : > { %14660 = vmatpush3.xpose.msk.msra.mxu0 %vm2068_vm1, %v7516_v6 }
0x1b4f   : > { %14669 = vmatprep.subr.msk.mxu0 %vm2068_vm1, %v7690_v14 }
0x1b51   : > { %14662 = vmatmul.mubr.msk.f32.vlgmr.msra.gmra.mrb[64].mxu0 %vm2068_vm1, %v7514_v52 }
0x1b52   : > { %14670 = vmatpush3.xpose.msk.msra.mxu0 %vm2068_vm1, %v7690_v14  ;;  %14671 = vmatprep.mubr.msk.f32.mxu0 %vm2068_vm1, %v7686_v37 }
0x1b55   : > { %14672 = vmatmul.mubr.msk.f32.vlgmr.msra.gmra.mrb[66].mxu0 %vm2068_vm1, %v7688_v15 }
0x1be6   : > { %v18620_v26 = vpop.f32.mrb[66].mxu1 }
0x1be7   : > { %v18622_v2 = vpop.f32.mrb[67].mxu1 }
0x1c0e   : > { %v18624_v7 = vpop.f32.mrb[68].mxu1 }
0x1c0f   : > { %v18626_v23 = vpop.f32.mrb[69].mxu1 }
0x1c12   : > { %v14658_v6 = vpop.f32.mrb[70].mxu1 }
0x1c13   : > { %v7773_v25 = vmul.f32 0.17677669, %v14658_v6  ;;  %v7502_v57 = vpop.f32.mrb[71].mxu1 }
0x1c14   : > { %v7772_v42 = vmul.f32 0.17677669, %v7502_v57 }
0x1c15   : > { %v7783_v63 = vsel %vm6222_vm8, %v7773_v25, -inf }
0x1c16   : > { %7784 = vmax.xlane.f32.xlu1 %v7783_v63  ;;  %v14668_v27 = vpop.f32.mrb[72].mxu1  ;;  %v7780_v24 = vsel %vm2414_vm4, %v7772_v42, -inf }
0x1c17   : > { %v7777_v1 = vmul.f32 0.17677669, %v14668_v27  ;;  %7781 = vmax.xlane.f32.xlu0 %v7780_v24  ;;  %v7676_v16 = vpop.f32.mrb[73].mxu1 }
0x1c18   : > { %v7776_v46 = vmul.f32 0.17677669, %v7676_v16 }
0x1c19   : > { %v18630_v32 = vpop.f32.mrb[60].mxu0  ;;  %v7795_v44 = vsel %vm6222_vm8, %v7777_v1, -inf }
0x1c1a   : > { %v18633_v5 = vpop.f32.mrb[61].mxu0  ;;  %v7792_v36 = vsel %vm2414_vm4, %v7776_v46, -inf }
0x1c1b   : > { %7796 = vmax.xlane.f32.xlu0 %v7795_v44 }
0x1c1d   : > { %v18635_v43 = vpop.f32.mrb[62].mxu0 }
0x1c1e   : > { %v18637_v50 = vpop.f32.mrb[63].mxu0 }
0x1c1f   : > { %7793 = vmax.xlane.f32.xlu0 %v7792_v36 }
0x1c24   : > { %v14663_v22 = vpop.f32.mrb[64].mxu0 }
0x1c25   : > { %v7775_v39 = vmul.f32 0.17677669, %v14663_v22  ;;  %v7589_v56 = vpop.f32.mrb[65].mxu0 }
0x1c26   : > { %v7774_v59 = vmul.f32 0.17677669, %v7589_v56 }
0x1c27   : > { %v7789_v4 = vsel %vm6222_vm8, %v7775_v39, -inf }
0x1c28   : > { %7790 = vmax.xlane.f32.xlu1 %v7789_v4  ;;  %v14673_v52 = vpop.f32.mrb[66].mxu0  ;;  %v7786_v14 = vsel %vm2414_vm4, %v7774_v59, -inf }
0x1c29   : > { %v7779_v37 = vmul.f32 0.17677669, %v14673_v52  ;;  %7787 = vmax.xlane.f32.xlu0 %v7786_v14  ;;  %v7763_v15 = vpop.f32.mrb[67].mxu0 }
0x1c2a   : > { %v7778_v6 = vmul.f32 0.17677669, %v7763_v15 }
0x1c2b   : > { %v7801_v57 = vsel %vm6222_vm8, %v7779_v37, -inf }
0x1c2c   : > { %7802 = vmax.xlane.f32.xlu1 %v7801_v57  ;;  %v7798_v63 = vsel %vm2414_vm4, %v7778_v6, -inf }
0x1c2d   : > { %7799 = vmax.xlane.f32.xlu0 %v7798_v63 }
0x1c3d   : > { %8038 = vrot.lane.b32.xlu1 %v18304_v62, %s19590_s19 }
0x1c41   : > { %7953 = vrot.lane.b32.xlu1 %v18392_v38, %s19590_s19 }
0x1c43   : > { %7868 = vrot.lane.b32.xlu0 %v18371_v3, %s19590_s19 }
0x1c45   : > { %8212 = vrot.lane.b32.xlu1 %v18282_v61, %s17094_s7 }
0x1c47   : > { %8123 = vrot.lane.b32.xlu0 %v18308_v0, %s19590_s19 }
0x1c49   : > { %8208 = vrot.lane.b32.xlu1 %v18321_v29, %s17094_s7 }
0x1c4b   : > { %8210 = vrot.lane.b32.xlu0 %v18324_v33, %s17094_s7 }
0x1c4d   : > { %8299 = vrot.lane.b32.xlu1 %v18294_v45, %s17094_s7 }
0x1ca3   : > { %v7785_v27 = vpop.xlane.xlu1 %7784 }
0x1ca4   : > { %v7805_v24 = vsub.f32 %v7773_v25, %v7785_v27  ;;  %v7782_v16 = vpop.xlane.xlu0 %7781 }
0x1ca5   : > { %v7804_v44 = vsub.f32 %v7772_v42, %v7782_v16 }
0x1ca6   : > { %v7814_v36 = vmul.f32 1.442695, %v7805_v24 }
0x1ca7   : > { %v7812_v22 = vmul.f32 1.442695, %v7804_v44 }
0x1ca8   : > { %16186 = vpow2.f32 %v7814_v36  ;;  %v7797_v61 = vpop.xlane.xlu0 %7796 }
0x1ca9   : > { %16188 = vpow2.f32 %v7812_v22  ;;  %v7809_v56 = vsub.f32 %v7777_v1, %v7797_v61 }
0x1cab   : > { %v7822_v4 = vmul.f32 1.442695, %v7809_v56 }
0x1cac   : > { %v7794_v52 = vpop.xlane.xlu0 %7793 }
0x1cad   : > { %16190 = vpow2.f32 %v7822_v4  ;;  %v7808_v29 = vsub.f32 %v7776_v46, %v7794_v52 }
0x1caf   : > { %v7820_v14 = vmul.f32 1.442695, %v7808_v29 }
0x1cb1   : > { %16192 = vpow2.f32 %v7820_v14 }
0x1cb2   : > { %v18660_v33 = vpop.eup %16186 }
0x1cb3   : > { %v18662_v15 = vpop.eup %16188  ;;  %v7831_v45 = vsel %vm6222_vm8, %v18660_v33, 0.0 }
0x1cb4   : > { %7832 = vadd.xlane.f32.xlu1 %v7831_v45  ;;  %v7828_v25 = vsel %vm2414_vm4, %v18662_v15, 0.0 }
0x1cb5   : > { %v7791_v42 = vpop.xlane.xlu1 %7790  ;;  %7829 = vadd.xlane.f32.xlu0 %v7828_v25 }
0x1cb6   : > { %v7807_v1 = vsub.f32 %v7775_v39, %v7791_v42  ;;  %v7788_v57 = vpop.xlane.xlu0 %7787 }
0x1cb7   : > { %v18668_v63 = vpop.eup %16190  ;;  %v7806_v46 = vsub.f32 %v7774_v59, %v7788_v57 }
0x1cb8   : > { %v7818_v27 = vmul.f32 1.442695, %v7807_v1  ;;  %v7843_v24 = vsel %vm6222_vm8, %v18668_v63, 0.0 }
0x1cb9   : > { %v7816_v16 = vmul.f32 1.442695, %v7806_v46  ;;  %v7803_v44 = vpop.xlane.xlu1 %7802  ;;  %7844 = vadd.xlane.f32.xlu1 %v7843_v24 }
0x1cba   : > { %16194 = vpow2.f32 %v7818_v27  ;;  %v7811_v36 = vsub.f32 %v7779_v37, %v7803_v44  ;;  %v7800_v22 = vpop.xlane.xlu0 %7799 }
0x1cbb   : > { %v18672_v61 = vpop.eup %16192  ;;  %16196 = vpow2.f32 %v7816_v16  ;;  %v7810_v56 = vsub.f32 %v7778_v6, %v7800_v22 }
0x1cbc   : > { %v7826_v4 = vmul.f32 1.442695, %v7811_v36  ;;  %v7840_v39 = vsel %vm2414_vm4, %v18672_v61, 0.0 }
0x1cbd   : > { %v7824_v52 = vmul.f32 1.442695, %v7810_v56  ;;  %v8039_v59 = vpop.permute.xlu1 %8038  ;;  %7841 = vadd.xlane.f32.xlu0 %v7840_v39 }
0x1cbe   : > { %16198 = vpow2.f32 %v7826_v4  ;;  %v7869_v29 = vpop.permute.xlu0 %7868 }
0x1cbf   : > { %16200 = vpow2.f32 %v7824_v52  ;;  %14674 = vmatprep.subr.msk.mxu1 %vm2418_vm2, %v7869_v29 }
0x1cc0   : > { %14675 = vmatpush3.msk.msra.mxu1 %vm2418_vm2, %v7869_v29 }
0x1cc1   : > { %v7954_v37 = vpop.permute.xlu1 %7953  ;;  %14684 = vmatprep.subr.msk.mxu1 %vm2418_vm2, %v8039_v59 }
0x1cc2   : > { %14679 = vmatprep.subr.msk.mxu0 %vm2418_vm2, %v7954_v37  ;;  %v18680_v6 = vpop.permute.xlu0 %8123 }
0x1cc3   : > { %14680 = vmatpush3.msk.msra.mxu0 %vm2418_vm2, %v7954_v37 }
0x1cc4   : > { %v18683_v14 = vpop.eup %16194  ;;  %14689 = vmatprep.subr.msk.mxu0 %vm2418_vm2, %v18680_v6 }
0x1cc5   : > { %v18687_v45 = vpop.eup %16196  ;;  %v7837_v25 = vsel %vm6222_vm8, %v18683_v14, 0.0 }
0x1cc6   : > { %7838 = vadd.xlane.f32.xlu1 %v7837_v25  ;;  %v7834_v42 = vsel %vm2414_vm4, %v18687_v45, 0.0  ;;  %v8211_v16 = vpop.permute.xlu0 %8210 }
0x1cc7   : > { %7835 = vadd.xlane.f32.xlu0 %v7834_v42 }
0x1cc8   : > { %v18693_v1 = vpop.eup %16198 }
0x1cc9   : > { %v18695_v57 = vpop.eup %16200  ;;  %v7849_v46 = vsel %vm6222_vm8, %v18693_v1, 0.0 }
0x1cca   : > { %7850 = vadd.xlane.f32.xlu1 %v7849_v46  ;;  %v7846_v27 = vsel %vm2414_vm4, %v18695_v57, 0.0 }
0x1ccb   : > { %7847 = vadd.xlane.f32.xlu0 %v7846_v27 }
0x1cdb   : > { %8297 = vrot.lane.b32.xlu1 %v18344_v40, %s17094_s7  ;;  %v8213_v40 = vpop.permute.xlu1 %8212 }
0x1cdf   : > { %8382 = vrot.lane.b32.xlu1 %v18362_v11, %s17094_s7  ;;  %v8209_v11 = vpop.permute.xlu1 %8208 }
0x1ce1   : > { %8295 = vrot.lane.b32.xlu0 %v18341_v60, %s17094_s7 }
0x1ce3   : > { %8473 = vrot.lane.b32.xlu1 %v18356_v54, %s17094_s7  ;;  %v8300_v24 = vpop.permute.xlu1 %8299 }
0x1ce5   : > { %8386 = vrot.lane.b32.xlu0 %v18330_v51, %s17094_s7 }
0x1ce7   : > { %8471 = vrot.lane.b32.xlu1 %v18378_v17, %s17094_s7 }
0x1ce9   : > { %8384 = vrot.lane.b32.xlu0 %v18365_v12, %s17094_s7 }
0x1ced   : > { %8469 = vrot.lane.b32.xlu0 %v18384_v49, %s17094_s7 }
0x1d41   : > { %v7833_v60 = vpop.xlane.xlu1 %7832 }
0x1d42   : > { %16202 = vrcp.f32 %v7833_v60  ;;  %v7830_v44 = vpop.xlane.xlu0 %7829 }
0x1d43   : > { %16204 = vrcp.f32 %v7830_v44 }
0x1d46   : > { %v7845_v54 = vpop.xlane.xlu1 %7844 }
0x1d47   : > { %16206 = vrcp.f32 %v7845_v54 }
0x1d4a   : > { %v7842_v51 = vpop.xlane.xlu0 %7841 }
0x1d4b   : > { %16208 = vrcp.f32 %v7842_v51 }
0x1d4c   : > { %v16203_v36 = vpop.eup %16202 }
0x1d4d   : > { %v16205_v17 = vpop.eup %16204  ;;  %v7861_v12 = vmul.f32 %v16203_v36, %v18660_v33 }
0x1d4e   : > { %v7860_v22 = vmul.f32 %v16205_v17, %v18662_v15 }
0x1d50   : > { %14676 = vmatprep.mubr.msk.f32.mxu1 %vm2414_vm4, %v7860_v22 }
0x1d51   : > { %14677 = vmatmul.mubr.msk.f32.vlgmr.msra.gmra.mrb[74].mxu1 %vm2414_vm4, %v7861_v12  ;;  %v16207_v56 = vpop.eup %16206 }
0x1d52   : > { %14685 = vmatpush3.msk.msra.mxu1 %vm2418_vm2, %v8039_v59  ;;  %v7865_v15 = vmul.f32 %v16207_v56, %v18668_v63 }
0x1d53   : > { %v7839_v49 = vpop.xlane.xlu1 %7838  ;;  %14694 = vmatprep.subr.msk.mxu1 %vm2068_vm1, %v8213_v40 }
0x1d54   : > { %16210 = vrcp.f32 %v7839_v49  ;;  %v7836_v4 = vpop.xlane.xlu0 %7835 }
0x1d55   : > { %v16209_v39 = vpop.eup %16208  ;;  %16212 = vrcp.f32 %v7836_v4 }
0x1d56   : > { %v7864_v52 = vmul.f32 %v16209_v39, %v18672_v61 }
0x1d57   : > { %v7851_v29 = vpop.xlane.xlu1 %7850 }
0x1d58   : > { %16214 = vrcp.f32 %v7851_v29  ;;  %v7848_v33 = vpop.xlane.xlu0 %7847  ;;  %14686 = vmatprep.mubr.msk.f32.mxu1 %vm2414_vm4, %v7864_v52 }
0x1d59   : > { %16216 = vrcp.f32 %v7848_v33  ;;  %14687 = vmatmul.mubr.msk.f32.vlgmr.msra.gmra.mrb[76].mxu1 %vm2414_vm4, %v7865_v15 }
0x1d5a   : > { %14695 = vmatpush3.xpose.msk.msra.mxu1 %vm2068_vm1, %v8213_v40  ;;  %14696 = vmatprep.mubr.msk.f32.mxu1 %vm2068_vm1, %v8209_v11 }
0x1d5b   : > { %v8298_v59 = vpop.permute.xlu1 %8297 }
0x1d5c   : > { %v8296_v37 = vpop.permute.xlu0 %8295 }
0x1d5d   : > { %14697 = vmatmul.mubr.msk.f32.vlgmr.msra.gmra.mrb[78].mxu1 %vm2068_vm1, %v8211_v16 }
0x1d5e   : > { %v16211_v25 = vpop.eup %16210 }
0x1d5f   : > { %v16213_v61 = vpop.eup %16212  ;;  %v8383_v42 = vpop.permute.xlu1 %8382  ;;  %v7863_v27 = vmul.f32 %v16211_v25, %v18683_v14 }
0x1d60   : > { %14706 = vmatprep.mubr.msk.f32.mxu1 %vm2068_vm1, %v8383_v42  ;;  %v8387_v63 = vpop.permute.xlu0 %8386  ;;  %v7862_v46 = vmul.f32 %v16213_v61, %v18687_v45 }
0x1d61   : > { %14704 = vmatprep.subr.msk.mxu1 %vm2068_vm1, %v8387_v63 }
0x1d62   : > { %v16215_v60 = vpop.eup %16214  ;;  %14681 = vmatprep.mubr.msk.f32.mxu0 %vm2414_vm4, %v7862_v46  ;;  %14705 = vmatpush3.xpose.msk.msra.mxu1 %vm2068_vm1, %v8387_v63 }
0x1d63   : > { %v16217_v40 = vpop.eup %16216  ;;  %14682 = vmatmul.mubr.msk.f32.vlgmr.msra.gmra.mrb[68].mxu0 %vm2414_vm4, %v7863_v27  ;;  %v7867_v14 = vmul.f32 %v16215_v60, %v18693_v1  ;;  %v8474_v45 = vpop.permute.xlu1 %8473 }
0x1d64   : > { %14690 = vmatpush3.msk.msra.mxu0 %vm2418_vm2, %v18680_v6  ;;  %v8385_v11 = vpop.permute.xlu0 %8384  ;;  %v7866_v16 = vmul.f32 %v16217_v40, %v18695_v57 }
0x1d65   : > { %14699 = vmatprep.subr.msk.mxu0 %vm2068_vm1, %v8300_v24  ;;  %14707 = vmatmul.mubr.msk.f32.vlgmr.msra.gmra.mrb[80].mxu1 %vm2068_vm1, %v8385_v11 }
0x1d66   : > { %14691 = vmatprep.mubr.msk.f32.mxu0 %vm2414_vm4, %v7866_v16 }
0x1d67   : > { %14692 = vmatmul.mubr.msk.f32.vlgmr.msra.gmra.mrb[70].mxu0 %vm2414_vm4, %v7867_v14  ;;  %v8472_v57 = vpop.permute.xlu1 %8471 }
0x1d68   : > { %14701 = vmatprep.mubr.msk.f32.mxu0 %vm2068_vm1, %v8296_v37  ;;  %v8470_v6 = vpop.permute.xlu0 %8469 }
0x1d6b   : > { %14700 = vmatpush3.xpose.msk.msra.mxu0 %vm2068_vm1, %v8300_v24 }
0x1d6c   : > { %14709 = vmatprep.subr.msk.mxu0 %vm2068_vm1, %v8474_v45 }
0x1d6e   : > { %14702 = vmatmul.mubr.msk.f32.vlgmr.msra.gmra.mrb[72].mxu0 %vm2068_vm1, %v8298_v59 }
0x1d6f   : > { %14710 = vmatpush3.xpose.msk.msra.mxu0 %vm2068_vm1, %v8474_v45  ;;  %14711 = vmatprep.mubr.msk.f32.mxu0 %vm2068_vm1, %v8470_v6 }
0x1d72   : > { %14712 = vmatmul.mubr.msk.f32.vlgmr.msra.gmra.mrb[74].mxu0 %vm2068_vm1, %v8472_v57 }
0x1e24   : > { %v18752_v1 = vpop.f32.mrb[74].mxu1 }
0x1e25   : > { %v18754_v44 = vpop.f32.mrb[75].mxu1 }
0x1e2c   : > { %v18756_v54 = vpop.f32.mrb[76].mxu1 }
0x1e2d   : > { %v18758_v51 = vpop.f32.mrb[77].mxu1 }
0x1e30   : > { %v14698_v24 = vpop.f32.mrb[78].mxu1 }
0x1e31   : > { %v8557_v36 = vmul.f32 0.17677669, %v14698_v24  ;;  %v8286_v17 = vpop.f32.mrb[79].mxu1 }
0x1e32   : > { %v8556_v22 = vmul.f32 0.17677669, %v8286_v17 }
0x1e33   : > { %v8567_v12 = vsel %vm6222_vm8, %v8557_v36, -inf }
0x1e34   : > { %8568 = vmax.xlane.f32.xlu1 %v8567_v12  ;;  %v8564_v49 = vsel %vm2414_vm4, %v8556_v22, -inf }
0x1e35   : > { %8565 = vmax.xlane.f32.xlu0 %v8564_v49 }
0x1e36   : > { %v18762_v56 = vpop.f32.mrb[68].mxu0 }
0x1e37   : > { %v18764_v4 = vpop.f32.mrb[69].mxu0 }
0x1e38   : > { %v14708_v39 = vpop.f32.mrb[80].mxu1 }
0x1e39   : > { %v8561_v52 = vmul.f32 0.17677669, %v14708_v39  ;;  %v8460_v29 = vpop.f32.mrb[81].mxu1 }
0x1e3a   : > { %v18766_v15 = vpop.f32.mrb[70].mxu0  ;;  %v8560_v40 = vmul.f32 0.17677669, %v8460_v29 }
0x1e3b   : > { %v18768_v33 = vpop.f32.mrb[71].mxu0  ;;  %v8579_v59 = vsel %vm6222_vm8, %v8561_v52, -inf }
0x1e3c   : > { %8580 = vmax.xlane.f32.xlu1 %v8579_v59  ;;  %v8576_v45 = vsel %vm2414_vm4, %v8560_v40, -inf }
0x1e41   : > { %v14703_v37 = vpop.f32.mrb[72].mxu0 }
0x1e42   : > { %v8559_v25 = vmul.f32 0.17677669, %v14703_v37  ;;  %v8373_v61 = vpop.f32.mrb[73].mxu0 }
0x1e43   : > { %v8558_v42 = vmul.f32 0.17677669, %v8373_v61 }
0x1e44   : > { %v8573_v63 = vsel %vm6222_vm8, %v8559_v25, -inf }
0x1e45   : > { %8574 = vmax.xlane.f32.xlu0 %v8573_v63  ;;  %v14713_v46 = vpop.f32.mrb[74].mxu0  ;;  %v8570_v11 = vsel %vm2414_vm4, %v8558_v42, -inf }
0x1e46   : > { %v8563_v27 = vmul.f32 0.17677669, %v14713_v46  ;;  %v8547_v60 = vpop.f32.mrb[75].mxu0 }
0x1e47   : > { %v8562_v14 = vmul.f32 0.17677669, %v8547_v60 }
0x1e48   : > { %v8585_v16 = vsel %vm6222_vm8, %v8563_v27, -inf }
0x1e49   : > { %8571 = vmax.xlane.f32.xlu0 %v8570_v11  ;;  %8586 = vmax.xlane.f32.xlu1 %v8585_v16  ;;  %v8582_v6 = vsel %vm2414_vm4, %v8562_v14, -inf }
0x1e4d   : > { %8577 = vmax.xlane.f32.xlu0 %v8576_v45 }
0x1e51   : > { %8583 = vmax.xlane.f32.xlu0 %v8582_v6 }
0x1ec1   : > { %v8569_v57 = vpop.xlane.xlu1 %8568 }
0x1ec2   : > { %v8589_v24 = vsub.f32 %v8557_v36, %v8569_v57  ;;  %v8566_v17 = vpop.xlane.xlu0 %8565 }
0x1ec3   : > { %v8588_v12 = vsub.f32 %v8556_v22, %v8566_v17 }
0x1ec4   : > { %v8598_v49 = vmul.f32 1.442695, %v8589_v24 }
0x1ec5   : > { %v8596_v39 = vmul.f32 1.442695, %v8588_v12 }
0x1ec6   : > { %16218 = vpow2.f32 %v8598_v49 }
0x1ec7   : > { %16220 = vpow2.f32 %v8596_v39 }
0x1ec9   : > { %v8581_v29 = vpop.xlane.xlu1 %8580 }
0x1eca   : > { %v8593_v61 = vsub.f32 %v8561_v52, %v8581_v29 }
0x1ecc   : > { %v8606_v22 = vmul.f32 1.442695, %v8593_v61 }
0x1ed0   : > { %v18776_v59 = vpop.eup %16218 }
0x1ed1   : > { %v18778_v37 = vpop.eup %16220  ;;  %v8615_v63 = vsel %vm6222_vm8, %v18776_v59, 0.0 }
0x1ed2   : > { %v8575_v46 = vpop.xlane.xlu0 %8574  ;;  %8616 = vadd.xlane.f32.xlu1 %v8615_v63  ;;  %v8612_v36 = vsel %vm2414_vm4, %v18778_v37, 0.0 }
0x1ed3   : > { %v8591_v60 = vsub.f32 %v8559_v25, %v8575_v46  ;;  %8613 = vadd.xlane.f32.xlu0 %v8612_v36 }
0x1ed5   : > { %v8602_v11 = vmul.f32 1.442695, %v8591_v60 }
0x1ed6   : > { %v8587_v16 = vpop.xlane.xlu1 %8586  ;;  %v8572_v45 = vpop.xlane.xlu0 %8571 }
0x1ed7   : > { %16222 = vpow2.f32 %v8602_v11  ;;  %v8595_v6 = vsub.f32 %v8563_v27, %v8587_v16  ;;  %v8590_v57 = vsub.f32 %v8558_v42, %v8572_v45 }
0x1ed8   : > { %16224 = vpow2.f32 %v8606_v22 }
0x1ed9   : > { %v8610_v24 = vmul.f32 1.442695, %v8595_v6  ;;  %v8600_v52 = vmul.f32 1.442695, %v8590_v57 }
0x1eda   : > { %v8578_v17 = vpop.xlane.xlu0 %8577 }
0x1edb   : > { %v8592_v12 = vsub.f32 %v8560_v40, %v8578_v17  ;;  %16226 = vpow2.f32 %v8600_v52 }
0x1edc   : > { %16228 = vpow2.f32 %v8610_v24 }
0x1edd   : > { %v8604_v49 = vmul.f32 1.442695, %v8592_v12 }
0x1ede   : > { %v8584_v39 = vpop.xlane.xlu0 %8583 }
0x1edf   : > { %16230 = vpow2.f32 %v8604_v49  ;;  %v8594_v29 = vsub.f32 %v8562_v14, %v8584_v39 }
0x1ee1   : > { %v18784_v25 = vpop.eup %16222  ;;  %v8608_v61 = vmul.f32 1.442695, %v8594_v29  ;;  %v1680_v29 = vld [vmem:[#allocation22] sm:$0xff] }
0x1ee2   : > { %v8621_v63 = vsel %vm6222_vm8, %v18784_v25, 0.0  ;;  %v18788_v46 = vpop.eup %16224 }
0x1ee3   : > { %16232 = vpow2.f32 %v8608_v61  ;;  %8622 = vadd.xlane.f32.xlu1 %v8621_v63  ;;  %v8627_v27 = vsel %vm6222_vm8, %v18788_v46, 0.0  ;;  %v1682_v61 = vld [vmem:[#allocation22 + $0x10] sm:$0xff] }
0x1ee5   : > { %v16227_v42 = vpop.eup %16226 }
0x1ee6   : > { %v18792_v40 = vpop.eup %16228  ;;  %v8618_v36 = vsel %vm2414_vm4, %v16227_v42, 0.0 }
0x1ee7   : > { %8628 = vadd.xlane.f32.xlu1 %v8627_v27  ;;  %8619 = vadd.xlane.f32.xlu0 %v8618_v36  ;;  %v8633_v60 = vsel %vm6222_vm8, %v18792_v40, 0.0  ;;  %v1684_v27 = vld [vmem:[#allocation22 + $0x20] sm:$0xff]  ;;  %v1685_v36 = vld [vmem:[#allocation22 + $0x28] sm:$0xff] }
0x1ee9   : > { %v18795_v14 = vpop.eup %16230 }
0x1eea   : > { %v8624_v22 = vsel %vm2414_vm4, %v18795_v14, 0.0 }
0x1eeb   : > { %8634 = vadd.xlane.f32.xlu1 %v8633_v60  ;;  %8625 = vadd.xlane.f32.xlu0 %v8624_v22  ;;  %v1687_v60 = vld [vmem:[#allocation22 + $0x38] sm:$0xff] }
0x1eed   : > { %v18801_v11 = vpop.eup %16232 }
0x1eee   : > { %v8630_v16 = vsel %vm2414_vm4, %v18801_v11, 0.0 }
0x1eef   : > { %8631 = vadd.xlane.f32.xlu0 %v8630_v16  ;;  %v1689_v16 = vld [vmem:[#allocation22 + $0x48] sm:$0xff] }
0x1efc   : > { %8737 = vrot.lane.b32.xlu1 %v18392_v38, %s17094_s7 }
0x1f00   : > { %8822 = vrot.lane.b32.xlu1 %v18304_v62, %s17094_s7 }
0x1f04   : > { %8907 = vrot.lane.b32.xlu1 %v18308_v0, %s17094_s7 }
0x1f05   : > { %8652 = vrot.lane.b32.xlu0 %v18371_v3, %s17094_s7 }
0x1f08   : > { %9032 = vrot.lane.b32.xlu1 %v18754_v44, %s19590_s19 }
0x1f09   : > { %9000 = vrot.lane.b32.xlu0 %v18622_v2, %s17094_s7 }
0x1f0c   : > { %9004 = vrot.lane.b32.xlu1 %v18633_v5, %s17094_s7 }
0x1f0d   : > { %9036 = vrot.lane.b32.xlu0 %v18764_v4, %s19590_s19 }
0x1f10   : > { %9002 = vrot.lane.b32.xlu1 %v18620_v26, %s17094_s7 }
0x1f11   : > { %9008 = vrot.lane.b32.xlu0 %v18626_v23, %s17094_s7 }
0x1f14   : > { %9034 = vrot.lane.b32.xlu1 %v18752_v1, %s19590_s19 }
0x1f15   : > { %9040 = vrot.lane.b32.xlu0 %v18758_v51, %s19590_s19 }
0x1f18   : > { %9006 = vrot.lane.b32.xlu1 %v18630_v32, %s17094_s7 }
0x1f19   : > { %9012 = vrot.lane.b32.xlu0 %v18637_v50, %s17094_s7 }
0x1f1c   : > { %9038 = vrot.lane.b32.xlu1 %v18762_v56, %s19590_s19 }
0x1f20   : > { %9010 = vrot.lane.b32.xlu1 %v18624_v7, %s17094_s7 }
0x1f24   : > { %9042 = vrot.lane.b32.xlu1 %v18756_v54, %s19590_s19 }
0x1f5f   : > { %v8617_v3 = vpop.xlane.xlu1 %8616 }
0x1f60   : > { %v8614_v62 = vpop.xlane.xlu0 %8613 }
0x1f61   : > { %16234 = vrcp.f32 %v8614_v62 }
0x1f62   : > { %16236 = vrcp.f32 %v8617_v3  ;;  %v1691_v3 = vld [vmem:[#allocation22 + $0x58] sm:$0xff] }
0x1f6b   : > { %v16235_v0 = vpop.eup %16234 }
0x1f6c   : > { %v8644_v38 = vmul.f32 %v16235_v0, %v18778_v37  ;;  %v16237_v1 = vpop.eup %16236  ;;  %v1690_v0 = vld [vmem:[#allocation22 + $0x50] sm:$0xff] }
0x1f6d   : > { %v8645_v37 = vmul.f32 %v16237_v1, %v18776_v59 }
0x1f6e   : > { %14716 = vmatprep.mubr.msk.f32.mxu1 %vm2414_vm4, %v8644_v38  ;;  %v15347_v38 = vpack.c.bf16 %v1691_v3, %v1690_v0  ;;  %v1715_v0 = vld [vmem:[#allocation25 + $0x90] sm:$0xff]  ;;  %v1718_v3 = vld [vmem:[#allocation25 + $0xa8] sm:$0xff] }
0x1f70   : > { %v8623_v26 = vpop.xlane.xlu1 %8622 }
0x1f71   : > { %16238 = vrcp.f32 %v8623_v26  ;;  %v1692_v26 = vld [vmem:[#allocation22 + $0x60] sm:$0xff] }
0x1f74   : > { %v8629_v2 = vpop.xlane.xlu1 %8628  ;;  %v8620_v23 = vpop.xlane.xlu0 %8619 }
0x1f75   : > { %16240 = vrcp.f32 %v8620_v23 }
0x1f76   : > { %16242 = vrcp.f32 %v8629_v2  ;;  %v1693_v2 = vld [vmem:[#allocation22 + $0x68] sm:$0xff] }
0x1f77   : > { %v15350_v23 = vpack.c.bf16 %v1693_v2, %v1692_v26 }
0x1f78   : > { %v8635_v32 = vpop.xlane.xlu1 %8634  ;;  %v8626_v7 = vpop.xlane.xlu0 %8625 }
0x1f79   : > { %16244 = vrcp.f32 %v8626_v7  ;;  %v1695_v7 = vld [vmem:[#allocation22 + $0x78] sm:$0xff] }
0x1f7a   : > { %16246 = vrcp.f32 %v8635_v32  ;;  %v1694_v32 = vld [vmem:[#allocation22 + $0x70] sm:$0xff] }
0x1f7b   : > { %v16239_v44 = vpop.eup %16238 }
0x1f7c   : > { %v8738_v5 = vpop.permute.xlu1 %8737  ;;  %v8632_v50 = vpop.xlane.xlu0 %8631  ;;  %v8647_v45 = vmul.f32 %v16239_v44, %v18784_v25  ;;  %v1681_v25 = vld [vmem:[#allocation22 + $0x8] sm:$0xff] }
0x1f7d   : > { %14719 = vmatprep.subr.msk.mxu0 %vm2418_vm2, %v8738_v5  ;;  %16248 = vrcp.f32 %v8632_v50  ;;  %v15332_v63 = vpack.c.bf16 %v1681_v25, %v1680_v29  ;;  %v1706_v29 = vld [vmem:[#allocation25 + $0x48] sm:$0xff]  ;;  %v1708_v25 = vld [vmem:[#allocation25 + $0x58] sm:$0xff] }
0x1f7e   : > { %14720 = vmatpush3.msk.msra.mxu0 %vm2418_vm2, %v8738_v5  ;;  %v15353_v5 = vpack.c.bf16 %v1695_v7, %v1694_v32  ;;  %v1719_v32 = vld [vmem:[#allocation25 + $0xb0] sm:$0xff]  ;;  %v1722_v7 = vld [vmem:[#allocation25 + $0xc8] sm:$0xff] }
0x1f7f   : > { %v16241_v54 = vpop.eup %16240 }
0x1f80   : > { %v8823_v51 = vpop.permute.xlu1 %8822  ;;  %v8653_v56 = vpop.permute.xlu0 %8652  ;;  %v8646_v4 = vmul.f32 %v16241_v54, %v16227_v42 }
0x1f81   : > { %14714 = vmatprep.subr.msk.mxu1 %vm2418_vm2, %v8653_v56  ;;  %v16243_v6 = vpop.eup %16242 }
0x1f82   : > { %14715 = vmatpush3.msk.msra.mxu1 %vm2418_vm2, %v8653_v56  ;;  %14721 = vmatprep.mubr.msk.f32.mxu0 %vm2414_vm4, %v8646_v4  ;;  %v8649_v59 = vmul.f32 %v16243_v6, %v18788_v46  ;;  %v1683_v46 = vld [vmem:[#allocation22 + $0x18] sm:$0xff] }
0x1f83   : > { %v16245_v57 = vpop.eup %16244  ;;  %14717 = vmatmul.mubr.msk.f32.vlgmr.msra.gmra.mrb[82].mxu1 %vm2414_vm4, %v8645_v37  ;;  %14722 = vmatmul.mubr.msk.f32.vlgmr.msra.gmra.mrb[76].mxu0 %vm2414_vm4, %v8647_v45  ;;  %v15335_v42 = vpack.c.bf16 %v1683_v46, %v1682_v61  ;;  %v1698_v45 = vld [vmem:[#allocation25 + $0x8] sm:$0xff]  ;;  %v1700_v6 = vld [vmem:[#allocation25 + $0x18] sm:$0xff]  ;;  %v15363_v61 = vpack.c.bf16 %v1708_v25, %v1706_v29  ;;  %v1707_v46 = vld [vmem:[#allocation25 + $0x50] sm:$0xff] }
0x1f84   : > { %v8908_v24 = vpop.permute.xlu1 %8907  ;;  %14724 = vmatprep.subr.msk.mxu1 %vm2418_vm2, %v8823_v51  ;;  %v8648_v52 = vmul.f32 %v16245_v57, %v18795_v14  ;;  %v16247_v17 = vpop.eup %16246  ;;  %v15338_v14 = vpack.c.bf16 %v1685_v36, %v1684_v27  ;;  %v1697_v57 = vld [vmem:[#allocation25] sm:$0xff]  ;;  %v1712_v27 = vld [vmem:[#allocation25 + $0x78] sm:$0xff] }
0x1f85   : > { %14729 = vmatprep.subr.msk.mxu0 %vm2418_vm2, %v8908_v24  ;;  %14725 = vmatpush3.msk.msra.mxu1 %vm2418_vm2, %v8823_v51  ;;  %v8651_v39 = vmul.f32 %v16247_v17, %v18792_v40  ;;  %v1686_v40 = vld [vmem:[#allocation22 + $0x30] sm:$0xff]  ;;  %v1704_v17 = vld [vmem:[#allocation25 + $0x38] sm:$0xff] }
0x1f86   : > { %14730 = vmatpush3.msk.msra.mxu0 %vm2418_vm2, %v8908_v24  ;;  %14726 = vmatprep.mubr.msk.f32.mxu1 %vm2414_vm4, %v8648_v52  ;;  %v15341_v22 = vpack.c.bf16 %v1687_v60, %v1686_v40  ;;  %v15355_v24 = vpack.c.bf16 %v1700_v6, %v1698_v45  ;;  %v1699_v52 = vld [vmem:[#allocation25 + $0x10] sm:$0xff]  ;;  %v1709_v40 = vld [vmem:[#allocation25 + $0x60] sm:$0xff] }
0x1f87   : > { %15331 = vmatprep.subr.bf16.mxu1 %v17095_v13  ;;  %v16249_v12 = vpop.eup %16248  ;;  %14727 = vmatmul.mubr.msk.f32.vlgmr.msra.gmra.mrb[84].mxu1 %vm2414_vm4, %v8649_v59  ;;  %v1702_v59 = vld [vmem:[#allocation25 + $0x28] sm:$0xff]  ;;  %v1711_v60 = vld [vmem:[#allocation25 + $0x70] sm:$0xff] }
0x1f88   : > { %v8650_v49 = vmul.f32 %v16249_v12, %v18801_v11  ;;  %14766 = vmatprep.mubr.msk.f32.mxu1 %vm17091_vm0, %v17090_v18  ;;  %15333 = vmatpush3.bf16.msra.mxu1 %v15332_v63  ;;  %v1688_v11 = vld [vmem:[#allocation22 + $0x40] sm:$0xff]  ;;  %v15357_v12 = vpack.c.bf16 %v1699_v52, %v1697_v57  ;;  %v9033_v45 = vpop.permute.xlu1 %9032 }
0x1f89   : > { %15334 = vmatprep.subr.bf16.mxu1 %v17095_v13  ;;  %v15344_v62 = vpack.c.bf16 %v1689_v16, %v1688_v11  ;;  %15356 = vmatprep.subr.bf16.mxu0 %v15355_v24  ;;  %v1705_v63 = vld [vmem:[#allocation25 + $0x40] sm:$0xff]  ;;  %v1716_v11 = vld [vmem:[#allocation25 + $0x98] sm:$0xff]  ;;  %v9001_v24 = vpop.permute.xlu0 %9000 }
0x1f8a   : > { %14731 = vmatprep.mubr.msk.f32.mxu0 %vm2414_vm4, %v8650_v49  ;;  %v1701_v49 = vld [vmem:[#allocation25 + $0x20] sm:$0xff]  ;;  %v15365_v36 = vpack.c.bf16 %v1707_v46, %v1705_v63  ;;  %v9088_v25 = vsel %vm2068_vm1, %v18490_v58, %v9001_v24 }
0x1f8b   : > { %14732 = vmatmul.mubr.msk.f32.vlgmr.msra.gmra.mrb[78].mxu0 %vm2414_vm4, %v8651_v39  ;;  %v1703_v39 = vld [vmem:[#allocation25 + $0x30] sm:$0xff] }
0x1f8c   : > { %9477 = vmatprep.mubr.f32.mxu0 %v17090_v18  ;;  %15336 = vmatpush3.bf16.msra.mxu1 %v15335_v42  ;;  %v1710_v42 = vld [vmem:[#allocation25 + $0x68] sm:$0xff]  ;;  %v9005_v6 = vpop.permute.xlu1 %9004 }
0x1f8d   : > { %15337 = vmatprep.subr.bf16.mxu1 %v17095_v13  ;;  %15358 = vmatpush1.bf16.msra.mxu0 %v15357_v12  ;;  %v9090_v58 = vsel %vm2068_vm1, %v18494_v8, %v9005_v6 }
0x1f90   : > { %15339 = vmatpush3.bf16.msra.mxu1 %v15338_v14  ;;  %v15367_v14 = vpack.c.bf16 %v1712_v27, %v1710_v42  ;;  %v9003_v57 = vpop.permute.xlu1 %9002 }
0x1f91   : > { %15340 = vmatprep.subr.bf16.mxu1 %v17095_v13 }
0x1f94   : > { %15342 = vmatpush3.bf16.msra.mxu1 %v15341_v22  ;;  %v1714_v22 = vld [vmem:[#allocation25 + $0x88] sm:$0xff]  ;;  %v9035_v52 = vpop.permute.xlu1 %9034 }
0x1f95   : > { %15343 = vmatprep.subr.bf16.mxu1 %v17095_v13  ;;  %v15371_v16 = vpack.c.bf16 %v1716_v11, %v1714_v22 }
0x1f98   : > { %15345 = vmatpush3.bf16.msra.mxu1 %v15344_v62  ;;  %v1713_v62 = vld [vmem:[#allocation25 + $0x80] sm:$0xff] }
0x1f99   : > { %15346 = vmatprep.subr.bf16.mxu1 %v17095_v13  ;;  %v15373_v26 = vpack.c.bf16 %v1715_v0, %v1713_v62 }
0x1f9c   : > { %15348 = vmatpush3.bf16.msra.mxu1 %v15347_v38  ;;  %v1720_v38 = vld [vmem:[#allocation25 + $0xb8] sm:$0xff] }
0x1f9d   : > { %15349 = vmatprep.subr.bf16.mxu1 %v17095_v13  ;;  %v15375_v2 = vpack.c.bf16 %v1720_v38, %v1718_v3 }
0x1fa0   : > { %15351 = vmatpush3.bf16.msra.mxu1 %v15350_v23  ;;  %v1717_v23 = vld [vmem:[#allocation25 + $0xa0] sm:$0xff] }
0x1fa1   : > { %15352 = vmatprep.subr.bf16.mxu1 %v17095_v13 }
0x1fa4   : > { %15354 = vmatpush3.bf16.msra.mxu1 %v15353_v5  ;;  %v1724_v5 = vld [vmem:[#allocation25 + $0xd8] sm:$0xff] }
0x1fa5   : > { %15395 = vmatprep.subr.bf16.mxu1 %v17095_v13 }
0x2056   : > { %v14718_v50 = vpop.f32.mrb[82].mxu1  ;;  %v14723_v1 = vpop.f32.mrb[76].mxu0 }
0x2057   : > { %v8813_v44 = vpop.f32.mrb[77].mxu0  ;;  %9066 = vrot.lane.b32.xlu1 %v14718_v50, %s17092_s14  ;;  %v8728_v54 = vpop.f32.mrb[83].mxu1  ;;  %v15377_v50 = vpack.c.bf16 %v1719_v32, %v1717_v23 }
0x2058   : > { %9064 = vrot.lane.b32.xlu0 %v8728_v54, %s17092_s14  ;;  %v1723_v54 = vld [vmem:[#allocation25 + $0xd0] sm:$0xff] }
0x205a   : > { %v14728_v51 = vpop.f32.mrb[84].mxu1 }
0x205b   : > { %9074 = vrot.lane.b32.xlu1 %v14728_v51, %s17092_s14  ;;  %v8898_v56 = vpop.f32.mrb[85].mxu1  ;;  %v1726_v51 = vld [vmem:[#allocation25 + $0xe8] sm:$0xff] }
0x205c   : > { %9070 = vrot.lane.b32.xlu0 %v14723_v1, %s17092_s14  ;;  %v15379_v1 = vpack.c.bf16 %v1724_v5, %v1722_v7 }
0x205e   : > { %v14733_v4 = vpop.f32.mrb[78].mxu0 }
0x205f   : > { %v8983_v37 = vpop.f32.mrb[79].mxu0  ;;  %9014 = vrot.lane.b32.xlu1 %v18635_v43, %s17094_s7  ;;  %v15359_v43 = vpack.c.bf16 %v1704_v17, %v1702_v59  ;;  %v9037_v59 = vpop.permute.xlu0 %9036 }
0x2060   : > { %9068 = vrot.lane.b32.xlu0 %v8813_v44, %s17092_s14  ;;  %v1721_v44 = vld [vmem:[#allocation25 + $0xc0] sm:$0xff]  ;;  %v9007_v17 = vpop.permute.xlu1 %9006 }
0x2061   : > { %15360 = vmatprep.subr.bf16.mxu0 %v15359_v43  ;;  %v9091_v0 = vsel %vm2068_vm1, %v18492_v48, %v9007_v17 }
0x2063   : > { %9078 = vrot.lane.b32.xlu1 %v14733_v4, %s17092_s14  ;;  %v15381_v4 = vpack.c.bf16 %v1723_v54, %v1721_v44  ;;  %v9009_v12 = vpop.permute.xlu0 %9008 }
0x2064   : > { %9072 = vrot.lane.b32.xlu0 %v8898_v56, %s17092_s14  ;;  %v1728_v56 = vld [vmem:[#allocation25 + $0xf8] sm:$0xff]  ;;  %v9039_v43 = vpop.permute.xlu1 %9038 }
0x2065   : > { %v9099_v3 = vsel %vm4772_vm5, %v9091_v0, %v9039_v43 }
0x2068   : > { %9044 = vrot.lane.b32.xlu0 %v18768_v33, %s19590_s19  ;;  %v15361_v33 = vpack.c.bf16 %v1703_v39, %v1701_v49  ;;  %v9041_v49 = vpop.permute.xlu0 %9040  ;;  %v9011_v39 = vpop.permute.xlu1 %9010 }
0x206a   : > { %15362 = vmatpush1.bf16.msra.mxu0 %v15361_v33 }
0x206b   : > { %15364 = vmatprep.subr.bf16.mxu0 %v15363_v61  ;;  %v9096_v61 = vsel %vm4772_vm5, %v9088_v25, %v9033_v45 }
0x206c   : > { %9076 = vrot.lane.b32.xlu0 %v8983_v37, %s17092_s14  ;;  %v15383_v37 = vpack.c.bf16 %v1728_v56, %v1726_v51  ;;  %v9013_v29 = vpop.permute.xlu0 %9012  ;;  %v9043_v33 = vpop.permute.xlu1 %9042 }
0x206e   : > { %15366 = vmatpush1.bf16.msra.mxu0 %v15365_v36 }
0x206f   : > { %15368 = vmatprep.subr.bf16.mxu0 %v15367_v14  ;;  %v9089_v14 = vsel %vm2068_vm1, %v18488_v47, %v9003_v57  ;;  %v9098_v47 = vsel %vm4772_vm5, %v9090_v58, %v9037_v59  ;;  %v9093_v59 = vsel %vm2068_vm1, %v18496_v9, %v9011_v39  ;;  %v9094_v9 = vsel %vm2068_vm1, %v18506_v41, %v9013_v29 }
0x2070   : > { %9046 = vrot.lane.b32.xlu0 %v18766_v15, %s19590_s19  ;;  %v15369_v15 = vpack.c.bf16 %v1711_v60, %v1709_v40  ;;  %v9097_v11 = vsel %vm4772_vm5, %v9089_v14, %v9035_v52 }
0x2072   : > { %15370 = vmatpush1.bf16.msra.mxu0 %v15369_v15 }
0x2073   : > { %15372 = vmatprep.subr.bf16.mxu0 %v15371_v16 }
0x2076   : > { %15374 = vmatpush1.bf16.msra.mxu0 %v15373_v26 }
0x2077   : > { %15376 = vmatprep.subr.bf16.mxu0 %v15375_v2  ;;  %v9092_v2 = vsel %vm2068_vm1, %v18498_v10, %v9009_v12 }
0x207a   : > { %15378 = vmatpush1.bf16.msra.mxu0 %v15377_v50 }
0x207b   : > { %15380 = vmatprep.subr.bf16.mxu0 %v15379_v1  ;;  %v9100_v1 = vsel %vm4772_vm5, %v9092_v2, %v9041_v49 }
0x207e   : > { %15382 = vmatpush1.bf16.msra.mxu0 %v15381_v4 }
0x207f   : > { %15384 = vmatprep.subr.bf16.mxu0 %v15383_v37 }
0x20c9   : > { %v9067_v36 = vpop.permute.xlu1 %9066 }
0x20ca   : > { %v9065_v63 = vpop.permute.xlu0 %9064  ;;  %v9105_v15 = vsel %vm4777_vm6, %v9097_v11, %v9067_v36 }
0x20cb   : > { %v9104_v46 = vsel %vm4777_vm6, %v9096_v61, %v9065_v63  ;;  %v9143_v8 = vrot.slane %v9105_v15, %v18240_v35  ;;  %v9101_v63 = vsel %vm4772_vm5, %v9093_v59, %v9043_v33 }
0x20cc   : > { %v9120_v42 = vcombine.high %v9104_v46, %v9104_v46  ;;  %v9127_v27 = vrot.slane %v9104_v46, %v18240_v35 }
0x20cd   : > { %v9075_v4 = vpop.permute.xlu1 %9074 }
0x20ce   : > { %v9134_v40 = vrot.slane %v9120_v42, %v18240_v35  ;;  %v9135_v60 = vcombine.high %v9127_v27, %v9127_v27  ;;  %v9071_v22 = vpop.permute.xlu0 %9070  ;;  %v9109_v46 = vsel %vm4777_vm6, %v9101_v63, %v9075_v4 }
0x20cf   : > { %v9107_v23 = vsel %vm4777_vm6, %v9099_v3, %v9071_v22  ;;  %v9191_v58 = vrot.slane %v9109_v46, %v18240_v35  ;;  %v1729_v46 = vld [vmem:[%s19676_s5] sm:$0x3]  ;;  %s13145_s5 = scalar_lea.sflag [#allocation4], %s17693_s20 }
0x20d0   : > { %v9136_v16 = vcombine.high %v9134_v40, %v9134_v40  ;;  %v9222_v62 = vcombine.low %v9127_v27, %v9135_v60  ;;  %v9167_v37 = vrot.slane %v9107_v23, %v18240_v35 }
0x20d1   : > { %v9015_v39 = vpop.permute.xlu1 %9014 }
0x20d2   : > { %v9223_v38 = vcombine.low %v9134_v40, %v9136_v16  ;;  %v9069_v26 = vpop.permute.xlu0 %9068  ;;  %v9230_v7 = vrot.slane %v9222_v62, %v18240_v35  ;;  %v9095_v16 = vsel %vm2068_vm1, %v18504_v55, %v9015_v39 }
0x20d3   : > { %v9106_v32 = vsel %vm4777_vm6, %v9098_v47, %v9069_v26 }
0x20d4   : > { %v9237_v5 = vrot.slane %v9223_v38, %v18240_v35  ;;  %v9144_v48 = vcombine.high %v9106_v32, %v9106_v32  ;;  %v9151_v50 = vrot.slane %v9106_v32, %v18240_v35 }
0x20d5   : > { %v9079_v47 = vpop.permute.xlu1 %9078 }
0x20d6   : > { %v9158_v44 = vrot.slane %v9144_v48, %v18240_v35  ;;  %v9159_v54 = vcombine.high %v9151_v50, %v9151_v50  ;;  %v9239_v51 = vcombine.low %v9143_v8, %v9151_v50  ;;  %v9073_v10 = vpop.permute.xlu0 %9072  ;;  %v9238_v56 = vcombine.low %v9230_v7, %v9237_v5 }
0x20d7   : > { %v9108_v45 = vsel %vm4777_vm6, %v9100_v1, %v9073_v10 }
0x20d8   : > { %v9160_v6 = vcombine.high %v9158_v44, %v9158_v44  ;;  %v9240_v57 = vcombine.low %v9159_v54, %v9158_v44  ;;  %v9168_v24 = vcombine.high %v9108_v45, %v9108_v45  ;;  %v9175_v52 = vrot.slane %v9108_v45, %v18240_v35  ;;  %14767 = vmatmul.mubr.f32.vlgmr.msra.gmra.mrb[86].mxu1 %v9238_v56  ;;  %v1725_v54 = vld [vmem:[#allocation25 + $0xe0] sm:$0xff]  ;;  %v13671_v56 = vld [vmem:[#allocation23] ss:$0 sm:$0xff] }
0x20d9   : > { %14769 = vmatprep.mubr.msk.f32.mxu1 %vm17091_vm0, %v17090_v18  ;;  %v9247_v17 = vrot.slane %v9239_v51, %v18240_v35  ;;  %v1727_v51 = vld [vmem:[#allocation25 + $0xf0] sm:$0xff] }
0x20da   : > { %v9182_v12 = vrot.slane %v9168_v24, %v18240_v35  ;;  %v9183_v43 = vcombine.high %v9175_v52, %v9175_v52  ;;  %v9045_v49 = vpop.permute.xlu0 %9044  ;;  %v9254_v25 = vrot.slane %v9240_v57, %v18240_v35  ;;  %v9256_v61 = vcombine.low %v9160_v6, %v9167_v37 }
0x20db   : > { %v9102_v14 = vsel %vm4772_vm5, %v9094_v9, %v9045_v49  ;;  %v15385_v10 = vpack.c.bf16 %v1727_v51, %v1725_v54 }
0x20dc   : > { %v9184_v42 = vcombine.high %v9182_v12, %v9182_v12  ;;  %v9257_v27 = vcombine.low %v9175_v52, %v9183_v43  ;;  %v9255_v36 = vcombine.low %v9247_v17, %v9254_v25  ;;  %v9264_v60 = vrot.slane %v9256_v61, %v18240_v35 }
0x20dd   : > { %15386 = vmatpush1.bf16.msra.mxu0 %v15385_v10 }
0x20de   : > { %14770 = vmatmul.mubr.f32.gmra.mrb[88].mxu1 %v9255_v36  ;;  %v9077_v40 = vpop.permute.xlu0 %9076  ;;  %v9271_v22 = vrot.slane %v9257_v27, %v18240_v35  ;;  %v9273_v11 = vcombine.low %v9182_v12, %v9184_v42  ;;  %15387 = vmatprep.subr.bf16.mxu0 %v17095_v13  ;;  %v18961_v42 = vrot.slane %v1729_v46, %v17773_v20  ;;  %v16330_v36 = vld [vmem:[%s19675_s30] sm:$0x7] }
0x20df   : > { %v9110_v33 = vsel %vm4777_vm6, %v9102_v14, %v9077_v40  ;;  %14772 = vmatprep.mubr.msk.f32.mxu1 %vm17091_vm0, %v17090_v18  ;;  %v18964_v27 = vrot.slane %v1729_v46, %v17776_v21  ;;  %v5243_v9 = vrot.slane %v16330_v36, %v17809_v34 }
0x20e0   : > { %v9192_v15 = vcombine.high %v9110_v33, %v9110_v33  ;;  %v9199_v41 = vrot.slane %v9110_v33, %v18240_v35  ;;  %v9272_v29 = vcombine.low %v9264_v60, %v9271_v22  ;;  %v9281_v23 = vrot.slane %v9273_v11, %v18240_v35 }
0x20e1   : > { %v18972_v33 = vadd.f32 %v18288_v31, %v5243_v9 }
0x20e2   : > { %v9206_v62 = vrot.slane %v9192_v15, %v18240_v35  ;;  %v9207_v0 = vcombine.high %v9199_v41, %v9199_v41  ;;  %v9274_v3 = vcombine.low %v9191_v58, %v9199_v41  ;;  %14773 = vmatmul.mubr.f32.gmra.mrb[90].mxu1 %v9272_v29  ;;  %v9047_v38 = vpop.permute.xlu0 %9046 }
0x20e3   : > { %v9103_v26 = vsel %vm4772_vm5, %v9095_v16, %v9047_v38  ;;  %14775 = vmatprep.mubr.msk.f32.mxu1 %vm17091_vm0, %v17090_v18 }
0x20e4   : > { %v9208_v2 = vcombine.high %v9206_v62, %v9206_v62  ;;  %v9111_v8 = vsel %vm4777_vm6, %v9103_v26, %v9079_v47  ;;  %v9288_v32 = vrot.slane %v9274_v3, %v18240_v35  ;;  %v9290_v55 = vcombine.low %v9207_v0, %v9206_v62 }
0x20e5   : > { %v9215_v7 = vrot.slane %v9111_v8, %v18240_v35  ;;  %v18978_v0 = vadd.f32 %v18286_v30, %v5243_v9 }
0x20e6   : > { %v9289_v5 = vcombine.low %v9281_v23, %v9288_v32  ;;  %v9298_v50 = vrot.slane %v9290_v55, %v18240_v35  ;;  %v18984_v23 = vcombine.high %v18972_v33, %v18972_v33 }
0x20e7   : > { %v9291_v48 = vcombine.low %v9208_v2, %v9215_v7 }
0x20e8   : > { %14776 = vmatmul.mubr.f32.gmra.mrb[92].mxu1 %v9289_v5 }
0x20e9   : > { %14778 = vmatprep.mubr.msk.f32.mxu1 %vm17091_vm0, %v17090_v18  ;;  %v9305_v1 = vrot.slane %v9291_v48, %v18240_v35 }
0x20eb   : > { %v9306_v44 = vcombine.low %v9298_v50, %v9305_v1 }
0x20ed   : > { %14779 = vmatmul.mubr.f32.gmra.mrb[94].mxu1 %v9306_v44 }
0x20ee   : > { %14799 = vmatprep.mubr.msk.f32.mxu1 %vm17091_vm0, %v17090_v18 }
0x21ab   : > { %v9378_v4 = vpop.f32.mrb[86].mxu1 }
0x21ac   : > { %v9379_v37 = vadd.f32 %v13671_v56, %v9378_v4  ;;  %v14768_v45 = vpop.f32.mrb[87].mxu1 }
0x21ae   : > { %9478 = vmatmul.mubr.f32.vlgmr.msra.gmra.mrb[80].mxu0 %v9379_v37 }
0x21af   : > { %9483 = vmatprep.mubr.f32.mxu0 %v17090_v18 }
0x21b1   : > { %v9383_v6 = vpop.f32.mrb[88].mxu1 }
0x21b2   : > { %v9384_v57 = vadd.f32 %v13671_v56, %v9383_v6  ;;  %v14771_v24 = vpop.f32.mrb[89].mxu1 }
0x21b4   : > { %9484 = vmatmul.mubr.f32.gmra.mrb[82].mxu0 %v9384_v57 }
0x21b5   : > { %v9388_v52 = vpop.f32.mrb[90].mxu1  ;;  %9489 = vmatprep.mubr.f32.mxu0 %v17090_v18 }
0x21b6   : > { %v9389_v59 = vadd.f32 %v13671_v56, %v9388_v52  ;;  %v14774_v17 = vpop.f32.mrb[91].mxu1 }
0x21b8   : > { %9490 = vmatmul.mubr.f32.gmra.mrb[84].mxu0 %v9389_v59 }
0x21b9   : > { %9495 = vmatprep.mubr.f32.mxu0 %v17090_v18 }
0x21bb   : > { %v9393_v12 = vpop.f32.mrb[92].mxu1 }
0x21bc   : > { %v9394_v43 = vadd.f32 %v13671_v56, %v9393_v12  ;;  %v14777_v49 = vpop.f32.mrb[93].mxu1 }
0x21be   : > { %9496 = vmatmul.mubr.f32.gmra.mrb[86].mxu0 %v9394_v43 }
0x21bf   : > { %9501 = vmatprep.mubr.f32.mxu0 %v17090_v18 }
0x21c0   : > { %v9398_v25 = vpop.f32.mrb[94].mxu1 }
0x21c1   : > { %v9399_v61 = vadd.f32 %v13671_v56, %v9398_v25  ;;  %v14780_v63 = vpop.f32.mrb[95].mxu1 }
0x21c3   : > { %9502 = vmatmul.mubr.f32.gmra.mrb[88].mxu0 %v9399_v61 }
0x21c4   : > { %14785 = vmatprep.mubr.msk.f32.mxu0 %vm17091_vm0, %v17090_v18 }
0x2281   : > { %v9479_v39 = vpop.f32.mrb[80].mxu0 }
0x2282   : > { %v9480_v14 = vadd.f32 %v9479_v39, %v18961_v42  ;;  %v9481_v40 = vpop.f32.mrb[81].mxu0 }
0x2283   : > { %v9482_v60 = vadd.f32 %v9481_v40, %v18964_v27 }
0x2284   : > { %v9513_v22 = vcombine.high %v9480_v14, %v9480_v14  ;;  %v9520_v58 = vrot.slane %v9480_v14, %v18240_v35 }
0x2285   : > { %v9603_v11 = vcombine.high %v9482_v60, %v9482_v60  ;;  %v9610_v15 = vrot.slane %v9482_v60, %v18240_v35 }
0x2286   : > { %v9527_v41 = vrot.slane %v9513_v22, %v18240_v35  ;;  %v9528_v29 = vcombine.high %v9520_v58, %v9520_v58 }
0x2287   : > { %v9617_v34 = vrot.slane %v9603_v11, %v18240_v35  ;;  %v9618_v16 = vcombine.high %v9610_v15, %v9610_v15  ;;  %v9485_v62 = vpop.f32.mrb[82].mxu0 }
0x2288   : > { %v9529_v3 = vcombine.high %v9527_v41, %v9527_v41  ;;  %v9688_v38 = vcombine.low %v9520_v58, %v9528_v29  ;;  %v9486_v47 = vadd.f32 %v9485_v62, %v18961_v42  ;;  %v9487_v26 = vpop.f32.mrb[83].mxu0 }
0x2289   : > { %v9619_v31 = vcombine.high %v9617_v34, %v9617_v34  ;;  %v10137_v2 = vcombine.low %v9610_v15, %v9618_v16  ;;  %v9488_v8 = vadd.f32 %v9487_v26, %v18964_v27 }
0x228a   : > { %v9689_v32 = vcombine.low %v9527_v41, %v9529_v3  ;;  %v9696_v55 = vrot.slane %v9688_v38, %v18240_v35  ;;  %v9530_v7 = vcombine.high %v9486_v47, %v9486_v47  ;;  %v9537_v30 = vrot.slane %v9486_v47, %v18240_v35 }
0x228b   : > { %v10138_v5 = vcombine.low %v9617_v34, %v9619_v31  ;;  %v10145_v48 = vrot.slane %v10137_v2, %v18240_v35  ;;  %v9620_v50 = vcombine.high %v9488_v8, %v9488_v8  ;;  %v9627_v1 = vrot.slane %v9488_v8, %v18240_v35  ;;  %v9491_v44 = vpop.f32.mrb[84].mxu0 }
0x228c   : > { %v9703_v54 = vrot.slane %v9689_v32, %v18240_v35  ;;  %v9544_v51 = vrot.slane %v9530_v7, %v18240_v35  ;;  %v9545_v10 = vcombine.high %v9537_v30, %v9537_v30  ;;  %v18993_v56 = vrot.slane %v9537_v30, %v18240_v35  ;;  %v9493_v4 = vpop.f32.mrb[85].mxu0 }
0x228d   : > { %v10152_v37 = vrot.slane %v10138_v5, %v18240_v35  ;;  %v9634_v45 = vrot.slane %v9620_v50, %v18240_v35  ;;  %v9635_v6 = vcombine.high %v9627_v1, %v9627_v1  ;;  %v18998_v57 = vrot.slane %v9627_v1, %v18240_v35 }
0x228e   : > { %v19000_v24 = vcombine.low %v9696_v55, %v9703_v54  ;;  %v9788_v52 = vcombine.low %v9545_v10, %v9544_v51  ;;  %v9492_v59 = vadd.f32 %v9491_v44, %v18961_v42  ;;  %v9546_v17 = vcombine.high %v9544_v51, %v9544_v51 }
0x228f   : > { %v19003_v12 = vcombine.low %v10145_v48, %v10152_v37  ;;  %v10239_v43 = vcombine.low %v9635_v6, %v9634_v45  ;;  %v9494_v49 = vadd.f32 %v9493_v4, %v18964_v27  ;;  %v9636_v25 = vcombine.high %v9634_v45, %v9634_v45 }
0x2290   : > { %v9796_v63 = vrot.slane %v9788_v52, %v18240_v35  ;;  %v9547_v46 = vcombine.high %v9492_v59, %v9492_v59  ;;  %v9554_v36 = vrot.slane %v9492_v59, %v18240_v35  ;;  %v15388_v9 = vpack.c.bf16 %v18993_v56, %v19000_v24 }
0x2291   : > { %v10247_v39 = vrot.slane %v10239_v43, %v18240_v35  ;;  %v9637_v14 = vcombine.high %v9494_v49, %v9494_v49  ;;  %v9644_v40 = vrot.slane %v9494_v49, %v18240_v35  ;;  %v9497_v60 = vpop.f32.mrb[86].mxu0  ;;  %v15404_v22 = vpack.c.bf16 %v18998_v57, %v19003_v12 }
0x2292   : > { %v9561_v58 = vrot.slane %v9547_v46, %v18240_v35  ;;  %v9562_v11 = vcombine.high %v9554_v36, %v9554_v36  ;;  %v9789_v15 = vcombine.low %v9546_v17, %v9554_v36  ;;  %v9498_v41 = vadd.f32 %v9497_v60, %v18961_v42  ;;  %v9499_v29 = vpop.f32.mrb[87].mxu0  ;;  %15390 = vmatpush3.bf16.xpose.msk.msra.mxu0 %vm19008_vm9, %v15388_v9 }
0x2293   : > { %v9651_v34 = vrot.slane %v9637_v14, %v18240_v35  ;;  %v9652_v16 = vcombine.high %v9644_v40, %v9644_v40  ;;  %v10240_v62 = vcombine.low %v9636_v25, %v9644_v40  ;;  %v9500_v3 = vadd.f32 %v9499_v29, %v18964_v27  ;;  %15391 = vmatprep.subr.bf16.mxu0 %v17095_v13 }
0x2294   : > { %v9563_v38 = vcombine.high %v9561_v58, %v9561_v58  ;;  %v9803_v47 = vrot.slane %v9789_v15, %v18240_v35  ;;  %v9811_v26 = vrot.slane %v9562_v11, %v18240_v35  ;;  %v9564_v31 = vcombine.high %v9498_v41, %v9498_v41 }
0x2295   : > { %v9653_v2 = vcombine.high %v9651_v34, %v9651_v34  ;;  %v10254_v8 = vrot.slane %v10240_v62, %v18240_v35  ;;  %v19031_v32 = vrot.slane %v9652_v16, %v18240_v35  ;;  %v9571_v55 = vrot.slane %v9498_v41, %v18240_v35 }
0x2296   : > { %v9804_v7 = vcombine.low %v9796_v63, %v9803_v47  ;;  %v9888_v30 = vcombine.low %v9561_v58, %v9563_v38  ;;  %v9578_v5 = vrot.slane %v9564_v31, %v18240_v35  ;;  %v9654_v48 = vcombine.high %v9500_v3, %v9500_v3  ;;  %v9503_v50 = vpop.f32.mrb[88].mxu0 }
0x2297   : > { %v19035_v1 = vcombine.low %v10247_v39, %v10254_v8  ;;  %v10339_v44 = vcombine.low %v9651_v34, %v9653_v2  ;;  %v9579_v54 = vcombine.high %v9571_v55, %v9571_v55  ;;  %v9661_v51 = vrot.slane %v9500_v3, %v18240_v35  ;;  %v9505_v10 = vpop.f32.mrb[89].mxu0 }
0x2298   : > { %v9896_v4 = vrot.slane %v9888_v30, %v18240_v35  ;;  %v9911_v37 = vrot.slane %v9578_v5, %v18240_v35  ;;  %v9668_v45 = vrot.slane %v9654_v48, %v18240_v35  ;;  %v9504_v6 = vadd.f32 %v9503_v50, %v18961_v42 }
0x2299   : > { %v10347_v52 = vrot.slane %v10339_v44, %v18240_v35  ;;  %v9889_v59 = vcombine.low %v9571_v55, %v9579_v54  ;;  %v9669_v17 = vcombine.high %v9661_v51, %v9661_v51  ;;  %v9580_v43 = vcombine.high %v9578_v5, %v9578_v5  ;;  %14786 = vmatmul.mubr.msk.f32.vlgmr.msra.gmra.mrb[90].mxu0 %vm2068_vm1, %v18972_v33 }
0x229a   : > { %v19046_v49 = vrot.slane %v9668_v45, %v18240_v35  ;;  %v9581_v25 = vcombine.high %v9504_v6, %v9504_v6  ;;  %v9588_v63 = vrot.slane %v9504_v6, %v18240_v35  ;;  %v9506_v46 = vadd.f32 %v9505_v10, %v18964_v27  ;;  %14792 = vmatprep.mubr.msk.f32.mxu0 %vm17091_vm0, %v17090_v18 }
0x229b   : > { %v9903_v42 = vrot.slane %v9889_v59, %v18240_v35  ;;  %v10340_v36 = vcombine.low %v9661_v51, %v9669_v17  ;;  %v9670_v9 = vcombine.high %v9668_v45, %v9668_v45  ;;  %v15392_v39 = vpack.c.bf16 %v9811_v26, %v9804_v7 }
0x229c   : > { %v9595_v14 = vrot.slane %v9581_v25, %v18240_v35  ;;  %v9596_v40 = vcombine.high %v9588_v63, %v9588_v63  ;;  %v9988_v60 = vcombine.low %v9580_v43, %v9588_v63  ;;  %v9671_v58 = vcombine.high %v9506_v46, %v9506_v46 }
0x229d   : > { %v9904_v11 = vcombine.low %v9896_v4, %v9903_v42  ;;  %v10354_v15 = vrot.slane %v10340_v36, %v18240_v35  ;;  %v9678_v41 = vrot.slane %v9506_v46, %v18240_v35  ;;  %15394 = vmatpush3.bf16.xpose.msk.msra.mxu0 %vm19008_vm9, %v15392_v39  ;;  %v15408_v27 = vpack.c.bf16 %v19031_v32, %v19035_v1 }
0x229e   : > { %v9597_v29 = vcombine.high %v9595_v14, %v9595_v14  ;;  %v9989_v34 = vcombine.low %v9596_v40, %v9595_v14  ;;  %v9996_v16 = vrot.slane %v9988_v60, %v18240_v35  ;;  %v9685_v62 = vrot.slane %v9671_v58, %v18240_v35  ;;  %15399 = vmatprep.subr.bf16.mxu0 %v17095_v13 }
0x229f   : > { %v19063_v3 = vcombine.low %v10347_v52, %v10354_v15  ;;  %v9686_v38 = vcombine.high %v9678_v41, %v9678_v41  ;;  %v10439_v47 = vcombine.low %v9670_v9, %v9678_v41  ;;  %v15396_v31 = vpack.c.bf16 %v9911_v37, %v9904_v11 }
0x22a0   : > { %v10003_v2 = vrot.slane %v9989_v34, %v18240_v35  ;;  %v10011_v8 = vrot.slane %v9597_v29, %v18240_v35  ;;  %v9687_v55 = vcombine.high %v9685_v62, %v9685_v62  ;;  %v19067_v30 = vpack.i.bf16 %v9811_v26, %v9804_v7 }
0x22a1   : > { %v10440_v5 = vcombine.low %v9686_v38, %v9685_v62  ;;  %v10447_v48 = vrot.slane %v10439_v47, %v18240_v35  ;;  %15398 = vmatpush3.bf16.xpose.msk.msra.mxu1 %vm19008_vm9, %v15396_v31  ;;  %v19074_v50 = vpack.i.bf16 %v18993_v56, %v19000_v24  ;;  %v19076_v44 = vpack.i.bf16 %v9911_v37, %v9904_v11 }
0x22a2   : > { %v10004_v54 = vcombine.low %v9996_v16, %v10003_v2  ;;  %v19079_v51 = vrot.slane %v9687_v55, %v18240_v35  ;;  %15403 = vmatprep.subr.bf16.mxu1 %v17095_v13  ;;  %v15412_v26 = vpack.c.bf16 %v19046_v49, %v19063_v3  ;;  %v19086_v7 = vpack.i.bf16 %v19031_v32, %v19035_v1 }
0x22a3   : > { %v10454_v10 = vrot.slane %v10440_v5, %v18240_v35  ;;  %v19091_v56 = vpack.i.bf16 %v19046_v49, %v19063_v3  ;;  %v19095_v24 = vpack.i.bf16 %v18998_v57, %v19003_v12  ;;  %v19131_v6 = vcombine.high %v18978_v0, %v18978_v0 }
0x22a4   : > { %14793 = vmatmul.mubr.msk.f32.vlgmr.msra.gmra.mrb[92].mxu0 %vm2068_vm1, %v18984_v23  ;;  %v15400_v4 = vpack.c.bf16 %v10011_v8, %v10004_v54  ;;  %v19099_v37 = vpack.i.bf16 %v10011_v8, %v10004_v54 }
0x22a5   : > { %v19101_v45 = vcombine.low %v10447_v48, %v10454_v10  ;;  %14806 = vmatprep.mubr.msk.f32.mxu0 %vm17091_vm0, %v17090_v18 }
0x22a6   : > { %15402 = vmatpush3.bf16.xpose.msk.msra.mxu0 %vm19008_vm9, %v15400_v4 }
0x22a7   : > { %15407 = vmatprep.subr.bf16.mxu0 %v17095_v13  ;;  %v15416_v32 = vpack.c.bf16 %v19079_v51, %v19101_v45  ;;  %v19117_v1 = vpack.i.bf16 %v19079_v51, %v19101_v45 }
0x22a8   : > { %14800 = vmatmul.mubr.msk.f32.vlgmr.msra.gmra.mrb[96].mxu1 %vm2068_vm1, %v18978_v0 }
0x22a9   : > { %15406 = vmatpush3.bf16.msk.msra.mxu1 %vm19108_vm12, %v15404_v22  ;;  %14813 = vmatprep.mubr.msk.f32.mxu1 %vm17091_vm0, %v17090_v18 }
0x22aa   : > { %15411 = vmatprep.subr.bf16.mxu1 %v17095_v13 }
0x22ad   : > { %14807 = vmatmul.mubr.msk.f32.vlgmr.msra.gmra.mrb[94].mxu0 %vm2068_vm1, %v19131_v6 }
0x22ae   : > { %15410 = vmatpush3.bf16.msk.msra.mxu0 %vm19108_vm12, %v15408_v27  ;;  %14820 = vmatprep.mubr.msk.f32.mxu0 %vm17091_vm0, %v17090_v18 }
0x22af   : > { %15415 = vmatprep.subr.bf16.mxu0 %v17095_v13 }
0x236c   : > { %v9784_v57 = vpop.f32.mrb[90].mxu0 }
0x236d   : > { %v10088_v12 = vmul.f32 0.17677669, %v9784_v57  ;;  %v14787_v22 = vpop.f32.mrb[91].mxu0 }
0x236f   : > { %v10093_v52 = vsel %vm10092_vm13, %v10088_v12, -inf }
0x2370   : > { %10094 = vmax.xlane.f32.xlu0 %v10093_v52 }
0x2377   : > { %v9884_v59 = vpop.f32.mrb[92].mxu0 }
0x2378   : > { %v10089_v17 = vmul.f32 0.17677669, %v9884_v59  ;;  %v14794_v43 = vpop.f32.mrb[93].mxu0 }
0x237a   : > { %v10096_v25 = vsel %vm10092_vm13, %v10089_v17, -inf }
0x237b   : > { %10097 = vmax.xlane.f32.xlu1 %v10096_v25  ;;  %v9984_v63 = vpop.f32.mrb[96].mxu1 }
0x237c   : > { %v10090_v46 = vmul.f32 0.17677669, %v9984_v63  ;;  %v14801_v42 = vpop.f32.mrb[97].mxu1 }
0x237e   : > { %v10099_v36 = vsel %vm10092_vm13, %v10090_v46, -inf }
0x237f   : > { %10100 = vmax.xlane.f32.xlu0 %v10099_v36 }
0x2380   : > { %v10084_v9 = vpop.f32.mrb[94].mxu0 }
0x2381   : > { %v10091_v39 = vmul.f32 0.17677669, %v10084_v9  ;;  %v14808_v14 = vpop.f32.mrb[95].mxu0 }
0x2383   : > { %v10102_v40 = vsel %vm10092_vm13, %v10091_v39, -inf }
0x2384   : > { %10103 = vmax.xlane.f32.xlu0 %v10102_v40 }
0x23fd   : > { %v10095_v60 = vpop.xlane.xlu0 %10094 }
0x23fe   : > { %v10105_v58 = vsub.f32 %v10088_v12, %v10095_v60 }
0x2400   : > { %v10109_v11 = vmul.f32 1.442695, %v10105_v58 }
0x2402   : > { %16250 = vpow2.f32 %v10109_v11 }
0x2408   : > { %v10098_v15 = vpop.xlane.xlu1 %10097 }
0x2409   : > { %v10106_v41 = vsub.f32 %v10089_v17, %v10098_v15 }
0x240b   : > { %v10111_v27 = vmul.f32 1.442695, %v10106_v41 }
0x240c   : > { %v16251_v29 = vpop.eup %16250  ;;  %v10101_v34 = vpop.xlane.xlu0 %10100 }
0x240d   : > { %16252 = vpow2.f32 %v10111_v27  ;;  %v10107_v16 = vsub.f32 %v10090_v46, %v10101_v34  ;;  %v10117_v62 = vsel %vm10092_vm13, %v16251_v29, 0.0 }
0x240e   : > { %10118 = vadd.xlane.f32.xlu0 %v10117_v62 }
0x240f   : > { %v10113_v38 = vmul.f32 1.442695, %v10107_v16 }
0x2411   : > { %16254 = vpow2.f32 %v10113_v38  ;;  %v10104_v55 = vpop.xlane.xlu0 %10103 }
0x2412   : > { %v10108_v5 = vsub.f32 %v10091_v39, %v10104_v55 }
0x2414   : > { %v10115_v48 = vmul.f32 1.442695, %v10108_v5 }
0x2416   : > { %16256 = vpow2.f32 %v10115_v48 }
0x2417   : > { %v16253_v47 = vpop.eup %16252 }
0x2418   : > { %v10120_v31 = vsel %vm10092_vm13, %v16253_v47, 0.0 }
0x2419   : > { %10121 = vadd.xlane.f32.xlu1 %v10120_v31 }
0x241b   : > { %v16255_v2 = vpop.eup %16254 }
0x241c   : > { %v10123_v8 = vsel %vm10092_vm13, %v16255_v2, 0.0 }
0x241d   : > { %10124 = vadd.xlane.f32.xlu0 %v10123_v8 }
0x2420   : > { %v16257_v54 = vpop.eup %16256 }
0x2421   : > { %v10126_v10 = vsel %vm10092_vm13, %v16257_v54, 0.0 }
0x242a   : > { %15916 = vrot.lane.b32.xlu1 %v19067_v30, %s17092_s14 }
0x242e   : > { %10539 = vrot.lane.b32.xlu1 %v18972_v33, %s17092_s14 }
0x2432   : > { %10621 = vrot.lane.b32.xlu1 %v18984_v23, %s17092_s14 }
0x2433   : > { %15911 = vrot.lane.b32.xlu0 %v19074_v50, %s17092_s14 }
0x2437   : > { %15921 = vrot.lane.b32.xlu0 %v19076_v44, %s17092_s14 }
0x243b   : > { %10703 = vrot.lane.b32.xlu0 %v18978_v0, %s17092_s14 }
0x2456   : > { %10127 = vadd.xlane.f32.xlu1 %v10126_v10 }
0x2467   : > { %15926 = vrot.lane.b32.xlu1 %v19099_v37, %s17092_s14 }
0x246b   : > { %10785 = vrot.lane.b32.xlu1 %v19131_v6, %s17092_s14 }
0x249b   : > { %v10119_v4 = vpop.xlane.xlu0 %10118 }
0x249c   : > { %16258 = vrcp.f32 %v10119_v4 }
0x24a6   : > { %v16259_v57 = vpop.eup %16258  ;;  %v10122_v12 = vpop.xlane.xlu1 %10121 }
0x24a7   : > { %v10133_v22 = vmul.f32 %v16259_v57, %v16251_v29  ;;  %16260 = vrcp.f32 %v10122_v12 }
0x24a9   : > { %14814 = vmatmul.mubr.msk.f32.vlgmr.msra.gmra.mrb[98].mxu1 %vm10162_vm14, %v10133_v22 }
0x24aa   : > { %15414 = vmatpush3.bf16.msk.msra.mxu1 %vm19108_vm12, %v15412_v26  ;;  %v10125_v52 = vpop.xlane.xlu0 %10124  ;;  %14827 = vmatprep.mubr.msk.f32.mxu1 %vm17091_vm0, %v17090_v18  ;;  %v15917_v42 = vpop.permute.xlu1 %15916 }
0x24ab   : > { %16262 = vrcp.f32 %v10125_v52  ;;  %15419 = vmatprep.subr.bf16.mxu1 %v17095_v13  ;;  %v15919_v40 = vunpack.i.h.bf16 %v15917_v42  ;;  %v15918_v60 = vunpack.i.l.bf16 %v15917_v42 }
0x24ad   : > { %v15424_v15 = vpack.c.bf16 %v15919_v40, %v15918_v60 }
0x24ae   : > { %v15912_v59 = vpop.permute.xlu0 %15911 }
0x24af   : > { %v15914_v25 = vunpack.i.h.bf16 %v15912_v59  ;;  %v15913_v63 = vunpack.i.l.bf16 %v15912_v59 }
0x24b1   : > { %v16261_v17 = vpop.eup %16260  ;;  %v15420_v3 = vpack.c.bf16 %v15914_v25, %v15913_v63 }
0x24b2   : > { %v10134_v43 = vmul.f32 %v16261_v17, %v16253_v47  ;;  %v15922_v26 = vpop.permute.xlu0 %15921 }
0x24b3   : > { %v15924_v51 = vunpack.i.h.bf16 %v15922_v26  ;;  %v15923_v45 = vunpack.i.l.bf16 %v15922_v26 }
0x24b4   : > { %14821 = vmatmul.mubr.msk.f32.vlgmr.msra.gmra.mrb[96].mxu0 %vm10162_vm14, %v10134_v43 }
0x24b5   : > { %v16263_v46 = vpop.eup %16262  ;;  %15418 = vmatpush3.bf16.msk.msra.mxu0 %vm19108_vm12, %v15416_v32  ;;  %14834 = vmatprep.mubr.msk.f32.mxu0 %vm17091_vm0, %v17090_v18  ;;  %v10540_v32 = vpop.permute.xlu1 %10539  ;;  %v15428_v36 = vpack.c.bf16 %v15924_v51, %v15923_v45 }
0x24b6   : > { %v10135_v49 = vmul.f32 %v16263_v46, %v16255_v2  ;;  %15423 = vmatprep.subr.bf16.mxu0 %v17095_v13  ;;  %v10704_v9 = vpop.permute.xlu0 %10703 }
0x24b8   : > { %14828 = vmatmul.mubr.msk.f32.vlgmr.msra.gmra.mrb[100].mxu1 %vm10162_vm14, %v10135_v49 }
0x24b9   : > { %15422 = vmatpush3.bf16.xpose.msk.msra.mxu1 %vm19008_vm9, %v15420_v3  ;;  %14841 = vmatprep.mubr.msk.f32.mxu1 %vm17091_vm0, %v17090_v18  ;;  %v10622_v39 = vpop.permute.xlu1 %10621 }
0x24ba   : > { %15427 = vmatprep.subr.bf16.mxu1 %v17095_v13 }
0x24c0   : > { %14842 = vmatmul.mubr.msk.f32.vlgmr.msra.gmra.mrb[102].mxu1 %vm2068_vm1, %v10540_v32 }
0x24c1   : > { %15430 = vmatpush3.bf16.xpose.msk.msra.mxu1 %vm19008_vm9, %v15428_v36  ;;  %14855 = vmatprep.mubr.msk.f32.mxu1 %vm17091_vm0, %v17090_v18 }
0x24c2   : > { %15435 = vmatprep.subr.bf16.mxu1 %v17095_v13 }
0x24c8   : > { %14856 = vmatmul.mubr.msk.f32.vlgmr.msra.gmra.mrb[104].mxu1 %vm2068_vm1, %v10704_v9 }
0x24c9   : > { %14869 = vmatprep.mubr.msk.f32.mxu1 %vm17091_vm0, %v17090_v18 }
0x24e3   : > { %v10128_v14 = vpop.xlane.xlu1 %10127 }
0x24e4   : > { %16264 = vrcp.f32 %v10128_v14 }
0x24e7   : > { %v15927_v41 = vpop.permute.xlu1 %15926 }
0x24e8   : > { %v15929_v27 = vunpack.i.h.bf16 %v15927_v41  ;;  %v15928_v29 = vunpack.i.l.bf16 %v15927_v41 }
0x24ea   : > { %v15432_v34 = vpack.c.bf16 %v15929_v27, %v15928_v29 }
0x24eb   : > { %v10786_v16 = vpop.permute.xlu1 %10785 }
0x24ee   : > { %v16265_v58 = vpop.eup %16264 }
0x24ef   : > { %v10136_v11 = vmul.f32 %v16265_v58, %v16257_v54 }
0x24f1   : > { %14835 = vmatmul.mubr.msk.f32.vlgmr.msra.gmra.mrb[98].mxu0 %vm10162_vm14, %v10136_v11 }
0x24f2   : > { %15426 = vmatpush3.bf16.xpose.msk.msra.mxu0 %vm19008_vm9, %v15424_v15  ;;  %14848 = vmatprep.mubr.msk.f32.mxu0 %vm17091_vm0, %v17090_v18 }
0x24f3   : > { %15431 = vmatprep.subr.bf16.mxu0 %v17095_v13 }
0x24f9   : > { %14849 = vmatmul.mubr.msk.f32.vlgmr.msra.gmra.mrb[100].mxu0 %vm2068_vm1, %v10622_v39 }
0x24fa   : > { %15434 = vmatpush3.bf16.xpose.msk.msra.mxu0 %vm19008_vm9, %v15432_v34  ;;  %14862 = vmatprep.mubr.msk.f32.mxu0 %vm17091_vm0, %v17090_v18 }
0x24fb   : > { %15439 = vmatprep.subr.bf16.mxu0 %v17095_v13 }
0x2501   : > { %14863 = vmatmul.mubr.msk.f32.vlgmr.msra.gmra.mrb[102].mxu0 %vm2068_vm1, %v10786_v16 }
0x2502   : > { %14876 = vmatprep.mubr.msk.f32.mxu0 %vm17091_vm0, %v17090_v18 }
0x257c   : > { %v19212_v62 = vpop.f32.mrb[98].mxu1 }
0x257d   : > { %v14815_v38 = vpop.f32.mrb[99].mxu1 }
0x2587   : > { %v19214_v47 = vpop.f32.mrb[96].mxu0 }
0x2588   : > { %v14822_v31 = vpop.f32.mrb[97].mxu0 }
0x258b   : > { %v19216_v2 = vpop.f32.mrb[100].mxu1 }
0x258c   : > { %v14829_v8 = vpop.f32.mrb[101].mxu1 }
0x2593   : > { %v10617_v55 = vpop.f32.mrb[102].mxu1 }
0x2594   : > { %v10867_v5 = vmul.f32 0.17677669, %v10617_v55  ;;  %v14843_v48 = vpop.f32.mrb[103].mxu1 }
0x2596   : > { %v10871_v54 = vsel %vm10092_vm13, %v10867_v5, -inf }
0x2597   : > { %10872 = vmax.xlane.f32.xlu0 %v10871_v54 }
0x259b   : > { %v10781_v10 = vpop.f32.mrb[104].mxu1 }
0x259c   : > { %v10869_v4 = vmul.f32 0.17677669, %v10781_v10  ;;  %v14857_v57 = vpop.f32.mrb[105].mxu1 }
0x259e   : > { %v10877_v12 = vsel %vm10092_vm13, %v10869_v4, -inf }
0x259f   : > { %10878 = vmax.xlane.f32.xlu0 %v10877_v12 }
0x25c4   : > { %v19220_v22 = vpop.f32.mrb[98].mxu0 }
0x25c5   : > { %v14836_v52 = vpop.f32.mrb[99].mxu0 }
0x25cc   : > { %v10699_v59 = vpop.f32.mrb[100].mxu0 }
0x25cd   : > { %v10868_v17 = vmul.f32 0.17677669, %v10699_v59  ;;  %v14850_v43 = vpop.f32.mrb[101].mxu0 }
0x25cf   : > { %v10874_v25 = vsel %vm10092_vm13, %v10868_v17, -inf }
0x25d0   : > { %10875 = vmax.xlane.f32.xlu1 %v10874_v25 }
0x25d4   : > { %v10863_v63 = vpop.f32.mrb[102].mxu0 }
0x25d5   : > { %v10870_v46 = vmul.f32 0.17677669, %v10863_v63  ;;  %v14864_v49 = vpop.f32.mrb[103].mxu0 }
0x25d7   : > { %v10880_v3 = vsel %vm10092_vm13, %v10870_v46, -inf }
0x25d8   : > { %10881 = vmax.xlane.f32.xlu0 %v10880_v3 }
0x25e1   : > { %15936 = vrot.lane.b32.xlu1 %v19086_v7, %s17092_s14 }
0x25e5   : > { %15941 = vrot.lane.b32.xlu1 %v19091_v56, %s17092_s14 }
0x25e9   : > { %15946 = vrot.lane.b32.xlu1 %v19117_v1, %s17092_s14 }
0x25ed   : > { %15956 = vrot.lane.b32.xlu1 %v19067_v30, %s19590_s19 }
0x25ee   : > { %15931 = vrot.lane.b32.xlu0 %v19095_v24, %s17092_s14 }
0x2624   : > { %v10873_v26 = vpop.xlane.xlu0 %10872 }
0x2625   : > { %v10883_v42 = vsub.f32 %v10867_v5, %v10873_v26 }
0x2627   : > { %v10887_v51 = vmul.f32 1.442695, %v10883_v42 }
0x2629   : > { %16266 = vpow2.f32 %v10887_v51 }
0x262c   : > { %v10879_v36 = vpop.xlane.xlu0 %10878 }
0x262d   : > { %v10885_v9 = vsub.f32 %v10869_v4, %v10879_v36 }
0x262f   : > { %v10891_v39 = vmul.f32 1.442695, %v10885_v9 }
0x2631   : > { %16268 = vpow2.f32 %v10891_v39 }
0x2633   : > { %v16267_v45 = vpop.eup %16266 }
0x2634   : > { %v10895_v32 = vsel %vm10092_vm13, %v16267_v45, 0.0 }
0x2635   : > { %10896 = vadd.xlane.f32.xlu0 %v10895_v32 }
0x263b   : > { %v16269_v29 = vpop.eup %16268 }
0x263c   : > { %v10901_v16 = vsel %vm10092_vm13, %v16269_v29, 0.0 }
0x264b   : > { %15951 = vrot.lane.b32.xlu0 %v19074_v50, %s19590_s19 }
0x265d   : > { %v10876_v14 = vpop.xlane.xlu1 %10875 }
0x265e   : > { %v10884_v40 = vsub.f32 %v10868_v17, %v10876_v14 }
0x2660   : > { %v10889_v60 = vmul.f32 1.442695, %v10884_v40 }
0x2661   : > { %v15937_v58 = vpop.permute.xlu1 %15936 }
0x2662   : > { %16270 = vpow2.f32 %v10889_v60  ;;  %v15939_v11 = vunpack.i.h.bf16 %v15937_v58  ;;  %v15938_v15 = vunpack.i.l.bf16 %v15937_v58 }
0x2664   : > { %v15440_v41 = vpack.c.bf16 %v15939_v11, %v15938_v15 }
0x2665   : > { %v10882_v27 = vpop.xlane.xlu0 %10881  ;;  %v15942_v12 = vpop.permute.xlu1 %15941 }
0x2666   : > { %15442 = vmatpush3.bf16.msk.msra.mxu0 %vm19108_vm12, %v15440_v41  ;;  %v10886_v48 = vsub.f32 %v10870_v46, %v10882_v27  ;;  %v15944_v52 = vunpack.i.h.bf16 %v15942_v12  ;;  %v15943_v59 = vunpack.i.l.bf16 %v15942_v12 }
0x2667   : > { %15447 = vmatprep.subr.bf16.mxu0 %v17095_v13 }
0x2668   : > { %v10893_v54 = vmul.f32 1.442695, %v10886_v48  ;;  %v15444_v25 = vpack.c.bf16 %v15944_v52, %v15943_v59 }
0x2669   : > { %v15932_v34 = vpop.permute.xlu0 %15931  ;;  %v15947_v63 = vpop.permute.xlu1 %15946 }
0x266a   : > { %v15934_v38 = vunpack.i.h.bf16 %v15932_v34  ;;  %10902 = vadd.xlane.f32.xlu0 %v10901_v16  ;;  %v15933_v31 = vunpack.i.l.bf16 %v15932_v34  ;;  %16272 = vpow2.f32 %v10893_v54  ;;  %v15949_v9 = vunpack.i.h.bf16 %v15947_v63 }
0x266b   : > { %v15948_v39 = vunpack.i.l.bf16 %v15947_v63 }
0x266c   : > { %v16271_v8 = vpop.eup %16270  ;;  %v15436_v55 = vpack.c.bf16 %v15934_v38, %v15933_v31 }
0x266d   : > { %v10898_v5 = vsel %vm10092_vm13, %v16271_v8, 0.0  ;;  %v15957_v49 = vpop.permute.xlu1 %15956  ;;  %v15448_v11 = vpack.c.bf16 %v15949_v9, %v15948_v39 }
0x266e   : > { %10899 = vadd.xlane.f32.xlu1 %v10898_v5  ;;  %15438 = vmatpush3.bf16.msk.msra.mxu1 %vm19108_vm12, %v15436_v55  ;;  %v15959_v38 = vunpack.i.h.bf16 %v15957_v49  ;;  %v15958_v31 = vunpack.i.l.bf16 %v15957_v49 }
0x266f   : > { %15443 = vmatprep.subr.bf16.mxu1 %v17095_v13 }
0x2670   : > { %v15456_v5 = vpack.c.bf16 %v15959_v38, %v15958_v31 }
0x2674   : > { %v16273_v10 = vpop.eup %16272 }
0x2675   : > { %v10904_v4 = vsel %vm10092_vm13, %v16273_v10, 0.0 }
0x267f   : > { %11317 = vrot.lane.b32.xlu1 %v18984_v23, %s19590_s19 }
0x2680   : > { %11235 = vrot.lane.b32.xlu0 %v18972_v33, %s19590_s19 }
0x2684   : > { %15961 = vrot.lane.b32.xlu0 %v19076_v44, %s19590_s19 }
0x2688   : > { %11399 = vrot.lane.b32.xlu0 %v18978_v0, %s19590_s19 }
0x26a3   : > { %10905 = vadd.xlane.f32.xlu1 %v10904_v4 }
0x26b4   : > { %15966 = vrot.lane.b32.xlu1 %v19099_v37, %s19590_s19 }
0x26b8   : > { %11481 = vrot.lane.b32.xlu1 %v19131_v6, %s19590_s19 }
0x26c2   : > { %v10897_v57 = vpop.xlane.xlu0 %10896 }
0x26c3   : > { %16274 = vrcp.f32 %v10897_v57 }
0x26c6   : > { %v15952_v46 = vpop.permute.xlu0 %15951 }
0x26c7   : > { %v15954_v51 = vunpack.i.h.bf16 %v15952_v46 }
0x26cd   : > { %v16275_v17 = vpop.eup %16274 }
0x26ce   : > { %v10911_v43 = vmul.f32 %v16275_v17, %v16267_v45  ;;  %v15953_v45 = vunpack.i.l.bf16 %v15952_v46 }
0x26d0   : > { %14870 = vmatmul.mubr.msk.f32.vlgmr.msra.gmra.mrb[106].mxu1 %vm10162_vm14, %v10911_v43  ;;  %v15452_v14 = vpack.c.bf16 %v15954_v51, %v15953_v45 }
0x26d1   : > { %15446 = vmatpush3.bf16.msk.msra.mxu1 %vm19108_vm12, %v15444_v25  ;;  %14883 = vmatprep.mubr.msk.f32.mxu1 %vm17091_vm0, %v17090_v18 }
0x26d2   : > { %15451 = vmatprep.subr.bf16.mxu1 %v17095_v13 }
0x26f7   : > { %v10903_v3 = vpop.xlane.xlu0 %10902 }
0x26f8   : > { %16276 = vrcp.f32 %v10903_v3 }
0x26fb   : > { %v10900_v26 = vpop.xlane.xlu1 %10899  ;;  %v11236_v42 = vpop.permute.xlu0 %11235 }
0x26fc   : > { %16278 = vrcp.f32 %v10900_v26 }
0x26ff   : > { %v15962_v40 = vpop.permute.xlu0 %15961  ;;  %v11318_v34 = vpop.permute.xlu1 %11317 }
0x2700   : > { %v15964_v15 = vunpack.i.h.bf16 %v15962_v40  ;;  %v15963_v41 = vunpack.i.l.bf16 %v15962_v40 }
0x2702   : > { %v16277_v32 = vpop.eup %16276  ;;  %v15460_v27 = vpack.c.bf16 %v15964_v15, %v15963_v41 }
0x2703   : > { %v10913_v36 = vmul.f32 %v16277_v32, %v16269_v29  ;;  %v11400_v29 = vpop.permute.xlu0 %11399 }
0x2705   : > { %14884 = vmatmul.mubr.msk.f32.vlgmr.msra.gmra.mrb[108].mxu1 %vm10162_vm14, %v10913_v36 }
0x2706   : > { %v16279_v60 = vpop.eup %16278  ;;  %15454 = vmatpush3.bf16.xpose.msk.msra.mxu1 %vm19008_vm9, %v15452_v14  ;;  %14897 = vmatprep.mubr.msk.f32.mxu1 %vm17091_vm0, %v17090_v18 }
0x2707   : > { %v10912_v58 = vmul.f32 %v16279_v60, %v16271_v8  ;;  %15459 = vmatprep.subr.bf16.mxu1 %v17095_v13 }
0x2709   : > { %14877 = vmatmul.mubr.msk.f32.vlgmr.msra.gmra.mrb[104].mxu0 %vm10162_vm14, %v10912_v58 }
0x270a   : > { %15450 = vmatpush3.bf16.msk.msra.mxu0 %vm19108_vm12, %v15448_v11  ;;  %14890 = vmatprep.mubr.msk.f32.mxu0 %vm17091_vm0, %v17090_v18 }
0x270b   : > { %15455 = vmatprep.subr.bf16.mxu0 %v17095_v13 }
0x270d   : > { %14898 = vmatmul.mubr.msk.f32.vlgmr.msra.gmra.mrb[110].mxu1 %vm2068_vm1, %v11236_v42 }
0x270e   : > { %15462 = vmatpush3.bf16.xpose.msk.msra.mxu1 %vm19008_vm9, %v15460_v27  ;;  %14911 = vmatprep.mubr.msk.f32.mxu1 %vm17091_vm0, %v17090_v18 }
0x270f   : > { %15467 = vmatprep.subr.bf16.mxu1 %v17095_v13 }
0x2715   : > { %14912 = vmatmul.mubr.msk.f32.vlgmr.msra.gmra.mrb[112].mxu1 %vm2068_vm1, %v11400_v29 }
0x2716   : > { %14925 = vmatprep.mubr.msk.f32.mxu1 %vm17091_vm0, %v17090_v18 }
0x2730   : > { %v10906_v16 = vpop.xlane.xlu1 %10905 }
0x2731   : > { %16280 = vrcp.f32 %v10906_v16 }
0x2734   : > { %v15967_v48 = vpop.permute.xlu1 %15966 }
0x2735   : > { %v15969_v54 = vunpack.i.h.bf16 %v15967_v48  ;;  %v15968_v4 = vunpack.i.l.bf16 %v15967_v48 }
0x2737   : > { %v15464_v57 = vpack.c.bf16 %v15969_v54, %v15968_v4 }
0x273b   : > { %v16281_v8 = vpop.eup %16280 }
0x273c   : > { %v10914_v55 = vmul.f32 %v16281_v8, %v16273_v10  ;;  %v11482_v10 = vpop.permute.xlu1 %11481 }
0x273e   : > { %14891 = vmatmul.mubr.msk.f32.vlgmr.msra.gmra.mrb[106].mxu0 %vm10162_vm14, %v10914_v55 }
0x273f   : > { %15458 = vmatpush3.bf16.xpose.msk.msra.mxu0 %vm19008_vm9, %v15456_v5  ;;  %14904 = vmatprep.mubr.msk.f32.mxu0 %vm17091_vm0, %v17090_v18 }
0x2740   : > { %15463 = vmatprep.subr.bf16.mxu0 %v17095_v13 }
0x2746   : > { %14905 = vmatmul.mubr.msk.f32.vlgmr.msra.gmra.mrb[108].mxu0 %vm2068_vm1, %v11318_v34 }
0x2747   : > { %15466 = vmatpush3.bf16.xpose.msk.msra.mxu0 %vm19008_vm9, %v15464_v57  ;;  %14918 = vmatprep.mubr.msk.f32.mxu0 %vm17091_vm0, %v17090_v18 }
0x2748   : > { %15471 = vmatprep.subr.bf16.mxu0 %v17095_v13 }
0x274e   : > { %14919 = vmatmul.mubr.msk.f32.vlgmr.msra.gmra.mrb[110].mxu0 %vm2068_vm1, %v11482_v10 }
0x274f   : > { %14932 = vmatprep.mubr.msk.f32.mxu0 %vm17091_vm0, %v17090_v18 }
0x27a3   : > { %v19300_v12 = vpop.f32.mrb[106].mxu1 }
0x27a4   : > { %v14871_v52 = vpop.f32.mrb[107].mxu1 }
0x27d8   : > { %v19302_v59 = vpop.f32.mrb[108].mxu1 }
0x27d9   : > { %v14885_v17 = vpop.f32.mrb[109].mxu1 }
0x27dc   : > { %v19304_v43 = vpop.f32.mrb[104].mxu0 }
0x27dd   : > { %v14878_v25 = vpop.f32.mrb[105].mxu0 }
0x27e0   : > { %v11313_v63 = vpop.f32.mrb[110].mxu1 }
0x27e1   : > { %v11563_v46 = vmul.f32 0.17677669, %v11313_v63  ;;  %v14899_v49 = vpop.f32.mrb[111].mxu1 }
0x27e3   : > { %v11567_v3 = vsel %vm10092_vm13, %v11563_v46, -inf }
0x27e4   : > { %11568 = vmax.xlane.f32.xlu0 %v11567_v3 }
0x27e8   : > { %v11477_v26 = vpop.f32.mrb[112].mxu1 }
0x27e9   : > { %v11565_v42 = vmul.f32 0.17677669, %v11477_v26  ;;  %v14913_v51 = vpop.f32.mrb[113].mxu1 }
0x27eb   : > { %v11573_v45 = vsel %vm10092_vm13, %v11565_v42, -inf }
0x27ec   : > { %11574 = vmax.xlane.f32.xlu0 %v11573_v45 }
0x2811   : > { %v19308_v32 = vpop.f32.mrb[106].mxu0 }
0x2812   : > { %v14892_v36 = vpop.f32.mrb[107].mxu0 }
0x2819   : > { %v11395_v9 = vpop.f32.mrb[108].mxu0 }
0x281a   : > { %v11564_v39 = vmul.f32 0.17677669, %v11395_v9  ;;  %v14906_v14 = vpop.f32.mrb[109].mxu0 }
0x281c   : > { %v11570_v40 = vsel %vm10092_vm13, %v11564_v39, -inf }
0x281d   : > { %11571 = vmax.xlane.f32.xlu1 %v11570_v40 }
0x2821   : > { %v11559_v60 = vpop.f32.mrb[110].mxu0 }
0x2822   : > { %v11566_v58 = vmul.f32 0.17677669, %v11559_v60  ;;  %v14920_v11 = vpop.f32.mrb[111].mxu0 }
0x2824   : > { %v11576_v15 = vsel %vm10092_vm13, %v11566_v58, -inf }
0x2825   : > { %11577 = vmax.xlane.f32.xlu0 %v11576_v15 }
0x282e   : > { %15976 = vrot.lane.b32.xlu1 %v19086_v7, %s19590_s19 }
0x2832   : > { %15981 = vrot.lane.b32.xlu1 %v19091_v56, %s19590_s19 }
0x2836   : > { %15986 = vrot.lane.b32.xlu1 %v19117_v1, %s19590_s19 }
0x283a   : > { %15996 = vrot.lane.b32.xlu1 %v19067_v30, %s17094_s7 }
0x283b   : > { %15971 = vrot.lane.b32.xlu0 %v19095_v24, %s19590_s19 }
0x2871   : > { %v11569_v41 = vpop.xlane.xlu0 %11568 }
0x2872   : > { %v11579_v27 = vsub.f32 %v11563_v46, %v11569_v41 }
0x2874   : > { %v11583_v29 = vmul.f32 1.442695, %v11579_v27 }
0x2876   : > { %16282 = vpow2.f32 %v11583_v29 }
0x2879   : > { %v11575_v38 = vpop.xlane.xlu0 %11574 }
0x287a   : > { %v11581_v31 = vsub.f32 %v11565_v42, %v11575_v38 }
0x287c   : > { %v11587_v8 = vmul.f32 1.442695, %v11581_v31 }
0x287e   : > { %16284 = vpow2.f32 %v11587_v8 }
0x2880   : > { %v16283_v34 = vpop.eup %16282 }
0x2881   : > { %v11591_v16 = vsel %vm10092_vm13, %v16283_v34, 0.0 }
0x2882   : > { %11592 = vadd.xlane.f32.xlu0 %v11591_v16 }
0x2888   : > { %v16285_v52 = vpop.eup %16284 }
0x2889   : > { %v11597_v17 = vsel %vm10092_vm13, %v16285_v52, 0.0 }
0x2898   : > { %15991 = vrot.lane.b32.xlu0 %v19074_v50, %s17094_s7 }
0x28aa   : > { %v11572_v55 = vpop.xlane.xlu1 %11571 }
0x28ab   : > { %v11580_v30 = vsub.f32 %v11564_v39, %v11572_v55 }
0x28ad   : > { %v11585_v5 = vmul.f32 1.442695, %v11580_v30 }
0x28ae   : > { %v15977_v48 = vpop.permute.xlu1 %15976 }
0x28af   : > { %16286 = vpow2.f32 %v11585_v5  ;;  %v15979_v54 = vunpack.i.h.bf16 %v15977_v48  ;;  %v15978_v4 = vunpack.i.l.bf16 %v15977_v48 }
0x28b1   : > { %v15472_v57 = vpack.c.bf16 %v15979_v54, %v15978_v4 }
0x28b2   : > { %v11578_v10 = vpop.xlane.xlu0 %11577 }
0x28b3   : > { %15474 = vmatpush3.bf16.msk.msra.mxu0 %vm19108_vm12, %v15472_v57  ;;  %v11582_v26 = vsub.f32 %v11566_v58, %v11578_v10 }
0x28b4   : > { %15479 = vmatprep.subr.bf16.mxu0 %v17095_v13 }
0x28b5   : > { %v11589_v42 = vmul.f32 1.442695, %v11582_v26 }
0x28b6   : > { %v15972_v50 = vpop.permute.xlu0 %15971 }
0x28b7   : > { %v15974_v25 = vunpack.i.h.bf16 %v15972_v50  ;;  %11598 = vadd.xlane.f32.xlu0 %v11597_v17  ;;  %v15973_v63 = vunpack.i.l.bf16 %v15972_v50  ;;  %16288 = vpow2.f32 %v11589_v42 }
0x28b9   : > { %v16287_v46 = vpop.eup %16286  ;;  %v15468_v49 = vpack.c.bf16 %v15974_v25, %v15973_v63 }
0x28ba   : > { %v11594_v3 = vsel %vm10092_vm13, %v16287_v46, 0.0 }
0x28bb   : > { %11595 = vadd.xlane.f32.xlu1 %v11594_v3  ;;  %15470 = vmatpush3.bf16.msk.msra.mxu1 %vm19108_vm12, %v15468_v49 }
0x28bc   : > { %15475 = vmatprep.subr.bf16.mxu1 %v17095_v13 }
0x28c1   : > { %v16289_v51 = vpop.eup %16288 }
0x28c2   : > { %v11600_v45 = vsel %vm10092_vm13, %v16289_v51, 0.0 }
0x28cc   : > { %16006 = vrot.lane.b32.xlu1 %v19099_v37, %s17094_s7  ;;  %v15982_v37 = vpop.permute.xlu1 %15981 }
0x28cd   : > { %16001 = vrot.lane.b32.xlu0 %v19076_v44, %s17094_s7  ;;  %v15983_v36 = vunpack.i.l.bf16 %v15982_v37 }
0x28d1   : > { %11931 = vrot.lane.b32.xlu0 %v18972_v33, %s17094_s7  ;;  %v15984_v33 = vunpack.i.h.bf16 %v15982_v37 }
0x28d3   : > { %v15476_v39 = vpack.c.bf16 %v15984_v33, %v15983_v36 }
0x28d5   : > { %12095 = vrot.lane.b32.xlu0 %v18978_v0, %s17094_s7 }
0x28f0   : > { %11601 = vadd.xlane.f32.xlu1 %v11600_v45 }
0x2901   : > { %12013 = vrot.lane.b32.xlu1 %v18984_v23, %s17094_s7  ;;  %v15987_v23 = vpop.permute.xlu1 %15986 }
0x2902   : > { %v15989_v27 = vunpack.i.h.bf16 %v15987_v23  ;;  %v15988_v29 = vunpack.i.l.bf16 %v15987_v23 }
0x2904   : > { %v15480_v8 = vpack.c.bf16 %v15989_v27, %v15988_v29 }
0x2905   : > { %12177 = vrot.lane.b32.xlu1 %v19131_v6, %s17094_s7  ;;  %v15997_v14 = vpop.permute.xlu1 %15996 }
0x2906   : > { %v15999_v10 = vunpack.i.h.bf16 %v15997_v14 }
0x290f   : > { %v11593_v44 = vpop.xlane.xlu0 %11592 }
0x2910   : > { %16290 = vrcp.f32 %v11593_v44 }
0x2913   : > { %v15992_v6 = vpop.permute.xlu0 %15991 }
0x2914   : > { %v15994_v58 = vunpack.i.h.bf16 %v15992_v6  ;;  %v15993_v11 = vunpack.i.l.bf16 %v15992_v6 }
0x291a   : > { %v16291_v9 = vpop.eup %16290 }
0x291b   : > { %v11607_v0 = vmul.f32 %v16291_v9, %v16283_v34  ;;  %v15484_v34 = vpack.c.bf16 %v15994_v58, %v15993_v11 }
0x291d   : > { %14926 = vmatmul.mubr.msk.f32.vlgmr.msra.gmra.mrb[114].mxu1 %vm10162_vm14, %v11607_v0 }
0x291e   : > { %15478 = vmatpush3.bf16.msk.msra.mxu1 %vm19108_vm12, %v15476_v39  ;;  %14939 = vmatprep.mubr.msk.f32.mxu1 %vm17091_vm0, %v17090_v18 }
0x291f   : > { %15483 = vmatprep.subr.bf16.mxu1 %v17095_v13 }
0x2944   : > { %v11599_v40 = vpop.xlane.xlu0 %11598 }
0x2945   : > { %16292 = vrcp.f32 %v11599_v40 }
0x2948   : > { %v11596_v60 = vpop.xlane.xlu1 %11595  ;;  %v16002_v16 = vpop.permute.xlu0 %16001 }
0x2949   : > { %16294 = vrcp.f32 %v11596_v60  ;;  %v16004_v55 = vunpack.i.h.bf16 %v16002_v16  ;;  %v16003_v30 = vunpack.i.l.bf16 %v16002_v16 }
0x294b   : > { %v15492_v5 = vpack.c.bf16 %v16004_v55, %v16003_v30 }
0x294c   : > { %v11932_v48 = vpop.permute.xlu0 %11931  ;;  %v16007_v4 = vpop.permute.xlu1 %16006 }
0x294d   : > { %v16009_v63 = vunpack.i.h.bf16 %v16007_v4 }
0x294f   : > { %v16293_v15 = vpop.eup %16292 }
0x2950   : > { %v11609_v41 = vmul.f32 %v16293_v15, %v16285_v52  ;;  %v12096_v54 = vpop.permute.xlu0 %12095  ;;  %v15998_v52 = vunpack.i.l.bf16 %v15997_v14 }
0x2952   : > { %14940 = vmatmul.mubr.msk.f32.vlgmr.msra.gmra.mrb[116].mxu1 %vm10162_vm14, %v11609_v41  ;;  %v15488_v25 = vpack.c.bf16 %v15999_v10, %v15998_v52 }
0x2953   : > { %v16295_v38 = vpop.eup %16294  ;;  %15486 = vmatpush3.bf16.xpose.msk.msra.mxu1 %vm19008_vm9, %v15484_v34  ;;  %14953 = vmatprep.mubr.msk.f32.mxu1 %vm17091_vm0, %v17090_v18 }
0x2954   : > { %v11608_v31 = vmul.f32 %v16295_v38, %v16287_v46  ;;  %15491 = vmatprep.subr.bf16.mxu1 %v17095_v13  ;;  %v16008_v46 = vunpack.i.l.bf16 %v16007_v4 }
0x2956   : > { %14933 = vmatmul.mubr.msk.f32.vlgmr.msra.gmra.mrb[112].mxu0 %vm10162_vm14, %v11608_v31  ;;  %v15496_v49 = vpack.c.bf16 %v16009_v63, %v16008_v46 }
0x2957   : > { %15482 = vmatpush3.bf16.msk.msra.mxu0 %vm19108_vm12, %v15480_v8  ;;  %14946 = vmatprep.mubr.msk.f32.mxu0 %vm17091_vm0, %v17090_v18 }
0x2958   : > { %15487 = vmatprep.subr.bf16.mxu0 %v17095_v13 }
0x295a   : > { %14954 = vmatmul.mubr.msk.f32.vlgmr.msra.gmra.mrb[118].mxu1 %vm2068_vm1, %v11932_v48 }
0x295b   : > { %15494 = vmatpush3.bf16.xpose.msk.msra.mxu1 %vm19008_vm9, %v15492_v5  ;;  %14967 = vmatprep.mubr.msk.f32.mxu1 %vm17091_vm0, %v17090_v18 }
0x295c   : > { %15499 = vmatprep.subr.bf16.mxu1 %v17095_v13 }
0x2962   : > { %14968 = vmatmul.mubr.msk.f32.vlgmr.msra.gmra.mrb[120].mxu1 %vm2068_vm1, %v12096_v54 }
0x2963   : > { %14981 = vmatprep.mubr.msk.f32.mxu1 %vm17091_vm0, %v17090_v18 }
0x297d   : > { %v11602_v57 = vpop.xlane.xlu1 %11601 }
0x297e   : > { %16296 = vrcp.f32 %v11602_v57 }
0x2981   : > { %v12014_v3 = vpop.permute.xlu1 %12013 }
0x2985   : > { %v12178_v26 = vpop.permute.xlu1 %12177 }
0x2988   : > { %v16297_v50 = vpop.eup %16296 }
0x2989   : > { %v11610_v17 = vmul.f32 %v16297_v50, %v16289_v51 }
0x298b   : > { %14947 = vmatmul.mubr.msk.f32.vlgmr.msra.gmra.mrb[114].mxu0 %vm10162_vm14, %v11610_v17 }
0x298c   : > { %15490 = vmatpush3.bf16.xpose.msk.msra.mxu0 %vm19008_vm9, %v15488_v25  ;;  %14960 = vmatprep.mubr.msk.f32.mxu0 %vm17091_vm0, %v17090_v18 }
0x298d   : > { %15495 = vmatprep.subr.bf16.mxu0 %v17095_v13 }
0x2993   : > { %14961 = vmatmul.mubr.msk.f32.vlgmr.msra.gmra.mrb[116].mxu0 %vm2068_vm1, %v12014_v3 }
0x2994   : > { %15498 = vmatpush3.bf16.xpose.msk.msra.mxu0 %vm19008_vm9, %v15496_v49  ;;  %14974 = vmatprep.mubr.msk.f32.mxu0 %vm17091_vm0, %v17090_v18 }
0x2995   : > { %15503 = vmatprep.subr.bf16.mxu0 %v17095_v13 }
0x299b   : > { %14975 = vmatmul.mubr.msk.f32.vlgmr.msra.gmra.mrb[118].mxu0 %vm2068_vm1, %v12178_v26 }
0x299c   : > { %14988 = vmatprep.mubr.msk.f32.mxu0 %vm17091_vm0, %v17090_v18 }
0x29f0   : > { %v11687_v42 = vpop.f32.mrb[114].mxu1 }
0x29f1   : > { %v14927_v51 = vpop.f32.mrb[115].mxu1 }
0x2a25   : > { %v11847_v45 = vpop.f32.mrb[116].mxu1 }
0x2a26   : > { %v14941_v44 = vpop.f32.mrb[117].mxu1 }
0x2a29   : > { %v11767_v37 = vpop.f32.mrb[112].mxu0 }
0x2a2a   : > { %v14934_v33 = vpop.f32.mrb[113].mxu0 }
0x2a2d   : > { %v12009_v36 = vpop.f32.mrb[118].mxu1 }
0x2a2e   : > { %v12259_v61 = vmul.f32 0.17677669, %v12009_v36  ;;  %v14955_v9 = vpop.f32.mrb[119].mxu1 }
0x2a30   : > { %v12263_v0 = vsel %vm10092_vm13, %v12259_v61, -inf }
0x2a31   : > { %12264 = vmax.xlane.f32.xlu0 %v12263_v0 }
0x2a35   : > { %v12173_v39 = vpop.f32.mrb[120].mxu1 }
0x2a36   : > { %v12261_v23 = vmul.f32 0.17677669, %v12173_v39  ;;  %v14969_v6 = vpop.f32.mrb[121].mxu1 }
0x2a38   : > { %v12269_v14 = vsel %vm10092_vm13, %v12261_v23, -inf }
0x2a39   : > { %12270 = vmax.xlane.f32.xlu0 %v12269_v14 }
0x2a5e   : > { %v11927_v40 = vpop.f32.mrb[114].mxu0 }
0x2a5f   : > { %v14948_v60 = vpop.f32.mrb[115].mxu0 }
0x2a66   : > { %v12091_v58 = vpop.f32.mrb[116].mxu0 }
0x2a67   : > { %v12260_v11 = vmul.f32 0.17677669, %v12091_v58  ;;  %v14962_v15 = vpop.f32.mrb[117].mxu0 }
0x2a69   : > { %v12266_v41 = vsel %vm10092_vm13, %v12260_v11, -inf }
0x2a6a   : > { %12267 = vmax.xlane.f32.xlu1 %v12266_v41 }
0x2a6e   : > { %v12255_v27 = vpop.f32.mrb[118].mxu0 }
0x2a6f   : > { %v12262_v29 = vmul.f32 0.17677669, %v12255_v27  ;;  %v14976_v34 = vpop.f32.mrb[119].mxu0 }
0x2a71   : > { %v12272_v16 = vsel %vm10092_vm13, %v12262_v29, -inf }
0x2a72   : > { %12273 = vmax.xlane.f32.xlu0 %v12272_v16 }
0x2abe   : > { %v12265_v38 = vpop.xlane.xlu0 %12264 }
0x2abf   : > { %v12275_v31 = vsub.f32 %v12259_v61, %v12265_v38 }
0x2ac1   : > { %v12279_v8 = vmul.f32 1.442695, %v12275_v31 }
0x2ac3   : > { %16298 = vpow2.f32 %v12279_v8  ;;  %v1730_v8 = vld [vmem:[#allocation26] sm:$0xff] }
0x2ac6   : > { %v12271_v55 = vpop.xlane.xlu0 %12270 }
0x2ac7   : > { %v12277_v30 = vsub.f32 %v12261_v23, %v12271_v55  ;;  %v1731_v55 = vld [vmem:[#allocation26 + $0x8] sm:$0xff] }
0x2ac8   : > { %v15515_v35 = vpack.c.bf16 %v1731_v55, %v1730_v8  ;;  %v1822_v55 = vld [vmem:[#allocation32] sm:$0xff] }
0x2ac9   : > { %v12283_v5 = vmul.f32 1.442695, %v12277_v30  ;;  %v1732_v30 = vld [vmem:[#allocation26 + $0x10] sm:$0xff] }
0x2acb   : > { %16300 = vpow2.f32 %v12283_v5  ;;  %v1733_v5 = vld [vmem:[#allocation26 + $0x18] sm:$0xff] }
0x2acd   : > { %v16299_v48 = vpop.eup %16298 }
0x2ace   : > { %v12287_v54 = vsel %vm10092_vm13, %v16299_v48, 0.0 }
0x2acf   : > { %12288 = vadd.xlane.f32.xlu0 %v12287_v54  ;;  %v1734_v54 = vld [vmem:[#allocation26 + $0x20] sm:$0xff] }
0x2ad5   : > { %v16301_v4 = vpop.eup %16300 }
0x2ad6   : > { %v12293_v57 = vsel %vm10092_vm13, %v16301_v4, 0.0 }
0x2ad7   : > { %12294 = vadd.xlane.f32.xlu0 %v12293_v57  ;;  %v1736_v57 = vld [vmem:[#allocation26 + $0x30] sm:$0xff] }
0x2aed   : > { %16011 = vrot.lane.b32.xlu0 %v19095_v24, %s17094_s7 }
0x2af1   : > { %12631 = vrot.lane.b32.xlu0 %v19300_v12, %s17094_s7 }
0x2af5   : > { %12635 = vrot.lane.b32.xlu0 %v19302_v59, %s17094_s7 }
0x2af7   : > { %v12268_v10 = vpop.xlane.xlu1 %12267 }
0x2af8   : > { %v12276_v52 = vsub.f32 %v12260_v11, %v12268_v10  ;;  %v1737_v10 = vld [vmem:[#allocation26 + $0x38] sm:$0xff] }
0x2af9   : > { %12647 = vrot.lane.b32.xlu0 %v11687_v42, %s19590_s19 }
0x2afa   : > { %v12281_v50 = vmul.f32 1.442695, %v12276_v52 }
0x2afc   : > { %16302 = vpow2.f32 %v12281_v50  ;;  %v15527_v50 = vpack.c.bf16 %v1737_v10, %v1736_v57  ;;  %v1828_v57 = vld [vmem:[#allocation32 + $0x30] sm:$0xff]  ;;  %v1831_v10 = vld [vmem:[#allocation32 + $0x48] sm:$0xff] }
0x2afd   : > { %12651 = vrot.lane.b32.xlu0 %v11847_v45, %s19590_s19 }
0x2aff   : > { %v12274_v24 = vpop.xlane.xlu0 %12273 }
0x2b00   : > { %v12278_v12 = vsub.f32 %v12262_v29, %v12274_v24  ;;  %v1739_v24 = vld [vmem:[#allocation26 + $0x48] sm:$0xff] }
0x2b02   : > { %v12285_v59 = vmul.f32 1.442695, %v12278_v12 }
0x2b04   : > { %16304 = vpow2.f32 %v12285_v59 }
0x2b06   : > { %v16303_v17 = vpop.eup %16302 }
0x2b07   : > { %v12290_v25 = vsel %vm10092_vm13, %v16303_v17, 0.0 }
0x2b08   : > { %12291 = vadd.xlane.f32.xlu1 %v12290_v25  ;;  %v1738_v25 = vld [vmem:[#allocation26 + $0x40] sm:$0xff] }
0x2b0e   : > { %v16305_v63 = vpop.eup %16304 }
0x2b0f   : > { %v12296_v46 = vsel %vm10092_vm13, %v16305_v63, 0.0 }
0x2b19   : > { %16016 = vrot.lane.b32.xlu1 %v19086_v7, %s17094_s7 }
0x2b1d   : > { %16021 = vrot.lane.b32.xlu1 %v19091_v56, %s17094_s7 }
0x2b41   : > { %12297 = vadd.xlane.f32.xlu1 %v12296_v46  ;;  %v1740_v46 = vld [vmem:[#allocation26 + $0x50] sm:$0xff] }
0x2b52   : > { %16026 = vrot.lane.b32.xlu1 %v19117_v1, %s17094_s7 }
0x2b56   : > { %12633 = vrot.lane.b32.xlu1 %v19304_v43, %s17094_s7 }
0x2b5a   : > { %12637 = vrot.lane.b32.xlu1 %v19308_v32, %s17094_s7 }
0x2b5c   : > { %v12289_v7 = vpop.xlane.xlu0 %12288 }
0x2b5d   : > { %16306 = vrcp.f32 %v12289_v7  ;;  %v1741_v7 = vld [vmem:[#allocation26 + $0x58] sm:$0xff] }
0x2b5e   : > { %12649 = vrot.lane.b32.xlu1 %v11767_v37, %s19590_s19 }
0x2b62   : > { %12653 = vrot.lane.b32.xlu1 %v11927_v40, %s19590_s19 }
0x2b64   : > { %v12295_v56 = vpop.xlane.xlu0 %12294 }
0x2b65   : > { %16308 = vrcp.f32 %v12295_v56  ;;  %v15535_v56 = vpack.c.bf16 %v1741_v7, %v1740_v46 }
0x2b67   : > { %v16307_v42 = vpop.eup %16306 }
0x2b68   : > { %v16012_v49 = vpop.permute.xlu0 %16011  ;;  %v12303_v1 = vmul.f32 %v16307_v42, %v16299_v48  ;;  %v15519_v48 = vpack.c.bf16 %v1733_v5, %v1732_v30  ;;  %v1744_v42 = vld [vmem:[#allocation26 + $0x70] sm:$0xff] }
0x2b69   : > { %v16014_v3 = vunpack.i.h.bf16 %v16012_v49  ;;  %v16013_v26 = vunpack.i.l.bf16 %v16012_v49  ;;  %v1742_v49 = vld [vmem:[#allocation26 + $0x60] sm:$0xff]  ;;  %v1827_v5 = vld [vmem:[#allocation32 + $0x28] sm:$0xff] }
0x2b6b   : > { %v15500_v51 = vpack.c.bf16 %v16014_v3, %v16013_v26  ;;  %v1743_v3 = vld [vmem:[#allocation26 + $0x68] sm:$0xff] }
0x2b6c   : > { %v19416_v45 = vpop.permute.xlu0 %12631  ;;  %v15539_v26 = vpack.c.bf16 %v1743_v3, %v1742_v49  ;;  %v1835_v3 = vld [vmem:[#allocation32 + $0x68] sm:$0xff] }
0x2b6d   : > { %15502 = vmatpush3.bf16.msk.msra.mxu1 %vm19108_vm12, %v15500_v51  ;;  %v1745_v51 = vld [vmem:[#allocation26 + $0x78] sm:$0xff] }
0x2b6e   : > { %15507 = vmatprep.subr.bf16.mxu1 %v17095_v13 }
0x2b6f   : > { %v16309_v23 = vpop.eup %16308 }
0x2b70   : > { %v12636_v43 = vpop.permute.xlu0 %12635  ;;  %14982 = vmatmul.mubr.msk.f32.vlgmr.msra.gmra.mrb[122].mxu1 %vm10162_vm14, %v12303_v1  ;;  %v12305_v40 = vmul.f32 %v16309_v23, %v16301_v4  ;;  %v1735_v4 = vld [vmem:[#allocation26 + $0x28] sm:$0xff]  ;;  %v15543_v1 = vpack.c.bf16 %v1745_v51, %v1744_v42 }
0x2b71   : > { %v19424_v32 = vsel %vm2068_vm1, %v19216_v2, %v12636_v43  ;;  %14995 = vmatprep.mubr.msk.f32.mxu1 %vm17091_vm0, %v17090_v18  ;;  %v1834_v42 = vld [vmem:[#allocation32 + $0x60] sm:$0xff] }
0x2b95   : > { %v12292_v44 = vpop.xlane.xlu1 %12291 }
0x2b96   : > { %16310 = vrcp.f32 %v12292_v44 }
0x2b99   : > { %v16017_v37 = vpop.permute.xlu1 %16016 }
0x2b9a   : > { %v16019_v33 = vunpack.i.h.bf16 %v16017_v37  ;;  %v16018_v36 = vunpack.i.l.bf16 %v16017_v37  ;;  %v12648_v37 = vpop.permute.xlu0 %12647 }
0x2b9c   : > { %v15504_v61 = vpack.c.bf16 %v16019_v33, %v16018_v36 }
0x2b9d   : > { %v16022_v9 = vpop.permute.xlu1 %16021 }
0x2b9e   : > { %v16024_v0 = vunpack.i.h.bf16 %v16022_v9  ;;  %v16023_v39 = vunpack.i.l.bf16 %v16022_v9  ;;  %15506 = vmatpush3.bf16.msk.msra.mxu0 %vm19108_vm12, %v15504_v61  ;;  %v12652_v36 = vpop.permute.xlu0 %12651 }
0x2b9f   : > { %15511 = vmatprep.subr.bf16.mxu0 %v17095_v13 }
0x2ba0   : > { %v16311_v2 = vpop.eup %16310  ;;  %v15508_v6 = vpack.c.bf16 %v16024_v0, %v16023_v39  ;;  %v12675_v0 = vsel %vm2068_vm1, %v19212_v62, %v19416_v45 }
0x2ba1   : > { %v12304_v14 = vmul.f32 %v16311_v2, %v16303_v17  ;;  %v12679_v23 = vsel %vm4772_vm5, %v12675_v0, %v12648_v37  ;;  %v1841_v37 = vld [vmem:[#allocation32 + $0x98] sm:$0xff] }
0x2ba2   : > { %15510 = vmatpush3.bf16.msk.msra.mxu1 %vm19108_vm12, %v15508_v6  ;;  %v1845_v0 = vld [vmem:[#allocation32 + $0xb8] sm:$0xff] }
0x2ba3   : > { %14989 = vmatmul.mubr.msk.f32.vlgmr.msra.gmra.mrb[120].mxu0 %vm10162_vm14, %v12304_v14  ;;  %15516 = vmatprep.subr.bf16.mxu1 %v15515_v35 }
0x2ba4   : > { %15002 = vmatprep.mubr.msk.f32.mxu0 %vm17091_vm0, %v17090_v18 }
0x2ba5   : > { %14996 = vmatmul.mubr.msk.f32.vlgmr.msra.gmra.mrb[124].mxu1 %vm10162_vm14, %v12305_v40 }
0x2ba6   : > { %15518 = vmatpush3.bf16.msra.mxu1 %v15515_v35  ;;  %v1824_v35 = vld [vmem:[#allocation32 + $0x10] sm:$0xff] }
0x2ba7   : > { %15520 = vmatprep.subr.bf16.mxu1 %v15519_v48 }
0x2baa   : > { %15522 = vmatpush3.bf16.msra.mxu1 %v15519_v48  ;;  %v1829_v48 = vld [vmem:[#allocation32 + $0x38] sm:$0xff] }
0x2bce   : > { %v12298_v60 = vpop.xlane.xlu1 %12297 }
0x2bcf   : > { %16312 = vrcp.f32 %v12298_v60 }
0x2bd2   : > { %v16027_v58 = vpop.permute.xlu1 %16026 }
0x2bd3   : > { %v16029_v11 = vunpack.i.h.bf16 %v16027_v58  ;;  %v16028_v15 = vunpack.i.l.bf16 %v16027_v58 }
0x2bd5   : > { %v15512_v13 = vpack.c.bf16 %v16029_v11, %v16028_v15  ;;  %v12681_v11 = vsel %vm4772_vm5, %v19424_v32, %v12652_v36  ;;  %v1823_v32 = vld [vmem:[#allocation32 + $0x8] sm:$0xff] }
0x2bd6   : > { %v19437_v41 = vpop.permute.xlu1 %12633 }
0x2bd7   : > { %15514 = vmatpush3.bf16.msk.msra.mxu0 %vm19108_vm12, %v15512_v13  ;;  %v12676_v39 = vsel %vm2068_vm1, %v19214_v47, %v19437_v41  ;;  %v13752_v41 = vld [vmem:[#allocation28] ss:$0 sm:$0xff] }
0x2bd9   : > { %v16313_v27 = vpop.eup %16312 }
0x2bda   : > { %v12306_v29 = vmul.f32 %v16313_v27, %v16305_v63  ;;  %v12638_v34 = vpop.permute.xlu1 %12637  ;;  %v15531_v63 = vpack.c.bf16 %v1739_v24, %v1738_v25 }
0x2bdb   : > { %v19443_v16 = vsel %vm2068_vm1, %v19220_v22, %v12638_v34  ;;  %v15523_v22 = vpack.c.bf16 %v1735_v4, %v1734_v54  ;;  %v15549_v54 = vpack.c.bf16 %v1824_v35, %v1822_v55  ;;  %v15551_v4 = vpack.c.bf16 %v1829_v48, %v1827_v5 }
0x2bdc   : > { %15003 = vmatmul.mubr.msk.f32.vlgmr.msra.gmra.mrb[122].mxu0 %vm10162_vm14, %v12306_v29 }
0x2bdd   : > { %12887 = vmatprep.mubr.f32.mxu0 %v17090_v18  ;;  %15524 = vmatprep.subr.bf16.mxu1 %v15523_v22 }
0x2bde   : > { %15526 = vmatpush3.bf16.msra.mxu1 %v15523_v22  ;;  %v12650_v33 = vpop.permute.xlu1 %12649  ;;  %v1826_v22 = vld [vmem:[#allocation32 + $0x20] sm:$0xff] }
0x2bdf   : > { %15528 = vmatprep.subr.bf16.mxu1 %v15527_v50  ;;  %v12680_v2 = vsel %vm4772_vm5, %v12676_v39, %v12650_v33  ;;  %v1838_v33 = vld [vmem:[#allocation32 + $0x80] sm:$0xff] }
0x2be2   : > { %15530 = vmatpush3.bf16.msra.mxu1 %v15527_v50  ;;  %v12654_v61 = vpop.permute.xlu1 %12653  ;;  %v1830_v50 = vld [vmem:[#allocation32 + $0x40] sm:$0xff] }
0x2be3   : > { %15532 = vmatprep.subr.bf16.mxu1 %v15531_v63  ;;  %v12682_v62 = vsel %vm4772_vm5, %v19443_v16, %v12654_v61  ;;  %v1825_v16 = vld [vmem:[#allocation32 + $0x18] sm:$0xff]  ;;  %v1840_v61 = vld [vmem:[#allocation32 + $0x90] sm:$0xff] }
0x2be4   : > { %v15547_v30 = vpack.c.bf16 %v1825_v16, %v1823_v32  ;;  %v15565_v39 = vpack.c.bf16 %v1840_v61, %v1838_v33  ;;  %v1856_v32 = vld [vmem:[#allocation34 + $0x8] sm:$0xff]  ;;  %v1862_v61 = vld [vmem:[#allocation34 + $0x38] sm:$0xff] }
0x2be6   : > { %15534 = vmatpush3.bf16.msra.mxu1 %v15531_v63  ;;  %15548 = vmatprep.subr.bf16.mxu0 %v15547_v30 }
0x2be7   : > { %15536 = vmatprep.subr.bf16.mxu1 %v15535_v56  ;;  %15550 = vmatpush1.bf16.msra.mxu0 %v15549_v54 }
0x2be8   : > { %15552 = vmatprep.subr.bf16.mxu0 %v15551_v4  ;;  %v12802_v4 = vsub.s32 4, %v17741_v28 }
0x2bea   : > { %15538 = vmatpush3.bf16.msra.mxu1 %v15535_v56 }
0x2beb   : > { %15540 = vmatprep.subr.bf16.mxu1 %v15539_v26 }
0x2bee   : > { %15542 = vmatpush3.bf16.msra.mxu1 %v15539_v26  ;;  %v1837_v26 = vld [vmem:[#allocation32 + $0x78] sm:$0xff] }
0x2bef   : > { %15544 = vmatprep.subr.bf16.mxu1 %v15543_v1  ;;  %v15559_v51 = vpack.c.bf16 %v1837_v26, %v1835_v3  ;;  %v1858_v3 = vld [vmem:[#allocation34 + $0x18] sm:$0xff]  ;;  %v1875_v26 = vld [vmem:[#allocation34 + $0xa0] sm:$0xff] }
0x2bf2   : > { %15546 = vmatpush3.bf16.msra.mxu1 %v15543_v1  ;;  %v1836_v1 = vld [vmem:[#allocation32 + $0x70] sm:$0xff] }
0x2c43   : > { %v12383_v38 = vpop.f32.mrb[122].mxu1 }
0x2c44   : > { %12663 = vrot.lane.b32.xlu0 %v12383_v38, %s17092_s14  ;;  %v14983_v31 = vpop.f32.mrb[123].mxu1 }
0x2c76   : > { %v12463_v52 = vpop.f32.mrb[120].mxu0 }
0x2c77   : > { %v14990_v17 = vpop.f32.mrb[121].mxu0  ;;  %12665 = vrot.lane.b32.xlu1 %v12463_v52, %s17092_s14  ;;  %v1833_v52 = vld [vmem:[#allocation32 + $0x58] sm:$0xff] }
0x2c78   : > { %v12543_v12 = vpop.f32.mrb[124].mxu1  ;;  %v1832_v17 = vld [vmem:[#allocation32 + $0x50] sm:$0xff] }
0x2c79   : > { %12667 = vrot.lane.b32.xlu0 %v12543_v12, %s17092_s14  ;;  %v14997_v59 = vpop.f32.mrb[125].mxu1  ;;  %v15557_v25 = vpack.c.bf16 %v1832_v17, %v1830_v50 }
0x2caf   : > { %v12623_v43 = vpop.f32.mrb[122].mxu0 }
0x2cb0   : > { %12669 = vrot.lane.b32.xlu1 %v12623_v43, %s17092_s14  ;;  %v15004_v44 = vpop.f32.mrb[123].mxu0  ;;  %v15561_v43 = vpack.c.bf16 %v1836_v1, %v1834_v42  ;;  %v1876_v42 = vld [vmem:[#allocation34 + $0xa8] sm:$0xff]  ;;  %s1252_s14 = scalar_lea.vmem [#allocation35], %s13500_s13  ;;  %s16926_s13 = sshll.u32 %s17098_s2, 4  ;;  %s16927_s13 = int_to_ptr.vmem [resolvable:$false] %s16926_s13 }
0x2cb1   : > { %v1839_v44 = vld [vmem:[#allocation32 + $0x88] sm:$0xff]  ;;  %v15587_v1 = vpack.c.bf16 %v1876_v42, %v1875_v26  ;;  %s13158_s7 = sshll.u32 %s1252_s14, 4  ;;  %s16928_s19 = scalar_lea.vmem %s16927_s13, 512  ;;  %s19507_s7 = int_to_ptr.vmem [resolvable:$true] %s13158_s7 }
0x2cb2   : > { %v15563_v36 = vpack.c.bf16 %v1841_v37, %v1839_v44  ;;  %v1877_v44 = vld [vmem:[#allocation34 + $0xb0] sm:$0xff]  ;;  %v1878_v37 = vld [vmem:[#allocation34 + $0xb8] sm:$0xff]  ;;  %p16929_p1 = scmp.lt.s32.totalorder %s19507_s7, %s16927_s13 }
0x2cb3   : > { %v15591_v33 = vpack.c.bf16 %v1878_v37, %v1877_v44 }
0x2cb6   : > { %v12664_v9 = vpop.permute.xlu0 %12663 }
0x2cb7   : > { %v12683_v14 = vsel %vm4777_vm6, %v12679_v23, %v12664_v9  ;;  %v1843_v9 = vld [vmem:[#allocation32 + $0xa8] sm:$0xff] }
0x2cb8   : > { %v15567_v23 = vpack.c.bf16 %v1845_v0, %v1843_v9  ;;  %v1879_v9 = vld [vmem:[#allocation34 + $0xc0] sm:$0xff]  ;;  %v1880_v0 = vld [vmem:[#allocation34 + $0xc8] sm:$0xff] }
0x2ce9   : > { %v12666_v6 = vpop.permute.xlu1 %12665 }
0x2cea   : > { %v12684_v40 = vsel %vm4777_vm6, %v12680_v2, %v12666_v6  ;;  %v1842_v2 = vld [vmem:[#allocation32 + $0xa0] sm:$0xff]  ;;  %v1844_v6 = vld [vmem:[#allocation32 + $0xb0] sm:$0xff] }
0x2ceb   : > { %v12697_v60 = vcombine.low %v12683_v14, %v12684_v40  ;;  %v12668_v58 = vpop.permute.xlu0 %12667  ;;  %v1847_v14 = vld [vmem:[#allocation32 + $0xc8] sm:$0xff]  ;;  %v1849_v40 = vld [vmem:[#allocation32 + $0xd8] sm:$0xff] }
0x2cec   : > { %v12685_v47 = vsel %vm4777_vm6, %v12681_v11, %v12668_v58  ;;  %v15571_v58 = vpack.c.bf16 %v1849_v40, %v1847_v14  ;;  %v1846_v11 = vld [vmem:[#allocation32 + $0xc0] sm:$0xff]  ;;  %v1881_v14 = vld [vmem:[#allocation34 + $0xd0] sm:$0xff]  ;;  %v1882_v40 = vld [vmem:[#allocation34 + $0xd8] sm:$0xff] }
0x2ced   : > { %15037 = vmatprep.mubr.f32.mxu1 %v12697_v60  ;;  %v15569_v60 = vpack.c.bf16 %v1844_v6, %v1842_v2  ;;  %v1863_v2 = vld [vmem:[#allocation34 + $0x40] sm:$0xff]  ;;  %v1864_v6 = vld [vmem:[#allocation34 + $0x48] sm:$0xff] }
0x2d22   : > { %v12670_v45 = vpop.permute.xlu1 %12669 }
0x2d23   : > { %v12686_v15 = vsel %vm4777_vm6, %v12682_v62, %v12670_v45  ;;  %v1848_v62 = vld [vmem:[#allocation32 + $0xd0] sm:$0xff]  ;;  %v1851_v45 = vld [vmem:[#allocation32 + $0xe8] sm:$0xff] }
0x2d24   : > { %v12698_v13 = vcombine.low %v12685_v47, %v12686_v15  ;;  %v1853_v47 = vld [vmem:[#allocation32 + $0xf8] sm:$0xff]  ;;  %v15573_v15 = vpack.c.bf16 %v1848_v62, %v1846_v11  ;;  %v1865_v11 = vld [vmem:[#allocation34 + $0x50] sm:$0xff] }
0x2d25   : > { %v1866_v62 = vld [vmem:[#allocation34 + $0x58] sm:$0xff] }
0x2d26   : > { %15038 = vmatmul.mubr.f32.vlgmr.msra.gmra.mrb[126].mxu1 %v12698_v13  ;;  %v15575_v13 = vpack.c.bf16 %v1853_v47, %v1851_v45  ;;  %v1883_v45 = vld [vmem:[#allocation34 + $0xe0] sm:$0xff]  ;;  %v1884_v47 = vld [vmem:[#allocation34 + $0xe8] sm:$0xff] }
0x2df9   : > { %v15039_v27 = vpop.f32.mrb[126].mxu1 }
0x2dfa   : > { %v12773_v29 = vadd.f32 %v15039_v27, %v13752_v41  ;;  %v12767_v34 = vpop.f32.mrb[127].mxu1  ;;  %v1852_v27 = vld [vmem:[#allocation32 + $0xf0] sm:$0xff] }
0x2dfb   : > { %v12768_v38 = vadd.f32 %v13752_v41, %v12767_v34  ;;  %v1850_v41 = vld [vmem:[#allocation32 + $0xe0] sm:$0xff] }
0x2dfc   : > { %v12777_v31 = vadd.f32 %v18225_v19, %v12773_v29  ;;  %v15553_v19 = vpack.c.bf16 %v1828_v57, %v1826_v22  ;;  %v15577_v29 = vpack.c.bf16 %v1852_v27, %v1850_v41  ;;  %v1871_v34 = vld [vmem:[#allocation34 + $0x80] sm:$0xff]  ;;  %v12808_v22 = vsub.s32 5, %v17741_v28  ;;  %v19480_v57 = vld [vmem:[%s19671_s11] sm:$0xff]  ;;  %v1868_v27 = vld [vmem:[#allocation34 + $0x68] sm:$0xff] }
0x2dfd   : > { %v12776_v8 = vadd.f32 %v12768_v38, %v18227_v53  ;;  %v15555_v53 = vpack.c.bf16 %v1833_v52, %v1831_v10  ;;  %v1872_v38 = vld [vmem:[#allocation34 + $0x88] sm:$0xff]  ;;  %v12803_v10 = vrot.slane %v19480_v57, %v12802_v4  ;;  %v1867_v41 = vld [vmem:[#allocation34 + $0x60] sm:$0xff] }
0x2dfe   : > { %12780 = vadd.xlane.f32.xlu1 %v12777_v31  ;;  %15554 = vmatpush1.bf16.msra.mxu0 %v15553_v19 }
0x2dff   : > { %12778 = vadd.xlane.f32.xlu0 %v12776_v8  ;;  %15556 = vmatprep.subr.bf16.mxu0 %v15555_v53  ;;  %v12809_v53 = vrot.slane %v19480_v57, %v12808_v22 }
0x2e02   : > { %15558 = vmatpush1.bf16.msra.mxu0 %v15557_v25 }
0x2e03   : > { %15560 = vmatprep.subr.bf16.mxu0 %v15559_v51 }
0x2e06   : > { %15562 = vmatpush1.bf16.msra.mxu0 %v15561_v43  ;;  %v1859_v43 = vld [vmem:[#allocation34 + $0x20] sm:$0xff] }
0x2e07   : > { %15564 = vmatprep.subr.bf16.mxu0 %v15563_v36  ;;  %v1861_v36 = vld [vmem:[#allocation34 + $0x30] sm:$0xff] }
0x2e0a   : > { %15566 = vmatpush1.bf16.msra.mxu0 %v15565_v39  ;;  %v15593_v39 = vpack.c.bf16 %v1862_v61, %v1861_v36 }
0x2e0b   : > { %15568 = vmatprep.subr.bf16.mxu0 %v15567_v23  ;;  %v15595_v23 = vpack.c.bf16 %v1880_v0, %v1879_v9 }
0x2e0e   : > { %15570 = vmatpush1.bf16.msra.mxu0 %v15569_v60  ;;  %v15597_v60 = vpack.c.bf16 %v1864_v6, %v1863_v2 }
0x2e0f   : > { %15572 = vmatprep.subr.bf16.mxu0 %v15571_v58  ;;  %v15599_v58 = vpack.c.bf16 %v1882_v40, %v1881_v14 }
0x2e12   : > { %15574 = vmatpush1.bf16.msra.mxu0 %v15573_v15  ;;  %v15601_v15 = vpack.c.bf16 %v1866_v62, %v1865_v11 }
0x2e13   : > { %15576 = vmatprep.subr.bf16.mxu0 %v15575_v13  ;;  %v15603_v13 = vpack.c.bf16 %v1884_v47, %v1883_v45  ;;  %v13753_v47 = vld [vmem:[%s19681_s12] ss:$0 sm:$0xff]  ;;  %s16922_s12 = scalar_lea.vmem %s19507_s7, 256 }
0x2e14   : > { %p16923_p11 = scmp.ne.s32.totalorder %s19507_s7, %s16922_s12  ;;  %p16930_p9 = scmp.lt.s32.totalorder %s16928_s19, %s16922_s12 }
0x2e16   : > { %15578 = vmatpush1.bf16.msra.mxu0 %v15577_v29  ;;  %v1885_v29 = vld [vmem:[#allocation34 + $0xf0] sm:$0xff]  ;;  %p16924_p5 = pnand %p16923_p11, %p19683_p12  ;;  %p16931_p13 = por %p16930_p9, %p16929_p1 }
0x2e18   : > { %p16925_p7 = pneg %p16924_p5 }
0x2e1a   : > { %p16932_p6 = pnand %p16931_p13, %p16925_p7 }
0x2e8b   : > { %v12781_v24 = vpop.xlane.xlu1 %12780 }
0x2e8c   : > { %v12779_v12 = vpop.xlane.xlu0 %12778  ;;  %v12783_v59 = vmul.f32 0.0078125, %v12781_v24 }
0x2e8d   : > { %v12782_v63 = vmul.f32 0.0078125, %v12779_v12 }
0x2e8e   : > { %v19471_v7 = vsub.f32 %v12777_v31, %v12783_v59  ;;  %v1855_v31 = vld [vmem:[#allocation34] sm:$0xff] }
0x2e8f   : > { %v19469_v46 = vsub.f32 %v12776_v8, %v12782_v63  ;;  %v15579_v8 = vpack.c.bf16 %v1872_v38, %v1871_v34  ;;  %v15581_v16 = vpack.c.bf16 %v1856_v32, %v1855_v31  ;;  %v1873_v63 = vld [vmem:[#allocation34 + $0x90] sm:$0xff]  ;;  %v1886_v34 = vld [vmem:[#allocation34 + $0xf8] sm:$0xff]  ;;  %v15605_v38 = vpack.c.bf16 %v1868_v27, %v1867_v41 }
0x2e90   : > { %v12787_v49 = vmul.f32 %v19471_v7, %v19471_v7  ;;  %v15607_v31 = vpack.c.bf16 %v1886_v34, %v1885_v29  ;;  %v1870_v32 = vld [vmem:[#allocation34 + $0x78] sm:$0xff] }
0x2e91   : > { %v12786_v56 = vmul.f32 %v19469_v46, %v19469_v46  ;;  %15580 = vmatprep.subr.bf16.mxu1 %v15579_v8  ;;  %v1869_v8 = vld [vmem:[#allocation34 + $0x70] sm:$0xff] }
0x2e92   : > { %15582 = vmatpush3.bf16.msra.mxu1 %v15581_v16  ;;  %v15609_v16 = vpack.c.bf16 %v1870_v32, %v1869_v8 }
0x2e93   : > { %12788 = vadd.xlane.f32.xlu0 %v12786_v56  ;;  %v1874_v56 = vld [vmem:[#allocation34 + $0x98] sm:$0xff] }
0x2e97   : > { %12790 = vadd.xlane.f32.xlu0 %v12787_v49  ;;  %v15583_v49 = vpack.c.bf16 %v1874_v56, %v1873_v63 }
0x2e99   : > { %15584 = vmatprep.subr.bf16.mxu1 %v15583_v49 }
0x2f20   : > { %v12789_v55 = vpop.xlane.xlu0 %12788 }
0x2f21   : > { %v12792_v30 = vmul.f32 0.0078125, %v12789_v55  ;;  %v1854_v55 = vld [vmem:[%s17248_s17] sm:$0x3] }
0x2f23   : > { %v12794_v35 = vadd.f32 1e-05, %v12792_v30  ;;  %v12816_v30 = vrot.slane %v1854_v55, %v17773_v20 }
0x2f24   : > { %v12791_v5 = vpop.xlane.xlu0 %12790 }
0x2f25   : > { %16314 = vrsqrt.f32 %v12794_v35  ;;  %v12793_v48 = vmul.f32 0.0078125, %v12791_v5  ;;  %v12820_v35 = vrot.slane %v1854_v55, %v17776_v21 }
0x2f27   : > { %v12795_v54 = vadd.f32 1e-05, %v12793_v48 }
0x2f29   : > { %16316 = vrsqrt.f32 %v12795_v54 }
0x2f2f   : > { %v16315_v52 = vpop.eup %16314 }
0x2f30   : > { %v12798_v19 = vmul.f32 %v16315_v52, %v19469_v46  ;;  %v1857_v46 = vld [vmem:[#allocation34 + $0x10] sm:$0xff] }
0x2f31   : > { %v15585_v51 = vpack.c.bf16 %v1858_v3, %v1857_v46 }
0x2f32   : > { %v12804_v50 = vmul.f32 %v12803_v10, %v12798_v19 }
0x2f33   : > { %v16317_v17 = vpop.eup %16316  ;;  %15586 = vmatpush3.bf16.msra.mxu1 %v15585_v51 }
0x2f34   : > { %v19485_v25 = vadd.f32 %v12809_v53, %v12804_v50  ;;  %v12799_v24 = vmul.f32 %v16317_v17, %v19471_v7  ;;  %v1860_v7 = vld [vmem:[#allocation34 + $0x28] sm:$0xff]  ;;  %15588 = vmatprep.subr.bf16.mxu1 %v15587_v1 }
0x2f36   : > { %12888 = vmatmul.mubr.f32.vlgmr.msra.gmra.mrb[124].mxu0 %v19485_v25  ;;  %v12805_v12 = vmul.f32 %v12803_v10, %v12799_v24 }
0x2f37   : > { %12893 = vmatprep.mubr.f32.mxu0 %v17090_v18  ;;  %v15589_v18 = vpack.c.bf16 %v1860_v7, %v1859_v43 }
0x2f38   : > { %v19490_v59 = vadd.f32 %v12809_v53, %v12805_v12 }
0x2f39   : > { %15590 = vmatpush3.bf16.msra.mxu1 %v15589_v18 }
0x2f3a   : > { %12894 = vmatmul.mubr.f32.gmra.mrb[126].mxu0 %v19490_v59  ;;  %15592 = vmatprep.subr.bf16.mxu1 %v15591_v33 }
0x2f3d   : > { %15594 = vmatpush3.bf16.msra.mxu1 %v15593_v39 }
0x2f3e   : > { %15596 = vmatprep.subr.bf16.mxu1 %v15595_v23 }
0x2f41   : > { %15598 = vmatpush3.bf16.msra.mxu1 %v15597_v60 }
0x2f42   : > { %15600 = vmatprep.subr.bf16.mxu1 %v15599_v58 }
0x2f45   : > { %15602 = vmatpush3.bf16.msra.mxu1 %v15601_v15 }
0x2f46   : > { %15604 = vmatprep.subr.bf16.mxu1 %v15603_v13 }
0x2f49   : > { %15606 = vmatpush3.bf16.msra.mxu1 %v15605_v38 }
0x2f4a   : > { %15608 = vmatprep.subr.bf16.mxu1 %v15607_v31 }
0x2f4d   : > { %15610 = vmatpush3.bf16.msra.mxu1 %v15609_v16 }
0x3009   : > { %v12889_v5 = vpop.f32.mrb[124].mxu0 }
0x300a   : > { %v12890_v48 = vadd.f32 %v12889_v5, %v12816_v30  ;;  %v12891_v54 = vpop.f32.mrb[125].mxu0 }
0x300b   : > { %v12892_v4 = vadd.f32 %v12891_v54, %v12820_v35 }
0x300c   : > { %v12904_v22 = vmul.f32 0.044715, %v12890_v48  ;;  %v12900_v0 = vmul.f32 0.5, %v12890_v48 }
0x300d   : > { %v12905_v10 = vmul.f32 0.044715, %v12892_v4  ;;  %v12895_v52 = vpop.f32.mrb[126].mxu0  ;;  %v12901_v61 = vmul.f32 0.5, %v12892_v4 }
0x300e   : > { %v12908_v19 = vmul.f32 %v12904_v22, %v12890_v48  ;;  %v12896_v53 = vadd.f32 %v12895_v52, %v12816_v30  ;;  %v12897_v50 = vpop.f32.mrb[127].mxu0 }
0x300f   : > { %v12909_v17 = vmul.f32 %v12905_v10, %v12892_v4  ;;  %v12898_v24 = vadd.f32 %v12897_v50, %v12820_v35 }
0x3010   : > { %v12912_v12 = vmul.f32 %v12908_v19, %v12890_v48  ;;  %v12906_v63 = vmul.f32 0.044715, %v12896_v53  ;;  %v12902_v58 = vmul.f32 0.5, %v12896_v53 }
0x3011   : > { %v12907_v56 = vmul.f32 0.044715, %v12898_v24  ;;  %v12913_v46 = vmul.f32 %v12909_v17, %v12892_v4  ;;  %v12903_v40 = vmul.f32 0.5, %v12898_v24 }
0x3012   : > { %v12916_v49 = vadd.f32 %v12912_v12, %v12890_v48  ;;  %v12910_v20 = vmul.f32 %v12906_v63, %v12896_v53  ;;  %v13049_v12 = vsub.s32 7, %v17741_v28 }
0x3013   : > { %v12911_v3 = vmul.f32 %v12907_v56, %v12898_v24  ;;  %v12917_v21 = vadd.f32 %v12913_v46, %v12892_v4  ;;  %v1546_v4 = vld [vmem:[#allocation7] sm:$0xff] }
0x3014   : > { %v12920_v26 = vmul.f32 0.7978846, %v12916_v49  ;;  %v12914_v42 = vmul.f32 %v12910_v20, %v12896_v53  ;;  %15044 = vmatprep.mubr.msk.f32.mxu0 %vm5149_vm7, %v1546_v4  ;;  %v13050_v49 = vrot.slane %v19480_v57, %v13049_v12 }
0x3015   : > { %v12921_v51 = vmul.f32 0.7978846, %v12917_v21  ;;  %v12915_v1 = vmul.f32 %v12911_v3, %v12898_v24 }
0x3016   : > { %16318 = vtanh.f32 %v12920_v26  ;;  %v12918_v43 = vadd.f32 %v12914_v42, %v12896_v53  ;;  %v13043_v53 = vsub.s32 6, %v17741_v28  ;;  %v1547_v42 = vld [vmem:[#allocation7 + $0x8] sm:$0xff] }
0x3017   : > { %16320 = vtanh.f32 %v12921_v51  ;;  %v12919_v7 = vadd.f32 %v12915_v1, %v12898_v24 }
0x3018   : > { %v12922_v44 = vmul.f32 0.7978846, %v12918_v43  ;;  %v13044_v24 = vrot.slane %v19480_v57, %v13043_v53 }
0x3019   : > { %v12923_v37 = vmul.f32 0.7978846, %v12919_v7 }
0x301a   : > { %16322 = vtanh.f32 %v12922_v44 }
0x301b   : > { %16324 = vtanh.f32 %v12923_v37 }
0x3020   : > { %v16319_v18 = vpop.eup %16318 }
0x3021   : > { %v16321_v33 = vpop.eup %16320  ;;  %v12928_v36 = vadd.f32 1.0, %v16319_v18 }
0x3022   : > { %v12929_v9 = vadd.f32 1.0, %v16321_v33 }
0x3023   : > { %v12932_v6 = vmul.f32 %v12928_v36, %v12900_v0 }
0x3024   : > { %v16323_v39 = vpop.eup %16322  ;;  %v12933_v23 = vmul.f32 %v12929_v9, %v12901_v61 }
0x3025   : > { %v16325_v2 = vpop.eup %16324  ;;  %v12930_v14 = vadd.f32 1.0, %v16323_v39 }
0x3026   : > { %13006 = vmatprep.mubr.f32.mxu1 %v12933_v23  ;;  %v12931_v60 = vadd.f32 1.0, %v16325_v2 }
0x3027   : > { %13007 = vmatmul.mubr.f32.vlgmr.msra.gmra.mrb[128].mxu1 %v12932_v6  ;;  %v12934_v62 = vmul.f32 %v12930_v14, %v12902_v58 }
0x3028   : > { %v12935_v11 = vmul.f32 %v12931_v60, %v12903_v40 }
0x302a   : > { %13011 = vmatprep.mubr.f32.mxu1 %v12935_v11 }
0x302b   : > { %13012 = vmatmul.mubr.f32.gmra.mrb[130].mxu1 %v12934_v62 }
0x30fa   : > { %v14245_v45 = vpop.f32.mrb[128].mxu1 }
0x30fb   : > { %v14246_v15 = vpop.f32.mrb[129].mxu1 }
0x30fc   : > { %v14247_v13 = vadd.f32 %v14246_v15, %v14245_v45 }
0x30fe   : > { %v13009_v41 = vadd.f32 %v14247_v13, %v13753_v47  ;;  %v14248_v27 = vpop.f32.mrb[130].mxu1 }
0x30ff   : > { %v14249_v29 = vpop.f32.mrb[131].mxu1 }
0x3100   : > { %v14250_v34 = vadd.f32 %v14249_v29, %v14248_v27  ;;  %v13017_v38 = vadd.f32 %v13009_v41, %v19485_v25 }
0x3102   : > { %v13014_v31 = vadd.f32 %v14250_v34, %v13753_v47  ;;  %13019 = vadd.xlane.f32.xlu0 %v13017_v38 }
0x3104   : > { %v13018_v8 = vadd.f32 %v13014_v31, %v19490_v59 }
0x3106   : > { %13021 = vadd.xlane.f32.xlu1 %v13018_v8 }
0x318f   : > { %v13020_v32 = vpop.xlane.xlu0 %13019 }
0x3190   : > { %v13023_v16 = vmul.f32 0.0078125, %v13020_v32 }
0x3192   : > { %v13025_v55 = vsub.f32 %v13017_v38, %v13023_v16 }
0x3193   : > { %v13022_v30 = vpop.xlane.xlu1 %13021 }
0x3194   : > { %v13024_v35 = vmul.f32 0.0078125, %v13022_v30  ;;  %v13027_v5 = vmul.f32 %v13025_v55, %v13025_v55 }
0x3196   : > { %v13026_v48 = vsub.f32 %v13018_v8, %v13024_v35  ;;  %13029 = vadd.xlane.f32.xlu0 %v13027_v5 }
0x3198   : > { %v13028_v54 = vmul.f32 %v13026_v48, %v13026_v48 }
0x319a   : > { %13031 = vadd.xlane.f32.xlu1 %v13028_v54 }
0x3223   : > { %v13030_v22 = vpop.xlane.xlu0 %13029 }
0x3224   : > { %v13033_v25 = vmul.f32 0.0078125, %v13030_v22 }
0x3226   : > { %v13035_v10 = vadd.f32 1e-05, %v13033_v25 }
0x3227   : > { %v13032_v52 = vpop.xlane.xlu1 %13031 }
0x3228   : > { %16326 = vrsqrt.f32 %v13035_v10  ;;  %v13034_v59 = vmul.f32 0.0078125, %v13032_v52 }
0x322a   : > { %v13036_v19 = vadd.f32 1e-05, %v13034_v59 }
0x322c   : > { %16328 = vrsqrt.f32 %v13036_v19 }
0x3232   : > { %v16327_v50 = vpop.eup %16326 }
0x3233   : > { %v13039_v17 = vmul.f32 %v16327_v50, %v13025_v55 }
0x3235   : > { %v13045_v46 = vmul.f32 %v13044_v24, %v13039_v17 }
0x3236   : > { %v16329_v63 = vpop.eup %16328 }
0x3237   : > { %v13040_v56 = vmul.f32 %v16329_v63, %v13026_v48  ;;  %v13051_v3 = vadd.f32 %v13050_v49, %v13045_v46 }
0x3239   : > { %v13046_v20 = vmul.f32 %v13044_v24, %v13040_v56 }
0x323b   : > { %v13052_v21 = vadd.f32 %v13050_v49, %v13046_v20 }
0x323d   : > { %v15611_v26 = vpack.c.bf16 %v13052_v21, %v13051_v3 }
0x323f   : > { %15612 = vmatprep.subr.bf16.mxu0 %v15611_v26 }
0x3240   : > { %15614 = vmatpush3.bf16.msra.mxu0 %v15611_v26 }
0x3243   : > { %15045 = vmatmul.mubr.msk.f32.vlgmr.msra.gmra.mrb[128].mxu0 %vm5149_vm7, %v1547_v42 }
0x3316   : > { %v15046_v28 = vpop.f32.mrb[128].mxu0 }
0x3317   : > { %v13137_v51 = vcombine.high %v15046_v28, %v15046_v28  ;;  %13142 = vst [vmem:[%s1252_s14 + $0x8] sm:$0xf] %v15046_v28  ;;  %v13125_v57 = vpop.f32.mrb[129].mxu0 }
0x3318   : > { %v13136_v1 = vcombine.high %v13125_v57, %v13125_v57  ;;  %13140 = vst [vmem:[%s1252_s14] sm:$0xf] %v13125_v57 }
0x3319   : > { %13143 = vst [vmem:[%s1252_s14 + $0xc] sm:$0xf] %v13137_v51 }
0x331a   : > { %13141 = vst [vmem:[%s1252_s14 + $0x4] sm:$0xf] %v13136_v1 }
0x331b   : > { %16935 = shalt.err (!%p16932_p6)
}
0x331c   : > { %s16936_s14 = scalar_lea.hbm %s19510_s8, 256  ;;  %s16940_s16 = scalar_lea.hbm %s19682_s9, 512 }
0x331d   : > { %p16937_p0 = scmp.ne.s32.totalorder %s19510_s8, %s16936_s14  ;;  %p16941_p4 = scmp.lt.u32.totalorder %s19510_s8, %s19682_s9 }
0x331e   : > { %p16942_p10 = scmp.lt.u32.totalorder %s16940_s16, %s16936_s14  ;;  %p16944_p11 = scmp.lt.u32.totalorder %s16936_s14, %s19510_s8 }
0x331f   : > { %p16938_p2 = pnand %p16937_p0, %p19683_p12 }
0x3320   : > { %p16943_p3 = por %p16942_p10, %p16941_p4 }
0x3321   : > { %p16939_p8 = pneg %p16938_p2 }
0x3322   : > { %p16945_p5 = por %p16944_p11, %p16943_p3 }
0x3324   : > { %p16946_p7 = pnand %p16945_p5, %p16939_p8 }
0x3326   : > { %16949 = shalt.err (!%p16946_p7)
}
0x3327   : > { %s17099_s19 = smov 4   ;;  %s19684_s12 = smov 64  }
0x3328   : > { %15697 = dma.vmem_to_hbm [thread:$0]  (%p19683_p12), %s19507_s7, 256, %s19510_s8, %s13145_s5, %s19684_s12, %s19684_s12, %s17099_s19  }
0x3329 PF: > { %s13173_s2 = sand.u32 1, %s17016_s22   ;;  %p19685_p1 = scmp.ne.s32.totalorder %s19646_s1, 0 }
0x332a   : > { %p19686_p9 = scmp.ge.s32.totalorder %s17028_s26, 2  ;;  %s13174_s13 = scalar_lea.sflag [#allocation4], %s13173_s2 }
0x332c   : > { %p15765_p13 = pnand %p19686_p9, %p19685_p1 }
0x332e   : > { %17011 = dma.done.wait (!%p15765_p13), %s13174_s13, 256  }
0x332f   : > { %17013 = vsyncadd (!%p15765_p13), %s13174_s13, 4294967040  ;;  %p86_p6 = scmp.ge.s32.totalorder %s17617_s15, 4   ;;  %s19687_s22 = smov %s17020_s23 }
0x3330   : > { %s19688_s23 = smov %s17024_s0  ;;  %s19689_s0 = smov %s17628_s3 }
0x3331   : > { %s19690_s26 = smov %s17617_s15  ;;  %88 = sbr.rel (!%p86_p6) target bundleno = 77 (0x4d), region = 300 }
0x3338   :  { %13179 = vsyncpa [#allocation3], 1 }
0x3339   :  { %13181 = vsyncpa [#allocation3 + $0x1], 1 }
0x333a   :  { %13182 = vsyncpa [#allocation6], 1 }
0x333b   :  { %13183 = vsyncpa [#allocation9], 1 }
0x333c   :  { %13184 = vsyncpa [#allocation12], 1 }
0x333d   :  { %13185 = vsyncpa [#allocation15], 1 }
0x333e   :  { %13186 = vsyncpa [#allocation18], 1 }
0x333f   :  { %13187 = vsyncpa [#allocation21], 1 }
0x3340   :  { %13188 = vsyncpa [#allocation24], 1 }
0x3341   :  { %13189 = vsyncpa [#allocation27], 1 }
0x3342   :  { %13190 = vsyncpa [#allocation30], 1 }
0x3343   :  { %13191 = vsyncpa [#allocation33], 1 }
0x3344   :  { %13192 = vsyncpa [#allocation4], 1 }
0x3345   :  { %13194 = vsyncpa [#allocation4 + $0x1], 1 }

</bundles_post_ra>
